<compile_context>
chip_gen: v7x
topology: tpu7x:2x2x1
jax: 0.10.0
libtpu: 0.0.40
codegen_flags: <defaults>
</compile_context>

<pallas_src>
import math

import jax
import jax.numpy as jnp
from jax import lax
from jax.experimental import pallas as pl
from jax.experimental.pallas import tpu as pltpu


# ------------------ host-side parameter preparation (runs once) ------------------

def _asr_scale(p):
    """ASR SE branch applied to its (i_feat,) parameter -> (1, i_feat) scale."""
    t = p["asr_tensor"].reshape(1, -1)
    h = t @ p["asr_w1"]
    h = h * jax.nn.sigmoid(h)          # SiLU
    return jax.nn.sigmoid(h @ p["asr_w2"])


def _pack_rows(entries, width=128, align=8):
    """Pack named 2-D weights into one lane-padded (rows, 128) f32 slab."""
    offs, parts, r = {}, [], 0
    for name, a in entries:
        a = jnp.asarray(a, jnp.float32)
        if a.ndim == 1:
            a = a.reshape(1, -1)
        nr, nc = a.shape
        assert nc <= width
        parts.append(jnp.pad(a, ((0, 0), (0, width - nc))))
        offs[name] = (r, nr, nc)
        pad_r = (-nr) % align
        if pad_r:
            parts.append(jnp.zeros((pad_r, width), jnp.float32))
        r += nr + pad_r
    return jnp.concatenate(parts, axis=0), offs


def _pool_matrix(H, W, k, s):
    """0/1 matrix P: (Hs*Ws, H*W) summing each k x k window (stride s, no pad)."""
    Hs = (H - k) // s + 1
    Ws = (W - k) // s + 1

    def axis(n_out, n_in):
        o = jnp.arange(n_out)[:, None]
        i = jnp.arange(n_in)[None, :]
        return ((i >= o * s) & (i < o * s + k)).astype(jnp.float32)

    P = jnp.einsum("ai,bj->abij", axis(Hs, H), axis(Ws, W)).reshape(Hs * Ws, H * W)
    return P, Hs, Ws


def _bilinear_matrix(src_h, src_w, dst_h, dst_w):
    """Interpolation matrix U: (dst_h*dst_w, src_h*src_w), align_corners=False."""
    def axis(dst, src):
        s = src / dst
        idx = (jnp.arange(dst, dtype=jnp.float32) + 0.5) * s - 0.5
        idx = jnp.maximum(idx, 0.0)
        i0 = jnp.minimum(jnp.floor(idx).astype(jnp.int32), src - 1)
        i1 = jnp.minimum(i0 + 1, src - 1)
        frac = idx - i0.astype(jnp.float32)
        m = jnp.zeros((dst, src), jnp.float32)
        m = m.at[jnp.arange(dst), i0].add(1.0 - frac)
        m = m.at[jnp.arange(dst), i1].add(frac)
        return m

    return jnp.einsum("Ii,Jj->IJij", axis(dst_h, src_h),
                      axis(dst_w, src_w)).reshape(dst_h * dst_w, src_h * src_w)


def prepare_params(params, H, W):
    """One-time host precompute: ASR scale, packed weight slab, pool/interp mats."""
    n_feat = params["mb1"]["w_exp"].shape[0]
    i_feat = params["mb1"]["w_exp"].shape[1]
    f = params["la"]["w0"].shape[1]

    def mb_entries(pre, p):
        return [
            (pre + "w_exp", p["w_exp"]),
            (pre + "b_exp", p["b_exp"]),
            (pre + "w_fea", p["w_fea"].reshape(9 * i_feat, i_feat)),
            (pre + "b_fea", p["b_fea"]),
            (pre + "asr", _asr_scale(p)),               # hoisted SE scale
            (pre + "w_red", p["w_red"]),
            (pre + "b_red", p["b_red"]),
        ]

    la = params["la"]
    entries = (
        mb_entries("mb1.", params["mb1"])
        + mb_entries("mb2.", params["mb2"])
        + [("w_p", params["w_p"]), ("b_p", params["b_p"])]
        + [("la.w0", la["w0"]), ("la.b0", la["b0"]),
           ("la.w2", la["w2"].reshape(9 * f, f)), ("la.b2", la["b2"]),
           ("la.w3", la["w3"].reshape(9 * f, n_feat)), ("la.b3", la["b3"])]
    )
    slab, offs = _pack_rows(entries)

    P, Hs, Ws = _pool_matrix(H, W, 7, 3)                 # SoftPool(7, stride 3)
    H2 = (Hs - 1) // 2 + 1                               # 3x3 stride 2 pad 1 output
    W2 = (Ws - 1) // 2 + 1
    U = _bilinear_matrix(H2, W2, H, W)

    meta = dict(offs=offs, H=H, W=W, C=n_feat, Ci=i_feat, F=f,
                Hs=Hs, Ws=Ws, H2=H2, W2=W2)
    return dict(slab=slab, P=P, U=U), meta


# ------------------------------ fused Pallas kernel ------------------------------

def _make_blockv2_kernel(meta):
    offs = meta["offs"]
    H, W, C = meta["H"], meta["W"], meta["C"]
    Ci, F = meta["Ci"], meta["F"]
    Hs, Ws, H2, W2 = meta["Hs"], meta["Ws"], meta["H2"], meta["W2"]
    HW = H * W

    def kernel(x_ref, wp_ref, pool_ref, up_ref, o_ref,
               pad1, patch1, pad2, patch2, pad3, patch3):
        def wget(name):
            r, nr, nc = offs[name]
            return wp_ref[pl.ds(r, nr), pl.ds(0, nc)]

        def mm(a, b):
            return jnp.dot(a, b, preferred_element_type=jnp.float32)

        x = x_ref[...].reshape(HW, C)                    # (HW, C)

        # ---- MBConv: expand 1x1 -> pad_tensor -> 3x3 (im2col) -> ASR+id -> reduce --
        def mbconv(xin, pre):
            b_exp = wget(pre + "b_exp")                  # (1, Ci)
            out = mm(xin, wget(pre + "w_exp")) + b_exp   # (HW, Ci)
            # pad_tensor: fill a (H+2, W+2, Ci) scratch with the bias, then
            # overwrite the interior -> border ring == bias, interior == out.
            pad1[...] = jnp.broadcast_to(b_exp.reshape(1, 1, Ci), (H + 2, W + 2, Ci))
            pad1[pl.ds(1, H), pl.ds(1, W), :] = out.reshape(H, W, Ci)
            # im2col: one (HW, 9*Ci) patch matrix -> single K=9*Ci MXU matmul.
            for t in range(9):
                ki, kj = divmod(t, 3)
                patch1[pl.ds(0, HW), pl.ds(t * Ci, Ci)] = (
                    pad1[pl.ds(ki, H), pl.ds(kj, W), :].reshape(HW, Ci))
            fea = mm(patch1[...], wget(pre + "w_fea")) + wget(pre + "b_fea")
            out = fea * wget(pre + "asr") + out          # ASR scale + identity
            return mm(out, wget(pre + "w_red")) + wget(pre + "b_red") + xin

        h = mbconv(x, "mb1.")
        h = jnp.where(h >= 0.0, h, 0.05 * h)             # LeakyReLU(0.05), fused
        h = mbconv(h, "mb2.")

        # ---- PConv: channel 0 <- 1x1 conv of all channels, channels 1: unchanged ---
        p1 = mm(h, wget("w_p")) + wget("b_p")            # (HW, 1)
        ch = lax.broadcasted_iota(jnp.int32, (HW, C), 1)
        xp = jnp.where(ch == 0, jnp.broadcast_to(p1, (HW, C)), h)

        # ---- LocalAttention body ----------------------------------------------------
        t0 = mm(xp, wget("la.w0")) + wget("la.b0")       # (HW, F)
        # SoftPool(7, stride 3): ratio of window sums via pooling matrix (max-shift
        # stabilized; the shift cancels exactly in the ratio).
        m = jnp.max(jnp.max(t0, axis=1, keepdims=True), axis=0, keepdims=True)
        e = jnp.exp(t0 - m)
        sp = mm(pool_ref[...], e * t0) / mm(pool_ref[...], e)   # (Hs*Ws, F)

        # 3x3 conv, stride 2, pad 1 (F -> F): stride handled directly in the gather.
        pad2[...] = jnp.zeros((Hs + 2, Ws + 2, F), jnp.float32)
        for i in range(Hs):
            pad2[pl.ds(1 + i, 1), pl.ds(1, Ws), :] = (
                sp[i * Ws:(i + 1) * Ws, :].reshape(1, Ws, F))
        for oi in range(H2):
            for oj in range(W2):
                for t in range(9):
                    ki, kj = divmod(t, 3)
                    v = pad2[pl.ds(2 * oi + ki, 1), pl.ds(2 * oj + kj, 1), :]
                    patch2[pl.ds(oi * W2 + oj, 1), pl.ds(t * F, F)] = v.reshape(1, F)
        t2 = mm(patch2[...], wget("la.w2")) + wget("la.b2")      # (H2*W2, F)

        # 3x3 conv, stride 1, pad 1 (F -> C), then sigmoid.
        pad3[...] = jnp.zeros((H2 + 2, W2 + 2, F), jnp.float32)
        for i in range(H2):
            pad3[pl.ds(1 + i, 1), pl.ds(1, W2), :] = (
                t2[i * W2:(i + 1) * W2, :].reshape(1, W2, F))
        for oi in range(H2):
            for oj in range(W2):
                for t in range(9):
                    ki, kj = divmod(t, 3)
                    v = pad3[pl.ds(oi + ki, 1), pl.ds(oj + kj, 1), :]
                    patch3[pl.ds(oi * W2 + oj, 1), pl.ds(t * F, F)] = v.reshape(1, F)
        wsmall = jax.nn.sigmoid(mm(patch3[...], wget("la.w3")) + wget("la.b3"))

        # Bilinear upsample (align_corners=False) fused as one matmul against the
        # host-precomputed interpolation matrix, then the gated combine.
        wup = mm(up_ref[...], wsmall)                    # (HW, C)
        gate = jax.nn.sigmoid(xp[:, 0:1])                # sigmoid of PConv channel 0
        o_ref[...] = (xp * wup * gate).reshape(1, H, W, C)

    return kernel


def blockv2_forward(x_nchw, arrays, meta):
    H, W, C = meta["H"], meta["W"], meta["C"]
    N = x_nchw.shape[0]
    x = jnp.transpose(x_nchw, (0, 2, 3, 1)).astype(jnp.float32)   # NCHW -> NHWC
    slab, P, U = arrays["slab"], arrays["P"], arrays["U"]
    kernel = _make_blockv2_kernel(meta)

    out = pl.pallas_call(
        kernel,
        out_shape=jax.ShapeDtypeStruct((N, H, W, C), jnp.float32),
        grid=(N,),
        in_specs=[
            pl.BlockSpec((1, H, W, C), lambda n: (n, 0, 0, 0)),
            pl.BlockSpec(slab.shape, lambda n: (0, 0)),   # packed weight slab
            pl.BlockSpec(P.shape, lambda n: (0, 0)),      # SoftPool matrix
            pl.BlockSpec(U.shape, lambda n: (0, 0)),      # bilinear matrix
        ],
        out_specs=pl.BlockSpec((1, H, W, C), lambda n: (n, 0, 0, 0)),
        scratch_shapes=[
            pltpu.VMEM((H + 2, W + 2, meta["Ci"]), jnp.float32),           # pad_tensor
            pltpu.VMEM((H * W, 9 * meta["Ci"]), jnp.float32),              # im2col
            pltpu.VMEM((meta["Hs"] + 2, meta["Ws"] + 2, meta["F"]), jnp.float32),
            pltpu.VMEM((meta["H2"] * meta["W2"], 9 * meta["F"]), jnp.float32),
            pltpu.VMEM((meta["H2"] + 2, meta["W2"] + 2, meta["F"]), jnp.float32),
            pltpu.VMEM((meta["H2"] * meta["W2"], 9 * meta["F"]), jnp.float32),
        ],
        compiler_params=pltpu.CompilerParams(dimension_semantics=("parallel",)),
    )(x, slab, P, U)
    return jnp.transpose(out, (0, 3, 1, 2))               # NHWC -> NCHW


# ----------------------- plain-JAX reference (correctness) -----------------------

def _bilinear_resize(v, H, W):
    N, h, w, C = v.shape

    def src(out_size, in_size):
        s = in_size / out_size
        idx = (jnp.arange(out_size, dtype=jnp.float32) + 0.5) * s - 0.5
        idx = jnp.maximum(idx, 0.0)
        i0 = jnp.minimum(jnp.floor(idx).astype(jnp.int32), in_size - 1)
        i1 = jnp.minimum(i0 + 1, in_size - 1)
        return i0, i1, idx - i0.astype(jnp.float32)

    y0, y1, fy = src(H, h)
    x0, x1, fx = src(W, w)
    fx = fx[None, None, :, None]
    fy = fy[None, :, None, None]
    top = v[:, y0][:, :, x0] * (1 - fx) + v[:, y0][:, :, x1] * fx
    bot = v[:, y1][:, :, x0] * (1 - fx) + v[:, y1][:, :, x1] * fx
    return top * (1 - fy) + bot * fy


def _reference_forward(x_nchw, params):
    prec = jax.lax.Precision.HIGHEST
    x = jnp.transpose(x_nchw, (0, 2, 3, 1)).astype(jnp.float32)

    def conv1x1(v, w, b):
        return jnp.einsum("nhwc,cd->nhwd", v, w, precision=prec) + b

    def conv3x3(v, w, b, stride=1, padding=0):
        w4 = w.reshape(3, 3, w.shape[1], w.shape[2])
        return lax.conv_general_dilated(
            v, w4, (stride, stride), [(padding, padding)] * 2,
            dimension_numbers=("NHWC", "HWIO", "NHWC"), precision=prec) + b

    def pad_bias(v, b):
        p = jnp.pad(v, ((0, 0), (1, 1), (1, 1), (0, 0)))
        p = p.at[:, 0, :, :].set(b)
        p = p.at[:, -1, :, :].set(b)
        p = p.at[:, :, 0, :].set(b)
        p = p.at[:, :, -1, :].set(b)
        return p

    def mbconv(v, p):
        out = conv1x1(v, p["w_exp"], p["b_exp"])
        out_id = out
        out = conv3x3(pad_bias(out, p["b_exp"]), p["w_fea"], p["b_fea"])
        out = out * _asr_scale(p)[None, None] + out_id
        return conv1x1(out, p["w_red"], p["b_red"]) + v

    v = mbconv(x, params["mb1"])
    v = jnp.where(v >= 0, v, 0.05 * v)
    v = mbconv(v, params["mb2"])
    v1 = conv1x1(v, params["w_p"], params["b_p"])
    v = jnp.concatenate([v1, v[..., 1:]], axis=-1)

    la = params["la"]
    N, H, W, C = v.shape
    t = conv1x1(v, la["w0"], la["b0"])
    xe = jnp.exp(t)
    num = lax.reduce_window(xe * t, 0.0, lax.add, (1, 7, 7, 1), (1, 3, 3, 1), "VALID")
    den = lax.reduce_window(xe, 0.0, lax.add, (1, 7, 7, 1), (1, 3, 3, 1), "VALID")
    t = num / den
    t = conv3x3(t, la["w2"], la["b2"], stride=2, padding=1)
    t = jax.nn.sigmoid(conv3x3(t, la["w3"], la["b3"], stride=1, padding=1))
    w_up = _bilinear_resize(t, H, W)
    g = jax.nn.sigmoid(v[..., 0:1])
    return jnp.transpose(v * w_up * g, (0, 3, 1, 2))


# --------------------------------- parameter init --------------------------------

def init_params(key, n_feat=4, f=16):
    i_feat = 2 * n_feat
    keys = iter(jax.random.split(key, 32))

    def conv_init(cin, cout, k):
        bound = 1.0 / math.sqrt(cin * k * k)
        if k == 1:
            w = jax.random.uniform(next(keys), (cin, cout), jnp.float32, -bound, bound)
        else:
            w = jax.random.uniform(next(keys), (k * k, cin, cout), jnp.float32,
                                   -bound, bound)
        b = jax.random.uniform(next(keys), (cout,), jnp.float32, -bound, bound)
        return w, b

    def mb_params():
        we, be = conv_init(n_feat, i_feat, 1)
        wf, bf = conv_init(i_feat, i_feat, 3)
        wr, br = conv_init(i_feat, n_feat, 1)
        return dict(
            w_exp=we, b_exp=be, w_fea=wf, b_fea=bf, w_red=wr, b_red=br,
            asr_tensor=0.1 * jnp.ones((i_feat,), jnp.float32),
            asr_w1=jnp.ones((i_feat, i_feat // 4), jnp.float32),   # filled with 1
            asr_w2=jnp.ones((i_feat // 4, i_feat), jnp.float32),   # filled with 1
        )

    w0, b0 = conv_init(n_feat, f, 1)
    w2, b2 = conv_init(f, f, 3)
    w3, b3 = conv_init(f, n_feat, 3)
    return dict(
        mb1=mb_params(),
        mb2=mb_params(),
        w_p=jnp.full((n_feat, 1), 1.0 / n_feat, jnp.float32),      # PConv init
        b_p=jnp.zeros((1,), jnp.float32),
        la=dict(w0=w0, b0=b0, w2=w2, b2=b2, w3=w3, b3=b3),
    )


# -------------------------------------- main --------------------------------------

if __name__ == "__main__":
    n_feat, f = 4, 16
    N, H, W = 2, 16, 16
    key = jax.random.PRNGKey(0)
    kx, kp = jax.random.split(key)
    x = jax.random.normal(kx, (N, n_feat, H, W), jnp.float32)
    params = init_params(kp, n_feat, f)

    arrays, meta = prepare_params(params, H, W)        # one-time host precompute

    fwd = jax.jit(lambda inp: blockv2_forward(inp, arrays, meta))
    y = fwd(x)
    jax.block_until_ready(y)

    assert y.shape == x.shape and y.dtype == jnp.float32
    assert bool(jnp.all(jnp.isfinite(y)))

    # correctness check against a straightforward plain-JAX reference
    y_ref = jax.jit(lambda inp: _reference_forward(inp, params))(x)
    jax.block_until_ready(y_ref)
    err = float(jnp.max(jnp.abs(y - y_ref)))
    assert err < 2e-3, f"mismatch vs reference: max abs err = {err}"

    print("KERNEL_OK")
</pallas_src>

<mosaic_0001>
module attributes {stable_mosaic.version = 11 : i64} {
  func.func @kernel(%arg0: i32, %arg1: memref<1x16x16x4xf32, #tpu.memory_space<vmem>>, %arg2: memref<576x128xf32, #tpu.memory_space<vmem>>, %arg3: memref<16x256xf32, #tpu.memory_space<vmem>>, %arg4: memref<256x4xf32, #tpu.memory_space<vmem>>, %arg5: memref<1x16x16x4xf32, #tpu.memory_space<vmem>>, %arg6: memref<18x18x8xf32, #tpu.memory_space<vmem>>, %arg7: memref<256x72xf32, #tpu.memory_space<vmem>>, %arg8: memref<6x6x16xf32, #tpu.memory_space<vmem>>, %arg9: memref<4x144xf32, #tpu.memory_space<vmem>>, %arg10: memref<4x4x16xf32, #tpu.memory_space<vmem>>, %arg11: memref<4x144xf32, #tpu.memory_space<vmem>>) attributes {dimension_semantics = [#tpu.dimension_semantics<parallel>], iteration_bounds = array<i64: 2>, scalar_prefetch = 0 : i64, scratch_operands = 6 : i64, tpu.core_type = #tpu.core_type<tc>, window_params = [{transform_indices = @transform_0, window_bounds = array<i64: 1, 16, 16, 4>}, {pipeline_mode = #tpu.pipeline_mode<synchronous>, transform_indices = @transform_1, window_bounds = array<i64: 576, 128>}, {pipeline_mode = #tpu.pipeline_mode<synchronous>, transform_indices = @transform_2, window_bounds = array<i64: 16, 256>}, {pipeline_mode = #tpu.pipeline_mode<synchronous>, transform_indices = @transform_3, window_bounds = array<i64: 256, 4>}, {transform_indices = @transform_4, window_bounds = array<i64: 1, 16, 16, 4>}]} {
    %c0 = arith.constant 0 : index
    %c0_0 = arith.constant 0 : index
    %c0_1 = arith.constant 0 : index
    %c0_2 = arith.constant 0 : index
    %0 = vector.load %arg1[%c0, %c0_0, %c0_1, %c0_2] : memref<1x16x16x4xf32, #tpu.memory_space<vmem>>, vector<1x16x16x4xf32>
    %1 = vector.shape_cast %0 : vector<1x16x16x4xf32> to vector<256x4xf32>
    %c8 = arith.constant 8 : index
    %c0_3 = arith.constant 0 : index
    %2 = vector.load %arg2[%c8, %c0_3] : memref<576x128xf32, #tpu.memory_space<vmem>>, vector<1x8xf32>
    %c0_4 = arith.constant 0 : index
    %c0_5 = arith.constant 0 : index
    %3 = vector.load %arg2[%c0_4, %c0_5] : memref<576x128xf32, #tpu.memory_space<vmem>>, vector<4x8xf32>
    %cst = arith.constant dense<0.000000e+00> : vector<256x8xf32>
    %4 = tpu.matmul %1, %3, %cst {dimension_numbers = #tpu.dot_dimension_numbers<[1], [0], [0], [1], [0, 0, 1, 1], [], []>} : vector<256x4xf32>, vector<4x8xf32>, vector<256x8xf32> -> vector<256x8xf32>
    %5 = vector.broadcast %2 : vector<1x8xf32> to vector<256x8xf32>
    %6 = arith.addf %4, %5 : vector<256x8xf32>
    %7 = vector.shape_cast %2 : vector<1x8xf32> to vector<1x1x8xf32>
    %8 = vector.shape_cast %7 : vector<1x1x8xf32> to vector<1x1x8xf32>
    %9 = vector.broadcast %8 : vector<1x1x8xf32> to vector<18x18x8xf32>
    %c0_6 = arith.constant 0 : index
    %c0_7 = arith.constant 0 : index
    %c0_8 = arith.constant 0 : index
    %10 = vector.load %arg6[%c0_6, %c0_7, %c0_8] : memref<18x18x8xf32, #tpu.memory_space<vmem>>, vector<18x18x8xf32>
    tpu.vector_store %arg6[%c0_6, %c0_7, %c0_8], %9 {strides = array<i32>} : memref<18x18x8xf32, #tpu.memory_space<vmem>>, vector<18x18x8xf32>,
    %11 = vector.shape_cast %6 : vector<256x8xf32> to vector<16x16x8xf32>
    %c1 = arith.constant 1 : index
    %c1_9 = arith.constant 1 : index
    %c0_10 = arith.constant 0 : index
    %12 = vector.load %arg6[%c1, %c1_9, %c0_10] : memref<18x18x8xf32, #tpu.memory_space<vmem>>, vector<16x16x8xf32>
    tpu.vector_store %arg6[%c1, %c1_9, %c0_10], %11 {strides = array<i32>} : memref<18x18x8xf32, #tpu.memory_space<vmem>>, vector<16x16x8xf32>,
    %c0_11 = arith.constant 0 : index
    %c0_12 = arith.constant 0 : index
    %c0_13 = arith.constant 0 : index
    %13 = vector.load %arg6[%c0_11, %c0_12, %c0_13] : memref<18x18x8xf32, #tpu.memory_space<vmem>>, vector<16x16x8xf32>
    %14 = vector.shape_cast %13 : vector<16x16x8xf32> to vector<256x8xf32>
    %c0_14 = arith.constant 0 : index
    %c0_15 = arith.constant 0 : index
    %15 = vector.load %arg7[%c0_14, %c0_15] : memref<256x72xf32, #tpu.memory_space<vmem>>, vector<256x8xf32>
    tpu.vector_store %arg7[%c0_14, %c0_15], %14 {strides = array<i32>} : memref<256x72xf32, #tpu.memory_space<vmem>>, vector<256x8xf32>,
    %c0_16 = arith.constant 0 : index
    %c1_17 = arith.constant 1 : index
    %c0_18 = arith.constant 0 : index
    %16 = vector.load %arg6[%c0_16, %c1_17, %c0_18] : memref<18x18x8xf32, #tpu.memory_space<vmem>>, vector<16x16x8xf32>
    %17 = vector.shape_cast %16 : vector<16x16x8xf32> to vector<256x8xf32>
    %c0_19 = arith.constant 0 : index
    %c8_20 = arith.constant 8 : index
    %18 = vector.load %arg7[%c0_19, %c8_20] : memref<256x72xf32, #tpu.memory_space<vmem>>, vector<256x8xf32>
    tpu.vector_store %arg7[%c0_19, %c8_20], %17 {strides = array<i32>} : memref<256x72xf32, #tpu.memory_space<vmem>>, vector<256x8xf32>,
    %c0_21 = arith.constant 0 : index
    %c2 = arith.constant 2 : index
    %c0_22 = arith.constant 0 : index
    %19 = vector.load %arg6[%c0_21, %c2, %c0_22] : memref<18x18x8xf32, #tpu.memory_space<vmem>>, vector<16x16x8xf32>
    %20 = vector.shape_cast %19 : vector<16x16x8xf32> to vector<256x8xf32>
    %c0_23 = arith.constant 0 : index
    %c16 = arith.constant 16 : index
    %21 = vector.load %arg7[%c0_23, %c16] : memref<256x72xf32, #tpu.memory_space<vmem>>, vector<256x8xf32>
    tpu.vector_store %arg7[%c0_23, %c16], %20 {strides = array<i32>} : memref<256x72xf32, #tpu.memory_space<vmem>>, vector<256x8xf32>,
    %c1_24 = arith.constant 1 : index
    %c0_25 = arith.constant 0 : index
    %c0_26 = arith.constant 0 : index
    %22 = vector.load %arg6[%c1_24, %c0_25, %c0_26] : memref<18x18x8xf32, #tpu.memory_space<vmem>>, vector<16x16x8xf32>
    %23 = vector.shape_cast %22 : vector<16x16x8xf32> to vector<256x8xf32>
    %c0_27 = arith.constant 0 : index
    %c24 = arith.constant 24 : index
    %24 = vector.load %arg7[%c0_27, %c24] : memref<256x72xf32, #tpu.memory_space<vmem>>, vector<256x8xf32>
    tpu.vector_store %arg7[%c0_27, %c24], %23 {strides = array<i32>} : memref<256x72xf32, #tpu.memory_space<vmem>>, vector<256x8xf32>,
    %c1_28 = arith.constant 1 : index
    %c1_29 = arith.constant 1 : index
    %c0_30 = arith.constant 0 : index
    %25 = vector.load %arg6[%c1_28, %c1_29, %c0_30] : memref<18x18x8xf32, #tpu.memory_space<vmem>>, vector<16x16x8xf32>
    %26 = vector.shape_cast %25 : vector<16x16x8xf32> to vector<256x8xf32>
    %c0_31 = arith.constant 0 : index
    %c32 = arith.constant 32 : index
    %27 = vector.load %arg7[%c0_31, %c32] : memref<256x72xf32, #tpu.memory_space<vmem>>, vector<256x8xf32>
    tpu.vector_store %arg7[%c0_31, %c32], %26 {strides = array<i32>} : memref<256x72xf32, #tpu.memory_space<vmem>>, vector<256x8xf32>,
    %c1_32 = arith.constant 1 : index
    %c2_33 = arith.constant 2 : index
    %c0_34 = arith.constant 0 : index
    %28 = vector.load %arg6[%c1_32, %c2_33, %c0_34] : memref<18x18x8xf32, #tpu.memory_space<vmem>>, vector<16x16x8xf32>
    %29 = vector.shape_cast %28 : vector<16x16x8xf32> to vector<256x8xf32>
    %c0_35 = arith.constant 0 : index
    %c40 = arith.constant 40 : index
    %30 = vector.load %arg7[%c0_35, %c40] : memref<256x72xf32, #tpu.memory_space<vmem>>, vector<256x8xf32>
    tpu.vector_store %arg7[%c0_35, %c40], %29 {strides = array<i32>} : memref<256x72xf32, #tpu.memory_space<vmem>>, vector<256x8xf32>,
    %c2_36 = arith.constant 2 : index
    %c0_37 = arith.constant 0 : index
    %c0_38 = arith.constant 0 : index
    %31 = vector.load %arg6[%c2_36, %c0_37, %c0_38] : memref<18x18x8xf32, #tpu.memory_space<vmem>>, vector<16x16x8xf32>
    %32 = vector.shape_cast %31 : vector<16x16x8xf32> to vector<256x8xf32>
    %c0_39 = arith.constant 0 : index
    %c48 = arith.constant 48 : index
    %33 = vector.load %arg7[%c0_39, %c48] : memref<256x72xf32, #tpu.memory_space<vmem>>, vector<256x8xf32>
    tpu.vector_store %arg7[%c0_39, %c48], %32 {strides = array<i32>} : memref<256x72xf32, #tpu.memory_space<vmem>>, vector<256x8xf32>,
    %c2_40 = arith.constant 2 : index
    %c1_41 = arith.constant 1 : index
    %c0_42 = arith.constant 0 : index
    %34 = vector.load %arg6[%c2_40, %c1_41, %c0_42] : memref<18x18x8xf32, #tpu.memory_space<vmem>>, vector<16x16x8xf32>
    %35 = vector.shape_cast %34 : vector<16x16x8xf32> to vector<256x8xf32>
    %c0_43 = arith.constant 0 : index
    %c56 = arith.constant 56 : index
    %36 = vector.load %arg7[%c0_43, %c56] : memref<256x72xf32, #tpu.memory_space<vmem>>, vector<256x8xf32>
    tpu.vector_store %arg7[%c0_43, %c56], %35 {strides = array<i32>} : memref<256x72xf32, #tpu.memory_space<vmem>>, vector<256x8xf32>,
    %c2_44 = arith.constant 2 : index
    %c2_45 = arith.constant 2 : index
    %c0_46 = arith.constant 0 : index
    %37 = vector.load %arg6[%c2_44, %c2_45, %c0_46] : memref<18x18x8xf32, #tpu.memory_space<vmem>>, vector<16x16x8xf32>
    %38 = vector.shape_cast %37 : vector<16x16x8xf32> to vector<256x8xf32>
    %c0_47 = arith.constant 0 : index
    %c64 = arith.constant 64 : index
    %39 = vector.load %arg7[%c0_47, %c64] : memref<256x72xf32, #tpu.memory_space<vmem>>, vector<256x8xf32>
    tpu.vector_store %arg7[%c0_47, %c64], %38 {strides = array<i32>} : memref<256x72xf32, #tpu.memory_space<vmem>>, vector<256x8xf32>,
    %c0_48 = arith.constant 0 : index
    %c0_49 = arith.constant 0 : index
    %40 = vector.load %arg7[%c0_48, %c0_49] : memref<256x72xf32, #tpu.memory_space<vmem>>, vector<256x72xf32>
    %c16_50 = arith.constant 16 : index
    %c0_51 = arith.constant 0 : index
    %41 = vector.load %arg2[%c16_50, %c0_51] : memref<576x128xf32, #tpu.memory_space<vmem>>, vector<72x8xf32>
    %cst_52 = arith.constant dense<0.000000e+00> : vector<256x8xf32>
    %42 = tpu.matmul %40, %41, %cst_52 {dimension_numbers = #tpu.dot_dimension_numbers<[1], [0], [0], [1], [0, 0, 1, 1], [], []>} : vector<256x72xf32>, vector<72x8xf32>, vector<256x8xf32> -> vector<256x8xf32>
    %c88 = arith.constant 88 : index
    %c0_53 = arith.constant 0 : index
    %43 = vector.load %arg2[%c88, %c0_53] : memref<576x128xf32, #tpu.memory_space<vmem>>, vector<1x8xf32>
    %44 = vector.broadcast %43 : vector<1x8xf32> to vector<256x8xf32>
    %45 = arith.addf %42, %44 : vector<256x8xf32>
    %c96 = arith.constant 96 : index
    %c0_54 = arith.constant 0 : index
    %46 = vector.load %arg2[%c96, %c0_54] : memref<576x128xf32, #tpu.memory_space<vmem>>, vector<1x8xf32>
    %47 = vector.broadcast %46 : vector<1x8xf32> to vector<256x8xf32>
    %48 = arith.mulf %45, %47 : vector<256x8xf32>
    %49 = arith.addf %48, %6 : vector<256x8xf32>
    %c104 = arith.constant 104 : index
    %c0_55 = arith.constant 0 : index
    %50 = vector.load %arg2[%c104, %c0_55] : memref<576x128xf32, #tpu.memory_space<vmem>>, vector<8x4xf32>
    %cst_56 = arith.constant dense<0.000000e+00> : vector<256x4xf32>
    %51 = tpu.matmul %49, %50, %cst_56 {dimension_numbers = #tpu.dot_dimension_numbers<[1], [0], [0], [1], [0, 0, 1, 1], [], []>} : vector<256x8xf32>, vector<8x4xf32>, vector<256x4xf32> -> vector<256x4xf32>
    %c112 = arith.constant 112 : index
    %c0_57 = arith.constant 0 : index
    %52 = vector.load %arg2[%c112, %c0_57] : memref<576x128xf32, #tpu.memory_space<vmem>>, vector<1x4xf32>
    %53 = vector.broadcast %52 : vector<1x4xf32> to vector<256x4xf32>
    %54 = arith.addf %51, %53 : vector<256x4xf32>
    %55 = arith.addf %54, %1 : vector<256x4xf32>
    %cst_58 = arith.constant 0.000000e+00 : f32
    %56 = vector.broadcast %cst_58 : f32 to vector<256x4xf32>
    %57 = arith.cmpf oge, %55, %56 : vector<256x4xf32>
    %cst_59 = arith.constant 5.000000e-02 : f32
    %58 = vector.broadcast %cst_59 : f32 to vector<256x4xf32>
    %59 = arith.mulf %58, %55 : vector<256x4xf32>
    %60 = arith.select %57, %55, %59 : vector<256x4xi1>, vector<256x4xf32>
    %c128 = arith.constant 128 : index
    %c0_60 = arith.constant 0 : index
    %61 = vector.load %arg2[%c128, %c0_60] : memref<576x128xf32, #tpu.memory_space<vmem>>, vector<1x8xf32>
    %c120 = arith.constant 120 : index
    %c0_61 = arith.constant 0 : index
    %62 = vector.load %arg2[%c120, %c0_61] : memref<576x128xf32, #tpu.memory_space<vmem>>, vector<4x8xf32>
    %cst_62 = arith.constant dense<0.000000e+00> : vector<256x8xf32>
    %63 = tpu.matmul %60, %62, %cst_62 {dimension_numbers = #tpu.dot_dimension_numbers<[1], [0], [0], [1], [0, 0, 1, 1], [], []>} : vector<256x4xf32>, vector<4x8xf32>, vector<256x8xf32> -> vector<256x8xf32>
    %64 = vector.broadcast %61 : vector<1x8xf32> to vector<256x8xf32>
    %65 = arith.addf %63, %64 : vector<256x8xf32>
    %66 = vector.shape_cast %61 : vector<1x8xf32> to vector<1x1x8xf32>
    %67 = vector.shape_cast %66 : vector<1x1x8xf32> to vector<1x1x8xf32>
    %68 = vector.broadcast %67 : vector<1x1x8xf32> to vector<18x18x8xf32>
    %c0_63 = arith.constant 0 : index
    %c0_64 = arith.constant 0 : index
    %c0_65 = arith.constant 0 : index
    %69 = vector.load %arg6[%c0_63, %c0_64, %c0_65] : memref<18x18x8xf32, #tpu.memory_space<vmem>>, vector<18x18x8xf32>
    tpu.vector_store %arg6[%c0_63, %c0_64, %c0_65], %68 {strides = array<i32>} : memref<18x18x8xf32, #tpu.memory_space<vmem>>, vector<18x18x8xf32>,
    %70 = vector.shape_cast %65 : vector<256x8xf32> to vector<16x16x8xf32>
    %c1_66 = arith.constant 1 : index
    %c1_67 = arith.constant 1 : index
    %c0_68 = arith.constant 0 : index
    %71 = vector.load %arg6[%c1_66, %c1_67, %c0_68] : memref<18x18x8xf32, #tpu.memory_space<vmem>>, vector<16x16x8xf32>
    tpu.vector_store %arg6[%c1_66, %c1_67, %c0_68], %70 {strides = array<i32>} : memref<18x18x8xf32, #tpu.memory_space<vmem>>, vector<16x16x8xf32>,
    %c0_69 = arith.constant 0 : index
    %c0_70 = arith.constant 0 : index
    %c0_71 = arith.constant 0 : index
    %72 = vector.load %arg6[%c0_69, %c0_70, %c0_71] : memref<18x18x8xf32, #tpu.memory_space<vmem>>, vector<16x16x8xf32>
    %73 = vector.shape_cast %72 : vector<16x16x8xf32> to vector<256x8xf32>
    %c0_72 = arith.constant 0 : index
    %c0_73 = arith.constant 0 : index
    %74 = vector.load %arg7[%c0_72, %c0_73] : memref<256x72xf32, #tpu.memory_space<vmem>>, vector<256x8xf32>
    tpu.vector_store %arg7[%c0_72, %c0_73], %73 {strides = array<i32>} : memref<256x72xf32, #tpu.memory_space<vmem>>, vector<256x8xf32>,
    %c0_74 = arith.constant 0 : index
    %c1_75 = arith.constant 1 : index
    %c0_76 = arith.constant 0 : index
    %75 = vector.load %arg6[%c0_74, %c1_75, %c0_76] : memref<18x18x8xf32, #tpu.memory_space<vmem>>, vector<16x16x8xf32>
    %76 = vector.shape_cast %75 : vector<16x16x8xf32> to vector<256x8xf32>
    %c0_77 = arith.constant 0 : index
    %c8_78 = arith.constant 8 : index
    %77 = vector.load %arg7[%c0_77, %c8_78] : memref<256x72xf32, #tpu.memory_space<vmem>>, vector<256x8xf32>
    tpu.vector_store %arg7[%c0_77, %c8_78], %76 {strides = array<i32>} : memref<256x72xf32, #tpu.memory_space<vmem>>, vector<256x8xf32>,
    %c0_79 = arith.constant 0 : index
    %c2_80 = arith.constant 2 : index
    %c0_81 = arith.constant 0 : index
    %78 = vector.load %arg6[%c0_79, %c2_80, %c0_81] : memref<18x18x8xf32, #tpu.memory_space<vmem>>, vector<16x16x8xf32>
    %79 = vector.shape_cast %78 : vector<16x16x8xf32> to vector<256x8xf32>
    %c0_82 = arith.constant 0 : index
    %c16_83 = arith.constant 16 : index
    %80 = vector.load %arg7[%c0_82, %c16_83] : memref<256x72xf32, #tpu.memory_space<vmem>>, vector<256x8xf32>
    tpu.vector_store %arg7[%c0_82, %c16_83], %79 {strides = array<i32>} : memref<256x72xf32, #tpu.memory_space<vmem>>, vector<256x8xf32>,
    %c1_84 = arith.constant 1 : index
    %c0_85 = arith.constant 0 : index
    %c0_86 = arith.constant 0 : index
    %81 = vector.load %arg6[%c1_84, %c0_85, %c0_86] : memref<18x18x8xf32, #tpu.memory_space<vmem>>, vector<16x16x8xf32>
    %82 = vector.shape_cast %81 : vector<16x16x8xf32> to vector<256x8xf32>
    %c0_87 = arith.constant 0 : index
    %c24_88 = arith.constant 24 : index
    %83 = vector.load %arg7[%c0_87, %c24_88] : memref<256x72xf32, #tpu.memory_space<vmem>>, vector<256x8xf32>
    tpu.vector_store %arg7[%c0_87, %c24_88], %82 {strides = array<i32>} : memref<256x72xf32, #tpu.memory_space<vmem>>, vector<256x8xf32>,
    %c1_89 = arith.constant 1 : index
    %c1_90 = arith.constant 1 : index
    %c0_91 = arith.constant 0 : index
    %84 = vector.load %arg6[%c1_89, %c1_90, %c0_91] : memref<18x18x8xf32, #tpu.memory_space<vmem>>, vector<16x16x8xf32>
    %85 = vector.shape_cast %84 : vector<16x16x8xf32> to vector<256x8xf32>
    %c0_92 = arith.constant 0 : index
    %c32_93 = arith.constant 32 : index
    %86 = vector.load %arg7[%c0_92, %c32_93] : memref<256x72xf32, #tpu.memory_space<vmem>>, vector<256x8xf32>
    tpu.vector_store %arg7[%c0_92, %c32_93], %85 {strides = array<i32>} : memref<256x72xf32, #tpu.memory_space<vmem>>, vector<256x8xf32>,
    %c1_94 = arith.constant 1 : index
    %c2_95 = arith.constant 2 : index
    %c0_96 = arith.constant 0 : index
    %87 = vector.load %arg6[%c1_94, %c2_95, %c0_96] : memref<18x18x8xf32, #tpu.memory_space<vmem>>, vector<16x16x8xf32>
    %88 = vector.shape_cast %87 : vector<16x16x8xf32> to vector<256x8xf32>
    %c0_97 = arith.constant 0 : index
    %c40_98 = arith.constant 40 : index
    %89 = vector.load %arg7[%c0_97, %c40_98] : memref<256x72xf32, #tpu.memory_space<vmem>>, vector<256x8xf32>
    tpu.vector_store %arg7[%c0_97, %c40_98], %88 {strides = array<i32>} : memref<256x72xf32, #tpu.memory_space<vmem>>, vector<256x8xf32>,
    %c2_99 = arith.constant 2 : index
    %c0_100 = arith.constant 0 : index
    %c0_101 = arith.constant 0 : index
    %90 = vector.load %arg6[%c2_99, %c0_100, %c0_101] : memref<18x18x8xf32, #tpu.memory_space<vmem>>, vector<16x16x8xf32>
    %91 = vector.shape_cast %90 : vector<16x16x8xf32> to vector<256x8xf32>
    %c0_102 = arith.constant 0 : index
    %c48_103 = arith.constant 48 : index
    %92 = vector.load %arg7[%c0_102, %c48_103] : memref<256x72xf32, #tpu.memory_space<vmem>>, vector<256x8xf32>
    tpu.vector_store %arg7[%c0_102, %c48_103], %91 {strides = array<i32>} : memref<256x72xf32, #tpu.memory_space<vmem>>, vector<256x8xf32>,
    %c2_104 = arith.constant 2 : index
    %c1_105 = arith.constant 1 : index
    %c0_106 = arith.constant 0 : index
    %93 = vector.load %arg6[%c2_104, %c1_105, %c0_106] : memref<18x18x8xf32, #tpu.memory_space<vmem>>, vector<16x16x8xf32>
    %94 = vector.shape_cast %93 : vector<16x16x8xf32> to vector<256x8xf32>
    %c0_107 = arith.constant 0 : index
    %c56_108 = arith.constant 56 : index
    %95 = vector.load %arg7[%c0_107, %c56_108] : memref<256x72xf32, #tpu.memory_space<vmem>>, vector<256x8xf32>
    tpu.vector_store %arg7[%c0_107, %c56_108], %94 {strides = array<i32>} : memref<256x72xf32, #tpu.memory_space<vmem>>, vector<256x8xf32>,
    %c2_109 = arith.constant 2 : index
    %c2_110 = arith.constant 2 : index
    %c0_111 = arith.constant 0 : index
    %96 = vector.load %arg6[%c2_109, %c2_110, %c0_111] : memref<18x18x8xf32, #tpu.memory_space<vmem>>, vector<16x16x8xf32>
    %97 = vector.shape_cast %96 : vector<16x16x8xf32> to vector<256x8xf32>
    %c0_112 = arith.constant 0 : index
    %c64_113 = arith.constant 64 : index
    %98 = vector.load %arg7[%c0_112, %c64_113] : memref<256x72xf32, #tpu.memory_space<vmem>>, vector<256x8xf32>
    tpu.vector_store %arg7[%c0_112, %c64_113], %97 {strides = array<i32>} : memref<256x72xf32, #tpu.memory_space<vmem>>, vector<256x8xf32>,
    %c0_114 = arith.constant 0 : index
    %c0_115 = arith.constant 0 : index
    %99 = vector.load %arg7[%c0_114, %c0_115] : memref<256x72xf32, #tpu.memory_space<vmem>>, vector<256x72xf32>
    %c136 = arith.constant 136 : index
    %c0_116 = arith.constant 0 : index
    %100 = vector.load %arg2[%c136, %c0_116] : memref<576x128xf32, #tpu.memory_space<vmem>>, vector<72x8xf32>
    %cst_117 = arith.constant dense<0.000000e+00> : vector<256x8xf32>
    %101 = tpu.matmul %99, %100, %cst_117 {dimension_numbers = #tpu.dot_dimension_numbers<[1], [0], [0], [1], [0, 0, 1, 1], [], []>} : vector<256x72xf32>, vector<72x8xf32>, vector<256x8xf32> -> vector<256x8xf32>
    %c208 = arith.constant 208 : index
    %c0_118 = arith.constant 0 : index
    %102 = vector.load %arg2[%c208, %c0_118] : memref<576x128xf32, #tpu.memory_space<vmem>>, vector<1x8xf32>
    %103 = vector.broadcast %102 : vector<1x8xf32> to vector<256x8xf32>
    %104 = arith.addf %101, %103 : vector<256x8xf32>
    %c216 = arith.constant 216 : index
    %c0_119 = arith.constant 0 : index
    %105 = vector.load %arg2[%c216, %c0_119] : memref<576x128xf32, #tpu.memory_space<vmem>>, vector<1x8xf32>
    %106 = vector.broadcast %105 : vector<1x8xf32> to vector<256x8xf32>
    %107 = arith.mulf %104, %106 : vector<256x8xf32>
    %108 = arith.addf %107, %65 : vector<256x8xf32>
    %c224 = arith.constant 224 : index
    %c0_120 = arith.constant 0 : index
    %109 = vector.load %arg2[%c224, %c0_120] : memref<576x128xf32, #tpu.memory_space<vmem>>, vector<8x4xf32>
    %cst_121 = arith.constant dense<0.000000e+00> : vector<256x4xf32>
    %110 = tpu.matmul %108, %109, %cst_121 {dimension_numbers = #tpu.dot_dimension_numbers<[1], [0], [0], [1], [0, 0, 1, 1], [], []>} : vector<256x8xf32>, vector<8x4xf32>, vector<256x4xf32> -> vector<256x4xf32>
    %c232 = arith.constant 232 : index
    %c0_122 = arith.constant 0 : index
    %111 = vector.load %arg2[%c232, %c0_122] : memref<576x128xf32, #tpu.memory_space<vmem>>, vector<1x4xf32>
    %112 = vector.broadcast %111 : vector<1x4xf32> to vector<256x4xf32>
    %113 = arith.addf %110, %112 : vector<256x4xf32>
    %114 = arith.addf %113, %60 : vector<256x4xf32>
    %c240 = arith.constant 240 : index
    %c0_123 = arith.constant 0 : index
    %115 = vector.load %arg2[%c240, %c0_123] : memref<576x128xf32, #tpu.memory_space<vmem>>, vector<4x1xf32>
    %cst_124 = arith.constant dense<0.000000e+00> : vector<256x1xf32>
    %116 = tpu.matmul %114, %115, %cst_124 {dimension_numbers = #tpu.dot_dimension_numbers<[1], [0], [0], [1], [0, 0, 1, 1], [], []>} : vector<256x4xf32>, vector<4x1xf32>, vector<256x1xf32> -> vector<256x1xf32>
    %c248 = arith.constant 248 : index
    %c0_125 = arith.constant 0 : index
    %117 = vector.load %arg2[%c248, %c0_125] : memref<576x128xf32, #tpu.memory_space<vmem>>, vector<1x1xf32>
    %118 = vector.broadcast %117 : vector<1x1xf32> to vector<256x1xf32>
    %119 = arith.addf %116, %118 : vector<256x1xf32>
    %120 = tpu.iota {dimensions = array<i32: 1>} : vector<256x4xi32>
    %c0_i32 = arith.constant 0 : i32
    %121 = vector.broadcast %c0_i32 : i32 to vector<256x4xi32>
    %122 = arith.cmpi eq, %120, %121 : vector<256x4xi32>
    %123 = vector.shape_cast %119 : vector<256x1xf32> to vector<256x1xf32>
    %124 = vector.broadcast %123 : vector<256x1xf32> to vector<256x4xf32>
    %125 = arith.select %122, %124, %114 : vector<256x4xi1>, vector<256x4xf32>
    %c256 = arith.constant 256 : index
    %c0_126 = arith.constant 0 : index
    %126 = vector.load %arg2[%c256, %c0_126] : memref<576x128xf32, #tpu.memory_space<vmem>>, vector<4x16xf32>
    %cst_127 = arith.constant dense<0.000000e+00> : vector<256x16xf32>
    %127 = tpu.matmul %125, %126, %cst_127 {dimension_numbers = #tpu.dot_dimension_numbers<[1], [0], [0], [1], [0, 0, 1, 1], [], []>} : vector<256x4xf32>, vector<4x16xf32>, vector<256x16xf32> -> vector<256x16xf32>
    %c264 = arith.constant 264 : index
    %c0_128 = arith.constant 0 : index
    %128 = vector.load %arg2[%c264, %c0_128] : memref<576x128xf32, #tpu.memory_space<vmem>>, vector<1x16xf32>
    %129 = vector.broadcast %128 : vector<1x16xf32> to vector<256x16xf32>
    %130 = arith.addf %127, %129 : vector<256x16xf32>
    %cst_129 = arith.constant dense<0xFF800000> : vector<256xf32>
    %131 = vector.multi_reduction <maximumf>, %130, %cst_129 [1] : vector<256x16xf32> to vector<256xf32>
    %132 = vector.shape_cast %131 : vector<256xf32> to vector<256x1xf32>
    %cst_130 = arith.constant dense<0xFF800000> : vector<1xf32>
    %133 = vector.multi_reduction <maximumf>, %132, %cst_130 [0] : vector<256x1xf32> to vector<1xf32>
    %134 = vector.shape_cast %133 : vector<1xf32> to vector<1x1xf32>
    %135 = vector.broadcast %134 : vector<1x1xf32> to vector<256x16xf32>
    %136 = arith.subf %130, %135 : vector<256x16xf32>
    %137 = math.exp %136 : vector<256x16xf32>
    %c0_131 = arith.constant 0 : index
    %c0_132 = arith.constant 0 : index
    %138 = vector.load %arg3[%c0_131, %c0_132] : memref<16x256xf32, #tpu.memory_space<vmem>>, vector<16x256xf32>
    %139 = arith.mulf %137, %130 : vector<256x16xf32>
    %cst_133 = arith.constant dense<0.000000e+00> : vector<16x16xf32>
    %140 = tpu.matmul %138, %139, %cst_133 {dimension_numbers = #tpu.dot_dimension_numbers<[1], [0], [0], [1], [0, 0, 1, 1], [], []>} : vector<16x256xf32>, vector<256x16xf32>, vector<16x16xf32> -> vector<16x16xf32>
    %c0_134 = arith.constant 0 : index
    %c0_135 = arith.constant 0 : index
    %141 = vector.load %arg3[%c0_134, %c0_135] : memref<16x256xf32, #tpu.memory_space<vmem>>, vector<16x256xf32>
    %cst_136 = arith.constant dense<0.000000e+00> : vector<16x16xf32>
    %142 = tpu.matmul %141, %137, %cst_136 {dimension_numbers = #tpu.dot_dimension_numbers<[1], [0], [0], [1], [0, 0, 1, 1], [], []>} : vector<16x256xf32>, vector<256x16xf32>, vector<16x16xf32> -> vector<16x16xf32>
    %143 = arith.divf %140, %142 : vector<16x16xf32>
    %cst_137 = arith.constant 0.000000e+00 : f32
    %144 = vector.broadcast %cst_137 : f32 to vector<6x6x16xf32>
    %c0_138 = arith.constant 0 : index
    %c0_139 = arith.constant 0 : index
    %c0_140 = arith.constant 0 : index
    %145 = vector.load %arg8[%c0_138, %c0_139, %c0_140] : memref<6x6x16xf32, #tpu.memory_space<vmem>>, vector<6x6x16xf32>
    tpu.vector_store %arg8[%c0_138, %c0_139, %c0_140], %144 {strides = array<i32>} : memref<6x6x16xf32, #tpu.memory_space<vmem>>, vector<6x6x16xf32>,
    %146 = vector.extract_strided_slice %143 {offsets = [0, 0], sizes = [4, 16], strides = [1, 1]} : vector<16x16xf32> to vector<4x16xf32>
    %147 = vector.shape_cast %146 : vector<4x16xf32> to vector<1x4x16xf32>
    %c1_141 = arith.constant 1 : index
    %c1_142 = arith.constant 1 : index
    %c0_143 = arith.constant 0 : index
    %148 = vector.load %arg8[%c1_141, %c1_142, %c0_143] : memref<6x6x16xf32, #tpu.memory_space<vmem>>, vector<1x4x16xf32>
    tpu.vector_store %arg8[%c1_141, %c1_142, %c0_143], %147 {strides = array<i32>} : memref<6x6x16xf32, #tpu.memory_space<vmem>>, vector<1x4x16xf32>,
    %149 = vector.extract_strided_slice %143 {offsets = [4, 0], sizes = [4, 16], strides = [1, 1]} : vector<16x16xf32> to vector<4x16xf32>
    %150 = vector.shape_cast %149 : vector<4x16xf32> to vector<1x4x16xf32>
    %c2_144 = arith.constant 2 : index
    %c1_145 = arith.constant 1 : index
    %c0_146 = arith.constant 0 : index
    %151 = vector.load %arg8[%c2_144, %c1_145, %c0_146] : memref<6x6x16xf32, #tpu.memory_space<vmem>>, vector<1x4x16xf32>
    tpu.vector_store %arg8[%c2_144, %c1_145, %c0_146], %150 {strides = array<i32>} : memref<6x6x16xf32, #tpu.memory_space<vmem>>, vector<1x4x16xf32>,
    %152 = vector.extract_strided_slice %143 {offsets = [8, 0], sizes = [4, 16], strides = [1, 1]} : vector<16x16xf32> to vector<4x16xf32>
    %153 = vector.shape_cast %152 : vector<4x16xf32> to vector<1x4x16xf32>
    %c3 = arith.constant 3 : index
    %c1_147 = arith.constant 1 : index
    %c0_148 = arith.constant 0 : index
    %154 = vector.load %arg8[%c3, %c1_147, %c0_148] : memref<6x6x16xf32, #tpu.memory_space<vmem>>, vector<1x4x16xf32>
    tpu.vector_store %arg8[%c3, %c1_147, %c0_148], %153 {strides = array<i32>} : memref<6x6x16xf32, #tpu.memory_space<vmem>>, vector<1x4x16xf32>,
    %155 = vector.extract_strided_slice %143 {offsets = [12, 0], sizes = [4, 16], strides = [1, 1]} : vector<16x16xf32> to vector<4x16xf32>
    %156 = vector.shape_cast %155 : vector<4x16xf32> to vector<1x4x16xf32>
    %c4 = arith.constant 4 : index
    %c1_149 = arith.constant 1 : index
    %c0_150 = arith.constant 0 : index
    %157 = vector.load %arg8[%c4, %c1_149, %c0_150] : memref<6x6x16xf32, #tpu.memory_space<vmem>>, vector<1x4x16xf32>
    tpu.vector_store %arg8[%c4, %c1_149, %c0_150], %156 {strides = array<i32>} : memref<6x6x16xf32, #tpu.memory_space<vmem>>, vector<1x4x16xf32>,
    %c0_151 = arith.constant 0 : index
    %c0_152 = arith.constant 0 : index
    %c0_153 = arith.constant 0 : index
    %158 = vector.load %arg8[%c0_151, %c0_152, %c0_153] : memref<6x6x16xf32, #tpu.memory_space<vmem>>, vector<1x1x16xf32>
    %159 = vector.shape_cast %158 : vector<1x1x16xf32> to vector<1x16xf32>
    %c0_154 = arith.constant 0 : index
    %c0_155 = arith.constant 0 : index
    %160 = vector.load %arg9[%c0_154, %c0_155] : memref<4x144xf32, #tpu.memory_space<vmem>>, vector<1x16xf32>
    tpu.vector_store %arg9[%c0_154, %c0_155], %159 {strides = array<i32>} : memref<4x144xf32, #tpu.memory_space<vmem>>, vector<1x16xf32>,
    %c0_156 = arith.constant 0 : index
    %c1_157 = arith.constant 1 : index
    %c0_158 = arith.constant 0 : index
    %161 = vector.load %arg8[%c0_156, %c1_157, %c0_158] : memref<6x6x16xf32, #tpu.memory_space<vmem>>, vector<1x1x16xf32>
    %162 = vector.shape_cast %161 : vector<1x1x16xf32> to vector<1x16xf32>
    %c0_159 = arith.constant 0 : index
    %c16_160 = arith.constant 16 : index
    %163 = vector.load %arg9[%c0_159, %c16_160] : memref<4x144xf32, #tpu.memory_space<vmem>>, vector<1x16xf32>
    tpu.vector_store %arg9[%c0_159, %c16_160], %162 {strides = array<i32>} : memref<4x144xf32, #tpu.memory_space<vmem>>, vector<1x16xf32>,
    %c0_161 = arith.constant 0 : index
    %c2_162 = arith.constant 2 : index
    %c0_163 = arith.constant 0 : index
    %164 = vector.load %arg8[%c0_161, %c2_162, %c0_163] : memref<6x6x16xf32, #tpu.memory_space<vmem>>, vector<1x1x16xf32>
    %165 = vector.shape_cast %164 : vector<1x1x16xf32> to vector<1x16xf32>
    %c0_164 = arith.constant 0 : index
    %c32_165 = arith.constant 32 : index
    %166 = vector.load %arg9[%c0_164, %c32_165] : memref<4x144xf32, #tpu.memory_space<vmem>>, vector<1x16xf32>
    tpu.vector_store %arg9[%c0_164, %c32_165], %165 {strides = array<i32>} : memref<4x144xf32, #tpu.memory_space<vmem>>, vector<1x16xf32>,
    %c1_166 = arith.constant 1 : index
    %c0_167 = arith.constant 0 : index
    %c0_168 = arith.constant 0 : index
    %167 = vector.load %arg8[%c1_166, %c0_167, %c0_168] : memref<6x6x16xf32, #tpu.memory_space<vmem>>, vector<1x1x16xf32>
    %168 = vector.shape_cast %167 : vector<1x1x16xf32> to vector<1x16xf32>
    %c0_169 = arith.constant 0 : index
    %c48_170 = arith.constant 48 : index
    %169 = vector.load %arg9[%c0_169, %c48_170] : memref<4x144xf32, #tpu.memory_space<vmem>>, vector<1x16xf32>
    tpu.vector_store %arg9[%c0_169, %c48_170], %168 {strides = array<i32>} : memref<4x144xf32, #tpu.memory_space<vmem>>, vector<1x16xf32>,
    %c1_171 = arith.constant 1 : index
    %c1_172 = arith.constant 1 : index
    %c0_173 = arith.constant 0 : index
    %170 = vector.load %arg8[%c1_171, %c1_172, %c0_173] : memref<6x6x16xf32, #tpu.memory_space<vmem>>, vector<1x1x16xf32>
    %171 = vector.shape_cast %170 : vector<1x1x16xf32> to vector<1x16xf32>
    %c0_174 = arith.constant 0 : index
    %c64_175 = arith.constant 64 : index
    %172 = vector.load %arg9[%c0_174, %c64_175] : memref<4x144xf32, #tpu.memory_space<vmem>>, vector<1x16xf32>
    tpu.vector_store %arg9[%c0_174, %c64_175], %171 {strides = array<i32>} : memref<4x144xf32, #tpu.memory_space<vmem>>, vector<1x16xf32>,
    %c1_176 = arith.constant 1 : index
    %c2_177 = arith.constant 2 : index
    %c0_178 = arith.constant 0 : index
    %173 = vector.load %arg8[%c1_176, %c2_177, %c0_178] : memref<6x6x16xf32, #tpu.memory_space<vmem>>, vector<1x1x16xf32>
    %174 = vector.shape_cast %173 : vector<1x1x16xf32> to vector<1x16xf32>
    %c0_179 = arith.constant 0 : index
    %c80 = arith.constant 80 : index
    %175 = vector.load %arg9[%c0_179, %c80] : memref<4x144xf32, #tpu.memory_space<vmem>>, vector<1x16xf32>
    tpu.vector_store %arg9[%c0_179, %c80], %174 {strides = array<i32>} : memref<4x144xf32, #tpu.memory_space<vmem>>, vector<1x16xf32>,
    %c2_180 = arith.constant 2 : index
    %c0_181 = arith.constant 0 : index
    %c0_182 = arith.constant 0 : index
    %176 = vector.load %arg8[%c2_180, %c0_181, %c0_182] : memref<6x6x16xf32, #tpu.memory_space<vmem>>, vector<1x1x16xf32>
    %177 = vector.shape_cast %176 : vector<1x1x16xf32> to vector<1x16xf32>
    %c0_183 = arith.constant 0 : index
    %c96_184 = arith.constant 96 : index
    %178 = vector.load %arg9[%c0_183, %c96_184] : memref<4x144xf32, #tpu.memory_space<vmem>>, vector<1x16xf32>
    tpu.vector_store %arg9[%c0_183, %c96_184], %177 {strides = array<i32>} : memref<4x144xf32, #tpu.memory_space<vmem>>, vector<1x16xf32>,
    %c2_185 = arith.constant 2 : index
    %c1_186 = arith.constant 1 : index
    %c0_187 = arith.constant 0 : index
    %179 = vector.load %arg8[%c2_185, %c1_186, %c0_187] : memref<6x6x16xf32, #tpu.memory_space<vmem>>, vector<1x1x16xf32>
    %180 = vector.shape_cast %179 : vector<1x1x16xf32> to vector<1x16xf32>
    %c0_188 = arith.constant 0 : index
    %c112_189 = arith.constant 112 : index
    %181 = vector.load %arg9[%c0_188, %c112_189] : memref<4x144xf32, #tpu.memory_space<vmem>>, vector<1x16xf32>
    tpu.vector_store %arg9[%c0_188, %c112_189], %180 {strides = array<i32>} : memref<4x144xf32, #tpu.memory_space<vmem>>, vector<1x16xf32>,
    %c2_190 = arith.constant 2 : index
    %c2_191 = arith.constant 2 : index
    %c0_192 = arith.constant 0 : index
    %182 = vector.load %arg8[%c2_190, %c2_191, %c0_192] : memref<6x6x16xf32, #tpu.memory_space<vmem>>, vector<1x1x16xf32>
    %183 = vector.shape_cast %182 : vector<1x1x16xf32> to vector<1x16xf32>
    %c0_193 = arith.constant 0 : index
    %c128_194 = arith.constant 128 : index
    %184 = vector.load %arg9[%c0_193, %c128_194] : memref<4x144xf32, #tpu.memory_space<vmem>>, vector<1x16xf32>
    tpu.vector_store %arg9[%c0_193, %c128_194], %183 {strides = array<i32>} : memref<4x144xf32, #tpu.memory_space<vmem>>, vector<1x16xf32>,
    %c0_195 = arith.constant 0 : index
    %c2_196 = arith.constant 2 : index
    %c0_197 = arith.constant 0 : index
    %185 = vector.load %arg8[%c0_195, %c2_196, %c0_197] : memref<6x6x16xf32, #tpu.memory_space<vmem>>, vector<1x1x16xf32>
    %186 = vector.shape_cast %185 : vector<1x1x16xf32> to vector<1x16xf32>
    %c1_198 = arith.constant 1 : index
    %c0_199 = arith.constant 0 : index
    %187 = vector.load %arg9[%c1_198, %c0_199] : memref<4x144xf32, #tpu.memory_space<vmem>>, vector<1x16xf32>
    tpu.vector_store %arg9[%c1_198, %c0_199], %186 {strides = array<i32>} : memref<4x144xf32, #tpu.memory_space<vmem>>, vector<1x16xf32>,
    %c0_200 = arith.constant 0 : index
    %c3_201 = arith.constant 3 : index
    %c0_202 = arith.constant 0 : index
    %188 = vector.load %arg8[%c0_200, %c3_201, %c0_202] : memref<6x6x16xf32, #tpu.memory_space<vmem>>, vector<1x1x16xf32>
    %189 = vector.shape_cast %188 : vector<1x1x16xf32> to vector<1x16xf32>
    %c1_203 = arith.constant 1 : index
    %c16_204 = arith.constant 16 : index
    %190 = vector.load %arg9[%c1_203, %c16_204] : memref<4x144xf32, #tpu.memory_space<vmem>>, vector<1x16xf32>
    tpu.vector_store %arg9[%c1_203, %c16_204], %189 {strides = array<i32>} : memref<4x144xf32, #tpu.memory_space<vmem>>, vector<1x16xf32>,
    %c0_205 = arith.constant 0 : index
    %c4_206 = arith.constant 4 : index
    %c0_207 = arith.constant 0 : index
    %191 = vector.load %arg8[%c0_205, %c4_206, %c0_207] : memref<6x6x16xf32, #tpu.memory_space<vmem>>, vector<1x1x16xf32>
    %192 = vector.shape_cast %191 : vector<1x1x16xf32> to vector<1x16xf32>
    %c1_208 = arith.constant 1 : index
    %c32_209 = arith.constant 32 : index
    %193 = vector.load %arg9[%c1_208, %c32_209] : memref<4x144xf32, #tpu.memory_space<vmem>>, vector<1x16xf32>
    tpu.vector_store %arg9[%c1_208, %c32_209], %192 {strides = array<i32>} : memref<4x144xf32, #tpu.memory_space<vmem>>, vector<1x16xf32>,
    %c1_210 = arith.constant 1 : index
    %c2_211 = arith.constant 2 : index
    %c0_212 = arith.constant 0 : index
    %194 = vector.load %arg8[%c1_210, %c2_211, %c0_212] : memref<6x6x16xf32, #tpu.memory_space<vmem>>, vector<1x1x16xf32>
    %195 = vector.shape_cast %194 : vector<1x1x16xf32> to vector<1x16xf32>
    %c1_213 = arith.constant 1 : index
    %c48_214 = arith.constant 48 : index
    %196 = vector.load %arg9[%c1_213, %c48_214] : memref<4x144xf32, #tpu.memory_space<vmem>>, vector<1x16xf32>
    tpu.vector_store %arg9[%c1_213, %c48_214], %195 {strides = array<i32>} : memref<4x144xf32, #tpu.memory_space<vmem>>, vector<1x16xf32>,
    %c1_215 = arith.constant 1 : index
    %c3_216 = arith.constant 3 : index
    %c0_217 = arith.constant 0 : index
    %197 = vector.load %arg8[%c1_215, %c3_216, %c0_217] : memref<6x6x16xf32, #tpu.memory_space<vmem>>, vector<1x1x16xf32>
    %198 = vector.shape_cast %197 : vector<1x1x16xf32> to vector<1x16xf32>
    %c1_218 = arith.constant 1 : index
    %c64_219 = arith.constant 64 : index
    %199 = vector.load %arg9[%c1_218, %c64_219] : memref<4x144xf32, #tpu.memory_space<vmem>>, vector<1x16xf32>
    tpu.vector_store %arg9[%c1_218, %c64_219], %198 {strides = array<i32>} : memref<4x144xf32, #tpu.memory_space<vmem>>, vector<1x16xf32>,
    %c1_220 = arith.constant 1 : index
    %c4_221 = arith.constant 4 : index
    %c0_222 = arith.constant 0 : index
    %200 = vector.load %arg8[%c1_220, %c4_221, %c0_222] : memref<6x6x16xf32, #tpu.memory_space<vmem>>, vector<1x1x16xf32>
    %201 = vector.shape_cast %200 : vector<1x1x16xf32> to vector<1x16xf32>
    %c1_223 = arith.constant 1 : index
    %c80_224 = arith.constant 80 : index
    %202 = vector.load %arg9[%c1_223, %c80_224] : memref<4x144xf32, #tpu.memory_space<vmem>>, vector<1x16xf32>
    tpu.vector_store %arg9[%c1_223, %c80_224], %201 {strides = array<i32>} : memref<4x144xf32, #tpu.memory_space<vmem>>, vector<1x16xf32>,
    %c2_225 = arith.constant 2 : index
    %c2_226 = arith.constant 2 : index
    %c0_227 = arith.constant 0 : index
    %203 = vector.load %arg8[%c2_225, %c2_226, %c0_227] : memref<6x6x16xf32, #tpu.memory_space<vmem>>, vector<1x1x16xf32>
    %204 = vector.shape_cast %203 : vector<1x1x16xf32> to vector<1x16xf32>
    %c1_228 = arith.constant 1 : index
    %c96_229 = arith.constant 96 : index
    %205 = vector.load %arg9[%c1_228, %c96_229] : memref<4x144xf32, #tpu.memory_space<vmem>>, vector<1x16xf32>
    tpu.vector_store %arg9[%c1_228, %c96_229], %204 {strides = array<i32>} : memref<4x144xf32, #tpu.memory_space<vmem>>, vector<1x16xf32>,
    %c2_230 = arith.constant 2 : index
    %c3_231 = arith.constant 3 : index
    %c0_232 = arith.constant 0 : index
    %206 = vector.load %arg8[%c2_230, %c3_231, %c0_232] : memref<6x6x16xf32, #tpu.memory_space<vmem>>, vector<1x1x16xf32>
    %207 = vector.shape_cast %206 : vector<1x1x16xf32> to vector<1x16xf32>
    %c1_233 = arith.constant 1 : index
    %c112_234 = arith.constant 112 : index
    %208 = vector.load %arg9[%c1_233, %c112_234] : memref<4x144xf32, #tpu.memory_space<vmem>>, vector<1x16xf32>
    tpu.vector_store %arg9[%c1_233, %c112_234], %207 {strides = array<i32>} : memref<4x144xf32, #tpu.memory_space<vmem>>, vector<1x16xf32>,
    %c2_235 = arith.constant 2 : index
    %c4_236 = arith.constant 4 : index
    %c0_237 = arith.constant 0 : index
    %209 = vector.load %arg8[%c2_235, %c4_236, %c0_237] : memref<6x6x16xf32, #tpu.memory_space<vmem>>, vector<1x1x16xf32>
    %210 = vector.shape_cast %209 : vector<1x1x16xf32> to vector<1x16xf32>
    %c1_238 = arith.constant 1 : index
    %c128_239 = arith.constant 128 : index
    %211 = vector.load %arg9[%c1_238, %c128_239] : memref<4x144xf32, #tpu.memory_space<vmem>>, vector<1x16xf32>
    tpu.vector_store %arg9[%c1_238, %c128_239], %210 {strides = array<i32>} : memref<4x144xf32, #tpu.memory_space<vmem>>, vector<1x16xf32>,
    %c2_240 = arith.constant 2 : index
    %c0_241 = arith.constant 0 : index
    %c0_242 = arith.constant 0 : index
    %212 = vector.load %arg8[%c2_240, %c0_241, %c0_242] : memref<6x6x16xf32, #tpu.memory_space<vmem>>, vector<1x1x16xf32>
    %213 = vector.shape_cast %212 : vector<1x1x16xf32> to vector<1x16xf32>
    %c2_243 = arith.constant 2 : index
    %c0_244 = arith.constant 0 : index
    %214 = vector.load %arg9[%c2_243, %c0_244] : memref<4x144xf32, #tpu.memory_space<vmem>>, vector<1x16xf32>
    tpu.vector_store %arg9[%c2_243, %c0_244], %213 {strides = array<i32>} : memref<4x144xf32, #tpu.memory_space<vmem>>, vector<1x16xf32>,
    %c2_245 = arith.constant 2 : index
    %c1_246 = arith.constant 1 : index
    %c0_247 = arith.constant 0 : index
    %215 = vector.load %arg8[%c2_245, %c1_246, %c0_247] : memref<6x6x16xf32, #tpu.memory_space<vmem>>, vector<1x1x16xf32>
    %216 = vector.shape_cast %215 : vector<1x1x16xf32> to vector<1x16xf32>
    %c2_248 = arith.constant 2 : index
    %c16_249 = arith.constant 16 : index
    %217 = vector.load %arg9[%c2_248, %c16_249] : memref<4x144xf32, #tpu.memory_space<vmem>>, vector<1x16xf32>
    tpu.vector_store %arg9[%c2_248, %c16_249], %216 {strides = array<i32>} : memref<4x144xf32, #tpu.memory_space<vmem>>, vector<1x16xf32>,
    %c2_250 = arith.constant 2 : index
    %c2_251 = arith.constant 2 : index
    %c0_252 = arith.constant 0 : index
    %218 = vector.load %arg8[%c2_250, %c2_251, %c0_252] : memref<6x6x16xf32, #tpu.memory_space<vmem>>, vector<1x1x16xf32>
    %219 = vector.shape_cast %218 : vector<1x1x16xf32> to vector<1x16xf32>
    %c2_253 = arith.constant 2 : index
    %c32_254 = arith.constant 32 : index
    %220 = vector.load %arg9[%c2_253, %c32_254] : memref<4x144xf32, #tpu.memory_space<vmem>>, vector<1x16xf32>
    tpu.vector_store %arg9[%c2_253, %c32_254], %219 {strides = array<i32>} : memref<4x144xf32, #tpu.memory_space<vmem>>, vector<1x16xf32>,
    %c3_255 = arith.constant 3 : index
    %c0_256 = arith.constant 0 : index
    %c0_257 = arith.constant 0 : index
    %221 = vector.load %arg8[%c3_255, %c0_256, %c0_257] : memref<6x6x16xf32, #tpu.memory_space<vmem>>, vector<1x1x16xf32>
    %222 = vector.shape_cast %221 : vector<1x1x16xf32> to vector<1x16xf32>
    %c2_258 = arith.constant 2 : index
    %c48_259 = arith.constant 48 : index
    %223 = vector.load %arg9[%c2_258, %c48_259] : memref<4x144xf32, #tpu.memory_space<vmem>>, vector<1x16xf32>
    tpu.vector_store %arg9[%c2_258, %c48_259], %222 {strides = array<i32>} : memref<4x144xf32, #tpu.memory_space<vmem>>, vector<1x16xf32>,
    %c3_260 = arith.constant 3 : index
    %c1_261 = arith.constant 1 : index
    %c0_262 = arith.constant 0 : index
    %224 = vector.load %arg8[%c3_260, %c1_261, %c0_262] : memref<6x6x16xf32, #tpu.memory_space<vmem>>, vector<1x1x16xf32>
    %225 = vector.shape_cast %224 : vector<1x1x16xf32> to vector<1x16xf32>
    %c2_263 = arith.constant 2 : index
    %c64_264 = arith.constant 64 : index
    %226 = vector.load %arg9[%c2_263, %c64_264] : memref<4x144xf32, #tpu.memory_space<vmem>>, vector<1x16xf32>
    tpu.vector_store %arg9[%c2_263, %c64_264], %225 {strides = array<i32>} : memref<4x144xf32, #tpu.memory_space<vmem>>, vector<1x16xf32>,
    %c3_265 = arith.constant 3 : index
    %c2_266 = arith.constant 2 : index
    %c0_267 = arith.constant 0 : index
    %227 = vector.load %arg8[%c3_265, %c2_266, %c0_267] : memref<6x6x16xf32, #tpu.memory_space<vmem>>, vector<1x1x16xf32>
    %228 = vector.shape_cast %227 : vector<1x1x16xf32> to vector<1x16xf32>
    %c2_268 = arith.constant 2 : index
    %c80_269 = arith.constant 80 : index
    %229 = vector.load %arg9[%c2_268, %c80_269] : memref<4x144xf32, #tpu.memory_space<vmem>>, vector<1x16xf32>
    tpu.vector_store %arg9[%c2_268, %c80_269], %228 {strides = array<i32>} : memref<4x144xf32, #tpu.memory_space<vmem>>, vector<1x16xf32>,
    %c4_270 = arith.constant 4 : index
    %c0_271 = arith.constant 0 : index
    %c0_272 = arith.constant 0 : index
    %230 = vector.load %arg8[%c4_270, %c0_271, %c0_272] : memref<6x6x16xf32, #tpu.memory_space<vmem>>, vector<1x1x16xf32>
    %231 = vector.shape_cast %230 : vector<1x1x16xf32> to vector<1x16xf32>
    %c2_273 = arith.constant 2 : index
    %c96_274 = arith.constant 96 : index
    %232 = vector.load %arg9[%c2_273, %c96_274] : memref<4x144xf32, #tpu.memory_space<vmem>>, vector<1x16xf32>
    tpu.vector_store %arg9[%c2_273, %c96_274], %231 {strides = array<i32>} : memref<4x144xf32, #tpu.memory_space<vmem>>, vector<1x16xf32>,
    %c4_275 = arith.constant 4 : index
    %c1_276 = arith.constant 1 : index
    %c0_277 = arith.constant 0 : index
    %233 = vector.load %arg8[%c4_275, %c1_276, %c0_277] : memref<6x6x16xf32, #tpu.memory_space<vmem>>, vector<1x1x16xf32>
    %234 = vector.shape_cast %233 : vector<1x1x16xf32> to vector<1x16xf32>
    %c2_278 = arith.constant 2 : index
    %c112_279 = arith.constant 112 : index
    %235 = vector.load %arg9[%c2_278, %c112_279] : memref<4x144xf32, #tpu.memory_space<vmem>>, vector<1x16xf32>
    tpu.vector_store %arg9[%c2_278, %c112_279], %234 {strides = array<i32>} : memref<4x144xf32, #tpu.memory_space<vmem>>, vector<1x16xf32>,
    %c4_280 = arith.constant 4 : index
    %c2_281 = arith.constant 2 : index
    %c0_282 = arith.constant 0 : index
    %236 = vector.load %arg8[%c4_280, %c2_281, %c0_282] : memref<6x6x16xf32, #tpu.memory_space<vmem>>, vector<1x1x16xf32>
    %237 = vector.shape_cast %236 : vector<1x1x16xf32> to vector<1x16xf32>
    %c2_283 = arith.constant 2 : index
    %c128_284 = arith.constant 128 : index
    %238 = vector.load %arg9[%c2_283, %c128_284] : memref<4x144xf32, #tpu.memory_space<vmem>>, vector<1x16xf32>
    tpu.vector_store %arg9[%c2_283, %c128_284], %237 {strides = array<i32>} : memref<4x144xf32, #tpu.memory_space<vmem>>, vector<1x16xf32>,
    %c2_285 = arith.constant 2 : index
    %c2_286 = arith.constant 2 : index
    %c0_287 = arith.constant 0 : index
    %239 = vector.load %arg8[%c2_285, %c2_286, %c0_287] : memref<6x6x16xf32, #tpu.memory_space<vmem>>, vector<1x1x16xf32>
    %240 = vector.shape_cast %239 : vector<1x1x16xf32> to vector<1x16xf32>
    %c3_288 = arith.constant 3 : index
    %c0_289 = arith.constant 0 : index
    %241 = vector.load %arg9[%c3_288, %c0_289] : memref<4x144xf32, #tpu.memory_space<vmem>>, vector<1x16xf32>
    tpu.vector_store %arg9[%c3_288, %c0_289], %240 {strides = array<i32>} : memref<4x144xf32, #tpu.memory_space<vmem>>, vector<1x16xf32>,
    %c2_290 = arith.constant 2 : index
    %c3_291 = arith.constant 3 : index
    %c0_292 = arith.constant 0 : index
    %242 = vector.load %arg8[%c2_290, %c3_291, %c0_292] : memref<6x6x16xf32, #tpu.memory_space<vmem>>, vector<1x1x16xf32>
    %243 = vector.shape_cast %242 : vector<1x1x16xf32> to vector<1x16xf32>
    %c3_293 = arith.constant 3 : index
    %c16_294 = arith.constant 16 : index
    %244 = vector.load %arg9[%c3_293, %c16_294] : memref<4x144xf32, #tpu.memory_space<vmem>>, vector<1x16xf32>
    tpu.vector_store %arg9[%c3_293, %c16_294], %243 {strides = array<i32>} : memref<4x144xf32, #tpu.memory_space<vmem>>, vector<1x16xf32>,
    %c2_295 = arith.constant 2 : index
    %c4_296 = arith.constant 4 : index
    %c0_297 = arith.constant 0 : index
    %245 = vector.load %arg8[%c2_295, %c4_296, %c0_297] : memref<6x6x16xf32, #tpu.memory_space<vmem>>, vector<1x1x16xf32>
    %246 = vector.shape_cast %245 : vector<1x1x16xf32> to vector<1x16xf32>
    %c3_298 = arith.constant 3 : index
    %c32_299 = arith.constant 32 : index
    %247 = vector.load %arg9[%c3_298, %c32_299] : memref<4x144xf32, #tpu.memory_space<vmem>>, vector<1x16xf32>
    tpu.vector_store %arg9[%c3_298, %c32_299], %246 {strides = array<i32>} : memref<4x144xf32, #tpu.memory_space<vmem>>, vector<1x16xf32>,
    %c3_300 = arith.constant 3 : index
    %c2_301 = arith.constant 2 : index
    %c0_302 = arith.constant 0 : index
    %248 = vector.load %arg8[%c3_300, %c2_301, %c0_302] : memref<6x6x16xf32, #tpu.memory_space<vmem>>, vector<1x1x16xf32>
    %249 = vector.shape_cast %248 : vector<1x1x16xf32> to vector<1x16xf32>
    %c3_303 = arith.constant 3 : index
    %c48_304 = arith.constant 48 : index
    %250 = vector.load %arg9[%c3_303, %c48_304] : memref<4x144xf32, #tpu.memory_space<vmem>>, vector<1x16xf32>
    tpu.vector_store %arg9[%c3_303, %c48_304], %249 {strides = array<i32>} : memref<4x144xf32, #tpu.memory_space<vmem>>, vector<1x16xf32>,
    %c3_305 = arith.constant 3 : index
    %c3_306 = arith.constant 3 : index
    %c0_307 = arith.constant 0 : index
    %251 = vector.load %arg8[%c3_305, %c3_306, %c0_307] : memref<6x6x16xf32, #tpu.memory_space<vmem>>, vector<1x1x16xf32>
    %252 = vector.shape_cast %251 : vector<1x1x16xf32> to vector<1x16xf32>
    %c3_308 = arith.constant 3 : index
    %c64_309 = arith.constant 64 : index
    %253 = vector.load %arg9[%c3_308, %c64_309] : memref<4x144xf32, #tpu.memory_space<vmem>>, vector<1x16xf32>
    tpu.vector_store %arg9[%c3_308, %c64_309], %252 {strides = array<i32>} : memref<4x144xf32, #tpu.memory_space<vmem>>, vector<1x16xf32>,
    %c3_310 = arith.constant 3 : index
    %c4_311 = arith.constant 4 : index
    %c0_312 = arith.constant 0 : index
    %254 = vector.load %arg8[%c3_310, %c4_311, %c0_312] : memref<6x6x16xf32, #tpu.memory_space<vmem>>, vector<1x1x16xf32>
    %255 = vector.shape_cast %254 : vector<1x1x16xf32> to vector<1x16xf32>
    %c3_313 = arith.constant 3 : index
    %c80_314 = arith.constant 80 : index
    %256 = vector.load %arg9[%c3_313, %c80_314] : memref<4x144xf32, #tpu.memory_space<vmem>>, vector<1x16xf32>
    tpu.vector_store %arg9[%c3_313, %c80_314], %255 {strides = array<i32>} : memref<4x144xf32, #tpu.memory_space<vmem>>, vector<1x16xf32>,
    %c4_315 = arith.constant 4 : index
    %c2_316 = arith.constant 2 : index
    %c0_317 = arith.constant 0 : index
    %257 = vector.load %arg8[%c4_315, %c2_316, %c0_317] : memref<6x6x16xf32, #tpu.memory_space<vmem>>, vector<1x1x16xf32>
    %258 = vector.shape_cast %257 : vector<1x1x16xf32> to vector<1x16xf32>
    %c3_318 = arith.constant 3 : index
    %c96_319 = arith.constant 96 : index
    %259 = vector.load %arg9[%c3_318, %c96_319] : memref<4x144xf32, #tpu.memory_space<vmem>>, vector<1x16xf32>
    tpu.vector_store %arg9[%c3_318, %c96_319], %258 {strides = array<i32>} : memref<4x144xf32, #tpu.memory_space<vmem>>, vector<1x16xf32>,
    %c4_320 = arith.constant 4 : index
    %c3_321 = arith.constant 3 : index
    %c0_322 = arith.constant 0 : index
    %260 = vector.load %arg8[%c4_320, %c3_321, %c0_322] : memref<6x6x16xf32, #tpu.memory_space<vmem>>, vector<1x1x16xf32>
    %261 = vector.shape_cast %260 : vector<1x1x16xf32> to vector<1x16xf32>
    %c3_323 = arith.constant 3 : index
    %c112_324 = arith.constant 112 : index
    %262 = vector.load %arg9[%c3_323, %c112_324] : memref<4x144xf32, #tpu.memory_space<vmem>>, vector<1x16xf32>
    tpu.vector_store %arg9[%c3_323, %c112_324], %261 {strides = array<i32>} : memref<4x144xf32, #tpu.memory_space<vmem>>, vector<1x16xf32>,
    %c4_325 = arith.constant 4 : index
    %c4_326 = arith.constant 4 : index
    %c0_327 = arith.constant 0 : index
    %263 = vector.load %arg8[%c4_325, %c4_326, %c0_327] : memref<6x6x16xf32, #tpu.memory_space<vmem>>, vector<1x1x16xf32>
    %264 = vector.shape_cast %263 : vector<1x1x16xf32> to vector<1x16xf32>
    %c3_328 = arith.constant 3 : index
    %c128_329 = arith.constant 128 : index
    %265 = vector.load %arg9[%c3_328, %c128_329] : memref<4x144xf32, #tpu.memory_space<vmem>>, vector<1x16xf32>
    tpu.vector_store %arg9[%c3_328, %c128_329], %264 {strides = array<i32>} : memref<4x144xf32, #tpu.memory_space<vmem>>, vector<1x16xf32>,
    %c0_330 = arith.constant 0 : index
    %c0_331 = arith.constant 0 : index
    %266 = vector.load %arg9[%c0_330, %c0_331] : memref<4x144xf32, #tpu.memory_space<vmem>>, vector<4x144xf32>
    %c272 = arith.constant 272 : index
    %c0_332 = arith.constant 0 : index
    %267 = vector.load %arg2[%c272, %c0_332] : memref<576x128xf32, #tpu.memory_space<vmem>>, vector<144x16xf32>
    %cst_333 = arith.constant dense<0.000000e+00> : vector<4x16xf32>
    %268 = tpu.matmul %266, %267, %cst_333 {dimension_numbers = #tpu.dot_dimension_numbers<[1], [0], [0], [1], [0, 0, 1, 1], [], []>} : vector<4x144xf32>, vector<144x16xf32>, vector<4x16xf32> -> vector<4x16xf32>
    %c416 = arith.constant 416 : index
    %c0_334 = arith.constant 0 : index
    %269 = vector.load %arg2[%c416, %c0_334] : memref<576x128xf32, #tpu.memory_space<vmem>>, vector<1x16xf32>
    %270 = vector.broadcast %269 : vector<1x16xf32> to vector<4x16xf32>
    %271 = arith.addf %268, %270 : vector<4x16xf32>
    %cst_335 = arith.constant 0.000000e+00 : f32
    %272 = vector.broadcast %cst_335 : f32 to vector<4x4x16xf32>
    %c0_336 = arith.constant 0 : index
    %c0_337 = arith.constant 0 : index
    %c0_338 = arith.constant 0 : index
    %273 = vector.load %arg10[%c0_336, %c0_337, %c0_338] : memref<4x4x16xf32, #tpu.memory_space<vmem>>, vector<4x4x16xf32>
    tpu.vector_store %arg10[%c0_336, %c0_337, %c0_338], %272 {strides = array<i32>} : memref<4x4x16xf32, #tpu.memory_space<vmem>>, vector<4x4x16xf32>,
    %274 = vector.extract_strided_slice %271 {offsets = [0, 0], sizes = [2, 16], strides = [1, 1]} : vector<4x16xf32> to vector<2x16xf32>
    %275 = vector.shape_cast %274 : vector<2x16xf32> to vector<1x2x16xf32>
    %c1_339 = arith.constant 1 : index
    %c1_340 = arith.constant 1 : index
    %c0_341 = arith.constant 0 : index
    %276 = vector.load %arg10[%c1_339, %c1_340, %c0_341] : memref<4x4x16xf32, #tpu.memory_space<vmem>>, vector<1x2x16xf32>
    tpu.vector_store %arg10[%c1_339, %c1_340, %c0_341], %275 {strides = array<i32>} : memref<4x4x16xf32, #tpu.memory_space<vmem>>, vector<1x2x16xf32>,
    %277 = vector.extract_strided_slice %271 {offsets = [2, 0], sizes = [2, 16], strides = [1, 1]} : vector<4x16xf32> to vector<2x16xf32>
    %278 = vector.shape_cast %277 : vector<2x16xf32> to vector<1x2x16xf32>
    %c2_342 = arith.constant 2 : index
    %c1_343 = arith.constant 1 : index
    %c0_344 = arith.constant 0 : index
    %279 = vector.load %arg10[%c2_342, %c1_343, %c0_344] : memref<4x4x16xf32, #tpu.memory_space<vmem>>, vector<1x2x16xf32>
    tpu.vector_store %arg10[%c2_342, %c1_343, %c0_344], %278 {strides = array<i32>} : memref<4x4x16xf32, #tpu.memory_space<vmem>>, vector<1x2x16xf32>,
    %c0_345 = arith.constant 0 : index
    %c0_346 = arith.constant 0 : index
    %c0_347 = arith.constant 0 : index
    %280 = vector.load %arg10[%c0_345, %c0_346, %c0_347] : memref<4x4x16xf32, #tpu.memory_space<vmem>>, vector<1x1x16xf32>
    %281 = vector.shape_cast %280 : vector<1x1x16xf32> to vector<1x16xf32>
    %c0_348 = arith.constant 0 : index
    %c0_349 = arith.constant 0 : index
    %282 = vector.load %arg11[%c0_348, %c0_349] : memref<4x144xf32, #tpu.memory_space<vmem>>, vector<1x16xf32>
    tpu.vector_store %arg11[%c0_348, %c0_349], %281 {strides = array<i32>} : memref<4x144xf32, #tpu.memory_space<vmem>>, vector<1x16xf32>,
    %c0_350 = arith.constant 0 : index
    %c1_351 = arith.constant 1 : index
    %c0_352 = arith.constant 0 : index
    %283 = vector.load %arg10[%c0_350, %c1_351, %c0_352] : memref<4x4x16xf32, #tpu.memory_space<vmem>>, vector<1x1x16xf32>
    %284 = vector.shape_cast %283 : vector<1x1x16xf32> to vector<1x16xf32>
    %c0_353 = arith.constant 0 : index
    %c16_354 = arith.constant 16 : index
    %285 = vector.load %arg11[%c0_353, %c16_354] : memref<4x144xf32, #tpu.memory_space<vmem>>, vector<1x16xf32>
    tpu.vector_store %arg11[%c0_353, %c16_354], %284 {strides = array<i32>} : memref<4x144xf32, #tpu.memory_space<vmem>>, vector<1x16xf32>,
    %c0_355 = arith.constant 0 : index
    %c2_356 = arith.constant 2 : index
    %c0_357 = arith.constant 0 : index
    %286 = vector.load %arg10[%c0_355, %c2_356, %c0_357] : memref<4x4x16xf32, #tpu.memory_space<vmem>>, vector<1x1x16xf32>
    %287 = vector.shape_cast %286 : vector<1x1x16xf32> to vector<1x16xf32>
    %c0_358 = arith.constant 0 : index
    %c32_359 = arith.constant 32 : index
    %288 = vector.load %arg11[%c0_358, %c32_359] : memref<4x144xf32, #tpu.memory_space<vmem>>, vector<1x16xf32>
    tpu.vector_store %arg11[%c0_358, %c32_359], %287 {strides = array<i32>} : memref<4x144xf32, #tpu.memory_space<vmem>>, vector<1x16xf32>,
    %c1_360 = arith.constant 1 : index
    %c0_361 = arith.constant 0 : index
    %c0_362 = arith.constant 0 : index
    %289 = vector.load %arg10[%c1_360, %c0_361, %c0_362] : memref<4x4x16xf32, #tpu.memory_space<vmem>>, vector<1x1x16xf32>
    %290 = vector.shape_cast %289 : vector<1x1x16xf32> to vector<1x16xf32>
    %c0_363 = arith.constant 0 : index
    %c48_364 = arith.constant 48 : index
    %291 = vector.load %arg11[%c0_363, %c48_364] : memref<4x144xf32, #tpu.memory_space<vmem>>, vector<1x16xf32>
    tpu.vector_store %arg11[%c0_363, %c48_364], %290 {strides = array<i32>} : memref<4x144xf32, #tpu.memory_space<vmem>>, vector<1x16xf32>,
    %c1_365 = arith.constant 1 : index
    %c1_366 = arith.constant 1 : index
    %c0_367 = arith.constant 0 : index
    %292 = vector.load %arg10[%c1_365, %c1_366, %c0_367] : memref<4x4x16xf32, #tpu.memory_space<vmem>>, vector<1x1x16xf32>
    %293 = vector.shape_cast %292 : vector<1x1x16xf32> to vector<1x16xf32>
    %c0_368 = arith.constant 0 : index
    %c64_369 = arith.constant 64 : index
    %294 = vector.load %arg11[%c0_368, %c64_369] : memref<4x144xf32, #tpu.memory_space<vmem>>, vector<1x16xf32>
    tpu.vector_store %arg11[%c0_368, %c64_369], %293 {strides = array<i32>} : memref<4x144xf32, #tpu.memory_space<vmem>>, vector<1x16xf32>,
    %c1_370 = arith.constant 1 : index
    %c2_371 = arith.constant 2 : index
    %c0_372 = arith.constant 0 : index
    %295 = vector.load %arg10[%c1_370, %c2_371, %c0_372] : memref<4x4x16xf32, #tpu.memory_space<vmem>>, vector<1x1x16xf32>
    %296 = vector.shape_cast %295 : vector<1x1x16xf32> to vector<1x16xf32>
    %c0_373 = arith.constant 0 : index
    %c80_374 = arith.constant 80 : index
    %297 = vector.load %arg11[%c0_373, %c80_374] : memref<4x144xf32, #tpu.memory_space<vmem>>, vector<1x16xf32>
    tpu.vector_store %arg11[%c0_373, %c80_374], %296 {strides = array<i32>} : memref<4x144xf32, #tpu.memory_space<vmem>>, vector<1x16xf32>,
    %c2_375 = arith.constant 2 : index
    %c0_376 = arith.constant 0 : index
    %c0_377 = arith.constant 0 : index
    %298 = vector.load %arg10[%c2_375, %c0_376, %c0_377] : memref<4x4x16xf32, #tpu.memory_space<vmem>>, vector<1x1x16xf32>
    %299 = vector.shape_cast %298 : vector<1x1x16xf32> to vector<1x16xf32>
    %c0_378 = arith.constant 0 : index
    %c96_379 = arith.constant 96 : index
    %300 = vector.load %arg11[%c0_378, %c96_379] : memref<4x144xf32, #tpu.memory_space<vmem>>, vector<1x16xf32>
    tpu.vector_store %arg11[%c0_378, %c96_379], %299 {strides = array<i32>} : memref<4x144xf32, #tpu.memory_space<vmem>>, vector<1x16xf32>,
    %c2_380 = arith.constant 2 : index
    %c1_381 = arith.constant 1 : index
    %c0_382 = arith.constant 0 : index
    %301 = vector.load %arg10[%c2_380, %c1_381, %c0_382] : memref<4x4x16xf32, #tpu.memory_space<vmem>>, vector<1x1x16xf32>
    %302 = vector.shape_cast %301 : vector<1x1x16xf32> to vector<1x16xf32>
    %c0_383 = arith.constant 0 : index
    %c112_384 = arith.constant 112 : index
    %303 = vector.load %arg11[%c0_383, %c112_384] : memref<4x144xf32, #tpu.memory_space<vmem>>, vector<1x16xf32>
    tpu.vector_store %arg11[%c0_383, %c112_384], %302 {strides = array<i32>} : memref<4x144xf32, #tpu.memory_space<vmem>>, vector<1x16xf32>,
    %c2_385 = arith.constant 2 : index
    %c2_386 = arith.constant 2 : index
    %c0_387 = arith.constant 0 : index
    %304 = vector.load %arg10[%c2_385, %c2_386, %c0_387] : memref<4x4x16xf32, #tpu.memory_space<vmem>>, vector<1x1x16xf32>
    %305 = vector.shape_cast %304 : vector<1x1x16xf32> to vector<1x16xf32>
    %c0_388 = arith.constant 0 : index
    %c128_389 = arith.constant 128 : index
    %306 = vector.load %arg11[%c0_388, %c128_389] : memref<4x144xf32, #tpu.memory_space<vmem>>, vector<1x16xf32>
    tpu.vector_store %arg11[%c0_388, %c128_389], %305 {strides = array<i32>} : memref<4x144xf32, #tpu.memory_space<vmem>>, vector<1x16xf32>,
    %c0_390 = arith.constant 0 : index
    %c1_391 = arith.constant 1 : index
    %c0_392 = arith.constant 0 : index
    %307 = vector.load %arg10[%c0_390, %c1_391, %c0_392] : memref<4x4x16xf32, #tpu.memory_space<vmem>>, vector<1x1x16xf32>
    %308 = vector.shape_cast %307 : vector<1x1x16xf32> to vector<1x16xf32>
    %c1_393 = arith.constant 1 : index
    %c0_394 = arith.constant 0 : index
    %309 = vector.load %arg11[%c1_393, %c0_394] : memref<4x144xf32, #tpu.memory_space<vmem>>, vector<1x16xf32>
    tpu.vector_store %arg11[%c1_393, %c0_394], %308 {strides = array<i32>} : memref<4x144xf32, #tpu.memory_space<vmem>>, vector<1x16xf32>,
    %c0_395 = arith.constant 0 : index
    %c2_396 = arith.constant 2 : index
    %c0_397 = arith.constant 0 : index
    %310 = vector.load %arg10[%c0_395, %c2_396, %c0_397] : memref<4x4x16xf32, #tpu.memory_space<vmem>>, vector<1x1x16xf32>
    %311 = vector.shape_cast %310 : vector<1x1x16xf32> to vector<1x16xf32>
    %c1_398 = arith.constant 1 : index
    %c16_399 = arith.constant 16 : index
    %312 = vector.load %arg11[%c1_398, %c16_399] : memref<4x144xf32, #tpu.memory_space<vmem>>, vector<1x16xf32>
    tpu.vector_store %arg11[%c1_398, %c16_399], %311 {strides = array<i32>} : memref<4x144xf32, #tpu.memory_space<vmem>>, vector<1x16xf32>,
    %c0_400 = arith.constant 0 : index
    %c3_401 = arith.constant 3 : index
    %c0_402 = arith.constant 0 : index
    %313 = vector.load %arg10[%c0_400, %c3_401, %c0_402] : memref<4x4x16xf32, #tpu.memory_space<vmem>>, vector<1x1x16xf32>
    %314 = vector.shape_cast %313 : vector<1x1x16xf32> to vector<1x16xf32>
    %c1_403 = arith.constant 1 : index
    %c32_404 = arith.constant 32 : index
    %315 = vector.load %arg11[%c1_403, %c32_404] : memref<4x144xf32, #tpu.memory_space<vmem>>, vector<1x16xf32>
    tpu.vector_store %arg11[%c1_403, %c32_404], %314 {strides = array<i32>} : memref<4x144xf32, #tpu.memory_space<vmem>>, vector<1x16xf32>,
    %c1_405 = arith.constant 1 : index
    %c1_406 = arith.constant 1 : index
    %c0_407 = arith.constant 0 : index
    %316 = vector.load %arg10[%c1_405, %c1_406, %c0_407] : memref<4x4x16xf32, #tpu.memory_space<vmem>>, vector<1x1x16xf32>
    %317 = vector.shape_cast %316 : vector<1x1x16xf32> to vector<1x16xf32>
    %c1_408 = arith.constant 1 : index
    %c48_409 = arith.constant 48 : index
    %318 = vector.load %arg11[%c1_408, %c48_409] : memref<4x144xf32, #tpu.memory_space<vmem>>, vector<1x16xf32>
    tpu.vector_store %arg11[%c1_408, %c48_409], %317 {strides = array<i32>} : memref<4x144xf32, #tpu.memory_space<vmem>>, vector<1x16xf32>,
    %c1_410 = arith.constant 1 : index
    %c2_411 = arith.constant 2 : index
    %c0_412 = arith.constant 0 : index
    %319 = vector.load %arg10[%c1_410, %c2_411, %c0_412] : memref<4x4x16xf32, #tpu.memory_space<vmem>>, vector<1x1x16xf32>
    %320 = vector.shape_cast %319 : vector<1x1x16xf32> to vector<1x16xf32>
    %c1_413 = arith.constant 1 : index
    %c64_414 = arith.constant 64 : index
    %321 = vector.load %arg11[%c1_413, %c64_414] : memref<4x144xf32, #tpu.memory_space<vmem>>, vector<1x16xf32>
    tpu.vector_store %arg11[%c1_413, %c64_414], %320 {strides = array<i32>} : memref<4x144xf32, #tpu.memory_space<vmem>>, vector<1x16xf32>,
    %c1_415 = arith.constant 1 : index
    %c3_416 = arith.constant 3 : index
    %c0_417 = arith.constant 0 : index
    %322 = vector.load %arg10[%c1_415, %c3_416, %c0_417] : memref<4x4x16xf32, #tpu.memory_space<vmem>>, vector<1x1x16xf32>
    %323 = vector.shape_cast %322 : vector<1x1x16xf32> to vector<1x16xf32>
    %c1_418 = arith.constant 1 : index
    %c80_419 = arith.constant 80 : index
    %324 = vector.load %arg11[%c1_418, %c80_419] : memref<4x144xf32, #tpu.memory_space<vmem>>, vector<1x16xf32>
    tpu.vector_store %arg11[%c1_418, %c80_419], %323 {strides = array<i32>} : memref<4x144xf32, #tpu.memory_space<vmem>>, vector<1x16xf32>,
    %c2_420 = arith.constant 2 : index
    %c1_421 = arith.constant 1 : index
    %c0_422 = arith.constant 0 : index
    %325 = vector.load %arg10[%c2_420, %c1_421, %c0_422] : memref<4x4x16xf32, #tpu.memory_space<vmem>>, vector<1x1x16xf32>
    %326 = vector.shape_cast %325 : vector<1x1x16xf32> to vector<1x16xf32>
    %c1_423 = arith.constant 1 : index
    %c96_424 = arith.constant 96 : index
    %327 = vector.load %arg11[%c1_423, %c96_424] : memref<4x144xf32, #tpu.memory_space<vmem>>, vector<1x16xf32>
    tpu.vector_store %arg11[%c1_423, %c96_424], %326 {strides = array<i32>} : memref<4x144xf32, #tpu.memory_space<vmem>>, vector<1x16xf32>,
    %c2_425 = arith.constant 2 : index
    %c2_426 = arith.constant 2 : index
    %c0_427 = arith.constant 0 : index
    %328 = vector.load %arg10[%c2_425, %c2_426, %c0_427] : memref<4x4x16xf32, #tpu.memory_space<vmem>>, vector<1x1x16xf32>
    %329 = vector.shape_cast %328 : vector<1x1x16xf32> to vector<1x16xf32>
    %c1_428 = arith.constant 1 : index
    %c112_429 = arith.constant 112 : index
    %330 = vector.load %arg11[%c1_428, %c112_429] : memref<4x144xf32, #tpu.memory_space<vmem>>, vector<1x16xf32>
    tpu.vector_store %arg11[%c1_428, %c112_429], %329 {strides = array<i32>} : memref<4x144xf32, #tpu.memory_space<vmem>>, vector<1x16xf32>,
    %c2_430 = arith.constant 2 : index
    %c3_431 = arith.constant 3 : index
    %c0_432 = arith.constant 0 : index
    %331 = vector.load %arg10[%c2_430, %c3_431, %c0_432] : memref<4x4x16xf32, #tpu.memory_space<vmem>>, vector<1x1x16xf32>
    %332 = vector.shape_cast %331 : vector<1x1x16xf32> to vector<1x16xf32>
    %c1_433 = arith.constant 1 : index
    %c128_434 = arith.constant 128 : index
    %333 = vector.load %arg11[%c1_433, %c128_434] : memref<4x144xf32, #tpu.memory_space<vmem>>, vector<1x16xf32>
    tpu.vector_store %arg11[%c1_433, %c128_434], %332 {strides = array<i32>} : memref<4x144xf32, #tpu.memory_space<vmem>>, vector<1x16xf32>,
    %c1_435 = arith.constant 1 : index
    %c0_436 = arith.constant 0 : index
    %c0_437 = arith.constant 0 : index
    %334 = vector.load %arg10[%c1_435, %c0_436, %c0_437] : memref<4x4x16xf32, #tpu.memory_space<vmem>>, vector<1x1x16xf32>
    %335 = vector.shape_cast %334 : vector<1x1x16xf32> to vector<1x16xf32>
    %c2_438 = arith.constant 2 : index
    %c0_439 = arith.constant 0 : index
    %336 = vector.load %arg11[%c2_438, %c0_439] : memref<4x144xf32, #tpu.memory_space<vmem>>, vector<1x16xf32>
    tpu.vector_store %arg11[%c2_438, %c0_439], %335 {strides = array<i32>} : memref<4x144xf32, #tpu.memory_space<vmem>>, vector<1x16xf32>,
    %c1_440 = arith.constant 1 : index
    %c1_441 = arith.constant 1 : index
    %c0_442 = arith.constant 0 : index
    %337 = vector.load %arg10[%c1_440, %c1_441, %c0_442] : memref<4x4x16xf32, #tpu.memory_space<vmem>>, vector<1x1x16xf32>
    %338 = vector.shape_cast %337 : vector<1x1x16xf32> to vector<1x16xf32>
    %c2_443 = arith.constant 2 : index
    %c16_444 = arith.constant 16 : index
    %339 = vector.load %arg11[%c2_443, %c16_444] : memref<4x144xf32, #tpu.memory_space<vmem>>, vector<1x16xf32>
    tpu.vector_store %arg11[%c2_443, %c16_444], %338 {strides = array<i32>} : memref<4x144xf32, #tpu.memory_space<vmem>>, vector<1x16xf32>,
    %c1_445 = arith.constant 1 : index
    %c2_446 = arith.constant 2 : index
    %c0_447 = arith.constant 0 : index
    %340 = vector.load %arg10[%c1_445, %c2_446, %c0_447] : memref<4x4x16xf32, #tpu.memory_space<vmem>>, vector<1x1x16xf32>
    %341 = vector.shape_cast %340 : vector<1x1x16xf32> to vector<1x16xf32>
    %c2_448 = arith.constant 2 : index
    %c32_449 = arith.constant 32 : index
    %342 = vector.load %arg11[%c2_448, %c32_449] : memref<4x144xf32, #tpu.memory_space<vmem>>, vector<1x16xf32>
    tpu.vector_store %arg11[%c2_448, %c32_449], %341 {strides = array<i32>} : memref<4x144xf32, #tpu.memory_space<vmem>>, vector<1x16xf32>,
    %c2_450 = arith.constant 2 : index
    %c0_451 = arith.constant 0 : index
    %c0_452 = arith.constant 0 : index
    %343 = vector.load %arg10[%c2_450, %c0_451, %c0_452] : memref<4x4x16xf32, #tpu.memory_space<vmem>>, vector<1x1x16xf32>
    %344 = vector.shape_cast %343 : vector<1x1x16xf32> to vector<1x16xf32>
    %c2_453 = arith.constant 2 : index
    %c48_454 = arith.constant 48 : index
    %345 = vector.load %arg11[%c2_453, %c48_454] : memref<4x144xf32, #tpu.memory_space<vmem>>, vector<1x16xf32>
    tpu.vector_store %arg11[%c2_453, %c48_454], %344 {strides = array<i32>} : memref<4x144xf32, #tpu.memory_space<vmem>>, vector<1x16xf32>,
    %c2_455 = arith.constant 2 : index
    %c1_456 = arith.constant 1 : index
    %c0_457 = arith.constant 0 : index
    %346 = vector.load %arg10[%c2_455, %c1_456, %c0_457] : memref<4x4x16xf32, #tpu.memory_space<vmem>>, vector<1x1x16xf32>
    %347 = vector.shape_cast %346 : vector<1x1x16xf32> to vector<1x16xf32>
    %c2_458 = arith.constant 2 : index
    %c64_459 = arith.constant 64 : index
    %348 = vector.load %arg11[%c2_458, %c64_459] : memref<4x144xf32, #tpu.memory_space<vmem>>, vector<1x16xf32>
    tpu.vector_store %arg11[%c2_458, %c64_459], %347 {strides = array<i32>} : memref<4x144xf32, #tpu.memory_space<vmem>>, vector<1x16xf32>,
    %c2_460 = arith.constant 2 : index
    %c2_461 = arith.constant 2 : index
    %c0_462 = arith.constant 0 : index
    %349 = vector.load %arg10[%c2_460, %c2_461, %c0_462] : memref<4x4x16xf32, #tpu.memory_space<vmem>>, vector<1x1x16xf32>
    %350 = vector.shape_cast %349 : vector<1x1x16xf32> to vector<1x16xf32>
    %c2_463 = arith.constant 2 : index
    %c80_464 = arith.constant 80 : index
    %351 = vector.load %arg11[%c2_463, %c80_464] : memref<4x144xf32, #tpu.memory_space<vmem>>, vector<1x16xf32>
    tpu.vector_store %arg11[%c2_463, %c80_464], %350 {strides = array<i32>} : memref<4x144xf32, #tpu.memory_space<vmem>>, vector<1x16xf32>,
    %c3_465 = arith.constant 3 : index
    %c0_466 = arith.constant 0 : index
    %c0_467 = arith.constant 0 : index
    %352 = vector.load %arg10[%c3_465, %c0_466, %c0_467] : memref<4x4x16xf32, #tpu.memory_space<vmem>>, vector<1x1x16xf32>
    %353 = vector.shape_cast %352 : vector<1x1x16xf32> to vector<1x16xf32>
    %c2_468 = arith.constant 2 : index
    %c96_469 = arith.constant 96 : index
    %354 = vector.load %arg11[%c2_468, %c96_469] : memref<4x144xf32, #tpu.memory_space<vmem>>, vector<1x16xf32>
    tpu.vector_store %arg11[%c2_468, %c96_469], %353 {strides = array<i32>} : memref<4x144xf32, #tpu.memory_space<vmem>>, vector<1x16xf32>,
    %c3_470 = arith.constant 3 : index
    %c1_471 = arith.constant 1 : index
    %c0_472 = arith.constant 0 : index
    %355 = vector.load %arg10[%c3_470, %c1_471, %c0_472] : memref<4x4x16xf32, #tpu.memory_space<vmem>>, vector<1x1x16xf32>
    %356 = vector.shape_cast %355 : vector<1x1x16xf32> to vector<1x16xf32>
    %c2_473 = arith.constant 2 : index
    %c112_474 = arith.constant 112 : index
    %357 = vector.load %arg11[%c2_473, %c112_474] : memref<4x144xf32, #tpu.memory_space<vmem>>, vector<1x16xf32>
    tpu.vector_store %arg11[%c2_473, %c112_474], %356 {strides = array<i32>} : memref<4x144xf32, #tpu.memory_space<vmem>>, vector<1x16xf32>,
    %c3_475 = arith.constant 3 : index
    %c2_476 = arith.constant 2 : index
    %c0_477 = arith.constant 0 : index
    %358 = vector.load %arg10[%c3_475, %c2_476, %c0_477] : memref<4x4x16xf32, #tpu.memory_space<vmem>>, vector<1x1x16xf32>
    %359 = vector.shape_cast %358 : vector<1x1x16xf32> to vector<1x16xf32>
    %c2_478 = arith.constant 2 : index
    %c128_479 = arith.constant 128 : index
    %360 = vector.load %arg11[%c2_478, %c128_479] : memref<4x144xf32, #tpu.memory_space<vmem>>, vector<1x16xf32>
    tpu.vector_store %arg11[%c2_478, %c128_479], %359 {strides = array<i32>} : memref<4x144xf32, #tpu.memory_space<vmem>>, vector<1x16xf32>,
    %c1_480 = arith.constant 1 : index
    %c1_481 = arith.constant 1 : index
    %c0_482 = arith.constant 0 : index
    %361 = vector.load %arg10[%c1_480, %c1_481, %c0_482] : memref<4x4x16xf32, #tpu.memory_space<vmem>>, vector<1x1x16xf32>
    %362 = vector.shape_cast %361 : vector<1x1x16xf32> to vector<1x16xf32>
    %c3_483 = arith.constant 3 : index
    %c0_484 = arith.constant 0 : index
    %363 = vector.load %arg11[%c3_483, %c0_484] : memref<4x144xf32, #tpu.memory_space<vmem>>, vector<1x16xf32>
    tpu.vector_store %arg11[%c3_483, %c0_484], %362 {strides = array<i32>} : memref<4x144xf32, #tpu.memory_space<vmem>>, vector<1x16xf32>,
    %c1_485 = arith.constant 1 : index
    %c2_486 = arith.constant 2 : index
    %c0_487 = arith.constant 0 : index
    %364 = vector.load %arg10[%c1_485, %c2_486, %c0_487] : memref<4x4x16xf32, #tpu.memory_space<vmem>>, vector<1x1x16xf32>
    %365 = vector.shape_cast %364 : vector<1x1x16xf32> to vector<1x16xf32>
    %c3_488 = arith.constant 3 : index
    %c16_489 = arith.constant 16 : index
    %366 = vector.load %arg11[%c3_488, %c16_489] : memref<4x144xf32, #tpu.memory_space<vmem>>, vector<1x16xf32>
    tpu.vector_store %arg11[%c3_488, %c16_489], %365 {strides = array<i32>} : memref<4x144xf32, #tpu.memory_space<vmem>>, vector<1x16xf32>,
    %c1_490 = arith.constant 1 : index
    %c3_491 = arith.constant 3 : index
    %c0_492 = arith.constant 0 : index
    %367 = vector.load %arg10[%c1_490, %c3_491, %c0_492] : memref<4x4x16xf32, #tpu.memory_space<vmem>>, vector<1x1x16xf32>
    %368 = vector.shape_cast %367 : vector<1x1x16xf32> to vector<1x16xf32>
    %c3_493 = arith.constant 3 : index
    %c32_494 = arith.constant 32 : index
    %369 = vector.load %arg11[%c3_493, %c32_494] : memref<4x144xf32, #tpu.memory_space<vmem>>, vector<1x16xf32>
    tpu.vector_store %arg11[%c3_493, %c32_494], %368 {strides = array<i32>} : memref<4x144xf32, #tpu.memory_space<vmem>>, vector<1x16xf32>,
    %c2_495 = arith.constant 2 : index
    %c1_496 = arith.constant 1 : index
    %c0_497 = arith.constant 0 : index
    %370 = vector.load %arg10[%c2_495, %c1_496, %c0_497] : memref<4x4x16xf32, #tpu.memory_space<vmem>>, vector<1x1x16xf32>
    %371 = vector.shape_cast %370 : vector<1x1x16xf32> to vector<1x16xf32>
    %c3_498 = arith.constant 3 : index
    %c48_499 = arith.constant 48 : index
    %372 = vector.load %arg11[%c3_498, %c48_499] : memref<4x144xf32, #tpu.memory_space<vmem>>, vector<1x16xf32>
    tpu.vector_store %arg11[%c3_498, %c48_499], %371 {strides = array<i32>} : memref<4x144xf32, #tpu.memory_space<vmem>>, vector<1x16xf32>,
    %c2_500 = arith.constant 2 : index
    %c2_501 = arith.constant 2 : index
    %c0_502 = arith.constant 0 : index
    %373 = vector.load %arg10[%c2_500, %c2_501, %c0_502] : memref<4x4x16xf32, #tpu.memory_space<vmem>>, vector<1x1x16xf32>
    %374 = vector.shape_cast %373 : vector<1x1x16xf32> to vector<1x16xf32>
    %c3_503 = arith.constant 3 : index
    %c64_504 = arith.constant 64 : index
    %375 = vector.load %arg11[%c3_503, %c64_504] : memref<4x144xf32, #tpu.memory_space<vmem>>, vector<1x16xf32>
    tpu.vector_store %arg11[%c3_503, %c64_504], %374 {strides = array<i32>} : memref<4x144xf32, #tpu.memory_space<vmem>>, vector<1x16xf32>,
    %c2_505 = arith.constant 2 : index
    %c3_506 = arith.constant 3 : index
    %c0_507 = arith.constant 0 : index
    %376 = vector.load %arg10[%c2_505, %c3_506, %c0_507] : memref<4x4x16xf32, #tpu.memory_space<vmem>>, vector<1x1x16xf32>
    %377 = vector.shape_cast %376 : vector<1x1x16xf32> to vector<1x16xf32>
    %c3_508 = arith.constant 3 : index
    %c80_509 = arith.constant 80 : index
    %378 = vector.load %arg11[%c3_508, %c80_509] : memref<4x144xf32, #tpu.memory_space<vmem>>, vector<1x16xf32>
    tpu.vector_store %arg11[%c3_508, %c80_509], %377 {strides = array<i32>} : memref<4x144xf32, #tpu.memory_space<vmem>>, vector<1x16xf32>,
    %c3_510 = arith.constant 3 : index
    %c1_511 = arith.constant 1 : index
    %c0_512 = arith.constant 0 : index
    %379 = vector.load %arg10[%c3_510, %c1_511, %c0_512] : memref<4x4x16xf32, #tpu.memory_space<vmem>>, vector<1x1x16xf32>
    %380 = vector.shape_cast %379 : vector<1x1x16xf32> to vector<1x16xf32>
    %c3_513 = arith.constant 3 : index
    %c96_514 = arith.constant 96 : index
    %381 = vector.load %arg11[%c3_513, %c96_514] : memref<4x144xf32, #tpu.memory_space<vmem>>, vector<1x16xf32>
    tpu.vector_store %arg11[%c3_513, %c96_514], %380 {strides = array<i32>} : memref<4x144xf32, #tpu.memory_space<vmem>>, vector<1x16xf32>,
    %c3_515 = arith.constant 3 : index
    %c2_516 = arith.constant 2 : index
    %c0_517 = arith.constant 0 : index
    %382 = vector.load %arg10[%c3_515, %c2_516, %c0_517] : memref<4x4x16xf32, #tpu.memory_space<vmem>>, vector<1x1x16xf32>
    %383 = vector.shape_cast %382 : vector<1x1x16xf32> to vector<1x16xf32>
    %c3_518 = arith.constant 3 : index
    %c112_519 = arith.constant 112 : index
    %384 = vector.load %arg11[%c3_518, %c112_519] : memref<4x144xf32, #tpu.memory_space<vmem>>, vector<1x16xf32>
    tpu.vector_store %arg11[%c3_518, %c112_519], %383 {strides = array<i32>} : memref<4x144xf32, #tpu.memory_space<vmem>>, vector<1x16xf32>,
    %c3_520 = arith.constant 3 : index
    %c3_521 = arith.constant 3 : index
    %c0_522 = arith.constant 0 : index
    %385 = vector.load %arg10[%c3_520, %c3_521, %c0_522] : memref<4x4x16xf32, #tpu.memory_space<vmem>>, vector<1x1x16xf32>
    %386 = vector.shape_cast %385 : vector<1x1x16xf32> to vector<1x16xf32>
    %c3_523 = arith.constant 3 : index
    %c128_524 = arith.constant 128 : index
    %387 = vector.load %arg11[%c3_523, %c128_524] : memref<4x144xf32, #tpu.memory_space<vmem>>, vector<1x16xf32>
    tpu.vector_store %arg11[%c3_523, %c128_524], %386 {strides = array<i32>} : memref<4x144xf32, #tpu.memory_space<vmem>>, vector<1x16xf32>,
    %c0_525 = arith.constant 0 : index
    %c0_526 = arith.constant 0 : index
    %388 = vector.load %arg11[%c0_525, %c0_526] : memref<4x144xf32, #tpu.memory_space<vmem>>, vector<4x144xf32>
    %c424 = arith.constant 424 : index
    %c0_527 = arith.constant 0 : index
    %389 = vector.load %arg2[%c424, %c0_527] : memref<576x128xf32, #tpu.memory_space<vmem>>, vector<144x4xf32>
    %cst_528 = arith.constant dense<0.000000e+00> : vector<4x4xf32>
    %390 = tpu.matmul %388, %389, %cst_528 {dimension_numbers = #tpu.dot_dimension_numbers<[1], [0], [0], [1], [0, 0, 1, 1], [], []>} : vector<4x144xf32>, vector<144x4xf32>, vector<4x4xf32> -> vector<4x4xf32>
    %c568 = arith.constant 568 : index
    %c0_529 = arith.constant 0 : index
    %391 = vector.load %arg2[%c568, %c0_529] : memref<576x128xf32, #tpu.memory_space<vmem>>, vector<1x4xf32>
    %392 = vector.broadcast %391 : vector<1x4xf32> to vector<4x4xf32>
    %393 = arith.addf %390, %392 : vector<4x4xf32>
    %394 = arith.negf %393 : vector<4x4xf32>
    %395 = math.exp %394 : vector<4x4xf32>
    %cst_530 = arith.constant 1.000000e+00 : f32
    %396 = vector.broadcast %cst_530 : f32 to vector<4x4xf32>
    %397 = arith.addf %396, %395 : vector<4x4xf32>
    %398 = arith.divf %396, %397 : vector<4x4xf32>
    %c0_531 = arith.constant 0 : index
    %c0_532 = arith.constant 0 : index
    %399 = vector.load %arg4[%c0_531, %c0_532] : memref<256x4xf32, #tpu.memory_space<vmem>>, vector<256x4xf32>
    %cst_533 = arith.constant dense<0.000000e+00> : vector<256x4xf32>
    %400 = tpu.matmul %399, %398, %cst_533 {dimension_numbers = #tpu.dot_dimension_numbers<[1], [0], [0], [1], [0, 0, 1, 1], [], []>} : vector<256x4xf32>, vector<4x4xf32>, vector<256x4xf32> -> vector<256x4xf32>
    %401 = vector.extract_strided_slice %125 {offsets = [0, 0], sizes = [256, 1], strides = [1, 1]} : vector<256x4xf32> to vector<256x1xf32>
    %402 = arith.negf %401 : vector<256x1xf32>
    %403 = math.exp %402 : vector<256x1xf32>
    %cst_534 = arith.constant 1.000000e+00 : f32
    %404 = vector.broadcast %cst_534 : f32 to vector<256x1xf32>
    %405 = arith.addf %404, %403 : vector<256x1xf32>
    %406 = arith.divf %404, %405 : vector<256x1xf32>
    %407 = arith.mulf %125, %400 : vector<256x4xf32>
    %408 = vector.broadcast %406 : vector<256x1xf32> to vector<256x4xf32>
    %409 = arith.mulf %407, %408 : vector<256x4xf32>
    %410 = vector.shape_cast %409 : vector<256x4xf32> to vector<1x16x16x4xf32>
    %c0_535 = arith.constant 0 : index
    %c0_536 = arith.constant 0 : index
    %c0_537 = arith.constant 0 : index
    %c0_538 = arith.constant 0 : index
    %411 = vector.load %arg5[%c0_535, %c0_536, %c0_537, %c0_538] : memref<1x16x16x4xf32, #tpu.memory_space<vmem>>, vector<1x16x16x4xf32>
    tpu.vector_store %arg5[%c0_535, %c0_536, %c0_537, %c0_538], %410 {strides = array<i32>} : memref<1x16x16x4xf32, #tpu.memory_space<vmem>>, vector<1x16x16x4xf32>,
    return
  }
  func.func @transform_0(%arg0: i32) -> (i32, i32, i32, i32) {
    %c0_i32 = arith.constant 0 : i32
    %c0_i32_0 = arith.constant 0 : i32
    %c0_i32_1 = arith.constant 0 : i32
    %c0_i32_2 = arith.constant 0 : i32
    return %arg0, %c0_i32, %c0_i32_0, %c0_i32_1 : i32, i32, i32, i32
  }
  func.func @transform_1(%arg0: i32) -> (i32, i32) {
    %c0_i32 = arith.constant 0 : i32
    %c0_i32_0 = arith.constant 0 : i32
    %c0_i32_1 = arith.constant 0 : i32
    return %c0_i32, %c0_i32_0 : i32, i32
  }
  func.func @transform_2(%arg0: i32) -> (i32, i32) {
    %c0_i32 = arith.constant 0 : i32
    %c0_i32_0 = arith.constant 0 : i32
    %c0_i32_1 = arith.constant 0 : i32
    return %c0_i32, %c0_i32_0 : i32, i32
  }
  func.func @transform_3(%arg0: i32) -> (i32, i32) {
    %c0_i32 = arith.constant 0 : i32
    %c0_i32_0 = arith.constant 0 : i32
    %c0_i32_1 = arith.constant 0 : i32
    return %c0_i32, %c0_i32_0 : i32, i32
  }
  func.func @transform_4(%arg0: i32) -> (i32, i32, i32, i32) {
    %c0_i32 = arith.constant 0 : i32
    %c0_i32_0 = arith.constant 0 : i32
    %c0_i32_1 = arith.constant 0 : i32
    %c0_i32_2 = arith.constant 0 : i32
    return %arg0, %c0_i32, %c0_i32_0, %c0_i32_1 : i32, i32, i32, i32
  }
}

</mosaic_0001>

<bundles_post_ra>
// kernel: _lambda_.1
= control target key start
LH: loop header
LB: loop body
LE: loop exit
PB: predicated region body
PF: predicated region fallthrough
CT: control target
= control target key end

     0   :  { %9 = vsyncpa [#allocation9], 0  ;;  %s10466_s15 = smov 0   ;;  %s14641_s0 = inlined_call_operand.vmem [shape: f32[2,16,16,4], index: 0, kind: input, shape index: {}]   ;;  %s14642_s1 = inlined_call_operand.vmem [shape: f32[576,128], index: 1, kind: input, shape index: {}]   ;;  %s14643_s2 = inlined_call_operand.vmem [shape: f32[16,256], index: 2, kind: input, shape index: {}]   ;;  %s14644_s3 = inlined_call_operand.hbm [shape: f32[256,4], index: 3, kind: input, shape index: {}]   ;;  %s14645_s4 = inlined_call_operand.vmem [shape: f32[2,16,16,4], index: 4, kind: output, shape index: {}]  }
   0x1 LB: > { %s10472_s16 = sadd.s32 4294967295, %s10422_s15   ;;  %p8732_p0 = scmp.ge.s32.totalorder %s10422_s15, 1  ;;  %s10422_s15 = sphi %s10466_s15, %s15_s15  }
   0x2   : > { %p135_p1 = scmp.lt.s32.totalorder %s10422_s15, 3  ;;  %s10424_s17 = smov [#allocation8]  }
   0x3   : > { %s153_s18 = sshll.u32 %s10424_s17, 4  ;;  %p14646_p3 = scmp.eq.s32.totalorder %s10472_s16, 0  ;;  %s154_s18 = int_to_ptr.vmem [resolvable:$true] %s153_s18 }
   0x4   : > { %p10476_p2 = pnand %p8732_p0, %p135_p1  ;;  %s10384_s23 = scalar_lea.hbm %s14644_s3, 4096 }
   0x5   : > { %p10385_p6 = scmp.ne.s32.totalorder %s14644_s3, %s10384_s23  ;;  %p10391_p10 = scmp.lt.u32.totalorder %s10384_s23, %s14644_s3 }
   0x6   : > { %s14776_s19 = scalar_select %p10476_p2, 1, 0 }
   0x7   : > { %p10112_p4 = pneg %p10476_p2 }
   0x9   : > { %p10485_p5 = pnand %p14646_p3, %p10112_p4 }
   0xb   : > { %p10386_p7 = pneg %p10485_p5 }
   0xd   : > { %p10387_p8 = pnand %p10386_p7, %p10385_p6 }
   0xf   : > { %p10388_p9 = pneg %p10387_p8 }
  0x11   : > { %p10393_p11 = pnand %p10391_p10, %p10388_p9 }
  0x13   : > { %10396 = shalt.err (!%p10393_p11)
}
  0x14   : > { %s10397_s28 = scalar_lea.vmem %s154_s18, 4096  ;;  %p10405_p1 = scmp.lt.s32.totalorder %s154_s18, %s154_s18 }
  0x15   : > { %p10398_p12 = scmp.ne.s32.totalorder %s154_s18, %s10397_s28  ;;  %p10406_p4 = scmp.lt.s32.totalorder %s10397_s28, %s10397_s28 }
  0x17   : > { %p10400_p13 = pnand %p10398_p12, %p10386_p7  ;;  %p10407_p3 = por %p10406_p4, %p10405_p1 }
  0x19   : > { %p10401_p0 = pneg %p10400_p13 }
  0x1b   : > { %p10408_p2 = pnand %p10407_p3, %p10401_p0 }
  0x1d   : > { %10411 = shalt.err (!%p10408_p2)
}
  0x1e   : > { %s10425_s29 = smov 128   ;;  %s10426_s30 = smov 8  }
  0x1f   : > { %10115 = dma.hbm_to_vmem [thread:$0]  (!%p10485_p5), %s14644_s3, 4096, %s154_s18, [#allocation9], %s10425_s29, %s10425_s29, %s10426_s30  }
  0x20   : > { %p14778_p6 = scmp.ne.s32.totalorder %s14776_s19, 0 }
  0x22   : > { %177 = sbr.rel (%p14778_p6) target bundleno = 4269 (0x10ad), region = 36 }
  0x29   : > { %p14779_p8 = scmp.eq.s32.totalorder %s10472_s16, 0 }
  0x2b   : > { %10417 = dma.done.wait (%p14779_p8), [#allocation9], 4096   ;;  %p14780_p7 = pmov %p14779_p8 }
  0x2c   : > { %p203_p2 = scmp.lt.s32.totalorder %s10472_s16, 1  ;;  %vm348_vm0 = vcmask 1043456   ;;  %vm251_vm1 = vcmask 31744   ;;  %v246_v0 = vld [vmem:[%s14642_s1] sm:$0xf]  ;;  %vm577_vm2 = vcmask 64512  }
  0x2d   : > { %10419 = vsyncadd (%p14780_p7), [#allocation9], 4294963200  ;;  %9474 = vmatprep.subr.msk.mxu0 %vm348_vm0, %v246_v0  ;;  %10106 = vmatprep.subr.msk.mxu1 %vm348_vm0, %v246_v0  ;;  %v10565_v17 = vld [vmem:[%s14642_s1 + $0x8] ss:$0 sm:$0xff]  ;;  %vm580_vm3 = vcmask 58368   ;;  %s10427_s17 = smov 8  }
  0x2e   : > { %s14950_s16 = smov (!%p203_p2, %s10472_s16), 1  ;;  %9475 = vmatpush3.msk.msra.mxu0 %vm348_vm0, %v246_v0  ;;  %10107 = vmatpush3.msk.msra.mxu1 %vm348_vm0, %v246_v0  ;;  %583 = vst.msk [vmem:[#allocation2 + $0x20] sm:$0xff] %vm577_vm2, %v10565_v17  ;;  %578 = vst.msk [vmem:[#allocation2] sm:$0xff] %vm577_vm2, %v10565_v17  ;;  %s10428_s18 = smov 16   ;;  %v10680_v20 = vld [vmem:[%s14642_s1 + $0x80] ss:$0 sm:$0xff] }
  0x2f   : > { %s9083_s7 = sshll.u32 %s14950_s16, 8  ;;  %579 = vst.msk [vmem:[#allocation2 + $0x8] sm:$0xff] %vm577_vm2, %v10565_v17  ;;  %582 = vst.msk [vmem:[#allocation2 + $0x18] sm:$0xff] %vm577_vm2, %v10565_v17  ;;  %vm890_vm4 = vcmask 130112   ;;  %vm1083_vm5 = vcmask 195712   ;;  %s10429_s21 = smov 32  }
  0x30   : > { %s10521_s10 = scalar_lea.vmem %s14641_s0, %s9083_s7  ;;  %585 = vst.msk [vmem:[#allocation2 + $0x30] sm:$0xff] %vm577_vm2, %v10565_v17  ;;  %586 = vst.msk [vmem:[#allocation2 + $0x38] sm:$0xff] %vm577_vm2, %v10565_v17  ;;  %s10430_s22 = smov 24   ;;  %vm1276_vm6 = vcmask 261312   ;;  %vm1469_vm7 = vcmask 326912   ;;  %vm1662_vm8 = vcmask 392512  }
  0x31   : > { %v213_v1 = vld [vmem:[%s10521_s10] sm:$0xff]  ;;  %v214_v2 = vld [vmem:[%s10521_s10 + $0x8] sm:$0xff]  ;;  %v215_v4 = vld [vmem:[%s10521_s10 + $0x10] sm:$0xff]  ;;  %588 = vst.msk [vmem:[#allocation2 + $0x48] sm:$0xff] %vm577_vm2, %v10565_v17  ;;  %s10431_s23 = smov 40   ;;  %s10432_s24 = smov 48  }
  0x32   : > { %9476 = vmatprep.mubr.msk.f32.mxu0 %vm251_vm1, %v213_v1  ;;  %v229_v3 = vld [vmem:[%s10521_s10 + $0x80] sm:$0xff]  ;;  %v230_v5 = vld [vmem:[%s10521_s10 + $0x88] sm:$0xff]  ;;  %v216_v6 = vld [vmem:[%s10521_s10 + $0x18] sm:$0xff]  ;;  %589 = vst.msk [vmem:[#allocation2 + $0x50] sm:$0xff] %vm577_vm2, %v10565_v17  ;;  %s10433_s25 = smov 56   ;;  %s10434_s30 = smov 64  }
  0x33   : > { %9477 = vmatmul.mubr.msk.f32.vlgmr.msra.gmra.mrb[0].mxu0 %vm251_vm1, %v214_v2  ;;  %9500 = vmatprep.mubr.msk.f32.mxu1 %vm251_vm1, %v229_v3  ;;  %v217_v7 = vld [vmem:[%s10521_s10 + $0x20] sm:$0xff]  ;;  %v218_v8 = vld [vmem:[%s10521_s10 + $0x28] sm:$0xff]  ;;  %v219_v9 = vld [vmem:[%s10521_s10 + $0x30] sm:$0xff]  ;;  %591 = vst.msk [vmem:[#allocation2 + $0x60] sm:$0xff] %vm577_vm2, %v10565_v17  ;;  %vm1856_vm9 = vcmask 458112   ;;  %vm2049_vm10 = vcmask 523712   ;;  %s14541_s8 = scalar_lea.vmem %s14645_s4, %s9083_s7 }
  0x34   : > { %9479 = vmatprep.mubr.msk.f32.mxu0 %vm251_vm1, %v215_v4  ;;  %9501 = vmatmul.mubr.msk.f32.vlgmr.msra.gmra.mrb[0].mxu1 %vm251_vm1, %v230_v5  ;;  %v220_v10 = vld [vmem:[%s10521_s10 + $0x38] sm:$0xff]  ;;  %v221_v11 = vld [vmem:[%s10521_s10 + $0x40] sm:$0xff]  ;;  %v222_v12 = vld [vmem:[%s10521_s10 + $0x48] sm:$0xff]  ;;  %592 = vst.msk [vmem:[#allocation2 + $0x68] sm:$0xff] %vm577_vm2, %v10565_v17  ;;  %vm2242_vm11 = vcmask 589312   ;;  %vm2321_vm12 = vcmask 588800  }
  0x35   : > { %v223_v13 = vld [vmem:[%s10521_s10 + $0x50] sm:$0xff]  ;;  %v224_v14 = vld [vmem:[%s10521_s10 + $0x58] sm:$0xff]  ;;  %v225_v15 = vld [vmem:[%s10521_s10 + $0x60] sm:$0xff]  ;;  %594 = vst.msk [vmem:[#allocation2 + $0x78] sm:$0xff] %vm577_vm2, %v10565_v17  ;;  %s10439_s12 = smov 80   ;;  %s10440_s20 = smov 112  }
  0x36   : > { %v226_v16 = vld [vmem:[%s10521_s10 + $0x68] sm:$0xff]  ;;  %595 = vst.msk [vmem:[#allocation2 + $0x80] sm:$0xff] %vm577_vm2, %v10565_v17  ;;  %597 = vst.msk [vmem:[#allocation2 + $0x90] sm:$0xff] %vm577_vm2, %v10565_v17  ;;  %v227_v23 = vld [vmem:[%s10521_s10 + $0x70] sm:$0xff] }
  0x37   : > { %9480 = vmatmul.mubr.msk.f32.gmra.mrb[2].mxu0 %vm251_vm1, %v216_v6  ;;  %598 = vst.msk [vmem:[#allocation2 + $0x98] sm:$0xff] %vm577_vm2, %v10565_v17  ;;  %600 = vst.msk [vmem:[#allocation2 + $0xa8] sm:$0xff] %vm577_vm2, %v10565_v17  ;;  %v730_v18 = vld [vmem:[#allocation2 + $0x1] sm:$0xff]  ;;  %v228_v24 = vld [vmem:[%s10521_s10 + $0x78] sm:$0xff] }
  0x38   : > { %9482 = vmatprep.mubr.msk.f32.mxu0 %vm251_vm1, %v217_v7  ;;  %601 = vst.msk [vmem:[#allocation2 + $0xb0] sm:$0xff] %vm577_vm2, %v10565_v17  ;;  %603 = vst.msk [vmem:[#allocation2 + $0xc0] sm:$0xff] %vm577_vm2, %v10565_v17  ;;  %794 = vrot.lane.b32.xlu0 %v730_v18, %s10427_s17  ;;  %v923_v19 = vld [vmem:[#allocation2 + $0x2] sm:$0xff]  ;;  %v231_v25 = vld [vmem:[%s10521_s10 + $0x90] sm:$0xff] }
  0x39   : > { %604 = vst.msk [vmem:[#allocation2 + $0xc8] sm:$0xff] %vm577_vm2, %v10565_v17  ;;  %606 = vst.msk [vmem:[#allocation2 + $0xd8] sm:$0xff] %vm577_vm2, %v10565_v17  ;;  %987 = vrot.lane.b32.xlu1 %v923_v19, %s10428_s18  ;;  %9503 = vmatprep.mubr.msk.f32.mxu1 %vm251_vm1, %v231_v25  ;;  %v232_v26 = vld [vmem:[%s10521_s10 + $0x98] sm:$0xff]  ;;  %v233_v27 = vld [vmem:[%s10521_s10 + $0xa0] sm:$0xff] }
  0x3a   : > { %607 = vst.msk [vmem:[#allocation2 + $0xe0] sm:$0xff] %vm577_vm2, %v10565_v17  ;;  %609 = vst.msk [vmem:[#allocation2 + $0xf0] sm:$0xff] %vm577_vm2, %v10565_v17  ;;  %9504 = vmatmul.mubr.msk.f32.gmra.mrb[2].mxu1 %vm251_vm1, %v232_v26  ;;  %v234_v28 = vld [vmem:[%s10521_s10 + $0xa8] sm:$0xff]  ;;  %v666_v29 = vld [vmem:[#allocation2] sm:$0xff] }
  0x3b   : > { %9483 = vmatmul.mubr.msk.f32.gmra.mrb[4].mxu0 %vm251_vm1, %v218_v8  ;;  %610 = vst.msk [vmem:[#allocation2 + $0xf8] sm:$0xff] %vm577_vm2, %v10565_v17  ;;  %612 = vst.msk [vmem:[#allocation2 + $0x108] sm:$0xff] %vm577_vm2, %v10565_v17  ;;  %9506 = vmatprep.mubr.msk.f32.mxu1 %vm251_vm1, %v233_v27  ;;  %v667_v32 = vld [vmem:[#allocation2 + $0x8] sm:$0xff]  ;;  %v235_v35 = vld [vmem:[%s10521_s10 + $0xb0] sm:$0xff] }
  0x3c   : > { %9485 = vmatprep.mubr.msk.f32.mxu0 %vm251_vm1, %v219_v9  ;;  %613 = vst.msk [vmem:[#allocation2 + $0x110] sm:$0xff] %vm577_vm2, %v10565_v17  ;;  %615 = vst.msk [vmem:[#allocation2 + $0x120] sm:$0xff] %vm577_vm2, %v10565_v17  ;;  %v236_v36 = vld [vmem:[%s10521_s10 + $0xb8] sm:$0xff] }
  0x3d   : > { %616 = vst.msk [vmem:[#allocation2 + $0x128] sm:$0xff] %vm577_vm2, %v10565_v17  ;;  %618 = vst.msk [vmem:[#allocation2 + $0x138] sm:$0xff] %vm577_vm2, %v10565_v17 }
  0x3e   : > { %619 = vst.msk [vmem:[#allocation2 + $0x140] sm:$0xff] %vm577_vm2, %v10565_v17  ;;  %621 = vst.msk [vmem:[#allocation2 + $0x150] sm:$0xff] %vm577_vm2, %v10565_v17  ;;  %9507 = vmatmul.mubr.msk.f32.gmra.mrb[4].mxu1 %vm251_vm1, %v234_v28 }
  0x3f   : > { %9486 = vmatmul.mubr.msk.f32.gmra.mrb[6].mxu0 %vm251_vm1, %v220_v10  ;;  %622 = vst.msk [vmem:[#allocation2 + $0x158] sm:$0xff] %vm577_vm2, %v10565_v17  ;;  %624 = vst.msk [vmem:[#allocation2 + $0x168] sm:$0xff] %vm577_vm2, %v10565_v17  ;;  %9509 = vmatprep.mubr.msk.f32.mxu1 %vm251_vm1, %v235_v35 }
  0x40   : > { %9488 = vmatprep.mubr.msk.f32.mxu0 %vm251_vm1, %v221_v11  ;;  %625 = vst.msk [vmem:[#allocation2 + $0x170] sm:$0xff] %vm577_vm2, %v10565_v17  ;;  %627 = vst.msk [vmem:[#allocation2 + $0x180] sm:$0xff] %vm577_vm2, %v10565_v17 }
  0x41   : > { %628 = vst.msk [vmem:[#allocation2 + $0x188] sm:$0xff] %vm577_vm2, %v10565_v17  ;;  %630 = vst.msk [vmem:[#allocation2 + $0x198] sm:$0xff] %vm577_vm2, %v10565_v17 }
  0x42   : > { %631 = vst.msk [vmem:[#allocation2 + $0x1a0] sm:$0xff] %vm577_vm2, %v10565_v17  ;;  %698 = vst.msk [vmem:[#allocation3] sm:$0xff] %vm577_vm2, %v666_v29  ;;  %9510 = vmatmul.mubr.msk.f32.gmra.mrb[6].mxu1 %vm251_vm1, %v236_v36  ;;  %v237_v36 = vld [vmem:[%s10521_s10 + $0xc0] sm:$0xff] }
  0x43   : > { %9489 = vmatmul.mubr.msk.f32.gmra.mrb[8].mxu0 %vm251_vm1, %v222_v12  ;;  %584 = vst.msk [vmem:[#allocation2 + $0x28] sm:$0x3] %vm580_vm3, %v10565_v17  ;;  %581 = vst.msk [vmem:[#allocation2 + $0x10] sm:$0x3] %vm580_vm3, %v10565_v17  ;;  %9512 = vmatprep.mubr.msk.f32.mxu1 %vm251_vm1, %v237_v36  ;;  %v241_v36 = vld [vmem:[%s10521_s10 + $0xe0] sm:$0xff] }
  0x44   : > { %9491 = vmatprep.mubr.msk.f32.mxu0 %vm251_vm1, %v223_v13  ;;  %587 = vst.msk [vmem:[#allocation2 + $0x40] sm:$0x3] %vm580_vm3, %v10565_v17  ;;  %590 = vst.msk [vmem:[#allocation2 + $0x58] sm:$0x3] %vm580_vm3, %v10565_v17 }
  0x45   : > { %593 = vst.msk [vmem:[#allocation2 + $0x70] sm:$0x3] %vm580_vm3, %v10565_v17  ;;  %596 = vst.msk [vmem:[#allocation2 + $0x88] sm:$0x3] %vm580_vm3, %v10565_v17 }
  0x46   : > { %599 = vst.msk [vmem:[#allocation2 + $0xa0] sm:$0x3] %vm580_vm3, %v10565_v17  ;;  %602 = vst.msk [vmem:[#allocation2 + $0xb8] sm:$0x3] %vm580_vm3, %v10565_v17 }
  0x47   : > { %9492 = vmatmul.mubr.msk.f32.gmra.mrb[10].mxu0 %vm251_vm1, %v224_v14  ;;  %605 = vst.msk [vmem:[#allocation2 + $0xd0] sm:$0x3] %vm580_vm3, %v10565_v17  ;;  %608 = vst.msk [vmem:[#allocation2 + $0xe8] sm:$0x3] %vm580_vm3, %v10565_v17 }
  0x48   : > { %9494 = vmatprep.mubr.msk.f32.mxu0 %vm251_vm1, %v225_v15  ;;  %611 = vst.msk [vmem:[#allocation2 + $0x100] sm:$0x3] %vm580_vm3, %v10565_v17  ;;  %614 = vst.msk [vmem:[#allocation2 + $0x118] sm:$0x3] %vm580_vm3, %v10565_v17 }
  0x49   : > { %617 = vst.msk [vmem:[#allocation2 + $0x130] sm:$0x3] %vm580_vm3, %v10565_v17  ;;  %620 = vst.msk [vmem:[#allocation2 + $0x148] sm:$0x3] %vm580_vm3, %v10565_v17 }
  0x4a   : > { %623 = vst.msk [vmem:[#allocation2 + $0x160] sm:$0x3] %vm580_vm3, %v10565_v17  ;;  %626 = vst.msk [vmem:[#allocation2 + $0x178] sm:$0x3] %vm580_vm3, %v10565_v17  ;;  %v731_v21 = vld [vmem:[#allocation2 + $0x9] sm:$0xff] }
  0x4b   : > { %9495 = vmatmul.mubr.msk.f32.gmra.mrb[12].mxu0 %vm251_vm1, %v226_v16  ;;  %629 = vst.msk [vmem:[#allocation2 + $0x190] sm:$0x3] %vm580_vm3, %v10565_v17  ;;  %632 = vst.msk [vmem:[#allocation2 + $0x1a8] sm:$0x3] %vm580_vm3, %v10565_v17  ;;  %v924_v22 = vld [vmem:[#allocation2 + $0xa] sm:$0xff]  ;;  %796 = vrot.lane.b32.xlu0 %v731_v21, %s10427_s17 }
  0x4c   : > { %3499 = vst.msk [vmem:[#allocation2 + $0x10] sm:$0x3] %vm580_vm3, %v10680_v20  ;;  %989 = vrot.lane.b32.xlu1 %v924_v22, %s10428_s18  ;;  %9497 = vmatprep.mubr.msk.f32.mxu0 %vm251_vm1, %v227_v23 }
  0x4d   : > { %3497 = vst.msk [vmem:[#allocation2] sm:$0xff] %vm577_vm2, %v10680_v20  ;;  %699 = vst.msk [vmem:[#allocation3 + $0x8] sm:$0xff] %vm577_vm2, %v667_v32 }
  0x4e   : > { %3498 = vst.msk [vmem:[#allocation2 + $0x8] sm:$0xff] %vm577_vm2, %v10680_v20 }
  0x4f   : > { %9498 = vmatmul.mubr.msk.f32.gmra.mrb[14].mxu0 %vm251_vm1, %v228_v24 }
  0xaa   : > { %v795_v30 = vpop.permute.xlu0 %794 }
  0xab   : > { %891 = vst.msk [vmem:[#allocation3] sm:$0xff] %vm890_vm4, %v795_v30  ;;  %v988_v31 = vpop.permute.xlu1 %987 }
  0xac   : > { %1084 = vst.msk [vmem:[#allocation3] sm:$0xff] %vm1083_vm5, %v988_v31 }
  0xbd   : > { %v797_v33 = vpop.permute.xlu0 %796 }
  0xbe   : > { %892 = vst.msk [vmem:[#allocation3 + $0x8] sm:$0xff] %vm890_vm4, %v797_v33  ;;  %v990_v34 = vpop.permute.xlu1 %989 }
  0xbf   : > { %1085 = vst.msk [vmem:[#allocation3 + $0x8] sm:$0xff] %vm1083_vm5, %v990_v34 }
 0x106   : > { %v9478_v37 = vpop.f32.mrb[0].mxu0 }
 0x107   : > { %v10713_v38 = vadd.f32 %v9478_v37, %v10565_v17  ;;  %v418_v39 = vpop.f32.mrb[1].mxu0  ;;  %v9502_v41 = vpop.f32.mrb[0].mxu1 }
 0x108   : > { %v10716_v40 = vadd.f32 %v10565_v17, %v418_v39  ;;  %v10721_v42 = vadd.f32 %v9502_v41, %v10565_v17  ;;  %v498_v43 = vpop.f32.mrb[1].mxu1  ;;  %v238_v39 = vld [vmem:[%s10521_s10 + $0xc8] sm:$0xff] }
 0x109   : > { %635 = vst.msk [vmem:[#allocation2 + $0x21] sm:$0xff] %vm577_vm2, %v10713_v38  ;;  %v10726_v44 = vadd.f32 %v10565_v17, %v498_v43  ;;  %9513 = vmatmul.mubr.msk.f32.gmra.mrb[8].mxu1 %vm251_vm1, %v238_v39  ;;  %v242_v39 = vld [vmem:[%s10521_s10 + $0xe8] sm:$0xff] }
 0x10a   : > { %14781 = vst [vmem:[#allocation11_spill] sm:$0xff] %v10721_v42  ;;  %634 = vst.msk [vmem:[#allocation2 + $0x19] sm:$0xff] %vm577_vm2, %v10716_v40  ;;  %v9481_v45 = vpop.f32.mrb[2].mxu0 }
 0x10b   : > { %14782 = vst [vmem:[#allocation12_spill] sm:$0xff] %v10726_v44  ;;  %651 = vst.msk [vmem:[#allocation2 + $0xe1] sm:$0xff] %vm577_vm2, %v10721_v42  ;;  %v10731_v46 = vadd.f32 %v9481_v45, %v10565_v17  ;;  %v428_v47 = vpop.f32.mrb[3].mxu0 }
 0x10c   : > { %650 = vst.msk [vmem:[#allocation2 + $0xd9] sm:$0xff] %vm577_vm2, %v10726_v44  ;;  %v10736_v48 = vadd.f32 %v10565_v17, %v428_v47 }
 0x10d   : > { %637 = vst.msk [vmem:[#allocation2 + $0x39] sm:$0xff] %vm577_vm2, %v10731_v46 }
 0x10e   : > { %636 = vst.msk [vmem:[#allocation2 + $0x31] sm:$0xff] %vm577_vm2, %v10736_v48  ;;  %v9484_v49 = vpop.f32.mrb[4].mxu0 }
 0x10f   : > { %v10743_v50 = vadd.f32 %v9484_v49, %v10565_v17  ;;  %v438_v51 = vpop.f32.mrb[5].mxu0 }
 0x110   : > { %v1310_v52 = vld [vmem:[#allocation2 + $0x21] sm:$0xff]  ;;  %v10748_v54 = vadd.f32 %v10565_v17, %v438_v51 }
 0x111   : > { %v10745_v53 = vld [vmem:[#allocation2 + $0x22] sm:$0xff]  ;;  %1375 = vrot.lane.b32.xlu0 %v1310_v52, %s10429_s21  ;;  %v10751_v56 = vld [vmem:[#allocation2 + $0x19] sm:$0xff]  ;;  %639 = vst.msk [vmem:[#allocation2 + $0x51] sm:$0xff] %vm577_vm2, %v10743_v50 }
 0x112   : > { %v1117_v55 = vld [vmem:[#allocation2 + $0x20] sm:$0xff]  ;;  %3502 = vst.msk [vmem:[#allocation2 + $0x28] sm:$0x3] %vm580_vm3, %v10680_v20  ;;  %v10760_v58 = vld [vmem:[#allocation2 + $0x18] sm:$0xff]  ;;  %v9487_v59 = vpop.f32.mrb[6].mxu0 }
 0x113   : > { %v10753_v57 = vld [vmem:[#allocation2 + $0x1a] sm:$0xff]  ;;  %1182 = vrot.lane.b32.xlu1 %v1117_v55, %s10430_s22  ;;  %638 = vst.msk [vmem:[#allocation2 + $0x49] sm:$0xff] %vm577_vm2, %v10748_v54  ;;  %701 = vst.msk [vmem:[#allocation3 + $0x18] sm:$0xff] %vm577_vm2, %v1117_v55  ;;  %v10769_v61 = vld [vmem:[#allocation2 + $0xe2] sm:$0xff]  ;;  %v10772_v62 = vadd.f32 %v9487_v59, %v10565_v17  ;;  %v448_v63 = vpop.f32.mrb[7].mxu0 }
 0x114   : > { %3501 = vst.msk [vmem:[#allocation2 + $0x20] sm:$0xff] %vm577_vm2, %v10680_v20  ;;  %v10767_v60 = vld [vmem:[#allocation2 + $0xe1] sm:$0xff]  ;;  %700 = vst.msk [vmem:[#allocation3 + $0x10] sm:$0xff] %vm577_vm2, %v10760_v58  ;;  %v10780_v0 = vld [vmem:[#allocation2 + $0xd8] sm:$0xff]  ;;  %v10789_v4 = vadd.f32 %v10565_v17, %v448_v63 }
 0x115   : > { %3500 = vst.msk [vmem:[#allocation2 + $0x18] sm:$0xff] %vm577_vm2, %v10680_v20  ;;  %v10782_v1 = vld [vmem:[#allocation2 + $0xd9] sm:$0xff]  ;;  %800 = vrot.lane.b32.xlu0 %v1310_v52, %s10427_s17  ;;  %v10794_v6 = vld [vmem:[#allocation2 + $0x30] sm:$0xff]  ;;  %641 = vst.msk [vmem:[#allocation2 + $0x69] sm:$0xff] %vm577_vm2, %v10772_v62 }
 0x116   : > { %3526 = vst.msk [vmem:[#allocation2 + $0xe8] sm:$0x3] %vm580_vm3, %v10680_v20  ;;  %v10784_v2 = vld [vmem:[#allocation2 + $0x39] sm:$0xff]  ;;  %v10800_v8 = vld [vmem:[#allocation2 + $0x31] sm:$0xff]  ;;  %v9490_v10 = vpop.f32.mrb[8].mxu0 }
 0x117   : > { %v10786_v3 = vld [vmem:[#allocation2 + $0x3a] sm:$0xff]  ;;  %798 = vrot.lane.b32.xlu1 %v10751_v56, %s10427_s17  ;;  %v10806_v9 = vld [vmem:[#allocation2 + $0x32] sm:$0xff]  ;;  %640 = vst.msk [vmem:[#allocation2 + $0x61] sm:$0xff] %vm577_vm2, %v10789_v4  ;;  %702 = vst.msk [vmem:[#allocation3 + $0x20] sm:$0xff] %vm577_vm2, %v10794_v6  ;;  %v10819_v14 = vadd.f32 %v9490_v10, %v10565_v17  ;;  %v458_v15 = vpop.f32.mrb[9].mxu0 }
 0x118   : > { %v10791_v5 = vld [vmem:[#allocation2 + $0xda] sm:$0xff]  ;;  %3505 = vst.msk [vmem:[#allocation2 + $0x40] sm:$0x3] %vm580_vm3, %v10680_v20  ;;  %v10828_v18 = vld [vmem:[#allocation2 + $0x51] sm:$0xff]  ;;  %v10833_v21 = vadd.f32 %v10565_v17, %v458_v15 }
 0x119   : > { %v10798_v7 = vld [vmem:[#allocation2 + $0x38] sm:$0xff]  ;;  %v10816_v13 = vld [vmem:[#allocation2 + $0xe0] sm:$0xff]  ;;  %14783 = vst [vmem:[#allocation13_spill] sm:$0xff] %v10819_v14  ;;  %3503 = vst.msk [vmem:[#allocation2 + $0x30] sm:$0xff] %vm577_vm2, %v10680_v20  ;;  %1568 = vrot.lane.b32.xlu0 %v10745_v53, %s10431_s23 }
 0x11a   : > { %703 = vst.msk [vmem:[#allocation3 + $0x28] sm:$0xff] %vm577_vm2, %v10798_v7  ;;  %v10814_v11 = vld [vmem:[#allocation2 + $0xd9] sm:$0xff]  ;;  %3504 = vst.msk [vmem:[#allocation2 + $0x38] sm:$0xff] %vm577_vm2, %v10680_v20  ;;  %v10840_v22 = vld [vmem:[#allocation2 + $0x48] sm:$0xff]  ;;  %v9493_v43 = vpop.f32.mrb[10].mxu0 }
 0x11b   : > { %v684_v12 = vld [vmem:[#allocation2 + $0xd8] sm:$0xff]  ;;  %v685_v16 = vld [vmem:[#allocation2 + $0xe0] sm:$0xff]  ;;  %v10844_v23 = vld [vmem:[#allocation2 + $0x50] sm:$0xff]  ;;  %643 = vst.msk [vmem:[#allocation2 + $0x81] sm:$0xff] %vm577_vm2, %v10819_v14  ;;  %1566 = vrot.lane.b32.xlu1 %v10753_v57, %s10431_s23  ;;  %v10925_v45 = vadd.f32 %v9493_v43, %v10565_v17  ;;  %v468_v47 = vpop.f32.mrb[11].mxu0 }
 0x11c   : > { %716 = vst.msk [vmem:[#allocation3 + $0x90] sm:$0xff] %vm577_vm2, %v684_v12  ;;  %3524 = vst.msk [vmem:[#allocation2 + $0xd8] sm:$0xff] %vm577_vm2, %v10680_v20  ;;  %v10830_v19 = vld [vmem:[#allocation2 + $0x52] sm:$0xff]  ;;  %v10850_v24 = vld [vmem:[#allocation2 + $0x49] sm:$0xff]  ;;  %v10928_v49 = vadd.f32 %v10565_v17, %v468_v47 }
 0x11d   : > { %717 = vst.msk [vmem:[#allocation3 + $0x98] sm:$0xff] %vm577_vm2, %v685_v16  ;;  %3525 = vst.msk [vmem:[#allocation2 + $0xe0] sm:$0xff] %vm577_vm2, %v10680_v20  ;;  %v10852_v25 = vld [vmem:[#allocation2 + $0x4a] sm:$0xff]  ;;  %993 = vrot.lane.b32.xlu0 %v10745_v53, %s10428_s18  ;;  %v2308_v53 = vld [vmem:[%s14642_s1 + $0x18] sm:$0xff] }
 0x11e   : > { %3508 = vst.msk [vmem:[#allocation2 + $0x58] sm:$0x3] %vm580_vm3, %v10680_v20  ;;  %v10864_v26 = vld [vmem:[#allocation2 + $0x69] sm:$0xff]  ;;  %v10870_v28 = vld [vmem:[#allocation2 + $0x60] sm:$0xff]  ;;  %14784 = vst [vmem:[#allocation14_spill] sm:$0xff] %v10925_v45 }
 0x11f   : > { %642 = vst.msk [vmem:[#allocation2 + $0x79] sm:$0xff] %vm577_vm2, %v10833_v21  ;;  %705 = vst.msk [vmem:[#allocation3 + $0x38] sm:$0xff] %vm577_vm2, %v10844_v23  ;;  %v10866_v27 = vld [vmem:[#allocation2 + $0x6a] sm:$0xff]  ;;  %991 = vrot.lane.b32.xlu1 %v10753_v57, %s10428_s18  ;;  %v10878_v30 = vld [vmem:[#allocation2 + $0x61] sm:$0xff] }
 0x120   : > { %704 = vst.msk [vmem:[#allocation3 + $0x30] sm:$0xff] %vm577_vm2, %v10840_v22  ;;  %3507 = vst.msk [vmem:[#allocation2 + $0x50] sm:$0xff] %vm577_vm2, %v10680_v20  ;;  %v10874_v29 = vld [vmem:[#allocation2 + $0x68] sm:$0xff]  ;;  %v2307_v52 = vld [vmem:[%s14642_s1 + $0x10] sm:$0xff] }
 0x121   : > { %3506 = vst.msk [vmem:[#allocation2 + $0x48] sm:$0xff] %vm577_vm2, %v10680_v20  ;;  %v10880_v31 = vld [vmem:[#allocation2 + $0x62] sm:$0xff]  ;;  %707 = vst.msk [vmem:[#allocation3 + $0x48] sm:$0xff] %vm577_vm2, %v10874_v29  ;;  %1180 = vrot.lane.b32.xlu0 %v10760_v58, %s10430_s22  ;;  %v239_v10 = vld [vmem:[%s10521_s10 + $0xd0] sm:$0xff] }
 0x122   : > { %3511 = vst.msk [vmem:[#allocation2 + $0x70] sm:$0x3] %vm580_vm3, %v10680_v20  ;;  %v10890_v32 = vld [vmem:[#allocation2 + $0x81] sm:$0xff]  ;;  %14785 = vst [vmem:[#allocation15_spill] sm:$0xff] %v10928_v49  ;;  %9515 = vmatprep.mubr.msk.f32.mxu1 %vm251_vm1, %v239_v10  ;;  %v240_v12 = vld [vmem:[%s10521_s10 + $0xd8] sm:$0xff] }
 0x123   : > { %706 = vst.msk [vmem:[#allocation3 + $0x40] sm:$0xff] %vm577_vm2, %v10870_v28  ;;  %3510 = vst.msk [vmem:[#allocation2 + $0x68] sm:$0xff] %vm577_vm2, %v10680_v20  ;;  %v10892_v33 = vld [vmem:[#allocation2 + $0x82] sm:$0xff]  ;;  %1788 = vrot.lane.b32.xlu1 %v10780_v0, %s10432_s24  ;;  %v2312_v15 = vld [vmem:[%s14642_s1 + $0x38] sm:$0xff]  ;;  %9516 = vmatmul.mubr.msk.f32.gmra.mrb[10].mxu1 %vm251_vm1, %v240_v12 }
 0x124   : > { %3509 = vst.msk [vmem:[#allocation2 + $0x60] sm:$0xff] %vm577_vm2, %v10680_v20  ;;  %645 = vst.msk [vmem:[#allocation2 + $0x99] sm:$0xff] %vm577_vm2, %v10925_v45  ;;  %9518 = vmatprep.mubr.msk.f32.mxu1 %vm251_vm1, %v241_v36  ;;  %v2313_v43 = vld [vmem:[%s14642_s1 + $0x40] sm:$0xff]  ;;  %v2314_v47 = vld [vmem:[%s14642_s1 + $0x48] sm:$0xff] }
 0x125   : > { %3514 = vst.msk [vmem:[#allocation2 + $0x88] sm:$0x3] %vm580_vm3, %v10680_v20  ;;  %1373 = vrot.lane.b32.xlu0 %v10751_v56, %s10429_s21  ;;  %v9956_v56 = vpack.c.bf16 %v2308_v53, %v2307_v52  ;;  %v9968_v52 = vpack.c.bf16 %v2314_v47, %v2313_v43  ;;  %v2315_v53 = vld [vmem:[%s14642_s1 + $0x50] sm:$0xff] }
 0x126   : > { %v10896_v34 = vld [vmem:[#allocation2 + $0x78] sm:$0xff]  ;;  %v10900_v35 = vld [vmem:[#allocation2 + $0x80] sm:$0xff]  ;;  %644 = vst.msk [vmem:[#allocation2 + $0x91] sm:$0xff] %vm577_vm2, %v10928_v49 }
 0x127   : > { %v10906_v37 = vld [vmem:[#allocation2 + $0x79] sm:$0xff]  ;;  %709 = vst.msk [vmem:[#allocation3 + $0x58] sm:$0xff] %vm577_vm2, %v10900_v35  ;;  %708 = vst.msk [vmem:[#allocation3 + $0x50] sm:$0xff] %vm577_vm2, %v10896_v34  ;;  %1212 = vrot.lane.b32.xlu1 %v10780_v0, %s10430_s22  ;;  %9957 = vmatprep.subr.bf16.mxu1 %v9956_v56 }
 0x128   : > { %v10909_v41 = vld [vmem:[#allocation2 + $0x7a] sm:$0xff]  ;;  %9959 = vmatpush3.bf16.msra.mxu1 %v9956_v56  ;;  %v9496_v56 = vpop.f32.mrb[12].mxu0 }
 0x129   : > { %3513 = vst.msk [vmem:[#allocation2 + $0x80] sm:$0xff] %vm577_vm2, %v10680_v20  ;;  %3512 = vst.msk [vmem:[#allocation2 + $0x78] sm:$0xff] %vm577_vm2, %v10680_v20  ;;  %1790 = vrot.lane.b32.xlu0 %v10816_v13, %s10432_s24  ;;  %v2309_v0 = vld [vmem:[%s14642_s1 + $0x20] sm:$0xff]  ;;  %9519 = vmatmul.mubr.msk.f32.gmra.mrb[12].mxu1 %vm251_vm1, %v242_v39 }
 0x12b   : > { %1981 = vrot.lane.b32.xlu1 %v10782_v1, %s10433_s25  ;;  %v10944_v51 = vld [vmem:[#allocation2 + $0x99] sm:$0xff] }
 0x12c   : > { %v10954_v55 = vld [vmem:[#allocation2 + $0x9a] sm:$0xff] }
 0x12d   : > { %1214 = vrot.lane.b32.xlu0 %v10816_v13, %s10430_s22  ;;  %v10956_v57 = vld [vmem:[#allocation2 + $0x90] sm:$0xff]  ;;  %3517 = vst.msk [vmem:[#allocation2 + $0xa0] sm:$0x3] %vm580_vm3, %v10680_v20  ;;  %v10960_v58 = vld [vmem:[#allocation2 + $0x98] sm:$0xff] }
 0x12e   : > { %v10962_v59 = vld [vmem:[#allocation2 + $0x91] sm:$0xff]  ;;  %711 = vst.msk [vmem:[#allocation3 + $0x68] sm:$0xff] %vm577_vm2, %v10960_v58  ;;  %710 = vst.msk [vmem:[#allocation3 + $0x60] sm:$0xff] %vm577_vm2, %v10956_v57 }
 0x12f   : > { %1405 = vrot.lane.b32.xlu1 %v10782_v1, %s10429_s21  ;;  %v10964_v63 = vld [vmem:[#allocation2 + $0x92] sm:$0xff]  ;;  %v2310_v1 = vld [vmem:[%s14642_s1 + $0x28] sm:$0xff] }
 0x130   : > { %3516 = vst.msk [vmem:[#allocation2 + $0x98] sm:$0xff] %vm577_vm2, %v10680_v20  ;;  %3515 = vst.msk [vmem:[#allocation2 + $0x90] sm:$0xff] %vm577_vm2, %v10680_v20  ;;  %v2311_v13 = vld [vmem:[%s14642_s1 + $0x30] sm:$0xff] }
 0x131   : > { %1955 = vrot.lane.b32.xlu0 %v10784_v2, %s10433_s25  ;;  %v9964_v16 = vpack.c.bf16 %v2312_v15, %v2311_v13 }
 0x133   : > { %1379 = vrot.lane.b32.xlu1 %v10784_v2, %s10429_s21 }
 0x135   : > { %804 = vrot.lane.b32.xlu0 %v10784_v2, %s10427_s17  ;;  %v9960_v2 = vpack.c.bf16 %v2310_v1, %v2309_v0  ;;  %v11028_v0 = vadd.f32 %v9496_v56, %v10565_v17  ;;  %v478_v1 = vpop.f32.mrb[13].mxu0 }
 0x137   : > { %2148 = vrot.lane.b32.xlu1 %v10786_v3, %s10434_s30  ;;  %9961 = vmatprep.subr.bf16.mxu1 %v9960_v2  ;;  %14786 = vst [vmem:[#allocation16_spill] sm:$0xff] %v11028_v0  ;;  %647 = vst.msk [vmem:[#allocation2 + $0xb1] sm:$0xff] %vm577_vm2, %v11028_v0 }
 0x138   : > { %9963 = vmatpush3.bf16.msra.mxu1 %v9960_v2  ;;  %v11031_v2 = vadd.f32 %v10565_v17, %v478_v1 }
 0x139   : > { %1572 = vrot.lane.b32.xlu0 %v10786_v3, %s10431_s23  ;;  %9965 = vmatprep.subr.bf16.mxu1 %v9964_v16 }
 0x13a   : > { %14787 = vst [vmem:[#allocation17_spill] sm:$0xff] %v11031_v2  ;;  %646 = vst.msk [vmem:[#allocation2 + $0xa9] sm:$0xff] %vm577_vm2, %v11031_v2 }
 0x13b   : > { %1760 = vrot.lane.b32.xlu1 %v10794_v6, %s10432_s24 }
 0x13c   : > { %9967 = vmatpush3.bf16.msra.mxu1 %v9964_v16 }
 0x13d   : > { %997 = vrot.lane.b32.xlu0 %v10786_v3, %s10428_s18  ;;  %9969 = vmatprep.subr.bf16.mxu1 %v9968_v52  ;;  %v243_v3 = vld [vmem:[%s10521_s10 + $0xf0] sm:$0xff] }
 0x13e   : > { %9521 = vmatprep.mubr.msk.f32.mxu1 %vm251_vm1, %v243_v3 }
 0x13f   : > { %1184 = vrot.lane.b32.xlu1 %v10794_v6, %s10430_s22  ;;  %v244_v6 = vld [vmem:[%s10521_s10 + $0xf8] sm:$0xff] }
 0x140   : > { %9971 = vmatpush3.bf16.msra.mxu1 %v9968_v52 }
 0x141   : > { %1762 = vrot.lane.b32.xlu0 %v10798_v7, %s10432_s24  ;;  %9522 = vmatmul.mubr.msk.f32.gmra.mrb[14].mxu1 %vm251_vm1, %v244_v6  ;;  %v11053_v10 = vld [vmem:[#allocation2 + $0xa8] sm:$0xff]  ;;  %v11055_v12 = vld [vmem:[#allocation2 + $0xb0] sm:$0xff] }
 0x142   : > { %9540 = vmatprep.subr.mxu1 %v2315_v53  ;;  %v11059_v13 = vld [vmem:[#allocation2 + $0xa9] sm:$0xff]  ;;  %713 = vst.msk [vmem:[#allocation3 + $0x78] sm:$0xff] %vm577_vm2, %v11055_v12  ;;  %712 = vst.msk [vmem:[#allocation3 + $0x70] sm:$0xff] %vm577_vm2, %v11053_v10 }
 0x143   : > { %1953 = vrot.lane.b32.xlu1 %v10800_v8, %s10433_s25 }
 0x144   : > { %9541 = vmatpush3.msra.mxu1 %v2315_v53 }
 0x145   : > { %1186 = vrot.lane.b32.xlu0 %v10798_v7, %s10430_s22  ;;  %v11047_v7 = vld [vmem:[#allocation2 + $0xb1] sm:$0xff] }
 0x147   : > { %1377 = vrot.lane.b32.xlu1 %v10800_v8, %s10429_s21 }
 0x149   : > { %802 = vrot.lane.b32.xlu0 %v10800_v8, %s10427_s17  ;;  %v11051_v8 = vld [vmem:[#allocation2 + $0xb2] sm:$0xff] }
 0x14a   : > { %3520 = vst.msk [vmem:[#allocation2 + $0xb8] sm:$0x3] %vm580_vm3, %v10680_v20 }
 0x14b   : > { %2146 = vrot.lane.b32.xlu1 %v10806_v9, %s10434_s30 }
 0x14d   : > { %1570 = vrot.lane.b32.xlu0 %v10806_v9, %s10431_s23 }
 0x14f   : > { %995 = vrot.lane.b32.xlu1 %v10806_v9, %s10428_s18  ;;  %v11061_v9 = vld [vmem:[#allocation2 + $0xaa] sm:$0xff] }
 0x150   : > { %3519 = vst.msk [vmem:[#allocation2 + $0xb0] sm:$0xff] %vm577_vm2, %v10680_v20  ;;  %3518 = vst.msk [vmem:[#allocation2 + $0xa8] sm:$0xff] %vm577_vm2, %v10680_v20 }
 0x151   : > { %1959 = vrot.lane.b32.xlu0 %v10828_v18, %s10433_s25 }
 0x153   : > { %1383 = vrot.lane.b32.xlu1 %v10828_v18, %s10429_s21 }
 0x155   : > { %808 = vrot.lane.b32.xlu0 %v10828_v18, %s10427_s17  ;;  %v9499_v18 = vpop.f32.mrb[14].mxu0 }
 0x156   : > { %v11092_v15 = vadd.f32 %v9499_v18, %v10565_v17 }
 0x157   : > { %2152 = vrot.lane.b32.xlu1 %v10830_v19, %s10434_s30 }
 0x158   : > { %14788 = vst [vmem:[#allocation18_spill] sm:$0xff] %v11092_v15  ;;  %649 = vst.msk [vmem:[#allocation2 + $0xc9] sm:$0xff] %vm577_vm2, %v11092_v15 }
 0x159   : > { %1576 = vrot.lane.b32.xlu0 %v10830_v19, %s10431_s23 }
 0x15b   : > { %1764 = vrot.lane.b32.xlu1 %v10840_v22, %s10432_s24 }
 0x15d   : > { %1001 = vrot.lane.b32.xlu0 %v10830_v19, %s10428_s18  ;;  %v488_v19 = vpop.f32.mrb[15].mxu0 }
 0x15e   : > { %v11095_v16 = vadd.f32 %v10565_v17, %v488_v19 }
 0x15f   : > { %1188 = vrot.lane.b32.xlu1 %v10840_v22, %s10430_s22  ;;  %v11111_v22 = vld [vmem:[#allocation2 + $0xc9] sm:$0xff] }
 0x160   : > { %14789 = vst [vmem:[#allocation19_spill] sm:$0xff] %v11095_v16  ;;  %648 = vst.msk [vmem:[#allocation2 + $0xc1] sm:$0xff] %vm577_vm2, %v11095_v16 }
 0x161   : > { %1766 = vrot.lane.b32.xlu0 %v10844_v23, %s10432_s24 }
 0x163   : > { %1957 = vrot.lane.b32.xlu1 %v10850_v24, %s10433_s25 }
 0x165   : > { %1190 = vrot.lane.b32.xlu0 %v10844_v23, %s10430_s22  ;;  %v11115_v23 = vld [vmem:[#allocation2 + $0xca] sm:$0xff] }
 0x166   : > { %3523 = vst.msk [vmem:[#allocation2 + $0xd0] sm:$0x3] %vm580_vm3, %v10680_v20 }
 0x167   : > { %1381 = vrot.lane.b32.xlu1 %v10850_v24, %s10429_s21  ;;  %v11119_v36 = vld [vmem:[#allocation2 + $0xc8] sm:$0xff] }
 0x168   : > { %v11123_v39 = vld [vmem:[#allocation2 + $0xc1] sm:$0xff]  ;;  %715 = vst.msk [vmem:[#allocation3 + $0x88] sm:$0xff] %vm577_vm2, %v11119_v36 }
 0x169   : > { %806 = vrot.lane.b32.xlu0 %v10850_v24, %s10427_s17  ;;  %v11117_v24 = vld [vmem:[#allocation2 + $0xc0] sm:$0xff] }
 0x16a   : > { %714 = vst.msk [vmem:[#allocation3 + $0x80] sm:$0xff] %vm577_vm2, %v11117_v24 }
 0x16b   : > { %2150 = vrot.lane.b32.xlu1 %v10852_v25, %s10434_s30 }
 0x16d   : > { %1574 = vrot.lane.b32.xlu0 %v10852_v25, %s10431_s23 }
 0x16f   : > { %999 = vrot.lane.b32.xlu1 %v10852_v25, %s10428_s18  ;;  %v11125_v25 = vld [vmem:[#allocation2 + $0xc2] sm:$0xff] }
 0x170   : > { %3522 = vst.msk [vmem:[#allocation2 + $0xc8] sm:$0xff] %vm577_vm2, %v10680_v20  ;;  %3521 = vst.msk [vmem:[#allocation2 + $0xc0] sm:$0xff] %vm577_vm2, %v10680_v20 }
 0x171   : > { %1963 = vrot.lane.b32.xlu0 %v10864_v26, %s10433_s25 }
 0x173   : > { %1387 = vrot.lane.b32.xlu1 %v10864_v26, %s10429_s21 }
 0x175   : > { %812 = vrot.lane.b32.xlu0 %v10864_v26, %s10427_s17 }
 0x177   : > { %2156 = vrot.lane.b32.xlu1 %v10866_v27, %s10434_s30 }
 0x179   : > { %1580 = vrot.lane.b32.xlu0 %v10866_v27, %s10431_s23 }
 0x17b   : > { %1768 = vrot.lane.b32.xlu1 %v10870_v28, %s10432_s24 }
 0x17d   : > { %1005 = vrot.lane.b32.xlu0 %v10866_v27, %s10428_s18 }
 0x17f   : > { %1192 = vrot.lane.b32.xlu1 %v10870_v28, %s10430_s22 }
 0x181   : > { %1770 = vrot.lane.b32.xlu0 %v10874_v29, %s10432_s24 }
 0x183   : > { %1961 = vrot.lane.b32.xlu1 %v10878_v30, %s10433_s25  ;;  %v1376_v26 = vpop.permute.xlu0 %1375 }
 0x185   : > { %v1183_v43 = vpop.permute.xlu1 %1182  ;;  %1194 = vrot.lane.b32.xlu0 %v10874_v29, %s10430_s22 }
 0x186   : > { %1278 = vst.msk [vmem:[#allocation3 + $0x8] sm:$0xff] %vm1276_vm6, %v1183_v43 }
 0x187   : > { %1385 = vrot.lane.b32.xlu1 %v10878_v30, %s10429_s21  ;;  %1471 = vst.msk [vmem:[#allocation3 + $0x8] sm:$0xff] %vm1469_vm7, %v1376_v26  ;;  %v801_v27 = vpop.permute.xlu0 %800 }
 0x188   : > { %894 = vst.msk [vmem:[#allocation3 + $0x18] sm:$0xff] %vm890_vm4, %v801_v27 }
 0x189   : > { %v799_v28 = vpop.permute.xlu1 %798  ;;  %810 = vrot.lane.b32.xlu0 %v10878_v30, %s10427_s17 }
 0x18a   : > { %893 = vst.msk [vmem:[#allocation3 + $0x10] sm:$0xff] %vm890_vm4, %v799_v28 }
 0x18b   : > { %2154 = vrot.lane.b32.xlu1 %v10880_v31, %s10434_s30  ;;  %v1569_v47 = vpop.permute.xlu0 %1568 }
 0x18c   : > { %1664 = vst.msk [vmem:[#allocation3 + $0x8] sm:$0xff] %vm1662_vm8, %v1569_v47 }
 0x18d   : > { %v1567_v29 = vpop.permute.xlu1 %1566  ;;  %1578 = vrot.lane.b32.xlu0 %v10880_v31, %s10431_s23 }
 0x18f   : > { %1003 = vrot.lane.b32.xlu1 %v10880_v31, %s10428_s18  ;;  %v994_v52 = vpop.permute.xlu0 %993  ;;  %v9505_v31 = vpop.f32.mrb[2].mxu1 }
 0x190   : > { %1087 = vst.msk [vmem:[#allocation3 + $0x18] sm:$0xff] %vm1083_vm5, %v994_v52  ;;  %v11182_v56 = vadd.f32 %v9505_v31, %v10565_v17  ;;  %v508_v1 = vpop.f32.mrb[3].mxu1 }
 0x191   : > { %v992_v3 = vpop.permute.xlu1 %991  ;;  %1967 = vrot.lane.b32.xlu0 %v10890_v32, %s10433_s25  ;;  %v11188_v19 = vadd.f32 %v10565_v17, %v508_v1 }
 0x192   : > { %1086 = vst.msk [vmem:[#allocation3 + $0x10] sm:$0xff] %vm1083_vm5, %v992_v3  ;;  %14790 = vst [vmem:[#allocation20_spill] sm:$0xff] %v11182_v56 }
 0x193   : > { %1391 = vrot.lane.b32.xlu1 %v10890_v32, %s10429_s21  ;;  %v1181_v30 = vpop.permute.xlu0 %1180  ;;  %14791 = vst [vmem:[#allocation21_spill] sm:$0xff] %v11188_v19  ;;  %653 = vst.msk [vmem:[#allocation2 + $0xf9] sm:$0xff] %vm577_vm2, %v11182_v56 }
 0x194   : > { %1277 = vst.msk [vmem:[#allocation3] sm:$0xff] %vm1276_vm6, %v1181_v30 }
 0x195   : > { %v11175_v6 = vpop.permute.xlu1 %1788  ;;  %816 = vrot.lane.b32.xlu0 %v10890_v32, %s10427_s17  ;;  %652 = vst.msk [vmem:[#allocation2 + $0xf1] sm:$0xff] %vm577_vm2, %v11188_v19 }
 0x197   : > { %2160 = vrot.lane.b32.xlu1 %v10892_v33, %s10434_s30  ;;  %v1374_v53 = vpop.permute.xlu0 %1373 }
 0x198   : > { %1470 = vst.msk [vmem:[#allocation3] sm:$0xff] %vm1469_vm7, %v1374_v53 }
 0x199   : > { %v11185_v18 = vpop.permute.xlu1 %1212  ;;  %1663 = vst.msk [vmem:[#allocation3] sm:$0xff] %vm1662_vm8, %v1567_v29  ;;  %1584 = vrot.lane.b32.xlu0 %v10892_v33, %s10431_s23 }
 0x19a   : > { %v11238_v31 = vld [vmem:[#allocation2 + $0xfa] sm:$0xff] }
 0x19b   : > { %1772 = vrot.lane.b32.xlu1 %v10896_v34, %s10432_s24  ;;  %v11199_v32 = vpop.permute.xlu0 %1790 }
 0x19c   : > { %v11213_v28 = vld [vmem:[#allocation2 + $0xf0] sm:$0xff]  ;;  %v11224_v52 = vld [vmem:[#allocation2 + $0xf8] sm:$0xff] }
 0x19d   : > { %v11201_v26 = vpop.permute.xlu1 %1981  ;;  %1009 = vrot.lane.b32.xlu0 %v10892_v33, %s10428_s18  ;;  %718 = vst.msk [vmem:[#allocation3 + $0xa0] sm:$0xff] %vm577_vm2, %v11213_v28  ;;  %v11228_v3 = vld [vmem:[#allocation2 + $0xf1] sm:$0xff]  ;;  %719 = vst.msk [vmem:[#allocation3 + $0xa8] sm:$0xff] %vm577_vm2, %v11224_v52 }
 0x19e   : > { %v11236_v30 = vld [vmem:[#allocation2 + $0xf2] sm:$0xff] }
 0x19f   : > { %1196 = vrot.lane.b32.xlu1 %v10896_v34, %s10430_s22  ;;  %v11207_v43 = vpop.permute.xlu0 %1214  ;;  %3527 = vst.msk [vmem:[#allocation2 + $0xf0] sm:$0xff] %vm577_vm2, %v10680_v20 }
 0x1a1   : > { %v11209_v27 = vpop.permute.xlu1 %1405  ;;  %1774 = vrot.lane.b32.xlu0 %v10900_v35, %s10432_s24 }
 0x1a3   : > { %1965 = vrot.lane.b32.xlu1 %v10906_v37, %s10433_s25  ;;  %v1956_v47 = vpop.permute.xlu0 %1955 }
 0x1a5   : > { %v1380_v33 = vpop.permute.xlu1 %1379  ;;  %1198 = vrot.lane.b32.xlu0 %v10900_v35, %s10430_s22  ;;  %v11234_v35 = vld [vmem:[#allocation2 + $0xf9] sm:$0xff] }
 0x1a6   : > { %3529 = vst.msk [vmem:[#allocation2 + $0x100] sm:$0x3] %vm580_vm3, %v10680_v20 }
 0x1a7   : > { %1389 = vrot.lane.b32.xlu1 %v10906_v37, %s10429_s21  ;;  %v805_v34 = vpop.permute.xlu0 %804  ;;  %3528 = vst.msk [vmem:[#allocation2 + $0xf8] sm:$0xff] %vm577_vm2, %v10680_v20 }
 0x1a8   : > { %896 = vst.msk [vmem:[#allocation3 + $0x28] sm:$0xff] %vm890_vm4, %v805_v34 }
 0x1a9   : > { %v2149_v29 = vpop.permute.xlu1 %2148  ;;  %814 = vrot.lane.b32.xlu0 %v10906_v37, %s10427_s17 }
 0x1ab   : > { %2158 = vrot.lane.b32.xlu1 %v10909_v41, %s10434_s30  ;;  %v1573_v53 = vpop.permute.xlu0 %1572 }
 0x1ad   : > { %v1761_v37 = vpop.permute.xlu1 %1760  ;;  %1582 = vrot.lane.b32.xlu0 %v10909_v41, %s10431_s23 }
 0x1ae   : > { %1857 = vst.msk [vmem:[#allocation3] sm:$0xff] %vm1856_vm9, %v1761_v37 }
 0x1af   : > { %1007 = vrot.lane.b32.xlu1 %v10909_v41, %s10428_s18  ;;  %v998_v1 = vpop.permute.xlu0 %997  ;;  %v9508_v41 = vpop.f32.mrb[4].mxu1 }
 0x1b0   : > { %1089 = vst.msk [vmem:[#allocation3 + $0x28] sm:$0xff] %vm1083_vm5, %v998_v1  ;;  %v518_v19 = vpop.f32.mrb[5].mxu1 }
 0x1b1   : > { %v1185_v34 = vpop.permute.xlu1 %1184  ;;  %1971 = vrot.lane.b32.xlu0 %v10944_v51, %s10433_s25 }
 0x1b2   : > { %1279 = vst.msk [vmem:[#allocation3 + $0x10] sm:$0xff] %vm1276_vm6, %v1185_v34  ;;  %v11266_v34 = vadd.f32 %v9508_v41, %v10565_v17 }
 0x1b3   : > { %1395 = vrot.lane.b32.xlu1 %v10944_v51, %s10429_s21  ;;  %v1763_v37 = vpop.permute.xlu0 %1762 }
 0x1b4   : > { %1858 = vst.msk [vmem:[#allocation3 + $0x8] sm:$0xff] %vm1856_vm9, %v1763_v37  ;;  %14792 = vst [vmem:[#allocation22_spill] sm:$0xff] %v11266_v34 }
 0x1b5   : > { %v1954_v56 = vpop.permute.xlu1 %1953  ;;  %2051 = vst.msk [vmem:[#allocation3 + $0x8] sm:$0xff] %vm2049_vm10, %v1956_v47  ;;  %820 = vrot.lane.b32.xlu0 %v10944_v51, %s10427_s17  ;;  %v11270_v47 = vadd.f32 %v10565_v17, %v518_v19 }
 0x1b6   : > { %2050 = vst.msk [vmem:[#allocation3] sm:$0xff] %vm2049_vm10, %v1954_v56 }
 0x1b7   : > { %2244 = vst.msk [vmem:[#allocation3 + $0x8] sm:$0xff] %vm2242_vm11, %v2149_v29  ;;  %2164 = vrot.lane.b32.xlu1 %v10954_v55, %s10434_s30  ;;  %v1187_v1 = vpop.permute.xlu0 %1186  ;;  %14793 = vst [vmem:[#allocation23_spill] sm:$0xff] %v11270_v47 }
 0x1b8   : > { %1280 = vst.msk [vmem:[#allocation3 + $0x18] sm:$0xff] %vm1276_vm6, %v1187_v1 }
 0x1b9   : > { %v1378_v37 = vpop.permute.xlu1 %1377  ;;  %1473 = vst.msk [vmem:[#allocation3 + $0x18] sm:$0xff] %vm1469_vm7, %v1380_v33  ;;  %1588 = vrot.lane.b32.xlu0 %v10954_v55, %s10431_s23 }
 0x1ba   : > { %1472 = vst.msk [vmem:[#allocation3 + $0x10] sm:$0xff] %vm1469_vm7, %v1378_v37 }
 0x1bb   : > { %655 = vst.msk [vmem:[#allocation2 + $0x111] sm:$0xff] %vm577_vm2, %v11266_v34  ;;  %1776 = vrot.lane.b32.xlu1 %v10956_v57, %s10432_s24  ;;  %654 = vst.msk [vmem:[#allocation2 + $0x109] sm:$0xff] %vm577_vm2, %v11270_v47  ;;  %v803_v51 = vpop.permute.xlu0 %802 }
 0x1bc   : > { %1666 = vst.msk [vmem:[#allocation3 + $0x18] sm:$0xff] %vm1662_vm8, %v1573_v53 }
 0x1bd   : > { %895 = vst.msk [vmem:[#allocation3 + $0x20] sm:$0xff] %vm890_vm4, %v803_v51  ;;  %v2147_v56 = vpop.permute.xlu1 %2146  ;;  %1013 = vrot.lane.b32.xlu0 %v10954_v55, %s10428_s18 }
 0x1be   : > { %2243 = vst.msk [vmem:[#allocation3] sm:$0xff] %vm2242_vm11, %v2147_v56  ;;  %v2276_v41 = vld [vmem:[#allocation3 + $0x8] sm:$0xff] }
 0x1bf   : > { %1200 = vrot.lane.b32.xlu1 %v10956_v57, %s10430_s22  ;;  %v1571_v19 = vpop.permute.xlu0 %1570 }
 0x1c0   : > { %1665 = vst.msk [vmem:[#allocation3 + $0x10] sm:$0xff] %vm1662_vm8, %v1571_v19 }
 0x1c1   : > { %v996_v33 = vpop.permute.xlu1 %995  ;;  %1778 = vrot.lane.b32.xlu0 %v10960_v58, %s10432_s24 }
 0x1c2   : > { %1088 = vst.msk [vmem:[#allocation3 + $0x20] sm:$0xff] %vm1083_vm5, %v996_v33  ;;  %v11293_v29 = vld [vmem:[#allocation2 + $0x108] sm:$0xff]  ;;  %v11306_v51 = vld [vmem:[#allocation2 + $0x110] sm:$0xff] }
 0x1c3   : > { %1969 = vrot.lane.b32.xlu1 %v10962_v59, %s10433_s25  ;;  %720 = vst.msk [vmem:[#allocation3 + $0xb0] sm:$0xff] %vm577_vm2, %v11293_v29  ;;  %v1960_v55 = vpop.permute.xlu0 %1959  ;;  %v11310_v56 = vld [vmem:[#allocation2 + $0x109] sm:$0xff]  ;;  %721 = vst.msk [vmem:[#allocation3 + $0xb8] sm:$0xff] %vm577_vm2, %v11306_v51  ;;  %v11320_v33 = vld [vmem:[#allocation2 + $0x112] sm:$0xff] }
 0x1c4   : > { %v11318_v19 = vld [vmem:[#allocation2 + $0x10a] sm:$0xff] }
 0x1c5   : > { %v1384_v57 = vpop.permute.xlu1 %1383  ;;  %v2275_v53 = vld [vmem:[#allocation3] sm:$0xff]  ;;  %1202 = vrot.lane.b32.xlu0 %v10960_v58, %s10430_s22  ;;  %3530 = vst.msk [vmem:[#allocation2 + $0x108] sm:$0xff] %vm577_vm2, %v10680_v20 }
 0x1c6   : > { %9542 = vmatprep.mubr.msk.f32.mxu1 %vm2321_vm12, %v2275_v53  ;;  %v11316_v58 = vld [vmem:[#allocation2 + $0x111] sm:$0xff] }
 0x1c7   : > { %1393 = vrot.lane.b32.xlu1 %v10962_v59, %s10429_s21  ;;  %9543 = vmatmul.mubr.msk.f32.vlgmr.msra.gmra.mrb[16].mxu1 %vm2321_vm12, %v2276_v41  ;;  %v809_v1 = vpop.permute.xlu0 %808  ;;  %3532 = vst.msk [vmem:[#allocation2 + $0x118] sm:$0x3] %vm580_vm3, %v10680_v20 }
 0x1c8   : > { %898 = vst.msk [vmem:[#allocation3 + $0x38] sm:$0xff] %vm890_vm4, %v809_v1 }
 0x1c9   : > { %v2153_v37 = vpop.permute.xlu1 %2152  ;;  %818 = vrot.lane.b32.xlu0 %v10962_v59, %s10427_s17  ;;  %3531 = vst.msk [vmem:[#allocation2 + $0x110] sm:$0xff] %vm577_vm2, %v10680_v20 }
 0x1cb   : > { %2162 = vrot.lane.b32.xlu1 %v10964_v63, %s10434_s30  ;;  %v1577_v53 = vpop.permute.xlu0 %1576 }
 0x1cd   : > { %v1765_v59 = vpop.permute.xlu1 %1764  ;;  %1586 = vrot.lane.b32.xlu0 %v10964_v63, %s10431_s23 }
 0x1ce   : > { %1859 = vst.msk [vmem:[#allocation3 + $0x10] sm:$0xff] %vm1856_vm9, %v1765_v59 }
 0x1cf   : > { %1011 = vrot.lane.b32.xlu1 %v10964_v63, %s10428_s18  ;;  %v1002_v41 = vpop.permute.xlu0 %1001  ;;  %v9511_v63 = vpop.f32.mrb[6].mxu1 }
 0x1d0   : > { %1091 = vst.msk [vmem:[#allocation3 + $0x38] sm:$0xff] %vm1083_vm5, %v1002_v41  ;;  %v528_v47 = vpop.f32.mrb[7].mxu1 }
 0x1d1   : > { %v1189_v1 = vpop.permute.xlu1 %1188  ;;  %1975 = vrot.lane.b32.xlu0 %v11047_v7, %s10433_s25 }
 0x1d2   : > { %1281 = vst.msk [vmem:[#allocation3 + $0x20] sm:$0xff] %vm1276_vm6, %v1189_v1  ;;  %v11348_v1 = vadd.f32 %v9511_v63, %v10565_v17 }
 0x1d3   : > { %1399 = vrot.lane.b32.xlu1 %v11047_v7, %s10429_s21  ;;  %v1767_v34 = vpop.permute.xlu0 %1766 }
 0x1d4   : > { %1860 = vst.msk [vmem:[#allocation3 + $0x18] sm:$0xff] %vm1856_vm9, %v1767_v34  ;;  %14794 = vst [vmem:[#allocation24_spill] sm:$0xff] %v11348_v1 }
 0x1d5   : > { %v1958_v59 = vpop.permute.xlu1 %1957  ;;  %2053 = vst.msk [vmem:[#allocation3 + $0x18] sm:$0xff] %vm2049_vm10, %v1960_v55  ;;  %824 = vrot.lane.b32.xlu0 %v11047_v7, %s10427_s17  ;;  %v11352_v55 = vadd.f32 %v10565_v17, %v528_v47 }
 0x1d6   : > { %2052 = vst.msk [vmem:[#allocation3 + $0x10] sm:$0xff] %vm2049_vm10, %v1958_v59 }
 0x1d7   : > { %2246 = vst.msk [vmem:[#allocation3 + $0x18] sm:$0xff] %vm2242_vm11, %v2153_v37  ;;  %2168 = vrot.lane.b32.xlu1 %v11051_v8, %s10434_s30  ;;  %v1191_v41 = vpop.permute.xlu0 %1190  ;;  %14795 = vst [vmem:[#allocation25_spill] sm:$0xff] %v11352_v55 }
 0x1d8   : > { %1282 = vst.msk [vmem:[#allocation3 + $0x28] sm:$0xff] %vm1276_vm6, %v1191_v41 }
 0x1d9   : > { %v1382_v34 = vpop.permute.xlu1 %1381  ;;  %1475 = vst.msk [vmem:[#allocation3 + $0x28] sm:$0xff] %vm1469_vm7, %v1384_v57  ;;  %1592 = vrot.lane.b32.xlu0 %v11051_v8, %s10431_s23 }
 0x1da   : > { %1474 = vst.msk [vmem:[#allocation3 + $0x20] sm:$0xff] %vm1469_vm7, %v1382_v34 }
 0x1db   : > { %657 = vst.msk [vmem:[#allocation2 + $0x129] sm:$0xff] %vm577_vm2, %v11348_v1  ;;  %1780 = vrot.lane.b32.xlu1 %v11053_v10, %s10432_s24  ;;  %656 = vst.msk [vmem:[#allocation2 + $0x121] sm:$0xff] %vm577_vm2, %v11352_v55  ;;  %v807_v7 = vpop.permute.xlu0 %806 }
 0x1dc   : > { %1668 = vst.msk [vmem:[#allocation3 + $0x28] sm:$0xff] %vm1662_vm8, %v1577_v53 }
 0x1dd   : > { %897 = vst.msk [vmem:[#allocation3 + $0x30] sm:$0xff] %vm890_vm4, %v807_v7  ;;  %v2151_v47 = vpop.permute.xlu1 %2150  ;;  %1017 = vrot.lane.b32.xlu0 %v11051_v8, %s10428_s18 }
 0x1de   : > { %2245 = vst.msk [vmem:[#allocation3 + $0x10] sm:$0xff] %vm2242_vm11, %v2151_v47  ;;  %v2278_v63 = vld [vmem:[#allocation3 + $0x18] sm:$0xff] }
 0x1df   : > { %1204 = vrot.lane.b32.xlu1 %v11053_v10, %s10430_s22  ;;  %v1575_v57 = vpop.permute.xlu0 %1574 }
 0x1e0   : > { %1667 = vst.msk [vmem:[#allocation3 + $0x20] sm:$0xff] %vm1662_vm8, %v1575_v57 }
 0x1e1   : > { %v1000_v37 = vpop.permute.xlu1 %999  ;;  %1782 = vrot.lane.b32.xlu0 %v11055_v12, %s10432_s24 }
 0x1e2   : > { %1090 = vst.msk [vmem:[#allocation3 + $0x30] sm:$0xff] %vm1083_vm5, %v1000_v37  ;;  %v11375_v53 = vld [vmem:[#allocation2 + $0x120] sm:$0xff]  ;;  %v11388_v7 = vld [vmem:[#allocation2 + $0x128] sm:$0xff] }
 0x1e3   : > { %1973 = vrot.lane.b32.xlu1 %v11059_v13, %s10433_s25  ;;  %722 = vst.msk [vmem:[#allocation3 + $0xc0] sm:$0xff] %vm577_vm2, %v11375_v53  ;;  %v1964_v8 = vpop.permute.xlu0 %1963  ;;  %v11392_v47 = vld [vmem:[#allocation2 + $0x121] sm:$0xff]  ;;  %723 = vst.msk [vmem:[#allocation3 + $0xc8] sm:$0xff] %vm577_vm2, %v11388_v7  ;;  %v11402_v37 = vld [vmem:[#allocation2 + $0x12a] sm:$0xff] }
 0x1e4   : > { %v11400_v57 = vld [vmem:[#allocation2 + $0x122] sm:$0xff] }
 0x1e5   : > { %v1388_v59 = vpop.permute.xlu1 %1387  ;;  %v2277_v10 = vld [vmem:[#allocation3 + $0x10] sm:$0xff]  ;;  %1206 = vrot.lane.b32.xlu0 %v11055_v12, %s10430_s22  ;;  %v11398_v12 = vld [vmem:[#allocation2 + $0x129] sm:$0xff]  ;;  %3533 = vst.msk [vmem:[#allocation2 + $0x120] sm:$0xff] %vm577_vm2, %v10680_v20 }
 0x1e6   : > { %9545 = vmatprep.mubr.msk.f32.mxu1 %vm2321_vm12, %v2277_v10  ;;  %3535 = vst.msk [vmem:[#allocation2 + $0x130] sm:$0x3] %vm580_vm3, %v10680_v20 }
 0x1e7   : > { %1397 = vrot.lane.b32.xlu1 %v11059_v13, %s10429_s21  ;;  %9546 = vmatmul.mubr.msk.f32.gmra.mrb[18].mxu1 %vm2321_vm12, %v2278_v63  ;;  %v813_v41 = vpop.permute.xlu0 %812  ;;  %3534 = vst.msk [vmem:[#allocation2 + $0x128] sm:$0xff] %vm577_vm2, %v10680_v20 }
 0x1e8   : > { %900 = vst.msk [vmem:[#allocation3 + $0x48] sm:$0xff] %vm890_vm4, %v813_v41 }
 0x1e9   : > { %v2157_v34 = vpop.permute.xlu1 %2156  ;;  %822 = vrot.lane.b32.xlu0 %v11059_v13, %s10427_s17 }
 0x1eb   : > { %2166 = vrot.lane.b32.xlu1 %v11061_v9, %s10434_s30  ;;  %v1581_v10 = vpop.permute.xlu0 %1580 }
 0x1ed   : > { %v1769_v13 = vpop.permute.xlu1 %1768  ;;  %1590 = vrot.lane.b32.xlu0 %v11061_v9, %s10431_s23 }
 0x1ee   : > { %1861 = vst.msk [vmem:[#allocation3 + $0x20] sm:$0xff] %vm1856_vm9, %v1769_v13 }
 0x1ef   : > { %1015 = vrot.lane.b32.xlu1 %v11061_v9, %s10428_s18  ;;  %v1006_v63 = vpop.permute.xlu0 %1005  ;;  %v9514_v9 = vpop.f32.mrb[8].mxu1 }
 0x1f0   : > { %1093 = vst.msk [vmem:[#allocation3 + $0x48] sm:$0xff] %vm1083_vm5, %v1006_v63  ;;  %v538_v55 = vpop.f32.mrb[9].mxu1 }
 0x1f1   : > { %v1193_v41 = vpop.permute.xlu1 %1192  ;;  %1979 = vrot.lane.b32.xlu0 %v11111_v22, %s10433_s25 }
 0x1f2   : > { %1283 = vst.msk [vmem:[#allocation3 + $0x30] sm:$0xff] %vm1276_vm6, %v1193_v41  ;;  %v11430_v41 = vadd.f32 %v9514_v9, %v10565_v17 }
 0x1f3   : > { %1403 = vrot.lane.b32.xlu1 %v11111_v22, %s10429_s21  ;;  %v1771_v1 = vpop.permute.xlu0 %1770 }
 0x1f4   : > { %1862 = vst.msk [vmem:[#allocation3 + $0x28] sm:$0xff] %vm1856_vm9, %v1771_v1  ;;  %14796 = vst [vmem:[#allocation26_spill] sm:$0xff] %v11430_v41 }
 0x1f5   : > { %v1962_v13 = vpop.permute.xlu1 %1961  ;;  %2055 = vst.msk [vmem:[#allocation3 + $0x28] sm:$0xff] %vm2049_vm10, %v1964_v8  ;;  %828 = vrot.lane.b32.xlu0 %v11111_v22, %s10427_s17  ;;  %v11434_v8 = vadd.f32 %v10565_v17, %v538_v55 }
 0x1f6   : > { %2054 = vst.msk [vmem:[#allocation3 + $0x20] sm:$0xff] %vm2049_vm10, %v1962_v13 }
 0x1f7   : > { %2248 = vst.msk [vmem:[#allocation3 + $0x28] sm:$0xff] %vm2242_vm11, %v2157_v34  ;;  %2172 = vrot.lane.b32.xlu1 %v11115_v23, %s10434_s30  ;;  %v1195_v63 = vpop.permute.xlu0 %1194  ;;  %14797 = vst [vmem:[#allocation27_spill] sm:$0xff] %v11434_v8 }
 0x1f8   : > { %1284 = vst.msk [vmem:[#allocation3 + $0x38] sm:$0xff] %vm1276_vm6, %v1195_v63 }
 0x1f9   : > { %v1386_v1 = vpop.permute.xlu1 %1385  ;;  %1477 = vst.msk [vmem:[#allocation3 + $0x38] sm:$0xff] %vm1469_vm7, %v1388_v59  ;;  %1596 = vrot.lane.b32.xlu0 %v11115_v23, %s10431_s23 }
 0x1fa   : > { %1476 = vst.msk [vmem:[#allocation3 + $0x30] sm:$0xff] %vm1469_vm7, %v1386_v1 }
 0x1fb   : > { %659 = vst.msk [vmem:[#allocation2 + $0x141] sm:$0xff] %vm577_vm2, %v11430_v41  ;;  %1784 = vrot.lane.b32.xlu1 %v11117_v24, %s10432_s24  ;;  %658 = vst.msk [vmem:[#allocation2 + $0x139] sm:$0xff] %vm577_vm2, %v11434_v8  ;;  %v811_v22 = vpop.permute.xlu0 %810  ;;  %v9517_v41 = vpop.f32.mrb[10].mxu1 }
 0x1fc   : > { %1670 = vst.msk [vmem:[#allocation3 + $0x38] sm:$0xff] %vm1662_vm8, %v1581_v10  ;;  %v11504_v8 = vadd.f32 %v9517_v41, %v10565_v17  ;;  %v548_v42 = vpop.f32.mrb[11].mxu1 }
 0x1fd   : > { %899 = vst.msk [vmem:[#allocation3 + $0x40] sm:$0xff] %vm890_vm4, %v811_v22  ;;  %v2155_v55 = vpop.permute.xlu1 %2154  ;;  %1021 = vrot.lane.b32.xlu0 %v11115_v23, %s10428_s18 }
 0x1fe   : > { %2247 = vst.msk [vmem:[#allocation3 + $0x20] sm:$0xff] %vm2242_vm11, %v2155_v55  ;;  %v2280_v9 = vld [vmem:[#allocation3 + $0x28] sm:$0xff]  ;;  %14798 = vst [vmem:[#allocation28_spill] sm:$0xff] %v11504_v8 }
 0x1ff   : > { %1208 = vrot.lane.b32.xlu1 %v11117_v24, %s10430_s22  ;;  %v1579_v59 = vpop.permute.xlu0 %1578  ;;  %661 = vst.msk [vmem:[#allocation2 + $0x159] sm:$0xff] %vm577_vm2, %v11504_v8 }
 0x200   : > { %1669 = vst.msk [vmem:[#allocation3 + $0x30] sm:$0xff] %vm1662_vm8, %v1579_v59 }
 0x201   : > { %v1004_v34 = vpop.permute.xlu1 %1003  ;;  %1786 = vrot.lane.b32.xlu0 %v11119_v36, %s10432_s24 }
 0x202   : > { %1092 = vst.msk [vmem:[#allocation3 + $0x40] sm:$0xff] %vm1083_vm5, %v1004_v34  ;;  %v11459_v10 = vld [vmem:[#allocation2 + $0x138] sm:$0xff]  ;;  %v11472_v22 = vld [vmem:[#allocation2 + $0x140] sm:$0xff] }
 0x203   : > { %1977 = vrot.lane.b32.xlu1 %v11123_v39, %s10433_s25  ;;  %v1968_v13 = vpop.permute.xlu0 %1967  ;;  %724 = vst.msk [vmem:[#allocation3 + $0xd0] sm:$0xff] %vm577_vm2, %v11459_v10  ;;  %v11474_v55 = vld [vmem:[#allocation2 + $0x139] sm:$0xff]  ;;  %v11482_v34 = vld [vmem:[#allocation2 + $0x142] sm:$0xff]  ;;  %725 = vst.msk [vmem:[#allocation3 + $0xd8] sm:$0xff] %vm577_vm2, %v11472_v22 }
 0x204   : > { %v11480_v59 = vld [vmem:[#allocation2 + $0x13a] sm:$0xff] }
 0x205   : > { %v1392_v23 = vpop.permute.xlu1 %1391  ;;  %v2279_v24 = vld [vmem:[#allocation3 + $0x20] sm:$0xff]  ;;  %1210 = vrot.lane.b32.xlu0 %v11119_v36, %s10430_s22  ;;  %v11478_v36 = vld [vmem:[#allocation2 + $0x141] sm:$0xff]  ;;  %3536 = vst.msk [vmem:[#allocation2 + $0x138] sm:$0xff] %vm577_vm2, %v10680_v20 }
 0x206   : > { %9548 = vmatprep.mubr.msk.f32.mxu1 %vm2321_vm12, %v2279_v24  ;;  %3538 = vst.msk [vmem:[#allocation2 + $0x148] sm:$0x3] %vm580_vm3, %v10680_v20 }
 0x207   : > { %1401 = vrot.lane.b32.xlu1 %v11123_v39, %s10429_s21  ;;  %9549 = vmatmul.mubr.msk.f32.gmra.mrb[20].mxu1 %vm2321_vm12, %v2280_v9  ;;  %v817_v63 = vpop.permute.xlu0 %816  ;;  %3537 = vst.msk [vmem:[#allocation2 + $0x140] sm:$0xff] %vm577_vm2, %v10680_v20 }
 0x208   : > { %902 = vst.msk [vmem:[#allocation3 + $0x58] sm:$0xff] %vm890_vm4, %v817_v63 }
 0x209   : > { %v2161_v1 = vpop.permute.xlu1 %2160  ;;  %826 = vrot.lane.b32.xlu0 %v11123_v39, %s10427_s17 }
 0x20b   : > { %2170 = vrot.lane.b32.xlu1 %v11125_v25, %s10434_s30  ;;  %v1585_v24 = vpop.permute.xlu0 %1584 }
 0x20d   : > { %v1773_v39 = vpop.permute.xlu1 %1772  ;;  %1594 = vrot.lane.b32.xlu0 %v11125_v25, %s10431_s23 }
 0x20e   : > { %1863 = vst.msk [vmem:[#allocation3 + $0x30] sm:$0xff] %vm1856_vm9, %v1773_v39 }
 0x20f   : > { %1019 = vrot.lane.b32.xlu1 %v11125_v25, %s10428_s18  ;;  %v1010_v9 = vpop.permute.xlu0 %1009 }
 0x210   : > { %1095 = vst.msk [vmem:[#allocation3 + $0x58] sm:$0xff] %vm1083_vm5, %v1010_v9  ;;  %v11514_v9 = vadd.f32 %v10565_v17, %v548_v42 }
 0x211   : > { %v1197_v63 = vpop.permute.xlu1 %1196  ;;  %1983 = vrot.lane.b32.xlu0 %v10767_v60, %s10433_s25 }
 0x212   : > { %1285 = vst.msk [vmem:[#allocation3 + $0x40] sm:$0xff] %vm1276_vm6, %v1197_v63  ;;  %14799 = vst [vmem:[#allocation29_spill] sm:$0xff] %v11514_v9  ;;  %v9520_v63 = vpop.f32.mrb[12].mxu1 }
 0x213   : > { %2174 = vrot.lane.b32.xlu1 %v10791_v5, %s10434_s30  ;;  %v1775_v39 = vpop.permute.xlu0 %1774  ;;  %v11520_v41 = vadd.f32 %v9520_v63, %v10565_v17  ;;  %660 = vst.msk [vmem:[#allocation2 + $0x151] sm:$0xff] %vm577_vm2, %v11514_v9 }
 0x214   : > { %1864 = vst.msk [vmem:[#allocation3 + $0x38] sm:$0xff] %vm1856_vm9, %v1775_v39 }
 0x215   : > { %v1966_v25 = vpop.permute.xlu1 %1965  ;;  %2057 = vst.msk [vmem:[#allocation3 + $0x38] sm:$0xff] %vm2049_vm10, %v1968_v13  ;;  %830 = vrot.lane.b32.xlu0 %v10814_v11, %s10427_s17  ;;  %14800 = vst [vmem:[#allocation30_spill] sm:$0xff] %v11520_v41  ;;  %v558_v13 = vpop.f32.mrb[13].mxu1 }
 0x216   : > { %2056 = vst.msk [vmem:[#allocation3 + $0x30] sm:$0xff] %vm2049_vm10, %v1966_v25  ;;  %v11525_v11 = vadd.f32 %v10565_v17, %v558_v13  ;;  %v9523_v25 = vpop.f32.mrb[14].mxu1 }
 0x217   : > { %2250 = vst.msk [vmem:[#allocation3 + $0x38] sm:$0xff] %vm2242_vm11, %v2161_v1  ;;  %1407 = vrot.lane.b32.xlu1 %v10767_v60, %s10429_s21  ;;  %v1199_v39 = vpop.permute.xlu0 %1198  ;;  %v11531_v1 = vadd.f32 %v9523_v25, %v10565_v17  ;;  %v568_v63 = vpop.f32.mrb[15].mxu1  ;;  %v2712_v25 = vld [vmem:[%s14642_s1 + $0x68] sm:$0xff] }
 0x218   : > { %14801 = vst [vmem:[#allocation31_spill] sm:$0xff] %v11525_v11  ;;  %1286 = vst.msk [vmem:[#allocation3 + $0x48] sm:$0xff] %vm1276_vm6, %v1199_v39  ;;  %v11540_v13 = vadd.f32 %v10565_v17, %v568_v63  ;;  %9590 = vmatprep.subr.mxu0 %v2712_v25 }
 0x219   : > { %v1390_v42 = vpop.permute.xlu1 %1389  ;;  %663 = vst.msk [vmem:[#allocation2 + $0x171] sm:$0xff] %vm577_vm2, %v11520_v41  ;;  %14802 = vst [vmem:[#allocation32_spill] sm:$0xff] %v11531_v1  ;;  %1598 = vrot.lane.b32.xlu0 %v10791_v5, %s10431_s23  ;;  %9591 = vmatpush3.msra.mxu0 %v2712_v25 }
 0x21a   : > { %1479 = vst.msk [vmem:[#allocation3 + $0x48] sm:$0xff] %vm1469_vm7, %v1392_v23  ;;  %1478 = vst.msk [vmem:[#allocation3 + $0x40] sm:$0xff] %vm1469_vm7, %v1390_v42 }
 0x21b   : > { %662 = vst.msk [vmem:[#allocation2 + $0x169] sm:$0xff] %vm577_vm2, %v11525_v11  ;;  %14803 = vst [vmem:[#allocation33_spill] sm:$0xff] %v11540_v13  ;;  %2176 = vrot.lane.b32.xlu1 %v10769_v61, %s10434_s30  ;;  %v815_v23 = vpop.permute.xlu0 %814 }
 0x21c   : > { %1672 = vst.msk [vmem:[#allocation3 + $0x48] sm:$0xff] %vm1662_vm8, %v1585_v24 }
 0x21d   : > { %665 = vst.msk [vmem:[#allocation2 + $0x189] sm:$0xff] %vm577_vm2, %v11531_v1  ;;  %664 = vst.msk [vmem:[#allocation2 + $0x181] sm:$0xff] %vm577_vm2, %v11540_v13  ;;  %v2159_v39 = vpop.permute.xlu1 %2158  ;;  %832 = vrot.lane.b32.xlu0 %v10767_v60, %s10427_s17  ;;  %v11564_v60 = vld [vmem:[#allocation2 + $0x150] sm:$0xff]  ;;  %v11581_v1 = vld [vmem:[#allocation2 + $0x159] sm:$0xff] }
 0x21e   : > { %901 = vst.msk [vmem:[#allocation3 + $0x50] sm:$0xff] %vm890_vm4, %v815_v23  ;;  %v2282_v23 = vld [vmem:[#allocation3 + $0x38] sm:$0xff]  ;;  %v11583_v13 = vld [vmem:[#allocation2 + $0x152] sm:$0xff] }
 0x21f   : > { %2249 = vst.msk [vmem:[#allocation3 + $0x30] sm:$0xff] %vm2242_vm11, %v2159_v39  ;;  %1023 = vrot.lane.b32.xlu1 %v10791_v5, %s10428_s18  ;;  %v1583_v17 = vpop.permute.xlu0 %1582 }
 0x220   : > { %1671 = vst.msk [vmem:[#allocation3 + $0x40] sm:$0xff] %vm1662_vm8, %v1583_v17  ;;  %v11576_v17 = vld [vmem:[#allocation2 + $0x158] sm:$0xff] }
 0x221   : > { %v1008_v24 = vpop.permute.xlu1 %1007  ;;  %1600 = vrot.lane.b32.xlu0 %v10769_v61, %s10431_s23  ;;  %726 = vst.msk [vmem:[#allocation3 + $0xe0] sm:$0xff] %vm577_vm2, %v11564_v60  ;;  %727 = vst.msk [vmem:[#allocation3 + $0xe8] sm:$0xff] %vm577_vm2, %v11576_v17  ;;  %v11605_v11 = vld [vmem:[#allocation2 + $0x171] sm:$0xff] }
 0x222   : > { %1094 = vst.msk [vmem:[#allocation3 + $0x50] sm:$0xff] %vm1083_vm5, %v1008_v24  ;;  %v11578_v24 = vld [vmem:[#allocation2 + $0x151] sm:$0xff] }
 0x223   : > { %1792 = vrot.lane.b32.xlu1 %v11213_v28, %s10432_s24  ;;  %v1972_v5 = vpop.permute.xlu0 %1971  ;;  %3539 = vst.msk [vmem:[#allocation2 + $0x150] sm:$0xff] %vm577_vm2, %v10680_v20  ;;  %v11607_v8 = vld [vmem:[#allocation2 + $0x16a] sm:$0xff]  ;;  %v11609_v9 = vld [vmem:[#allocation2 + $0x172] sm:$0xff] }
 0x224   : > { %3544 = vst.msk [vmem:[#allocation2 + $0x178] sm:$0x3] %vm580_vm3, %v10680_v20  ;;  %v11626_v15 = vld [vmem:[#allocation2 + $0x180] sm:$0xff]  ;;  %v11628_v16 = vld [vmem:[#allocation2 + $0x188] sm:$0xff] }
 0x225   : > { %v11568_v42 = vpop.permute.xlu1 %1395  ;;  %1025 = vrot.lane.b32.xlu0 %v10769_v61, %s10428_s18  ;;  %v11585_v61 = vld [vmem:[#allocation2 + $0x15a] sm:$0xff]  ;;  %v11633_v0 = vld [vmem:[#allocation2 + $0x189] sm:$0xff] }
 0x226   : > { %v2281_v63 = vld [vmem:[#allocation3 + $0x30] sm:$0xff]  ;;  %3541 = vst.msk [vmem:[#allocation2 + $0x160] sm:$0x3] %vm580_vm3, %v10680_v20  ;;  %v11637_v45 = vld [vmem:[#allocation2 + $0x18a] sm:$0xff] }
 0x227   : > { %9551 = vmatprep.mubr.msk.f32.mxu1 %vm2321_vm12, %v2281_v63  ;;  %1216 = vrot.lane.b32.xlu1 %v11213_v28, %s10430_s22  ;;  %v821_v39 = vpop.permute.xlu0 %820  ;;  %3540 = vst.msk [vmem:[#allocation2 + $0x158] sm:$0xff] %vm577_vm2, %v10680_v20  ;;  %v11599_v63 = vld [vmem:[#allocation2 + $0x168] sm:$0xff] }
 0x228   : > { %9552 = vmatmul.mubr.msk.f32.gmra.mrb[22].mxu1 %vm2321_vm12, %v2282_v23  ;;  %904 = vst.msk [vmem:[#allocation3 + $0x68] sm:$0xff] %vm890_vm4, %v821_v39  ;;  %v11601_v23 = vld [vmem:[#allocation2 + $0x170] sm:$0xff]  ;;  %v11635_v2 = vld [vmem:[#allocation2 + $0x182] sm:$0xff] }
 0x229   : > { %v2165_v25 = vpop.permute.xlu1 %2164  ;;  %1794 = vrot.lane.b32.xlu0 %v11224_v52, %s10432_s24  ;;  %v11603_v39 = vld [vmem:[#allocation2 + $0x169] sm:$0xff]  ;;  %728 = vst.msk [vmem:[#allocation3 + $0xf0] sm:$0xff] %vm577_vm2, %v11599_v63  ;;  %729 = vst.msk [vmem:[#allocation3 + $0xf8] sm:$0xff] %vm577_vm2, %v11601_v23 }
 0x22a   : > { %3542 = vst.msk [vmem:[#allocation2 + $0x168] sm:$0xff] %vm577_vm2, %v10680_v20  ;;  %3543 = vst.msk [vmem:[#allocation2 + $0x170] sm:$0xff] %vm577_vm2, %v10680_v20 }
 0x22b   : > { %1985 = vrot.lane.b32.xlu1 %v11228_v3, %s10433_s25  ;;  %v1589_v28 = vpop.permute.xlu0 %1588  ;;  %3547 = vst.msk [vmem:[#allocation2 + $0x190] sm:$0x3] %vm580_vm3, %v10680_v20 }
 0x22d   : > { %v1777_v41 = vpop.permute.xlu1 %1776  ;;  %1218 = vrot.lane.b32.xlu0 %v11224_v52, %s10430_s22 }
 0x22e   : > { %1865 = vst.msk [vmem:[#allocation3 + $0x40] sm:$0xff] %vm1856_vm9, %v1777_v41  ;;  %v11630_v41 = vld [vmem:[#allocation2 + $0x181] sm:$0xff] }
 0x22f   : > { %1409 = vrot.lane.b32.xlu1 %v11228_v3, %s10429_s21  ;;  %v1014_v44 = vpop.permute.xlu0 %1013  ;;  %3545 = vst.msk [vmem:[#allocation2 + $0x180] sm:$0xff] %vm577_vm2, %v10680_v20  ;;  %3546 = vst.msk [vmem:[#allocation2 + $0x188] sm:$0xff] %vm577_vm2, %v10680_v20 }
 0x230   : > { %1097 = vst.msk [vmem:[#allocation3 + $0x68] sm:$0xff] %vm1083_vm5, %v1014_v44 }
 0x231   : > { %v1201_v52 = vpop.permute.xlu1 %1200  ;;  %1987 = vrot.lane.b32.xlu0 %v11234_v35, %s10433_s25 }
 0x232   : > { %1287 = vst.msk [vmem:[#allocation3 + $0x50] sm:$0xff] %vm1276_vm6, %v1201_v52 }
 0x233   : > { %2178 = vrot.lane.b32.xlu1 %v11236_v30, %s10434_s30  ;;  %v1779_v44 = vpop.permute.xlu0 %1778 }
 0x234   : > { %1866 = vst.msk [vmem:[#allocation3 + $0x48] sm:$0xff] %vm1856_vm9, %v1779_v44 }
 0x235   : > { %v1970_v49 = vpop.permute.xlu1 %1969  ;;  %2059 = vst.msk [vmem:[#allocation3 + $0x48] sm:$0xff] %vm2049_vm10, %v1972_v5  ;;  %834 = vrot.lane.b32.xlu0 %v11228_v3, %s10427_s17 }
 0x236   : > { %2058 = vst.msk [vmem:[#allocation3 + $0x40] sm:$0xff] %vm2049_vm10, %v1970_v49 }
 0x237   : > { %2252 = vst.msk [vmem:[#allocation3 + $0x48] sm:$0xff] %vm2242_vm11, %v2165_v25  ;;  %1411 = vrot.lane.b32.xlu1 %v11234_v35, %s10429_s21  ;;  %v1203_v52 = vpop.permute.xlu0 %1202 }
 0x238   : > { %1288 = vst.msk [vmem:[#allocation3 + $0x58] sm:$0xff] %vm1276_vm6, %v1203_v52 }
 0x239   : > { %v1394_v14 = vpop.permute.xlu1 %1393  ;;  %1481 = vst.msk [vmem:[#allocation3 + $0x58] sm:$0xff] %vm1469_vm7, %v11568_v42  ;;  %1602 = vrot.lane.b32.xlu0 %v11236_v30, %s10431_s23 }
 0x23a   : > { %1480 = vst.msk [vmem:[#allocation3 + $0x50] sm:$0xff] %vm1469_vm7, %v1394_v14 }
 0x23b   : > { %1674 = vst.msk [vmem:[#allocation3 + $0x58] sm:$0xff] %vm1662_vm8, %v1589_v28  ;;  %2180 = vrot.lane.b32.xlu1 %v11238_v31, %s10434_s30  ;;  %v819_v49 = vpop.permute.xlu0 %818 }
 0x23c   : > { %903 = vst.msk [vmem:[#allocation3 + $0x60] sm:$0xff] %vm890_vm4, %v819_v49 }
 0x23d   : > { %v2163_v3 = vpop.permute.xlu1 %2162  ;;  %836 = vrot.lane.b32.xlu0 %v11234_v35, %s10427_s17 }
 0x23e   : > { %2251 = vst.msk [vmem:[#allocation3 + $0x40] sm:$0xff] %vm2242_vm11, %v2163_v3  ;;  %v2284_v35 = vld [vmem:[#allocation3 + $0x48] sm:$0xff] }
 0x23f   : > { %1027 = vrot.lane.b32.xlu1 %v11236_v30, %s10428_s18  ;;  %v1587_v14 = vpop.permute.xlu0 %1586 }
 0x240   : > { %1673 = vst.msk [vmem:[#allocation3 + $0x50] sm:$0xff] %vm1662_vm8, %v1587_v14 }
 0x241   : > { %v1012_v5 = vpop.permute.xlu1 %1011  ;;  %1604 = vrot.lane.b32.xlu0 %v11238_v31, %s10431_s23 }
 0x242   : > { %1096 = vst.msk [vmem:[#allocation3 + $0x60] sm:$0xff] %vm1083_vm5, %v1012_v5 }
 0x243   : > { %1796 = vrot.lane.b32.xlu1 %v11293_v29, %s10432_s24  ;;  %v1976_v42 = vpop.permute.xlu0 %1975 }
 0x245   : > { %v1400_v25 = vpop.permute.xlu1 %1399  ;;  %v2283_v28 = vld [vmem:[#allocation3 + $0x40] sm:$0xff]  ;;  %1029 = vrot.lane.b32.xlu0 %v11238_v31, %s10428_s18 }
 0x246   : > { %9554 = vmatprep.mubr.msk.f32.mxu1 %vm2321_vm12, %v2283_v28 }
 0x247   : > { %1220 = vrot.lane.b32.xlu1 %v11293_v29, %s10430_s22  ;;  %9555 = vmatmul.mubr.msk.f32.gmra.mrb[24].mxu1 %vm2321_vm12, %v2284_v35  ;;  %v825_v30 = vpop.permute.xlu0 %824 }
 0x248   : > { %906 = vst.msk [vmem:[#allocation3 + $0x78] sm:$0xff] %vm890_vm4, %v825_v30 }
 0x249   : > { %v2169_v44 = vpop.permute.xlu1 %2168  ;;  %1798 = vrot.lane.b32.xlu0 %v11306_v51, %s10432_s24 }
 0x24b   : > { %1989 = vrot.lane.b32.xlu1 %v11310_v56, %s10433_s25  ;;  %v1593_v52 = vpop.permute.xlu0 %1592 }
 0x24d   : > { %v1781_v31 = vpop.permute.xlu1 %1780  ;;  %1222 = vrot.lane.b32.xlu0 %v11306_v51, %s10430_s22 }
 0x24e   : > { %1867 = vst.msk [vmem:[#allocation3 + $0x50] sm:$0xff] %vm1856_vm9, %v1781_v31 }
 0x24f   : > { %1413 = vrot.lane.b32.xlu1 %v11310_v56, %s10429_s21  ;;  %v1018_v29 = vpop.permute.xlu0 %1017 }
 0x250   : > { %1099 = vst.msk [vmem:[#allocation3 + $0x78] sm:$0xff] %vm1083_vm5, %v1018_v29 }
 0x251   : > { %v1205_v49 = vpop.permute.xlu1 %1204  ;;  %1991 = vrot.lane.b32.xlu0 %v11316_v58, %s10433_s25 }
 0x252   : > { %1289 = vst.msk [vmem:[#allocation3 + $0x60] sm:$0xff] %vm1276_vm6, %v1205_v49 }
 0x253   : > { %2182 = vrot.lane.b32.xlu1 %v11318_v19, %s10434_s30  ;;  %v1783_v3 = vpop.permute.xlu0 %1782 }
 0x254   : > { %1868 = vst.msk [vmem:[#allocation3 + $0x58] sm:$0xff] %vm1856_vm9, %v1783_v3 }
 0x255   : > { %v1974_v14 = vpop.permute.xlu1 %1973  ;;  %2061 = vst.msk [vmem:[#allocation3 + $0x58] sm:$0xff] %vm2049_vm10, %v1976_v42  ;;  %838 = vrot.lane.b32.xlu0 %v11310_v56, %s10427_s17 }
 0x256   : > { %2060 = vst.msk [vmem:[#allocation3 + $0x50] sm:$0xff] %vm2049_vm10, %v1974_v14 }
 0x257   : > { %2254 = vst.msk [vmem:[#allocation3 + $0x58] sm:$0xff] %vm2242_vm11, %v2169_v44  ;;  %1415 = vrot.lane.b32.xlu1 %v11316_v58, %s10429_s21  ;;  %v1207_v51 = vpop.permute.xlu0 %1206 }
 0x258   : > { %1290 = vst.msk [vmem:[#allocation3 + $0x68] sm:$0xff] %vm1276_vm6, %v1207_v51 }
 0x259   : > { %v1398_v5 = vpop.permute.xlu1 %1397  ;;  %1483 = vst.msk [vmem:[#allocation3 + $0x68] sm:$0xff] %vm1469_vm7, %v1400_v25  ;;  %1606 = vrot.lane.b32.xlu0 %v11318_v19, %s10431_s23 }
 0x25a   : > { %1482 = vst.msk [vmem:[#allocation3 + $0x60] sm:$0xff] %vm1469_vm7, %v1398_v5 }
 0x25b   : > { %1676 = vst.msk [vmem:[#allocation3 + $0x68] sm:$0xff] %vm1662_vm8, %v1593_v52  ;;  %2184 = vrot.lane.b32.xlu1 %v11320_v33, %s10434_s30  ;;  %v823_v56 = vpop.permute.xlu0 %822 }
 0x25c   : > { %905 = vst.msk [vmem:[#allocation3 + $0x70] sm:$0xff] %vm890_vm4, %v823_v56 }
 0x25d   : > { %v2167_v42 = vpop.permute.xlu1 %2166  ;;  %840 = vrot.lane.b32.xlu0 %v11316_v58, %s10427_s17 }
 0x25e   : > { %2253 = vst.msk [vmem:[#allocation3 + $0x50] sm:$0xff] %vm2242_vm11, %v2167_v42  ;;  %v2286_v58 = vld [vmem:[#allocation3 + $0x58] sm:$0xff]  ;;  %v11794_v42 = vld [vmem:[#allocation2 + $0x1a0] sm:$0xff] }
 0x25f   : > { %1031 = vrot.lane.b32.xlu1 %v11318_v19, %s10428_s18  ;;  %v1591_v25 = vpop.permute.xlu0 %1590 }
 0x260   : > { %1675 = vst.msk [vmem:[#allocation3 + $0x60] sm:$0xff] %vm1662_vm8, %v1591_v25  ;;  %v11806_v25 = vld [vmem:[#allocation2 + $0x1a2] sm:$0xff] }
 0x261   : > { %v1016_v28 = vpop.permute.xlu1 %1015  ;;  %1608 = vrot.lane.b32.xlu0 %v11320_v33, %s10431_s23 }
 0x262   : > { %1098 = vst.msk [vmem:[#allocation3 + $0x70] sm:$0xff] %vm1083_vm5, %v1016_v28 }
 0x263   : > { %1800 = vrot.lane.b32.xlu1 %v11375_v53, %s10432_s24  ;;  %v1980_v35 = vpop.permute.xlu0 %1979 }
 0x265   : > { %v1404_v30 = vpop.permute.xlu1 %1403  ;;  %v2285_v44 = vld [vmem:[#allocation3 + $0x50] sm:$0xff]  ;;  %1033 = vrot.lane.b32.xlu0 %v11320_v33, %s10428_s18 }
 0x266   : > { %9557 = vmatprep.mubr.msk.f32.mxu1 %vm2321_vm12, %v2285_v44 }
 0x267   : > { %1224 = vrot.lane.b32.xlu1 %v11375_v53, %s10430_s22  ;;  %9558 = vmatmul.mubr.msk.f32.gmra.mrb[26].mxu1 %vm2321_vm12, %v2286_v58  ;;  %v829_v19 = vpop.permute.xlu0 %828 }
 0x268   : > { %908 = vst.msk [vmem:[#allocation3 + $0x88] sm:$0xff] %vm890_vm4, %v829_v19 }
 0x269   : > { %v2173_v52 = vpop.permute.xlu1 %2172  ;;  %1802 = vrot.lane.b32.xlu0 %v11388_v7, %s10432_s24 }
 0x26b   : > { %1993 = vrot.lane.b32.xlu1 %v11392_v47, %s10433_s25  ;;  %v1597_v31 = vpop.permute.xlu0 %1596 }
 0x26d   : > { %v1785_v33 = vpop.permute.xlu1 %1784  ;;  %1226 = vrot.lane.b32.xlu0 %v11388_v7, %s10430_s22 }
 0x26e   : > { %1869 = vst.msk [vmem:[#allocation3 + $0x60] sm:$0xff] %vm1856_vm9, %v1785_v33  ;;  %v11846_v33 = vld [vmem:[%s14642_s1 + $0x58] ss:$0 sm:$0xff] }
 0x26f   : > { %1417 = vrot.lane.b32.xlu1 %v11392_v47, %s10429_s21  ;;  %v1022_v53 = vpop.permute.xlu0 %1021 }
 0x270   : > { %1101 = vst.msk [vmem:[#allocation3 + $0x88] sm:$0xff] %vm1083_vm5, %v1022_v53 }
 0x271   : > { %v1209_v29 = vpop.permute.xlu1 %1208  ;;  %1294 = vst.msk [vmem:[#allocation3 + $0x88] sm:$0xff] %vm1276_vm6, %v11207_v43  ;;  %1995 = vrot.lane.b32.xlu0 %v11398_v12, %s10433_s25 }
 0x272   : > { %1291 = vst.msk [vmem:[#allocation3 + $0x70] sm:$0xff] %vm1276_vm6, %v1209_v29  ;;  %v11855_v29 = vld [vmem:[%s14642_s1 + $0x60] ss:$0 sm:$0xff] }
 0x273   : > { %2186 = vrot.lane.b32.xlu1 %v11400_v57, %s10434_s30  ;;  %v1787_v49 = vpop.permute.xlu0 %1786 }
 0x274   : > { %1870 = vst.msk [vmem:[#allocation3 + $0x68] sm:$0xff] %vm1856_vm9, %v1787_v49 }
 0x275   : > { %v1978_v7 = vpop.permute.xlu1 %1977  ;;  %2063 = vst.msk [vmem:[#allocation3 + $0x68] sm:$0xff] %vm2049_vm10, %v1980_v35  ;;  %842 = vrot.lane.b32.xlu0 %v11392_v47, %s10427_s17 }
 0x276   : > { %2062 = vst.msk [vmem:[#allocation3 + $0x60] sm:$0xff] %vm2049_vm10, %v1978_v7 }
 0x277   : > { %2256 = vst.msk [vmem:[#allocation3 + $0x68] sm:$0xff] %vm2242_vm11, %v2173_v52  ;;  %1419 = vrot.lane.b32.xlu1 %v11398_v12, %s10429_s21  ;;  %v1211_v43 = vpop.permute.xlu0 %1210 }
 0x278   : > { %1292 = vst.msk [vmem:[#allocation3 + $0x78] sm:$0xff] %vm1276_vm6, %v1211_v43 }
 0x279   : > { %v1402_v3 = vpop.permute.xlu1 %1401  ;;  %1485 = vst.msk [vmem:[#allocation3 + $0x78] sm:$0xff] %vm1469_vm7, %v1404_v30  ;;  %1610 = vrot.lane.b32.xlu0 %v11400_v57, %s10431_s23 }
 0x27a   : > { %1484 = vst.msk [vmem:[#allocation3 + $0x70] sm:$0xff] %vm1469_vm7, %v1402_v3 }
 0x27b   : > { %1678 = vst.msk [vmem:[#allocation3 + $0x78] sm:$0xff] %vm1662_vm8, %v1597_v31  ;;  %2188 = vrot.lane.b32.xlu1 %v11402_v37, %s10434_s30  ;;  %v827_v47 = vpop.permute.xlu0 %826 }
 0x27c   : > { %1872 = vst.msk [vmem:[#allocation3 + $0x78] sm:$0xff] %vm1856_vm9, %v11199_v32 }
 0x27d   : > { %907 = vst.msk [vmem:[#allocation3 + $0x80] sm:$0xff] %vm890_vm4, %v827_v47  ;;  %v2171_v14 = vpop.permute.xlu1 %2170  ;;  %844 = vrot.lane.b32.xlu0 %v11398_v12, %s10427_s17 }
 0x27e   : > { %2255 = vst.msk [vmem:[#allocation3 + $0x60] sm:$0xff] %vm2242_vm11, %v2171_v14  ;;  %v2288_v12 = vld [vmem:[#allocation3 + $0x68] sm:$0xff] }
 0x27f   : > { %1035 = vrot.lane.b32.xlu1 %v11400_v57, %s10428_s18  ;;  %v1595_v51 = vpop.permute.xlu0 %1594 }
 0x280   : > { %1677 = vst.msk [vmem:[#allocation3 + $0x70] sm:$0xff] %vm1662_vm8, %v1595_v51 }
 0x281   : > { %v1020_v5 = vpop.permute.xlu1 %1019  ;;  %1871 = vst.msk [vmem:[#allocation3 + $0x70] sm:$0xff] %vm1856_vm9, %v11175_v6  ;;  %1612 = vrot.lane.b32.xlu0 %v11402_v37, %s10431_s23  ;;  %v11791_v6 = vld [vmem:[#allocation2 + $0x198] sm:$0xff] }
 0x282   : > { %1100 = vst.msk [vmem:[#allocation3 + $0x80] sm:$0xff] %vm1083_vm5, %v1020_v5 }
 0x283   : > { %2064 = vst.msk [vmem:[#allocation3 + $0x70] sm:$0xff] %vm2049_vm10, %v11201_v26  ;;  %1804 = vrot.lane.b32.xlu1 %v11459_v10, %s10432_s24  ;;  %v1984_v32 = vpop.permute.xlu0 %1983  ;;  %v11796_v26 = vld [vmem:[#allocation2 + $0x199] sm:$0xff] }
 0x284   : > { %1293 = vst.msk [vmem:[#allocation3 + $0x80] sm:$0xff] %vm1276_vm6, %v11185_v18  ;;  %v11802_v18 = vld [vmem:[#allocation2 + $0x1a1] sm:$0xff] }
 0x285   : > { %1486 = vst.msk [vmem:[#allocation3 + $0x80] sm:$0xff] %vm1469_vm7, %v11209_v27  ;;  %v2175_v57 = vpop.permute.xlu1 %2174  ;;  %v2287_v56 = vld [vmem:[#allocation3 + $0x60] sm:$0xff]  ;;  %1037 = vrot.lane.b32.xlu0 %v11402_v37, %s10428_s18  ;;  %v11804_v27 = vld [vmem:[#allocation2 + $0x19a] sm:$0xff] }
 0x286   : > { %2065 = vst.msk [vmem:[#allocation3 + $0x78] sm:$0xff] %vm2049_vm10, %v1984_v32  ;;  %9560 = vmatprep.mubr.msk.f32.mxu1 %vm2321_vm12, %v2287_v56 }
 0x287   : > { %2257 = vst.msk [vmem:[#allocation3 + $0x70] sm:$0xff] %vm2242_vm11, %v2175_v57  ;;  %1228 = vrot.lane.b32.xlu1 %v11459_v10, %s10430_s22  ;;  %9561 = vmatmul.mubr.msk.f32.gmra.mrb[28].mxu1 %vm2321_vm12, %v2288_v12  ;;  %v831_v37 = vpop.permute.xlu0 %830 }
 0x288   : > { %3548 = vst.msk [vmem:[#allocation2 + $0x198] sm:$0xff] %vm577_vm2, %v10680_v20  ;;  %3549 = vst.msk [vmem:[#allocation2 + $0x1a0] sm:$0xff] %vm577_vm2, %v10680_v20 }
 0x289   : > { %3550 = vst.msk [vmem:[#allocation2 + $0x1a8] sm:$0x3] %vm580_vm3, %v10680_v20  ;;  %v1408_v28 = vpop.permute.xlu1 %1407  ;;  %1806 = vrot.lane.b32.xlu0 %v11472_v22, %s10432_s24 }
 0x28a   : > { %909 = vst.msk [vmem:[#allocation3 + $0x90] sm:$0xff] %vm890_vm4, %v831_v37 }
 0x28b   : > { %1487 = vst.msk [vmem:[#allocation3 + $0x88] sm:$0xff] %vm1469_vm7, %v1408_v28  ;;  %1997 = vrot.lane.b32.xlu1 %v11474_v55, %s10433_s25  ;;  %v1599_v10 = vpop.permute.xlu0 %1598 }
 0x28c   : > { %1679 = vst.msk [vmem:[#allocation3 + $0x80] sm:$0xff] %vm1662_vm8, %v1599_v10 }
 0x28d   : > { %v2177_v35 = vpop.permute.xlu1 %2176  ;;  %1230 = vrot.lane.b32.xlu0 %v11472_v22, %s10430_s22 }
 0x28e   : > { %v2289_v30 = vld [vmem:[#allocation3 + $0x70] sm:$0xff]  ;;  %2258 = vst.msk [vmem:[#allocation3 + $0x78] sm:$0xff] %vm2242_vm11, %v2177_v35 }
 0x28f   : > { %9563 = vmatprep.mubr.msk.f32.mxu1 %vm2321_vm12, %v2289_v30  ;;  %1421 = vrot.lane.b32.xlu1 %v11474_v55, %s10429_s21  ;;  %v833_v44 = vpop.permute.xlu0 %832 }
 0x290   : > { %910 = vst.msk [vmem:[#allocation3 + $0x98] sm:$0xff] %vm890_vm4, %v833_v44 }
 0x291   : > { %v1024_v58 = vpop.permute.xlu1 %1023  ;;  %1999 = vrot.lane.b32.xlu0 %v11478_v36, %s10433_s25 }
 0x292   : > { %1102 = vst.msk [vmem:[#allocation3 + $0x90] sm:$0xff] %vm1083_vm5, %v1024_v58 }
 0x293   : > { %2190 = vrot.lane.b32.xlu1 %v11480_v59, %s10434_s30  ;;  %v1601_v19 = vpop.permute.xlu0 %1600 }
 0x294   : > { %1680 = vst.msk [vmem:[#allocation3 + $0x88] sm:$0xff] %vm1662_vm8, %v1601_v19 }
 0x295   : > { %v1793_v22 = vpop.permute.xlu1 %1792  ;;  %v2290_v52 = vld [vmem:[#allocation3 + $0x78] sm:$0xff]  ;;  %846 = vrot.lane.b32.xlu0 %v11474_v55, %s10427_s17 }
 0x296   : > { %1873 = vst.msk [vmem:[#allocation3 + $0x80] sm:$0xff] %vm1856_vm9, %v1793_v22  ;;  %9564 = vmatmul.mubr.msk.f32.gmra.mrb[30].mxu1 %vm2321_vm12, %v2290_v52 }
 0x297   : > { %1423 = vrot.lane.b32.xlu1 %v11478_v36, %s10429_s21  ;;  %v1026_v31 = vpop.permute.xlu0 %1025 }
 0x298   : > { %1103 = vst.msk [vmem:[#allocation3 + $0x98] sm:$0xff] %vm1083_vm5, %v1026_v31 }
 0x299   : > { %v1217_v53 = vpop.permute.xlu1 %1216  ;;  %1614 = vrot.lane.b32.xlu0 %v11480_v59, %s10431_s23 }
 0x29a   : > { %1295 = vst.msk [vmem:[#allocation3 + $0x90] sm:$0xff] %vm1276_vm6, %v1217_v53  ;;  %v9544_v55 = vpop.f32.mrb[16].mxu1 }
 0x29b   : > { %v2490_v49 = vadd.f32 %v9544_v55, %v11846_v33  ;;  %v2484_v7 = vpop.f32.mrb[17].mxu1  ;;  %2192 = vrot.lane.b32.xlu1 %v11482_v34, %s10434_s30  ;;  %v1795_v3 = vpop.permute.xlu0 %1794 }
 0x29c   : > { %v2485_v43 = vadd.f32 %v11846_v33, %v2484_v7  ;;  %1874 = vst.msk [vmem:[#allocation3 + $0x88] sm:$0xff] %vm1856_vm9, %v1795_v3 }
 0x29d   : > { %v2649_v47 = vmul.f32 %v11855_v29, %v2490_v49  ;;  %v1986_v14 = vpop.permute.xlu1 %1985  ;;  %848 = vrot.lane.b32.xlu0 %v11478_v36, %s10427_s17 }
 0x29e   : > { %v2648_v51 = vmul.f32 %v11855_v29, %v2485_v43  ;;  %2066 = vst.msk [vmem:[#allocation3 + $0x80] sm:$0xff] %vm2049_vm10, %v1986_v14 }
 0x29f   : > { %1039 = vrot.lane.b32.xlu1 %v11480_v59, %s10428_s18  ;;  %v1219_v32 = vpop.permute.xlu0 %1218  ;;  %v2681_v12 = vadd.f32 %v2649_v47, %v10713_v38 }
 0x2a0   : > { %v2680_v5 = vadd.f32 %v2648_v51, %v10716_v40  ;;  %1296 = vst.msk [vmem:[#allocation3 + $0x98] sm:$0xff] %vm1276_vm6, %v1219_v32 }
 0x2a1   : > { %v1410_v57 = vpop.permute.xlu1 %1409  ;;  %1616 = vrot.lane.b32.xlu0 %v11482_v34, %s10431_s23 }
 0x2a2   : > { %1488 = vst.msk [vmem:[#allocation3 + $0x90] sm:$0xff] %vm1469_vm7, %v1410_v57  ;;  %9592 = vmatprep.mubr.msk.f32.mxu0 %vm577_vm2, %v2680_v5 }
 0x2a3   : > { %9593 = vmatmul.mubr.msk.f32.vlgmr.msra.gmra.mrb[16].mxu0 %vm577_vm2, %v2681_v12  ;;  %1808 = vrot.lane.b32.xlu1 %v11564_v60, %s10432_s24  ;;  %v1988_v36 = vpop.permute.xlu0 %1987 }
 0x2a4   : > { %2067 = vst.msk [vmem:[#allocation3 + $0x88] sm:$0xff] %vm2049_vm10, %v1988_v36 }
 0x2a5   : > { %v2179_v40 = vpop.permute.xlu1 %2178  ;;  %1041 = vrot.lane.b32.xlu0 %v11482_v34, %s10428_s18 }
 0x2a6   : > { %2259 = vst.msk [vmem:[#allocation3 + $0x80] sm:$0xff] %vm2242_vm11, %v2179_v40 }
 0x2a7   : > { %1232 = vrot.lane.b32.xlu1 %v11564_v60, %s10430_s22  ;;  %v835_v38 = vpop.permute.xlu0 %834 }
 0x2a8   : > { %911 = vst.msk [vmem:[#allocation3 + $0xa0] sm:$0xff] %vm890_vm4, %v835_v38 }
 0x2a9   : > { %v1412_v59 = vpop.permute.xlu1 %1411  ;;  %1810 = vrot.lane.b32.xlu0 %v11576_v17, %s10432_s24 }
 0x2aa   : > { %1489 = vst.msk [vmem:[#allocation3 + $0x98] sm:$0xff] %vm1469_vm7, %v1412_v59 }
 0x2ab   : > { %2001 = vrot.lane.b32.xlu1 %v11578_v24, %s10433_s25  ;;  %v1603_v56 = vpop.permute.xlu0 %1602 }
 0x2ac   : > { %1681 = vst.msk [vmem:[#allocation3 + $0x90] sm:$0xff] %vm1662_vm8, %v1603_v56 }
 0x2ad   : > { %v2181_v37 = vpop.permute.xlu1 %2180  ;;  %v2291_v34 = vld [vmem:[#allocation3 + $0x80] sm:$0xff]  ;;  %1234 = vrot.lane.b32.xlu0 %v11576_v17, %s10430_s22 }
 0x2ae   : > { %2260 = vst.msk [vmem:[#allocation3 + $0x88] sm:$0xff] %vm2242_vm11, %v2181_v37  ;;  %9566 = vmatprep.mubr.msk.f32.mxu1 %vm2321_vm12, %v2291_v34 }
 0x2af   : > { %1425 = vrot.lane.b32.xlu1 %v11578_v24, %s10429_s21  ;;  %v837_v60 = vpop.permute.xlu0 %836 }
 0x2b0   : > { %912 = vst.msk [vmem:[#allocation3 + $0xa8] sm:$0xff] %vm890_vm4, %v837_v60 }
 0x2b1   : > { %v1028_v28 = vpop.permute.xlu1 %1027  ;;  %2003 = vrot.lane.b32.xlu0 %v11581_v1, %s10433_s25 }
 0x2b2   : > { %1104 = vst.msk [vmem:[#allocation3 + $0xa0] sm:$0xff] %vm1083_vm5, %v1028_v28 }
 0x2b3   : > { %2194 = vrot.lane.b32.xlu1 %v11583_v13, %s10434_s30  ;;  %v1605_v10 = vpop.permute.xlu0 %1604 }
 0x2b4   : > { %1682 = vst.msk [vmem:[#allocation3 + $0x98] sm:$0xff] %vm1662_vm8, %v1605_v10 }
 0x2b5   : > { %v1797_v17 = vpop.permute.xlu1 %1796  ;;  %v2292_v35 = vld [vmem:[#allocation3 + $0x88] sm:$0xff]  ;;  %850 = vrot.lane.b32.xlu0 %v11578_v24, %s10427_s17 }
 0x2b6   : > { %1875 = vst.msk [vmem:[#allocation3 + $0x90] sm:$0xff] %vm1856_vm9, %v1797_v17  ;;  %9567 = vmatmul.mubr.msk.f32.gmra.mrb[32].mxu1 %vm2321_vm12, %v2292_v35 }
 0x2b7   : > { %1427 = vrot.lane.b32.xlu1 %v11581_v1, %s10429_s21  ;;  %v1030_v30 = vpop.permute.xlu0 %1029 }
 0x2b8   : > { %1105 = vst.msk [vmem:[#allocation3 + $0xa8] sm:$0xff] %vm1083_vm5, %v1030_v30 }
 0x2b9   : > { %v1221_v44 = vpop.permute.xlu1 %1220  ;;  %1618 = vrot.lane.b32.xlu0 %v11583_v13, %s10431_s23 }
 0x2ba   : > { %1297 = vst.msk [vmem:[#allocation3 + $0xa0] sm:$0xff] %vm1276_vm6, %v1221_v44  ;;  %v9547_v58 = vpop.f32.mrb[18].mxu1 }
 0x2bb   : > { %v2500_v19 = vadd.f32 %v9547_v58, %v11846_v33  ;;  %2196 = vrot.lane.b32.xlu1 %v11585_v61, %s10434_s30  ;;  %v2494_v24 = vpop.f32.mrb[19].mxu1  ;;  %v1799_v52 = vpop.permute.xlu0 %1798 }
 0x2bc   : > { %v2495_v22 = vadd.f32 %v11846_v33, %v2494_v24  ;;  %1876 = vst.msk [vmem:[#allocation3 + $0x98] sm:$0xff] %vm1856_vm9, %v1799_v52 }
 0x2bd   : > { %v2651_v31 = vmul.f32 %v11855_v29, %v2500_v19  ;;  %v1990_v53 = vpop.permute.xlu1 %1989  ;;  %852 = vrot.lane.b32.xlu0 %v11581_v1, %s10427_s17 }
 0x2be   : > { %v2650_v55 = vmul.f32 %v11855_v29, %v2495_v22  ;;  %2068 = vst.msk [vmem:[#allocation3 + $0x90] sm:$0xff] %vm2049_vm10, %v1990_v53 }
 0x2bf   : > { %1043 = vrot.lane.b32.xlu1 %v11583_v13, %s10428_s18  ;;  %v1223_v7 = vpop.permute.xlu0 %1222  ;;  %v2683_v43 = vadd.f32 %v2651_v31, %v10731_v46 }
 0x2c0   : > { %v2682_v49 = vadd.f32 %v2650_v55, %v10736_v48  ;;  %1298 = vst.msk [vmem:[#allocation3 + $0xa8] sm:$0xff] %vm1276_vm6, %v1223_v7 }
 0x2c1   : > { %v1414_v3 = vpop.permute.xlu1 %1413  ;;  %1620 = vrot.lane.b32.xlu0 %v11585_v61, %s10431_s23 }
 0x2c2   : > { %1490 = vst.msk [vmem:[#allocation3 + $0xa0] sm:$0xff] %vm1469_vm7, %v1414_v3  ;;  %9595 = vmatprep.mubr.msk.f32.mxu0 %vm577_vm2, %v2682_v49 }
 0x2c3   : > { %1812 = vrot.lane.b32.xlu1 %v11599_v63, %s10432_s24  ;;  %9596 = vmatmul.mubr.msk.f32.gmra.mrb[18].mxu0 %vm577_vm2, %v2683_v43  ;;  %v1992_v1 = vpop.permute.xlu0 %1991 }
 0x2c4   : > { %2069 = vst.msk [vmem:[#allocation3 + $0x98] sm:$0xff] %vm2049_vm10, %v1992_v1 }
 0x2c5   : > { %v2183_v48 = vpop.permute.xlu1 %2182  ;;  %1045 = vrot.lane.b32.xlu0 %v11585_v61, %s10428_s18 }
 0x2c6   : > { %2261 = vst.msk [vmem:[#allocation3 + $0x90] sm:$0xff] %vm2242_vm11, %v2183_v48 }
 0x2c7   : > { %1236 = vrot.lane.b32.xlu1 %v11599_v63, %s10430_s22  ;;  %v839_v46 = vpop.permute.xlu0 %838 }
 0x2c8   : > { %913 = vst.msk [vmem:[#allocation3 + $0xb0] sm:$0xff] %vm890_vm4, %v839_v46 }
 0x2c9   : > { %v1416_v13 = vpop.permute.xlu1 %1415  ;;  %1814 = vrot.lane.b32.xlu0 %v11601_v23, %s10432_s24 }
 0x2ca   : > { %1491 = vst.msk [vmem:[#allocation3 + $0xa8] sm:$0xff] %vm1469_vm7, %v1416_v13 }
 0x2cb   : > { %2005 = vrot.lane.b32.xlu1 %v11603_v39, %s10433_s25  ;;  %v1607_v47 = vpop.permute.xlu0 %1606 }
 0x2cc   : > { %1683 = vst.msk [vmem:[#allocation3 + $0xa0] sm:$0xff] %vm1662_vm8, %v1607_v47 }
 0x2cd   : > { %v2185_v14 = vpop.permute.xlu1 %2184  ;;  %v2293_v61 = vld [vmem:[#allocation3 + $0x90] sm:$0xff]  ;;  %1238 = vrot.lane.b32.xlu0 %v11601_v23, %s10430_s22 }
 0x2ce   : > { %2262 = vst.msk [vmem:[#allocation3 + $0x98] sm:$0xff] %vm2242_vm11, %v2185_v14  ;;  %9569 = vmatprep.mubr.msk.f32.mxu1 %vm2321_vm12, %v2293_v61 }
 0x2cf   : > { %1429 = vrot.lane.b32.xlu1 %v11603_v39, %s10429_s21  ;;  %v841_v63 = vpop.permute.xlu0 %840 }
 0x2d0   : > { %914 = vst.msk [vmem:[#allocation3 + $0xb8] sm:$0xff] %vm890_vm4, %v841_v63 }
 0x2d1   : > { %v1032_v51 = vpop.permute.xlu1 %1031  ;;  %2007 = vrot.lane.b32.xlu0 %v11605_v11, %s10433_s25 }
 0x2d2   : > { %1106 = vst.msk [vmem:[#allocation3 + $0xb0] sm:$0xff] %vm1083_vm5, %v1032_v51 }
 0x2d3   : > { %2198 = vrot.lane.b32.xlu1 %v11607_v8, %s10434_s30  ;;  %v1609_v5 = vpop.permute.xlu0 %1608 }
 0x2d4   : > { %1684 = vst.msk [vmem:[#allocation3 + $0xa8] sm:$0xff] %vm1662_vm8, %v1609_v5 }
 0x2d5   : > { %v1801_v23 = vpop.permute.xlu1 %1800  ;;  %v2294_v32 = vld [vmem:[#allocation3 + $0x98] sm:$0xff]  ;;  %854 = vrot.lane.b32.xlu0 %v11603_v39, %s10427_s17 }
 0x2d6   : > { %1877 = vst.msk [vmem:[#allocation3 + $0xa0] sm:$0xff] %vm1856_vm9, %v1801_v23  ;;  %9570 = vmatmul.mubr.msk.f32.gmra.mrb[34].mxu1 %vm2321_vm12, %v2294_v32 }
 0x2d7   : > { %1431 = vrot.lane.b32.xlu1 %v11605_v11, %s10429_s21  ;;  %v1034_v12 = vpop.permute.xlu0 %1033 }
 0x2d8   : > { %1107 = vst.msk [vmem:[#allocation3 + $0xb8] sm:$0xff] %vm1083_vm5, %v1034_v12 }
 0x2d9   : > { %v1225_v57 = vpop.permute.xlu1 %1224  ;;  %1622 = vrot.lane.b32.xlu0 %v11607_v8, %s10431_s23 }
 0x2da   : > { %1299 = vst.msk [vmem:[#allocation3 + $0xb0] sm:$0xff] %vm1276_vm6, %v1225_v57  ;;  %v9550_v36 = vpop.f32.mrb[20].mxu1 }
 0x2db   : > { %v2510_v40 = vadd.f32 %v9550_v36, %v11846_v33  ;;  %2200 = vrot.lane.b32.xlu1 %v11609_v9, %s10434_s30  ;;  %v2504_v39 = vpop.f32.mrb[21].mxu1  ;;  %v1803_v59 = vpop.permute.xlu0 %1802 }
 0x2dc   : > { %v2505_v38 = vadd.f32 %v11846_v33, %v2504_v39  ;;  %1878 = vst.msk [vmem:[#allocation3 + $0xa8] sm:$0xff] %vm1856_vm9, %v1803_v59 }
 0x2dd   : > { %v2653_v56 = vmul.f32 %v11855_v29, %v2510_v40  ;;  %v1994_v37 = vpop.permute.xlu1 %1993  ;;  %856 = vrot.lane.b32.xlu0 %v11605_v11, %s10427_s17 }
 0x2de   : > { %v2652_v34 = vmul.f32 %v11855_v29, %v2505_v38  ;;  %2070 = vst.msk [vmem:[#allocation3 + $0xa0] sm:$0xff] %vm2049_vm10, %v1994_v37  ;;  %v14804_v38 = vld [vmem:[#allocation13_spill] sm:$0xff] }
 0x2df   : > { %1047 = vrot.lane.b32.xlu1 %v11607_v8, %s10428_s18  ;;  %v1227_v28 = vpop.permute.xlu0 %1226  ;;  %v2685_v10 = vadd.f32 %v2653_v56, %v10743_v50 }
 0x2e0   : > { %v2684_v60 = vadd.f32 %v2652_v34, %v10748_v54  ;;  %1300 = vst.msk [vmem:[#allocation3 + $0xb8] sm:$0xff] %vm1276_vm6, %v1227_v28 }
 0x2e1   : > { %v1418_v17 = vpop.permute.xlu1 %1417  ;;  %1624 = vrot.lane.b32.xlu0 %v11609_v9, %s10431_s23 }
 0x2e2   : > { %1492 = vst.msk [vmem:[#allocation3 + $0xb0] sm:$0xff] %vm1469_vm7, %v1418_v17  ;;  %9598 = vmatprep.mubr.msk.f32.mxu0 %vm577_vm2, %v2684_v60 }
 0x2e3   : > { %1816 = vrot.lane.b32.xlu1 %v11626_v15, %s10432_s24  ;;  %9599 = vmatmul.mubr.msk.f32.gmra.mrb[20].mxu0 %vm577_vm2, %v2685_v10  ;;  %v1996_v8 = vpop.permute.xlu0 %1995 }
 0x2e4   : > { %2071 = vst.msk [vmem:[#allocation3 + $0xa8] sm:$0xff] %vm2049_vm10, %v1996_v8 }
 0x2e5   : > { %v2187_v54 = vpop.permute.xlu1 %2186  ;;  %1049 = vrot.lane.b32.xlu0 %v11609_v9, %s10428_s18 }
 0x2e6   : > { %2263 = vst.msk [vmem:[#allocation3 + $0xa0] sm:$0xff] %vm2242_vm11, %v2187_v54 }
 0x2e7   : > { %1240 = vrot.lane.b32.xlu1 %v11626_v15, %s10430_s22  ;;  %v843_v50 = vpop.permute.xlu0 %842  ;;  %v3168_v15 = vld [vmem:[%s14642_s1 + $0x78] sm:$0xf] }
 0x2e8   : > { %915 = vst.msk [vmem:[#allocation3 + $0xc0] sm:$0xff] %vm890_vm4, %v843_v50  ;;  %9640 = vmatprep.subr.msk.mxu1 %vm348_vm0, %v3168_v15 }
 0x2e9   : > { %v1420_v11 = vpop.permute.xlu1 %1419  ;;  %1818 = vrot.lane.b32.xlu0 %v11628_v16, %s10432_s24  ;;  %9641 = vmatpush3.msk.msra.mxu1 %vm348_vm0, %v3168_v15 }
 0x2ea   : > { %1493 = vst.msk [vmem:[#allocation3 + $0xb8] sm:$0xff] %vm1469_vm7, %v1420_v11 }
 0x2eb   : > { %2009 = vrot.lane.b32.xlu1 %v11630_v41, %s10433_s25  ;;  %v1611_v35 = vpop.permute.xlu0 %1610 }
 0x2ec   : > { %1685 = vst.msk [vmem:[#allocation3 + $0xb0] sm:$0xff] %vm1662_vm8, %v1611_v35 }
 0x2ed   : > { %v2189_v30 = vpop.permute.xlu1 %2188  ;;  %v2295_v9 = vld [vmem:[#allocation3 + $0xa0] sm:$0xff]  ;;  %1242 = vrot.lane.b32.xlu0 %v11628_v16, %s10430_s22 }
 0x2ee   : > { %2264 = vst.msk [vmem:[#allocation3 + $0xa8] sm:$0xff] %vm2242_vm11, %v2189_v30  ;;  %9572 = vmatprep.mubr.msk.f32.mxu1 %vm2321_vm12, %v2295_v9 }
 0x2ef   : > { %1433 = vrot.lane.b32.xlu1 %v11630_v41, %s10429_s21  ;;  %v845_v44 = vpop.permute.xlu0 %844 }
 0x2f0   : > { %916 = vst.msk [vmem:[#allocation3 + $0xc8] sm:$0xff] %vm890_vm4, %v845_v44 }
 0x2f1   : > { %v1036_v58 = vpop.permute.xlu1 %1035  ;;  %2011 = vrot.lane.b32.xlu0 %v11633_v0, %s10433_s25 }
 0x2f2   : > { %1108 = vst.msk [vmem:[#allocation3 + $0xc0] sm:$0xff] %vm1083_vm5, %v1036_v58 }
 0x2f3   : > { %2202 = vrot.lane.b32.xlu1 %v11635_v2, %s10434_s30  ;;  %v1613_v16 = vpop.permute.xlu0 %1612 }
 0x2f4   : > { %1686 = vst.msk [vmem:[#allocation3 + $0xb8] sm:$0xff] %vm1662_vm8, %v1613_v16 }
 0x2f5   : > { %v1805_v41 = vpop.permute.xlu1 %1804  ;;  %v2296_v19 = vld [vmem:[#allocation3 + $0xa8] sm:$0xff]  ;;  %1435 = vrot.lane.b32.xlu0 %v11633_v0, %s10429_s21 }
 0x2f6   : > { %1879 = vst.msk [vmem:[#allocation3 + $0xb0] sm:$0xff] %vm1856_vm9, %v1805_v41  ;;  %9573 = vmatmul.mubr.msk.f32.gmra.mrb[36].mxu1 %vm2321_vm12, %v2296_v19 }
 0x2f7   : > { %1626 = vrot.lane.b32.xlu1 %v11635_v2, %s10431_s23  ;;  %v1038_v24 = vpop.permute.xlu0 %1037 }
 0x2f8   : > { %1109 = vst.msk [vmem:[#allocation3 + $0xc8] sm:$0xff] %vm1083_vm5, %v1038_v24 }
 0x2f9   : > { %v1229_v22 = vpop.permute.xlu1 %1228  ;;  %2204 = vrot.lane.b32.xlu0 %v11637_v45, %s10434_s30 }
 0x2fa   : > { %1301 = vst.msk [vmem:[#allocation3 + $0xc0] sm:$0xff] %vm1276_vm6, %v1229_v22 }
 0x2fb   : > { %v9553_v52 = vpop.f32.mrb[22].mxu1  ;;  %1628 = vrot.lane.b32.xlu1 %v11637_v45, %s10431_s23  ;;  %v1807_v55 = vpop.permute.xlu0 %1806 }
 0x2fc   : > { %v2520_v31 = vadd.f32 %v9553_v52, %v11846_v33  ;;  %v2514_v0 = vpop.f32.mrb[23].mxu1  ;;  %1880 = vst.msk [vmem:[#allocation3 + $0xb8] sm:$0xff] %vm1856_vm9, %v1807_v55  ;;  %v14805_v52 = vld [vmem:[#allocation15_spill] sm:$0xff] }
 0x2fd   : > { %v2515_v53 = vadd.f32 %v11846_v33, %v2514_v0  ;;  %v1998_v49 = vpop.permute.xlu1 %1997  ;;  %1820 = vrot.lane.b32.xlu0 %v11791_v6, %s10432_s24 }
 0x2fe   : > { %v2655_v2 = vmul.f32 %v11855_v29, %v2520_v31  ;;  %2072 = vst.msk [vmem:[#allocation3 + $0xb0] sm:$0xff] %vm2049_vm10, %v1998_v49 }
 0x2ff   : > { %v2654_v7 = vmul.f32 %v11855_v29, %v2515_v53  ;;  %1822 = vrot.lane.b32.xlu1 %v11794_v42, %s10432_s24  ;;  %v1231_v43 = vpop.permute.xlu0 %1230  ;;  %v14806_v53 = vld [vmem:[#allocation14_spill] sm:$0xff] }
 0x300   : > { %v2687_v3 = vadd.f32 %v2655_v2, %v10772_v62  ;;  %1302 = vst.msk [vmem:[#allocation3 + $0xc8] sm:$0xff] %vm1276_vm6, %v1231_v43 }
 0x301   : > { %v2686_v45 = vadd.f32 %v2654_v7, %v10789_v4  ;;  %v1422_v1 = vpop.permute.xlu1 %1421  ;;  %2013 = vrot.lane.b32.xlu0 %v11796_v26, %s10433_s25 }
 0x302   : > { %1494 = vst.msk [vmem:[#allocation3 + $0xc0] sm:$0xff] %vm1469_vm7, %v1422_v1 }
 0x303   : > { %9601 = vmatprep.mubr.msk.f32.mxu0 %vm577_vm2, %v2686_v45  ;;  %2015 = vrot.lane.b32.xlu1 %v11802_v18, %s10433_s25  ;;  %v2000_v6 = vpop.permute.xlu0 %1999 }
 0x304   : > { %9602 = vmatmul.mubr.msk.f32.gmra.mrb[22].mxu0 %vm577_vm2, %v2687_v3  ;;  %2073 = vst.msk [vmem:[#allocation3 + $0xb8] sm:$0xff] %vm2049_vm10, %v2000_v6 }
 0x305   : > { %v2191_v4 = vpop.permute.xlu1 %2190  ;;  %2206 = vrot.lane.b32.xlu0 %v11804_v27, %s10434_s30 }
 0x306   : > { %2265 = vst.msk [vmem:[#allocation3 + $0xb0] sm:$0xff] %vm2242_vm11, %v2191_v4 }
 0x307   : > { %2208 = vrot.lane.b32.xlu1 %v11806_v25, %s10434_s30  ;;  %v847_v62 = vpop.permute.xlu0 %846 }
 0x308   : > { %917 = vst.msk [vmem:[#allocation3 + $0xd0] sm:$0xff] %vm890_vm4, %v847_v62 }
 0x309   : > { %v1424_v42 = vpop.permute.xlu1 %1423 }
 0x30a   : > { %1495 = vst.msk [vmem:[#allocation3 + $0xc8] sm:$0xff] %vm1469_vm7, %v1424_v42 }
 0x30b   : > { %v1615_v26 = vpop.permute.xlu0 %1614 }
 0x30c   : > { %1687 = vst.msk [vmem:[#allocation3 + $0xc0] sm:$0xff] %vm1662_vm8, %v1615_v26 }
 0x30d   : > { %v2193_v18 = vpop.permute.xlu1 %2192  ;;  %v2297_v48 = vld [vmem:[#allocation3 + $0xb0] sm:$0xff] }
 0x30e   : > { %2266 = vst.msk [vmem:[#allocation3 + $0xb8] sm:$0xff] %vm2242_vm11, %v2193_v18  ;;  %9575 = vmatprep.mubr.msk.f32.mxu1 %vm2321_vm12, %v2297_v48 }
 0x30f   : > { %v849_v46 = vpop.permute.xlu0 %848 }
 0x310   : > { %918 = vst.msk [vmem:[#allocation3 + $0xd8] sm:$0xff] %vm890_vm4, %v849_v46 }
 0x311   : > { %v1040_v27 = vpop.permute.xlu1 %1039 }
 0x312   : > { %1110 = vst.msk [vmem:[#allocation3 + $0xd0] sm:$0xff] %vm1083_vm5, %v1040_v27 }
 0x313   : > { %v1617_v25 = vpop.permute.xlu0 %1616 }
 0x314   : > { %1688 = vst.msk [vmem:[#allocation3 + $0xc8] sm:$0xff] %vm1662_vm8, %v1617_v25 }
 0x315   : > { %v1809_v13 = vpop.permute.xlu1 %1808  ;;  %v2298_v47 = vld [vmem:[#allocation3 + $0xb8] sm:$0xff] }
 0x316   : > { %1881 = vst.msk [vmem:[#allocation3 + $0xc0] sm:$0xff] %vm1856_vm9, %v1809_v13  ;;  %9576 = vmatmul.mubr.msk.f32.gmra.mrb[38].mxu1 %vm2321_vm12, %v2298_v47 }
 0x317   : > { %v1042_v14 = vpop.permute.xlu0 %1041 }
 0x318   : > { %1111 = vst.msk [vmem:[#allocation3 + $0xd8] sm:$0xff] %vm1083_vm5, %v1042_v14 }
 0x319   : > { %v1233_v61 = vpop.permute.xlu1 %1232 }
 0x31a   : > { %1303 = vst.msk [vmem:[#allocation3 + $0xd0] sm:$0xff] %vm1276_vm6, %v1233_v61  ;;  %v9556_v63 = vpop.f32.mrb[24].mxu1 }
 0x31b   : > { %v2530_v51 = vadd.f32 %v9556_v63, %v11846_v33  ;;  %v2524_v5 = vpop.f32.mrb[25].mxu1  ;;  %v1811_v32 = vpop.permute.xlu0 %1810 }
 0x31c   : > { %v2525_v23 = vadd.f32 %v11846_v33, %v2524_v5  ;;  %1882 = vst.msk [vmem:[#allocation3 + $0xc8] sm:$0xff] %vm1856_vm9, %v1811_v32  ;;  %v14807_v5 = vld [vmem:[#allocation17_spill] sm:$0xff] }
 0x31d   : > { %v2657_v12 = vmul.f32 %v11855_v29, %v2530_v51  ;;  %v2002_v57 = vpop.permute.xlu1 %2001 }
 0x31e   : > { %v2656_v36 = vmul.f32 %v11855_v29, %v2525_v23  ;;  %2074 = vst.msk [vmem:[#allocation3 + $0xc0] sm:$0xff] %vm2049_vm10, %v2002_v57 }
 0x31f   : > { %v1235_v39 = vpop.permute.xlu0 %1234  ;;  %v2689_v59 = vadd.f32 %v2657_v12, %v14804_v38  ;;  %v14808_v12 = vld [vmem:[#allocation16_spill] sm:$0xff] }
 0x320   : > { %v2688_v40 = vadd.f32 %v2656_v36, %v10833_v21  ;;  %1304 = vst.msk [vmem:[#allocation3 + $0xd8] sm:$0xff] %vm1276_vm6, %v1235_v39 }
 0x321   : > { %v1426_v56 = vpop.permute.xlu1 %1425 }
 0x322   : > { %1496 = vst.msk [vmem:[#allocation3 + $0xd0] sm:$0xff] %vm1469_vm7, %v1426_v56  ;;  %9604 = vmatprep.mubr.msk.f32.mxu0 %vm577_vm2, %v2688_v40 }
 0x323   : > { %9605 = vmatmul.mubr.msk.f32.gmra.mrb[24].mxu0 %vm577_vm2, %v2689_v59  ;;  %v2004_v37 = vpop.permute.xlu0 %2003 }
 0x324   : > { %2075 = vst.msk [vmem:[#allocation3 + $0xc8] sm:$0xff] %vm2049_vm10, %v2004_v37 }
 0x325   : > { %v2195_v34 = vpop.permute.xlu1 %2194 }
 0x326   : > { %2267 = vst.msk [vmem:[#allocation3 + $0xc0] sm:$0xff] %vm2242_vm11, %v2195_v34 }
 0x327   : > { %v851_v60 = vpop.permute.xlu0 %850 }
 0x328   : > { %919 = vst.msk [vmem:[#allocation3 + $0xe0] sm:$0xff] %vm890_vm4, %v851_v60 }
 0x329   : > { %v1428_v21 = vpop.permute.xlu1 %1427 }
 0x32a   : > { %1497 = vst.msk [vmem:[#allocation3 + $0xd8] sm:$0xff] %vm1469_vm7, %v1428_v21 }
 0x32b   : > { %v1619_v28 = vpop.permute.xlu0 %1618 }
 0x32c   : > { %1689 = vst.msk [vmem:[#allocation3 + $0xd0] sm:$0xff] %vm1662_vm8, %v1619_v28 }
 0x32d   : > { %v2197_v10 = vpop.permute.xlu1 %2196  ;;  %v2299_v17 = vld [vmem:[#allocation3 + $0xc0] sm:$0xff] }
 0x32e   : > { %2268 = vst.msk [vmem:[#allocation3 + $0xc8] sm:$0xff] %vm2242_vm11, %v2197_v10  ;;  %9578 = vmatprep.mubr.msk.f32.mxu1 %vm2321_vm12, %v2299_v17 }
 0x32f   : > { %v853_v8 = vpop.permute.xlu0 %852 }
 0x330   : > { %920 = vst.msk [vmem:[#allocation3 + $0xe8] sm:$0xff] %vm890_vm4, %v853_v8 }
 0x331   : > { %v1044_v54 = vpop.permute.xlu1 %1043 }
 0x332   : > { %1112 = vst.msk [vmem:[#allocation3 + $0xe0] sm:$0xff] %vm1083_vm5, %v1044_v54  ;;  %v14809_v54 = vld [vmem:[#allocation19_spill] sm:$0xff] }
 0x333   : > { %v1621_v50 = vpop.permute.xlu0 %1620 }
 0x334   : > { %1690 = vst.msk [vmem:[#allocation3 + $0xd8] sm:$0xff] %vm1662_vm8, %v1621_v50 }
 0x335   : > { %v1813_v11 = vpop.permute.xlu1 %1812  ;;  %v2300_v35 = vld [vmem:[#allocation3 + $0xc8] sm:$0xff] }
 0x336   : > { %1883 = vst.msk [vmem:[#allocation3 + $0xd0] sm:$0xff] %vm1856_vm9, %v1813_v11  ;;  %9579 = vmatmul.mubr.msk.f32.gmra.mrb[40].mxu1 %vm2321_vm12, %v2300_v35  ;;  %v14810_v11 = vld [vmem:[#allocation18_spill] sm:$0xff] }
 0x337   : > { %v1046_v30 = vpop.permute.xlu0 %1045 }
 0x338   : > { %1113 = vst.msk [vmem:[#allocation3 + $0xe8] sm:$0xff] %vm1083_vm5, %v1046_v30 }
 0x339   : > { %v1237_v9 = vpop.permute.xlu1 %1236 }
 0x33a   : > { %1305 = vst.msk [vmem:[#allocation3 + $0xe0] sm:$0xff] %vm1276_vm6, %v1237_v9  ;;  %v9559_v15 = vpop.f32.mrb[26].mxu1 }
 0x33b   : > { %v2540_v44 = vadd.f32 %v9559_v15, %v11846_v33  ;;  %v2534_v58 = vpop.f32.mrb[27].mxu1  ;;  %v1815_v41 = vpop.permute.xlu0 %1814 }
 0x33c   : > { %v2535_v16 = vadd.f32 %v11846_v33, %v2534_v58  ;;  %1884 = vst.msk [vmem:[#allocation3 + $0xd8] sm:$0xff] %vm1856_vm9, %v1815_v41 }
 0x33d   : > { %v2659_v19 = vmul.f32 %v11855_v29, %v2540_v44  ;;  %v2006_v24 = vpop.permute.xlu1 %2005 }
 0x33e   : > { %v2658_v22 = vmul.f32 %v11855_v29, %v2535_v16  ;;  %2076 = vst.msk [vmem:[#allocation3 + $0xd0] sm:$0xff] %vm2049_vm10, %v2006_v24  ;;  %v12162_v16 = vld [vmem:[%s14642_s1 + $0x70] ss:$0 sm:$0xff] }
 0x33f   : > { %v1239_v0 = vpop.permute.xlu0 %1238  ;;  %v2691_v55 = vadd.f32 %v2659_v19, %v14806_v53 }
 0x340   : > { %v2690_v31 = vadd.f32 %v2658_v22, %v14805_v52  ;;  %1306 = vst.msk [vmem:[#allocation3 + $0xe8] sm:$0xff] %vm1276_vm6, %v1239_v0  ;;  %v10347_v0 = vld [vmem:[%s10521_s10] sm:$0xff] }
 0x341   : > { %v1430_v2 = vpop.permute.xlu1 %1429 }
 0x342   : > { %1498 = vst.msk [vmem:[#allocation3 + $0xe0] sm:$0xff] %vm1469_vm7, %v1430_v2  ;;  %9607 = vmatprep.mubr.msk.f32.mxu0 %vm577_vm2, %v2690_v31 }
 0x343   : > { %9608 = vmatmul.mubr.msk.f32.gmra.mrb[26].mxu0 %vm577_vm2, %v2691_v55  ;;  %v2008_v49 = vpop.permute.xlu0 %2007  ;;  %v10348_v55 = vld [vmem:[%s10521_s10 + $0x8] sm:$0xff] }
 0x344   : > { %2077 = vst.msk [vmem:[#allocation3 + $0xd8] sm:$0xff] %vm2049_vm10, %v2008_v49 }
 0x345   : > { %v2199_v7 = vpop.permute.xlu1 %2198 }
 0x346   : > { %2269 = vst.msk [vmem:[#allocation3 + $0xd0] sm:$0xff] %vm2242_vm11, %v2199_v7 }
 0x347   : > { %v855_v45 = vpop.permute.xlu0 %854 }
 0x348   : > { %921 = vst.msk [vmem:[#allocation3 + $0xf0] sm:$0xff] %vm890_vm4, %v855_v45 }
 0x349   : > { %v1432_v43 = vpop.permute.xlu1 %1431 }
 0x34a   : > { %1499 = vst.msk [vmem:[#allocation3 + $0xe8] sm:$0xff] %vm1469_vm7, %v1432_v43 }
 0x34b   : > { %v1623_v3 = vpop.permute.xlu0 %1622 }
 0x34c   : > { %1691 = vst.msk [vmem:[#allocation3 + $0xe0] sm:$0xff] %vm1662_vm8, %v1623_v3 }
 0x34d   : > { %v2201_v1 = vpop.permute.xlu1 %2200  ;;  %v2301_v6 = vld [vmem:[#allocation3 + $0xd0] sm:$0xff] }
 0x34e   : > { %2270 = vst.msk [vmem:[#allocation3 + $0xd8] sm:$0xff] %vm2242_vm11, %v2201_v1  ;;  %9581 = vmatprep.mubr.msk.f32.mxu1 %vm2321_vm12, %v2301_v6 }
 0x34f   : > { %v857_v4 = vpop.permute.xlu0 %856 }
 0x350   : > { %922 = vst.msk [vmem:[#allocation3 + $0xf8] sm:$0xff] %vm890_vm4, %v857_v4 }
 0x351   : > { %v1048_v62 = vpop.permute.xlu1 %1047 }
 0x352   : > { %1114 = vst.msk [vmem:[#allocation3 + $0xf0] sm:$0xff] %vm1083_vm5, %v1048_v62 }
 0x353   : > { %v1625_v42 = vpop.permute.xlu0 %1624 }
 0x354   : > { %1692 = vst.msk [vmem:[#allocation3 + $0xe8] sm:$0xff] %vm1662_vm8, %v1625_v42 }
 0x355   : > { %v1817_v26 = vpop.permute.xlu1 %1816  ;;  %v2302_v18 = vld [vmem:[#allocation3 + $0xd8] sm:$0xff] }
 0x356   : > { %1885 = vst.msk [vmem:[#allocation3 + $0xe0] sm:$0xff] %vm1856_vm9, %v1817_v26  ;;  %9582 = vmatmul.mubr.msk.f32.gmra.mrb[42].mxu1 %vm2321_vm12, %v2302_v18 }
 0x357   : > { %v1050_v48 = vpop.permute.xlu0 %1049 }
 0x358   : > { %1115 = vst.msk [vmem:[#allocation3 + $0xf8] sm:$0xff] %vm1083_vm5, %v1050_v48  ;;  %v14811_v48 = vld [vmem:[#allocation12_spill] sm:$0xff] }
 0x359   : > { %v1241_v46 = vpop.permute.xlu1 %1240 }
 0x35a   : > { %1307 = vst.msk [vmem:[#allocation3 + $0xf0] sm:$0xff] %vm1276_vm6, %v1241_v46  ;;  %v9562_v27 = vpop.f32.mrb[28].mxu1 }
 0x35b   : > { %v2550_v25 = vadd.f32 %v9562_v27, %v11846_v33  ;;  %v2544_v13 = vpop.f32.mrb[29].mxu1  ;;  %v1819_v14 = vpop.permute.xlu0 %1818  ;;  %v14812_v27 = vld [vmem:[#allocation11_spill] sm:$0xff] }
 0x35c   : > { %v2545_v47 = vadd.f32 %v11846_v33, %v2544_v13  ;;  %1886 = vst.msk [vmem:[#allocation3 + $0xe8] sm:$0xff] %vm1856_vm9, %v1819_v14 }
 0x35d   : > { %v2661_v61 = vmul.f32 %v11855_v29, %v2550_v25  ;;  %v2010_v63 = vpop.permute.xlu1 %2009 }
 0x35e   : > { %v2660_v51 = vmul.f32 %v11855_v29, %v2545_v47  ;;  %2078 = vst.msk [vmem:[#allocation3 + $0xe0] sm:$0xff] %vm2049_vm10, %v2010_v63  ;;  %v10349_v63 = vld [vmem:[%s10521_s10 + $0x18] sm:$0xff] }
 0x35f   : > { %v1243_v32 = vpop.permute.xlu0 %1242  ;;  %v2693_v57 = vadd.f32 %v2661_v61, %v14808_v12 }
 0x360   : > { %v2692_v23 = vadd.f32 %v2660_v51, %v14807_v5  ;;  %1308 = vst.msk [vmem:[#allocation3 + $0xf8] sm:$0xff] %vm1276_vm6, %v1243_v32  ;;  %v10350_v5 = vld [vmem:[%s10521_s10 + $0x10] sm:$0xff] }
 0x361   : > { %v1434_v36 = vpop.permute.xlu1 %1433 }
 0x362   : > { %1500 = vst.msk [vmem:[#allocation3 + $0xf0] sm:$0xff] %vm1469_vm7, %v1434_v36  ;;  %9610 = vmatprep.mubr.msk.f32.mxu0 %vm577_vm2, %v2692_v23 }
 0x363   : > { %9611 = vmatmul.mubr.msk.f32.gmra.mrb[28].mxu0 %vm577_vm2, %v2693_v57  ;;  %v2012_v40 = vpop.permute.xlu0 %2011 }
 0x364   : > { %2079 = vst.msk [vmem:[#allocation3 + $0xe8] sm:$0xff] %vm2049_vm10, %v2012_v40 }
 0x365   : > { %v2203_v39 = vpop.permute.xlu1 %2202 }
 0x366   : > { %2271 = vst.msk [vmem:[#allocation3 + $0xe0] sm:$0xff] %vm2242_vm11, %v2203_v39 }
 0x367   : > { %v1436_v38 = vpop.permute.xlu0 %1435 }
 0x368   : > { %1501 = vst.msk [vmem:[#allocation3 + $0xf8] sm:$0xff] %vm1469_vm7, %v1436_v38 }
 0x369   : > { %v1627_v59 = vpop.permute.xlu1 %1626  ;;  %v9565_v56 = vpop.f32.mrb[30].mxu1 }
 0x36a   : > { %1693 = vst.msk [vmem:[#allocation3 + $0xf0] sm:$0xff] %vm1662_vm8, %v1627_v59  ;;  %v2560_v37 = vadd.f32 %v9565_v56, %v11846_v33  ;;  %v2554_v34 = vpop.f32.mrb[31].mxu1 }
 0x36b   : > { %v2555_v60 = vadd.f32 %v11846_v33, %v2554_v34  ;;  %v2205_v28 = vpop.permute.xlu0 %2204  ;;  %v14813_v34 = vld [vmem:[#allocation21_spill] sm:$0xff] }
 0x36c   : > { %v2663_v21 = vmul.f32 %v11855_v29, %v2560_v37  ;;  %2272 = vst.msk [vmem:[#allocation3 + $0xe8] sm:$0xff] %vm2242_vm11, %v2205_v28 }
 0x36d   : > { %v2662_v10 = vmul.f32 %v11855_v29, %v2555_v60  ;;  %v1629_v17 = vpop.permute.xlu1 %1628  ;;  %v2303_v8 = vld [vmem:[#allocation3 + $0xe0] sm:$0xff] }
 0x36e   : > { %1694 = vst.msk [vmem:[#allocation3 + $0xf8] sm:$0xff] %vm1662_vm8, %v1629_v17  ;;  %9584 = vmatprep.mubr.msk.f32.mxu1 %vm2321_vm12, %v2303_v8  ;;  %v2695_v35 = vadd.f32 %v2663_v21, %v14810_v11  ;;  %v14814_v21 = vld [vmem:[#allocation20_spill] sm:$0xff] }
 0x36f   : > { %v2694_v50 = vadd.f32 %v2662_v10, %v14809_v54  ;;  %v1821_v30 = vpop.permute.xlu0 %1820 }
 0x370   : > { %1887 = vst.msk [vmem:[#allocation3 + $0xf0] sm:$0xff] %vm1856_vm9, %v1821_v30 }
 0x371   : > { %v1823_v9 = vpop.permute.xlu1 %1822  ;;  %9613 = vmatprep.mubr.msk.f32.mxu0 %vm577_vm2, %v2694_v50  ;;  %v10351_v50 = vld [vmem:[%s10521_s10 + $0x28] sm:$0xff] }
 0x372   : > { %1888 = vst.msk [vmem:[#allocation3 + $0xf8] sm:$0xff] %vm1856_vm9, %v1823_v9  ;;  %9614 = vmatmul.mubr.msk.f32.gmra.mrb[30].mxu0 %vm577_vm2, %v2695_v35  ;;  %v10352_v35 = vld [vmem:[%s10521_s10 + $0x20] sm:$0xff] }
 0x373   : > { %v2014_v15 = vpop.permute.xlu0 %2013  ;;  %v2304_v44 = vld [vmem:[#allocation3 + $0xe8] sm:$0xff] }
 0x374   : > { %2080 = vst.msk [vmem:[#allocation3 + $0xf0] sm:$0xff] %vm2049_vm10, %v2014_v15  ;;  %9585 = vmatmul.mubr.msk.f32.gmra.mrb[44].mxu1 %vm2321_vm12, %v2304_v44 }
 0x375   : > { %v2016_v58 = vpop.permute.xlu1 %2015 }
 0x376   : > { %2081 = vst.msk [vmem:[#allocation3 + $0xf8] sm:$0xff] %vm2049_vm10, %v2016_v58  ;;  %v9594_v41 = vpop.f32.mrb[16].mxu0 }
 0x377   : > { %v2880_v19 = vpop.f32.mrb[17].mxu0  ;;  %v2207_v22 = vpop.permute.xlu0 %2206  ;;  %v2886_v52 = vadd.f32 %v9594_v41, %v12162_v16 }
 0x378   : > { %v2881_v24 = vadd.f32 %v12162_v16, %v2880_v19  ;;  %2273 = vst.msk [vmem:[#allocation3 + $0xf0] sm:$0xff] %vm2242_vm11, %v2207_v22 }
 0x379   : > { %v2209_v31 = vpop.permute.xlu1 %2208  ;;  %v3040_v2 = vadd.f32 %v10348_v55, %v2886_v52  ;;  %v14816_v55 = vld [vmem:[#allocation22_spill] sm:$0xff] }
 0x37a   : > { %v3039_v53 = vadd.f32 %v10347_v0, %v2881_v24  ;;  %2274 = vst.msk [vmem:[#allocation3 + $0xf8] sm:$0xff] %vm2242_vm11, %v2209_v31  ;;  %v14815_v0 = vld [vmem:[#allocation23_spill] sm:$0xff] }
 0x37b   : > { %v3104_v45 = vmul.f32 0.05, %v3040_v2  ;;  %vm3072_vm14 = vcmp.ge.f32.partialorder %v3040_v2, 0.0 }
 0x37c   : > { %v3103_v49 = vmul.f32 0.05, %v3039_v53  ;;  %vm3071_vm13 = vcmp.ge.f32.partialorder %v3039_v53, 0.0 }
 0x37d   : > { %v12177_v1 = vsel %vm3072_vm14, %v3040_v2, %v3104_v45 }
 0x37e   : > { %v12173_v3 = vsel %vm3071_vm13, %v3039_v53, %v3103_v49  ;;  %v3647_v49 = vld [vmem:[#allocation2 + $0x1] sm:$0xff] }
 0x37f   : > { %v2305_v7 = vld [vmem:[#allocation3 + $0xf0] sm:$0xff]  ;;  %3711 = vrot.lane.b32.xlu0 %v3647_v49, %s10427_s17 }
 0x380   : > { %9587 = vmatprep.mubr.msk.f32.mxu1 %vm2321_vm12, %v2305_v7  ;;  %v3648_v7 = vld [vmem:[#allocation2 + $0x9] sm:$0xff] }
 0x381   : > { %v2306_v43 = vld [vmem:[#allocation3 + $0xf8] sm:$0xff]  ;;  %3713 = vrot.lane.b32.xlu1 %v3648_v7, %s10427_s17 }
 0x382   : > { %9588 = vmatmul.mubr.msk.f32.gmra.mrb[46].mxu1 %vm2321_vm12, %v2306_v43 }
 0x383   : > { %9642 = vmatprep.mubr.msk.f32.mxu1 %vm251_vm1, %v12173_v3 }
 0x386   : > { %9643 = vmatmul.mubr.msk.f32.vlgmr.msra.gmra.mrb[48].mxu1 %vm251_vm1, %v12177_v1 }
 0x389   : > { %v9568_v6 = vpop.f32.mrb[32].mxu1 }
 0x38a   : > { %v2570_v4 = vadd.f32 %v9568_v6, %v11846_v33  ;;  %v2564_v62 = vpop.f32.mrb[33].mxu1 }
 0x38b   : > { %v2565_v42 = vadd.f32 %v11846_v33, %v2564_v62  ;;  %v3839_v62 = vld [vmem:[#allocation2 + $0x2] sm:$0xff] }
 0x38c   : > { %v2665_v26 = vmul.f32 %v11855_v29, %v2570_v4  ;;  %3903 = vrot.lane.b32.xlu0 %v3839_v62, %s10428_s18 }
 0x38d   : > { %v2664_v18 = vmul.f32 %v11855_v29, %v2565_v42  ;;  %v10353_v42 = vld [vmem:[%s10521_s10 + $0x38] sm:$0xff] }
 0x38e   : > { %v2697_v25 = vadd.f32 %v2665_v26, %v14812_v27 }
 0x38f   : > { %v2696_v46 = vadd.f32 %v2664_v18, %v14811_v48  ;;  %v3840_v18 = vld [vmem:[#allocation2 + $0xa] sm:$0xff] }
 0x390   : > { %v10354_v48 = vld [vmem:[%s10521_s10 + $0x30] sm:$0xff]  ;;  %3905 = vrot.lane.b32.xlu1 %v3840_v18, %s10428_s18 }
 0x391   : > { %9616 = vmatprep.mubr.msk.f32.mxu0 %vm577_vm2, %v2696_v46 }
 0x392   : > { %9617 = vmatmul.mubr.msk.f32.gmra.mrb[32].mxu0 %vm577_vm2, %v2697_v25 }
 0x396   : > { %v9597_v13 = vpop.f32.mrb[18].mxu0 }
 0x397   : > { %v2896_v47 = vadd.f32 %v9597_v13, %v12162_v16  ;;  %v2890_v14 = vpop.f32.mrb[19].mxu0  ;;  %v4637_v13 = vld [vmem:[#allocation2 + $0x198] sm:$0xff] }
 0x398   : > { %v2891_v61 = vadd.f32 %v12162_v16, %v2890_v14  ;;  %4731 = vrot.lane.b32.xlu0 %v4637_v13, %s10432_s24 }
 0x399   : > { %v3042_v51 = vadd.f32 %v10349_v63, %v2896_v47  ;;  %v4638_v47 = vld [vmem:[#allocation2 + $0x1a0] sm:$0xff] }
 0x39a   : > { %v3041_v23 = vadd.f32 %v10350_v5, %v2891_v61  ;;  %4733 = vrot.lane.b32.xlu1 %v4638_v47, %s10432_s24  ;;  %v4829_v61 = vld [vmem:[#allocation2 + $0x199] sm:$0xff] }
 0x39b   : > { %v3106_v32 = vmul.f32 0.05, %v3042_v51  ;;  %vm3074_vm3 = vcmp.ge.f32.partialorder %v3042_v51, 0.0 }
 0x39c   : > { %v3105_v12 = vmul.f32 0.05, %v3041_v23  ;;  %vm3073_vm15 = vcmp.ge.f32.partialorder %v3041_v23, 0.0  ;;  %4923 = vrot.lane.b32.xlu0 %v4829_v61, %s10433_s25  ;;  %v14821_v61 = vld [vmem:[#allocation29_spill] sm:$0xff] }
 0x39d   : > { %v12197_v36 = vsel %vm3074_vm3, %v3042_v51, %v3106_v32  ;;  %v4830_v51 = vld [vmem:[#allocation2 + $0x1a1] sm:$0xff] }
 0x39e   : > { %v12193_v57 = vsel %vm3073_vm15, %v3041_v23, %v3105_v12  ;;  %4925 = vrot.lane.b32.xlu1 %v4830_v51, %s10433_s25 }
 0x39f   : > { %9645 = vmatprep.mubr.msk.f32.mxu1 %vm251_vm1, %v12193_v57 }
 0x3a0   : > { %9646 = vmatmul.mubr.msk.f32.gmra.mrb[50].mxu1 %vm251_vm1, %v12197_v36 }
 0x3a9   : > { %v9571_v40 = vpop.f32.mrb[34].mxu1 }
 0x3aa   : > { %v2580_v39 = vadd.f32 %v9571_v40, %v11846_v33  ;;  %v2574_v38 = vpop.f32.mrb[35].mxu1 }
 0x3ab   : > { %v2575_v59 = vadd.f32 %v11846_v33, %v2574_v38  ;;  %v14817_v38 = vld [vmem:[#allocation25_spill] sm:$0xff] }
 0x3ac   : > { %v2667_v56 = vmul.f32 %v11855_v29, %v2580_v39 }
 0x3ad   : > { %v2666_v37 = vmul.f32 %v11855_v29, %v2575_v59 }
 0x3ae   : > { %v2699_v28 = vadd.f32 %v2667_v56, %v14814_v21  ;;  %v14818_v56 = vld [vmem:[#allocation24_spill] sm:$0xff] }
 0x3af   : > { %v2698_v60 = vadd.f32 %v2666_v37, %v14813_v34 }
 0x3b1   : > { %9619 = vmatprep.mubr.msk.f32.mxu0 %vm577_vm2, %v2698_v60 }
 0x3b2   : > { %9620 = vmatmul.mubr.msk.f32.gmra.mrb[34].mxu0 %vm577_vm2, %v2699_v28 }
 0x3b6   : > { %v9600_v10 = vpop.f32.mrb[20].mxu0 }
 0x3b7   : > { %v2906_v17 = vadd.f32 %v9600_v10, %v12162_v16  ;;  %v2900_v8 = vpop.f32.mrb[21].mxu0  ;;  %v10355_v10 = vld [vmem:[%s10521_s10 + $0x48] sm:$0xff] }
 0x3b8   : > { %v2901_v54 = vadd.f32 %v12162_v16, %v2900_v8 }
 0x3b9   : > { %v3044_v11 = vadd.f32 %v10351_v50, %v2906_v17  ;;  %v10356_v17 = vld [vmem:[%s10521_s10 + $0x40] sm:$0xff] }
 0x3ba   : > { %v3043_v30 = vadd.f32 %v10352_v35, %v2901_v54 }
 0x3bb   : > { %v3108_v9 = vmul.f32 0.05, %v3044_v11  ;;  %vm3076_vm14 = vcmp.ge.f32.partialorder %v3044_v11, 0.0 }
 0x3bc   : > { %v3107_v15 = vmul.f32 0.05, %v3043_v30  ;;  %vm3075_vm13 = vcmp.ge.f32.partialorder %v3043_v30, 0.0 }
 0x3bd   : > { %v12217_v58 = vsel %vm3076_vm14, %v3044_v11, %v3108_v9 }
 0x3be   : > { %v12213_v44 = vsel %vm3075_vm13, %v3043_v30, %v3107_v15  ;;  %v12272_v30 = vld [vmem:[%s14642_s1 + $0x58] ss:$0 sm:$0xff] }
 0x3bf   : > { %9648 = vmatprep.mubr.msk.f32.mxu1 %vm251_vm1, %v12213_v44 }
 0x3c0   : > { %9649 = vmatmul.mubr.msk.f32.gmra.mrb[52].mxu1 %vm251_vm1, %v12217_v58 }
 0x3c9   : > { %v9574_v41 = vpop.f32.mrb[36].mxu1 }
 0x3ca   : > { %v2590_v19 = vadd.f32 %v9574_v41, %v11846_v33  ;;  %v2584_v24 = vpop.f32.mrb[37].mxu1 }
 0x3cb   : > { %v2585_v22 = vadd.f32 %v11846_v33, %v2584_v24 }
 0x3cc   : > { %v2669_v52 = vmul.f32 %v11855_v29, %v2590_v19  ;;  %v12279_v19 = vld [vmem:[%s14642_s1 + $0x60] ss:$0 sm:$0xff] }
 0x3cd   : > { %v2668_v31 = vmul.f32 %v11855_v29, %v2585_v22 }
 0x3ce   : > { %v2701_v2 = vadd.f32 %v2669_v52, %v14816_v55  ;;  %v14819_v52 = vld [vmem:[#allocation27_spill] sm:$0xff] }
 0x3cf   : > { %v2700_v53 = vadd.f32 %v2668_v31, %v14815_v0  ;;  %v14820_v0 = vld [vmem:[#allocation26_spill] sm:$0xff] }
 0x3d1   : > { %9622 = vmatprep.mubr.msk.f32.mxu0 %vm577_vm2, %v2700_v53 }
 0x3d2   : > { %9623 = vmatmul.mubr.msk.f32.gmra.mrb[36].mxu0 %vm577_vm2, %v2701_v2 }
 0x3d7   : > { %v9603_v45 = vpop.f32.mrb[22].mxu0 }
 0x3d8   : > { %v2916_v43 = vadd.f32 %v9603_v45, %v12162_v16  ;;  %v2910_v6 = vpop.f32.mrb[23].mxu0  ;;  %v10359_v45 = vld [vmem:[%s10521_s10 + $0x58] sm:$0xff] }
 0x3d9   : > { %v2911_v4 = vadd.f32 %v12162_v16, %v2910_v6  ;;  %v10360_v6 = vld [vmem:[%s10521_s10 + $0x50] sm:$0xff] }
 0x3da   : > { %v3046_v26 = vadd.f32 %v10353_v42, %v2916_v43 }
 0x3db   : > { %v3045_v46 = vadd.f32 %v10354_v48, %v2911_v4 }
 0x3dc   : > { %v3110_v27 = vmul.f32 0.05, %v3046_v26  ;;  %vm3078_vm3 = vcmp.ge.f32.partialorder %v3046_v26, 0.0 }
 0x3dd   : > { %v3109_v25 = vmul.f32 0.05, %v3045_v46  ;;  %vm3077_vm15 = vcmp.ge.f32.partialorder %v3045_v46, 0.0 }
 0x3de   : > { %v12243_v63 = vsel %vm3078_vm3, %v3046_v26, %v3110_v27 }
 0x3df   : > { %v12238_v14 = vsel %vm3077_vm15, %v3045_v46, %v3109_v25 }
 0x3e0   : > { %9651 = vmatprep.mubr.msk.f32.mxu1 %vm251_vm1, %v12238_v14 }
 0x3e1   : > { %9652 = vmatmul.mubr.msk.f32.gmra.mrb[54].mxu1 %vm251_vm1, %v12243_v63 }
 0x3e9   : > { %v9577_v5 = vpop.f32.mrb[38].mxu1 }
 0x3ea   : > { %v2600_v23 = vadd.f32 %v9577_v5, %v11846_v33  ;;  %v2594_v32 = vpop.f32.mrb[39].mxu1  ;;  %v14822_v5 = vld [vmem:[#allocation28_spill] sm:$0xff] }
 0x3eb   : > { %v2595_v12 = vadd.f32 %v11846_v33, %v2594_v32 }
 0x3ec   : > { %v2671_v40 = vmul.f32 %v11855_v29, %v2600_v23 }
 0x3ed   : > { %v2670_v39 = vmul.f32 %v11855_v29, %v2595_v12 }
 0x3ee   : > { %v2703_v37 = vadd.f32 %v2671_v40, %v14818_v56  ;;  %v10362_v56 = vld [vmem:[%s10521_s10 + $0x60] sm:$0xff] }
 0x3ef   : > { %v2702_v59 = vadd.f32 %v2670_v39, %v14817_v38  ;;  %v10361_v38 = vld [vmem:[%s10521_s10 + $0x68] sm:$0xff] }
 0x3f1   : > { %9625 = vmatprep.mubr.msk.f32.mxu0 %vm577_vm2, %v2702_v59 }
 0x3f2   : > { %9626 = vmatmul.mubr.msk.f32.gmra.mrb[38].mxu0 %vm577_vm2, %v2703_v37 }
 0x3f6   : > { %v9606_v34 = vpop.f32.mrb[24].mxu0 }
 0x3f7   : > { %v2926_v60 = vadd.f32 %v9606_v34, %v12162_v16  ;;  %v2920_v21 = vpop.f32.mrb[25].mxu0 }
 0x3f8   : > { %v2921_v28 = vadd.f32 %v12162_v16, %v2920_v21 }
 0x3f9   : > { %v3048_v33 = vadd.f32 %v10355_v10, %v2926_v60 }
 0x3fa   : > { %v3047_v8 = vadd.f32 %v10356_v17, %v2921_v28 }
 0x3fb   : > { %v3112_v54 = vmul.f32 0.05, %v3048_v33  ;;  %vm3080_vm14 = vcmp.ge.f32.partialorder %v3048_v33, 0.0 }
 0x3fc   : > { %v3111_v29 = vmul.f32 0.05, %v3047_v8  ;;  %vm3079_vm13 = vcmp.ge.f32.partialorder %v3047_v8, 0.0 }
 0x3fd   : > { %v12265_v11 = vsel %vm3080_vm14, %v3048_v33, %v3112_v54  ;;  %v3712_v54 = vpop.permute.xlu0 %3711 }
 0x3fe   : > { %v12261_v50 = vsel %vm3079_vm13, %v3047_v8, %v3111_v29  ;;  %v10363_v29 = vld [vmem:[%s10521_s10 + $0x78] sm:$0xff] }
 0x3ff   : > { %9654 = vmatprep.mubr.msk.f32.mxu1 %vm251_vm1, %v12261_v50 }
 0x400   : > { %9655 = vmatmul.mubr.msk.f32.gmra.mrb[56].mxu1 %vm251_vm1, %v12265_v11 }
 0x409   : > { %v9580_v35 = vpop.f32.mrb[40].mxu1 }
 0x40a   : > { %v2610_v9 = vadd.f32 %v12272_v30, %v9580_v35  ;;  %v2604_v15 = vpop.f32.mrb[41].mxu1 }
 0x40b   : > { %v2605_v41 = vadd.f32 %v12272_v30, %v2604_v15  ;;  %v3714_v15 = vpop.permute.xlu1 %3713 }
 0x40c   : > { %v2673_v24 = vmul.f32 %v12279_v19, %v2610_v9 }
 0x40d   : > { %v2672_v22 = vmul.f32 %v12279_v19, %v2605_v41  ;;  %v10364_v41 = vld [vmem:[%s10521_s10 + $0x70] sm:$0xff] }
 0x40e   : > { %v2705_v53 = vadd.f32 %v2673_v24, %v14820_v0 }
 0x40f   : > { %v2704_v31 = vadd.f32 %v2672_v22, %v14819_v52 }
 0x411   : > { %9628 = vmatprep.mubr.msk.f32.mxu0 %vm577_vm2, %v2704_v31 }
 0x412   : > { %9629 = vmatmul.mubr.msk.f32.gmra.mrb[40].mxu0 %vm577_vm2, %v2705_v53  ;;  %v3583_v53 = vld [vmem:[#allocation2] sm:$0xff] }
 0x413   : > { %3615 = vst.msk [vmem:[#allocation3] sm:$0xff] %vm577_vm2, %v3583_v53 }
 0x414   : > { %3807 = vst.msk [vmem:[#allocation3] sm:$0xff] %vm890_vm4, %v3712_v54  ;;  %v10366_v54 = vld [vmem:[%s10521_s10 + $0x80] sm:$0xff] }
 0x416   : > { %v9609_v55 = vpop.f32.mrb[26].mxu0 }
 0x417   : > { %v2936_v2 = vadd.f32 %v9609_v55, %v12162_v16  ;;  %v2930_v49 = vpop.f32.mrb[27].mxu0 }
 0x418   : > { %v2931_v7 = vadd.f32 %v12162_v16, %v2930_v49  ;;  %v3584_v49 = vld [vmem:[#allocation2 + $0x8] sm:$0xff] }
 0x419   : > { %v3050_v43 = vadd.f32 %v10359_v45, %v2936_v2  ;;  %3616 = vst.msk [vmem:[#allocation3 + $0x8] sm:$0xff] %vm577_vm2, %v3584_v49  ;;  %v3904_v45 = vpop.permute.xlu0 %3903 }
 0x41a   : > { %v3049_v4 = vadd.f32 %v10360_v6, %v2931_v7  ;;  %3808 = vst.msk [vmem:[#allocation3 + $0x8] sm:$0xff] %vm890_vm4, %v3714_v15  ;;  %v3906_v6 = vpop.permute.xlu1 %3905 }
 0x41b   : > { %v3114_v62 = vmul.f32 0.05, %v3050_v43  ;;  %vm3082_vm3 = vcmp.ge.f32.partialorder %v3050_v43, 0.0  ;;  %3999 = vst.msk [vmem:[#allocation3] sm:$0xff] %vm1083_vm5, %v3904_v45  ;;  %4000 = vst.msk [vmem:[#allocation3 + $0x8] sm:$0xff] %vm1083_vm5, %v3906_v6  ;;  %v5216_v45 = vld [vmem:[%s14642_s1 + $0x90] sm:$0xff] }
 0x41c   : > { %v3113_v42 = vmul.f32 0.05, %v3049_v4  ;;  %vm3081_vm15 = vcmp.ge.f32.partialorder %v3049_v4, 0.0 }
 0x41d   : > { %v12295_v18 = vsel %vm3082_vm3, %v3050_v43, %v3114_v62 }
 0x41e   : > { %v12291_v26 = vsel %vm3081_vm15, %v3049_v4, %v3113_v42  ;;  %v14823_v4 = vld [vmem:[#allocation31_spill] sm:$0xff] }
 0x41f   : > { %9657 = vmatprep.mubr.msk.f32.mxu1 %vm251_vm1, %v12291_v26 }
 0x420   : > { %9658 = vmatmul.mubr.msk.f32.gmra.mrb[58].mxu1 %vm251_vm1, %v12295_v18 }
 0x429   : > { %v9583_v48 = vpop.f32.mrb[42].mxu1 }
 0x42a   : > { %v2620_v46 = vadd.f32 %v12272_v30, %v9583_v48  ;;  %v2614_v27 = vpop.f32.mrb[43].mxu1  ;;  %v14824_v48 = vld [vmem:[#allocation30_spill] sm:$0xff] }
 0x42b   : > { %v2615_v25 = vadd.f32 %v12272_v30, %v2614_v27 }
 0x42c   : > { %v2675_v13 = vmul.f32 %v12279_v19, %v2620_v46 }
 0x42d   : > { %v2674_v47 = vmul.f32 %v12279_v19, %v2615_v25 }
 0x42e   : > { %v2707_v23 = vadd.f32 %v2675_v13, %v14822_v5 }
 0x42f   : > { %v2706_v51 = vadd.f32 %v2674_v47, %v14821_v61 }
 0x431   : > { %9631 = vmatprep.mubr.msk.f32.mxu0 %vm577_vm2, %v2706_v51 }
 0x432   : > { %9632 = vmatmul.mubr.msk.f32.gmra.mrb[42].mxu0 %vm577_vm2, %v2707_v23 }
 0x436   : > { %v9612_v32 = vpop.f32.mrb[28].mxu0 }
 0x437   : > { %v2946_v12 = vadd.f32 %v9612_v32, %v12162_v16  ;;  %v2940_v40 = vpop.f32.mrb[29].mxu0 }
 0x438   : > { %v2941_v39 = vadd.f32 %v12162_v16, %v2940_v40 }
 0x439   : > { %v3052_v59 = vadd.f32 %v10361_v38, %v2946_v12  ;;  %v14825_v12 = vld [vmem:[#allocation33_spill] sm:$0xff]  ;;  %v14826_v38 = vld [vmem:[#allocation32_spill] sm:$0xff] }
 0x43a   : > { %v3051_v37 = vadd.f32 %v10362_v56, %v2941_v39 }
 0x43b   : > { %v3116_v34 = vmul.f32 0.05, %v3052_v59  ;;  %vm3084_vm14 = vcmp.ge.f32.partialorder %v3052_v59, 0.0 }
 0x43c   : > { %v3115_v60 = vmul.f32 0.05, %v3051_v37  ;;  %vm3083_vm13 = vcmp.ge.f32.partialorder %v3051_v37, 0.0 }
 0x43d   : > { %v12315_v28 = vsel %vm3084_vm14, %v3052_v59, %v3116_v34 }
 0x43e   : > { %v12311_v21 = vsel %vm3083_vm13, %v3051_v37, %v3115_v60 }
 0x43f   : > { %9660 = vmatprep.mubr.msk.f32.mxu1 %vm251_vm1, %v12311_v21 }
 0x440   : > { %9661 = vmatmul.mubr.msk.f32.gmra.mrb[60].mxu1 %vm251_vm1, %v12315_v28 }
 0x445   : > { %v9615_v10 = vpop.f32.mrb[30].mxu0 }
 0x446   : > { %v2956_v33 = vadd.f32 %v9615_v10, %v12162_v16  ;;  %v2950_v17 = vpop.f32.mrb[31].mxu0 }
 0x447   : > { %v2951_v8 = vadd.f32 %v12162_v16, %v2950_v17  ;;  %v9586_v9 = vpop.f32.mrb[44].mxu1 }
 0x448   : > { %v3054_v35 = vadd.f32 %v10363_v29, %v2956_v33  ;;  %v2630_v22 = vadd.f32 %v12272_v30, %v9586_v9  ;;  %v2624_v52 = vpop.f32.mrb[45].mxu1  ;;  %v10365_v33 = vld [vmem:[%s10521_s10 + $0x88] sm:$0xff] }
 0x449   : > { %v3053_v24 = vadd.f32 %v10364_v41, %v2951_v8  ;;  %v2625_v0 = vadd.f32 %v12272_v30, %v2624_v52 }
 0x44a   : > { %v3118_v31 = vmul.f32 0.05, %v3054_v35  ;;  %v2677_v2 = vmul.f32 %v12279_v19, %v2630_v22  ;;  %vm3086_vm3 = vcmp.ge.f32.partialorder %v3054_v35, 0.0 }
 0x44b   : > { %v3117_v55 = vmul.f32 0.05, %v3053_v24  ;;  %vm3085_vm15 = vcmp.ge.f32.partialorder %v3053_v24, 0.0  ;;  %v2676_v7 = vmul.f32 %v12279_v19, %v2625_v0 }
 0x44c   : > { %v12337_v42 = vsel %vm3086_vm3, %v3054_v35, %v3118_v31  ;;  %v2709_v46 = vadd.f32 %v2677_v2, %v14824_v48  ;;  %v5218_v48 = vld [vmem:[%s14642_s1 + $0xa0] sm:$0xff] }
 0x44d   : > { %v12330_v43 = vsel %vm3085_vm15, %v3053_v24, %v3117_v55  ;;  %v2708_v62 = vadd.f32 %v2676_v7, %v14823_v4  ;;  %v5215_v7 = vld [vmem:[%s14642_s1 + $0x88] sm:$0xff] }
 0x44e   : > { %9663 = vmatprep.mubr.msk.f32.mxu1 %vm251_vm1, %v12330_v43  ;;  %v9972_v6 = vpack.c.bf16 %v5216_v45, %v5215_v7  ;;  %v10369_v7 = vld [vmem:[%s10521_s10 + $0xa8] sm:$0xff] }
 0x44f   : > { %9664 = vmatmul.mubr.msk.f32.gmra.mrb[62].mxu1 %vm251_vm1, %v12337_v42  ;;  %9634 = vmatprep.mubr.msk.f32.mxu0 %vm577_vm2, %v2708_v62  ;;  %v5217_v62 = vld [vmem:[%s14642_s1 + $0x98] sm:$0xff] }
 0x450   : > { %9635 = vmatmul.mubr.msk.f32.gmra.mrb[44].mxu0 %vm577_vm2, %v2709_v46  ;;  %9973 = vmatprep.subr.bf16.mxu0 %v9972_v6  ;;  %v9976_v46 = vpack.c.bf16 %v5218_v48, %v5217_v62 }
 0x451   : > { %9975 = vmatpush3.bf16.msra.mxu0 %v9972_v6  ;;  %v10370_v6 = vld [vmem:[%s10521_s10 + $0xa0] sm:$0xff] }
 0x452   : > { %9977 = vmatprep.subr.bf16.mxu0 %v9976_v46 }
 0x455   : > { %v9589_v27 = vpop.f32.mrb[46].mxu1  ;;  %9979 = vmatpush3.bf16.msra.mxu0 %v9976_v46 }
 0x456   : > { %v2640_v25 = vadd.f32 %v12272_v30, %v9589_v27  ;;  %v2634_v13 = vpop.f32.mrb[47].mxu1 }
 0x457   : > { %v2635_v47 = vadd.f32 %v12272_v30, %v2634_v13 }
 0x458   : > { %v2679_v61 = vmul.f32 %v12279_v19, %v2640_v25 }
 0x459   : > { %v2678_v51 = vmul.f32 %v12279_v19, %v2635_v47  ;;  %v9644_v5 = vpop.f32.mrb[48].mxu1  ;;  %v5219_v47 = vld [vmem:[%s14642_s1 + $0xa8] sm:$0xff] }
 0x45a   : > { %v12350_v23 = vadd.f32 %v9644_v5, %v10680_v20  ;;  %v3338_v32 = vpop.f32.mrb[49].mxu1  ;;  %v2711_v59 = vadd.f32 %v2679_v61, %v14826_v38  ;;  %v5220_v61 = vld [vmem:[%s14642_s1 + $0xb0] sm:$0xff] }
 0x45b   : > { %v2710_v40 = vadd.f32 %v2678_v51, %v14825_v12  ;;  %v12354_v39 = vadd.f32 %v10680_v20, %v3338_v32  ;;  %v9980_v5 = vpack.c.bf16 %v5220_v61, %v5219_v47  ;;  %v10367_v32 = vld [vmem:[%s10521_s10 + $0x98] sm:$0xff] }
 0x45c   : > { %3552 = vst.msk [vmem:[#allocation2 + $0x21] sm:$0xff] %vm577_vm2, %v12350_v23 }
 0x45d   : > { %3551 = vst.msk [vmem:[#allocation2 + $0x19] sm:$0xff] %vm577_vm2, %v12354_v39  ;;  %9637 = vmatprep.mubr.msk.f32.mxu0 %vm577_vm2, %v2710_v40  ;;  %v10368_v40 = vld [vmem:[%s10521_s10 + $0x90] sm:$0xff]  ;;  %9981 = vmatprep.subr.bf16.mxu0 %v9980_v5 }
 0x45e   : > { %9638 = vmatmul.mubr.msk.f32.gmra.mrb[46].mxu0 %vm577_vm2, %v2711_v59 }
 0x45f   : > { %9983 = vmatpush3.bf16.msra.mxu0 %v9980_v5 }
 0x463   : > { %v4224_v30 = vld [vmem:[#allocation2 + $0x21] sm:$0xff] }
 0x464   : > { %4289 = vrot.lane.b32.xlu0 %v4224_v30, %s10429_s21  ;;  %v4032_v19 = vld [vmem:[#allocation2 + $0x20] sm:$0xff]  ;;  %v4031_v37 = vld [vmem:[#allocation2 + $0x18] sm:$0xff] }
 0x465   : > { %4097 = vrot.lane.b32.xlu1 %v4032_v19, %s10430_s22  ;;  %v9618_v56 = vpop.f32.mrb[32].mxu0  ;;  %3618 = vst.msk [vmem:[#allocation3 + $0x18] sm:$0xff] %vm577_vm2, %v4032_v19  ;;  %3617 = vst.msk [vmem:[#allocation3 + $0x10] sm:$0xff] %vm577_vm2, %v4031_v37  ;;  %v3649_v8 = vld [vmem:[#allocation2 + $0x19] sm:$0xff]  ;;  %v4416_v15 = vld [vmem:[#allocation2 + $0x22] sm:$0xff] }
 0x466   : > { %v2966_v34 = vadd.f32 %v9618_v56, %v12162_v16  ;;  %v2960_v60 = vpop.f32.mrb[33].mxu0  ;;  %v4415_v41 = vld [vmem:[#allocation2 + $0x1a] sm:$0xff] }
 0x467   : > { %v2961_v10 = vadd.f32 %v12162_v16, %v2960_v60  ;;  %v5222_v19 = vld [vmem:[%s14642_s1 + $0xc0] sm:$0xff] }
 0x468   : > { %v3056_v17 = vadd.f32 %v10365_v33, %v2966_v34  ;;  %3717 = vrot.lane.b32.xlu0 %v4224_v30, %s10427_s17  ;;  %v5221_v30 = vld [vmem:[%s14642_s1 + $0xb8] sm:$0xff]  ;;  %v5223_v33 = vld [vmem:[%s14642_s1 + $0xc8] sm:$0xff] }
 0x469   : > { %v3055_v29 = vadd.f32 %v10366_v54, %v2961_v10  ;;  %3715 = vrot.lane.b32.xlu1 %v3649_v8, %s10427_s17 }
 0x46a   : > { %v3120_v35 = vmul.f32 0.05, %v3056_v17  ;;  %vm3088_vm14 = vcmp.ge.f32.partialorder %v3056_v17, 0.0 }
 0x46b   : > { %v3119_v9 = vmul.f32 0.05, %v3055_v29  ;;  %vm3087_vm13 = vcmp.ge.f32.partialorder %v3055_v29, 0.0 }
 0x46c   : > { %4481 = vrot.lane.b32.xlu0 %v4416_v15, %s10431_s23  ;;  %v12379_v22 = vsel %vm3088_vm14, %v3056_v17, %v3120_v35 }
 0x46d   : > { %4479 = vrot.lane.b32.xlu1 %v4415_v41, %s10431_s23  ;;  %v12375_v24 = vsel %vm3087_vm13, %v3055_v29, %v3119_v9  ;;  %14828 = vst [vmem:[#allocation15_spill] sm:$0xff] %v12379_v22 }
 0x46e   : > { %14827 = vst [vmem:[#allocation13_spill] sm:$0xff] %v12375_v24  ;;  %9666 = vmatprep.mubr.msk.f32.mxu1 %vm251_vm1, %v12375_v24 }
 0x46f   : > { %9667 = vmatmul.mubr.msk.f32.gmra.mrb[64].mxu1 %vm251_vm1, %v12379_v22 }
 0x470   : > { %3909 = vrot.lane.b32.xlu0 %v4416_v15, %s10428_s18 }
 0x471   : > { %3907 = vrot.lane.b32.xlu1 %v4415_v41, %s10428_s18 }
 0x473   : > { %v9647_v52 = vpop.f32.mrb[50].mxu1 }
 0x474   : > { %v12386_v31 = vadd.f32 %v9647_v52, %v10680_v20  ;;  %4095 = vrot.lane.b32.xlu0 %v4031_v37, %s10430_s22  ;;  %v3348_v0 = vpop.f32.mrb[51].mxu1  ;;  %v9984_v37 = vpack.c.bf16 %v5222_v19, %v5221_v30 }
 0x475   : > { %v12390_v53 = vadd.f32 %v10680_v20, %v3348_v0 }
 0x476   : > { %3554 = vst.msk [vmem:[#allocation2 + $0x39] sm:$0xff] %vm577_vm2, %v12386_v31  ;;  %9985 = vmatprep.subr.bf16.mxu0 %v9984_v37 }
 0x477   : > { %3553 = vst.msk [vmem:[#allocation2 + $0x31] sm:$0xff] %vm577_vm2, %v12390_v53  ;;  %9987 = vmatpush3.bf16.msra.mxu0 %v9984_v37  ;;  %v10371_v37 = vld [vmem:[%s10521_s10 + $0xb8] sm:$0xff] }
 0x478   : > { %4287 = vrot.lane.b32.xlu0 %v3649_v8, %s10429_s21  ;;  %9706 = vmatprep.subr.mxu0 %v5223_v33 }
 0x47b   : > { %9707 = vmatpush3.msra.mxu0 %v5223_v33  ;;  %v10372_v33 = vld [vmem:[%s10521_s10 + $0xb0] sm:$0xff] }
 0x47d   : > { %v4800_v55 = vld [vmem:[#allocation2 + $0x39] sm:$0xff] }
 0x47e   : > { %4865 = vrot.lane.b32.xlu0 %v4800_v55, %s10433_s25  ;;  %4293 = vrot.lane.b32.xlu1 %v4800_v55, %s10429_s21  ;;  %v4607_v2 = vld [vmem:[#allocation2 + $0x30] sm:$0xff]  ;;  %v4608_v49 = vld [vmem:[#allocation2 + $0x38] sm:$0xff] }
 0x47f   : > { %3620 = vst.msk [vmem:[#allocation3 + $0x28] sm:$0xff] %vm577_vm2, %v4608_v49  ;;  %3619 = vst.msk [vmem:[#allocation3 + $0x20] sm:$0xff] %vm577_vm2, %v4607_v2  ;;  %v4992_v4 = vld [vmem:[#allocation2 + $0x3a] sm:$0xff]  ;;  %v4799_v60 = vld [vmem:[#allocation2 + $0x31] sm:$0xff] }
 0x480   : > { %v4991_v35 = vld [vmem:[#allocation2 + $0x32] sm:$0xff] }
 0x482   : > { %5057 = vrot.lane.b32.xlu1 %v4992_v4, %s10434_s30  ;;  %3721 = vrot.lane.b32.xlu0 %v4800_v55, %s10427_s17 }
 0x485   : > { %v9621_v27 = vpop.f32.mrb[34].mxu0 }
 0x486   : > { %v2976_v25 = vadd.f32 %v9621_v27, %v12162_v16  ;;  %v2970_v13 = vpop.f32.mrb[35].mxu0  ;;  %4485 = vrot.lane.b32.xlu0 %v4992_v4, %s10431_s23  ;;  %4671 = vrot.lane.b32.xlu1 %v4607_v2, %s10432_s24 }
 0x487   : > { %v2971_v51 = vadd.f32 %v12162_v16, %v2970_v13 }
 0x488   : > { %v3058_v12 = vadd.f32 %v10367_v32, %v2976_v25 }
 0x489   : > { %v3057_v38 = vadd.f32 %v10368_v40, %v2971_v51 }
 0x48a   : > { %v3122_v59 = vmul.f32 0.05, %v3058_v12  ;;  %3913 = vrot.lane.b32.xlu0 %v4992_v4, %s10428_s18  ;;  %4099 = vrot.lane.b32.xlu1 %v4607_v2, %s10430_s22  ;;  %vm3090_vm3 = vcmp.ge.f32.partialorder %v3058_v12, 0.0 }
 0x48b   : > { %v3121_v56 = vmul.f32 0.05, %v3057_v38  ;;  %vm3089_vm15 = vcmp.ge.f32.partialorder %v3057_v38, 0.0 }
 0x48c   : > { %v12440_v10 = vsel %vm3090_vm3, %v3058_v12, %v3122_v59 }
 0x48d   : > { %v12435_v34 = vsel %vm3089_vm15, %v3057_v38, %v3121_v56  ;;  %14830 = vst [vmem:[#allocation17_spill] sm:$0xff] %v12440_v10 }
 0x48e   : > { %14829 = vst [vmem:[#allocation14_spill] sm:$0xff] %v12435_v34  ;;  %9669 = vmatprep.mubr.msk.f32.mxu1 %vm251_vm1, %v12435_v34  ;;  %4673 = vrot.lane.b32.xlu0 %v4608_v49, %s10432_s24 }
 0x48f   : > { %4863 = vrot.lane.b32.xlu1 %v4799_v60, %s10433_s25  ;;  %9670 = vmatmul.mubr.msk.f32.gmra.mrb[66].mxu1 %vm251_vm1, %v12440_v10 }
 0x492   : > { %4101 = vrot.lane.b32.xlu0 %v4608_v49, %s10430_s22 }
 0x493   : > { %4291 = vrot.lane.b32.xlu1 %v4799_v60, %s10429_s21  ;;  %v9650_v17 = vpop.f32.mrb[52].mxu1 }
 0x494   : > { %v12451_v8 = vadd.f32 %v9650_v17, %v10680_v20  ;;  %v3358_v54 = vpop.f32.mrb[53].mxu1 }
 0x495   : > { %v12454_v29 = vadd.f32 %v10680_v20, %v3358_v54 }
 0x496   : > { %3556 = vst.msk [vmem:[#allocation2 + $0x51] sm:$0xff] %vm577_vm2, %v12451_v8  ;;  %3719 = vrot.lane.b32.xlu0 %v4799_v60, %s10427_s17 }
 0x497   : > { %3555 = vst.msk [vmem:[#allocation2 + $0x49] sm:$0xff] %vm577_vm2, %v12454_v29  ;;  %5055 = vrot.lane.b32.xlu1 %v4991_v35, %s10434_s30 }
 0x49a   : > { %4483 = vrot.lane.b32.xlu0 %v4991_v35, %s10431_s23 }
 0x49b   : > { %3911 = vrot.lane.b32.xlu1 %v4991_v35, %s10428_s18  ;;  %v12517_v35 = vpop.permute.xlu0 %4731 }
 0x49d   : > { %v4228_v9 = vld [vmem:[#allocation2 + $0x51] sm:$0xff] }
 0x49e   : > { %4869 = vrot.lane.b32.xlu0 %v4228_v9, %s10433_s25  ;;  %v4609_v15 = vld [vmem:[#allocation2 + $0x48] sm:$0xff]  ;;  %v4610_v41 = vld [vmem:[#allocation2 + $0x50] sm:$0xff] }
 0x49f   : > { %4297 = vrot.lane.b32.xlu1 %v4228_v9, %s10429_s21  ;;  %3622 = vst.msk [vmem:[#allocation3 + $0x38] sm:$0xff] %vm577_vm2, %v4610_v41  ;;  %3621 = vst.msk [vmem:[#allocation3 + $0x30] sm:$0xff] %vm577_vm2, %v4609_v15  ;;  %v4994_v52 = vld [vmem:[#allocation2 + $0x52] sm:$0xff]  ;;  %v4801_v27 = vld [vmem:[#allocation2 + $0x49] sm:$0xff] }
 0x4a0   : > { %v4993_v5 = vld [vmem:[#allocation2 + $0x4a] sm:$0xff] }
 0x4a2   : > { %3725 = vrot.lane.b32.xlu0 %v4228_v9, %s10427_s17 }
 0x4a3   : > { %5061 = vrot.lane.b32.xlu1 %v4994_v52, %s10434_s30 }
 0x4a5   : > { %v9624_v0 = vpop.f32.mrb[36].mxu0 }
 0x4a6   : > { %v2986_v55 = vadd.f32 %v9624_v0, %v12162_v16  ;;  %v2980_v2 = vpop.f32.mrb[37].mxu0  ;;  %4489 = vrot.lane.b32.xlu0 %v4994_v52, %s10431_s23 }
 0x4a7   : > { %v2981_v49 = vadd.f32 %v12162_v16, %v2980_v2  ;;  %4675 = vrot.lane.b32.xlu1 %v4609_v15, %s10432_s24 }
 0x4a8   : > { %v3060_v45 = vadd.f32 %v10369_v7, %v2986_v55  ;;  %v12532_v55 = vpop.permute.xlu0 %4923 }
 0x4a9   : > { %v3059_v4 = vadd.f32 %v10370_v6, %v2981_v49 }
 0x4aa   : > { %v3124_v62 = vmul.f32 0.05, %v3060_v45  ;;  %3917 = vrot.lane.b32.xlu0 %v4994_v52, %s10428_s18  ;;  %vm3092_vm14 = vcmp.ge.f32.partialorder %v3060_v45, 0.0 }
 0x4ab   : > { %v3123_v48 = vmul.f32 0.05, %v3059_v4  ;;  %4103 = vrot.lane.b32.xlu1 %v4609_v15, %s10430_s22  ;;  %vm3091_vm13 = vcmp.ge.f32.partialorder %v3059_v4, 0.0  ;;  %v12520_v15 = vpop.permute.xlu1 %4733 }
 0x4ac   : > { %v12483_v25 = vsel %vm3092_vm14, %v3060_v45, %v3124_v62 }
 0x4ad   : > { %v12478_v46 = vsel %vm3091_vm13, %v3059_v4, %v3123_v48  ;;  %14832 = vst [vmem:[#allocation19_spill] sm:$0xff] %v12483_v25 }
 0x4ae   : > { %14831 = vst [vmem:[#allocation16_spill] sm:$0xff] %v12478_v46  ;;  %9672 = vmatprep.mubr.msk.f32.mxu1 %vm251_vm1, %v12478_v46  ;;  %4677 = vrot.lane.b32.xlu0 %v4610_v41, %s10432_s24 }
 0x4af   : > { %4867 = vrot.lane.b32.xlu1 %v4801_v27, %s10433_s25  ;;  %9673 = vmatmul.mubr.msk.f32.gmra.mrb[68].mxu1 %vm251_vm1, %v12483_v25  ;;  %v12534_v2 = vpop.permute.xlu1 %4925 }
 0x4b2   : > { %4105 = vrot.lane.b32.xlu0 %v4610_v41, %s10430_s22 }
 0x4b3   : > { %4295 = vrot.lane.b32.xlu1 %v4801_v27, %s10429_s21 }
 0x4b4   : > { %v9653_v13 = vpop.f32.mrb[54].mxu1 }
 0x4b5   : > { %v12491_v47 = vadd.f32 %v9653_v13, %v10680_v20  ;;  %v3368_v61 = vpop.f32.mrb[55].mxu1 }
 0x4b6   : > { %v12494_v51 = vadd.f32 %v10680_v20, %v3368_v61  ;;  %3723 = vrot.lane.b32.xlu0 %v4801_v27, %s10427_s17 }
 0x4b7   : > { %3558 = vst.msk [vmem:[#allocation2 + $0x69] sm:$0xff] %vm577_vm2, %v12491_v47  ;;  %5059 = vrot.lane.b32.xlu1 %v4993_v5, %s10434_s30 }
 0x4b8   : > { %3557 = vst.msk [vmem:[#allocation2 + $0x61] sm:$0xff] %vm577_vm2, %v12494_v51 }
 0x4ba   : > { %4487 = vrot.lane.b32.xlu0 %v4993_v5, %s10431_s23 }
 0x4bb   : > { %3915 = vrot.lane.b32.xlu1 %v4993_v5, %s10428_s18 }
 0x4be   : > { %v4230_v32 = vld [vmem:[#allocation2 + $0x69] sm:$0xff] }
 0x4bf   : > { %4873 = vrot.lane.b32.xlu0 %v4230_v32, %s10433_s25  ;;  %v4611_v12 = vld [vmem:[#allocation2 + $0x60] sm:$0xff]  ;;  %v4612_v40 = vld [vmem:[#allocation2 + $0x68] sm:$0xff]  ;;  %4301 = vrot.lane.b32.xlu1 %v4230_v32, %s10429_s21 }
 0x4c0   : > { %3624 = vst.msk [vmem:[#allocation3 + $0x48] sm:$0xff] %vm577_vm2, %v4612_v40  ;;  %3623 = vst.msk [vmem:[#allocation3 + $0x40] sm:$0xff] %vm577_vm2, %v4611_v12  ;;  %v4996_v38 = vld [vmem:[#allocation2 + $0x6a] sm:$0xff]  ;;  %v4803_v52 = vld [vmem:[#allocation2 + $0x61] sm:$0xff] }
 0x4c1   : > { %v4995_v62 = vld [vmem:[#allocation2 + $0x62] sm:$0xff] }
 0x4c3   : > { %3729 = vrot.lane.b32.xlu0 %v4230_v32, %s10427_s17  ;;  %5065 = vrot.lane.b32.xlu1 %v4996_v38, %s10434_s30 }
 0x4c5   : > { %v9627_v59 = vpop.f32.mrb[38].mxu0 }
 0x4c6   : > { %v2996_v30 = vadd.f32 %v9627_v59, %v12162_v16  ;;  %v2990_v19 = vpop.f32.mrb[39].mxu0 }
 0x4c7   : > { %4493 = vrot.lane.b32.xlu0 %v4996_v38, %s10431_s23  ;;  %v2991_v56 = vadd.f32 %v12162_v16, %v2990_v19  ;;  %4679 = vrot.lane.b32.xlu1 %v4611_v12, %s10432_s24 }
 0x4c8   : > { %v3062_v60 = vadd.f32 %v10371_v37, %v2996_v30 }
 0x4c9   : > { %v3061_v17 = vadd.f32 %v10372_v33, %v2991_v56 }
 0x4ca   : > { %v3126_v54 = vmul.f32 0.05, %v3062_v60  ;;  %vm3094_vm3 = vcmp.ge.f32.partialorder %v3062_v60, 0.0 }
 0x4cb   : > { %3921 = vrot.lane.b32.xlu0 %v4996_v38, %s10428_s18  ;;  %v3125_v9 = vmul.f32 0.05, %v3061_v17  ;;  %4107 = vrot.lane.b32.xlu1 %v4611_v12, %s10430_s22  ;;  %vm3093_vm15 = vcmp.ge.f32.partialorder %v3061_v17, 0.0 }
 0x4cc   : > { %v12527_v0 = vsel %vm3094_vm3, %v3062_v60, %v3126_v54 }
 0x4cd   : > { %v12522_v41 = vsel %vm3093_vm15, %v3061_v17, %v3125_v9  ;;  %14834 = vst [vmem:[#allocation12_spill] sm:$0xff] %v12527_v0  ;;  %v10373_v17 = vld [vmem:[%s10521_s10 + $0xc8] sm:$0xff]  ;;  %v10374_v9 = vld [vmem:[%s10521_s10 + $0xc0] sm:$0xff] }
 0x4ce   : > { %14833 = vst [vmem:[#allocation18_spill] sm:$0xff] %v12522_v41  ;;  %9675 = vmatprep.mubr.msk.f32.mxu1 %vm251_vm1, %v12522_v41 }
 0x4cf   : > { %4681 = vrot.lane.b32.xlu0 %v4612_v40, %s10432_s24  ;;  %4871 = vrot.lane.b32.xlu1 %v4803_v52, %s10433_s25 }
 0x4d0   : > { %9676 = vmatmul.mubr.msk.f32.gmra.mrb[70].mxu1 %vm251_vm1, %v12527_v0 }
 0x4d3   : > { %4109 = vrot.lane.b32.xlu0 %v4612_v40, %s10430_s22  ;;  %4299 = vrot.lane.b32.xlu1 %v4803_v52, %s10429_s21  ;;  %v9656_v49 = vpop.f32.mrb[56].mxu1 }
 0x4d4   : > { %v12539_v7 = vadd.f32 %v9656_v49, %v10680_v20  ;;  %v3378_v45 = vpop.f32.mrb[57].mxu1 }
 0x4d5   : > { %v12542_v6 = vadd.f32 %v10680_v20, %v3378_v45 }
 0x4d6   : > { %3560 = vst.msk [vmem:[#allocation2 + $0x81] sm:$0xff] %vm577_vm2, %v12539_v7  ;;  %v4290_v4 = vpop.permute.xlu0 %4289 }
 0x4d7   : > { %3727 = vrot.lane.b32.xlu0 %v4803_v52, %s10427_s17  ;;  %3559 = vst.msk [vmem:[#allocation2 + $0x79] sm:$0xff] %vm577_vm2, %v12542_v6  ;;  %5063 = vrot.lane.b32.xlu1 %v4995_v62, %s10434_s30  ;;  %v4098_v48 = vpop.permute.xlu1 %4097 }
 0x4d8   : > { %4192 = vst.msk [vmem:[#allocation3 + $0x8] sm:$0xff] %vm1276_vm6, %v4098_v48 }
 0x4d9   : > { %4384 = vst.msk [vmem:[#allocation3 + $0x8] sm:$0xff] %vm1469_vm7, %v4290_v4 }
 0x4da   : > { %v3718_v27 = vpop.permute.xlu0 %3717 }
 0x4db   : > { %4491 = vrot.lane.b32.xlu0 %v4995_v62, %s10431_s23  ;;  %3810 = vst.msk [vmem:[#allocation3 + $0x18] sm:$0xff] %vm890_vm4, %v3718_v27  ;;  %3919 = vrot.lane.b32.xlu1 %v4995_v62, %s10428_s18  ;;  %v3716_v13 = vpop.permute.xlu1 %3715 }
 0x4dc   : > { %3809 = vst.msk [vmem:[#allocation3 + $0x10] sm:$0xff] %vm890_vm4, %v3716_v13 }
 0x4dd   : > { %v4232_v61 = vld [vmem:[#allocation2 + $0x81] sm:$0xff] }
 0x4de   : > { %v4482_v5 = vpop.permute.xlu0 %4481  ;;  %v4613_v32 = vld [vmem:[#allocation2 + $0x78] sm:$0xff]  ;;  %v4614_v12 = vld [vmem:[#allocation2 + $0x80] sm:$0xff] }
 0x4df   : > { %4877 = vrot.lane.b32.xlu0 %v4232_v61, %s10433_s25  ;;  %4576 = vst.msk [vmem:[#allocation3 + $0x8] sm:$0xff] %vm1662_vm8, %v4482_v5  ;;  %4305 = vrot.lane.b32.xlu1 %v4232_v61, %s10429_s21  ;;  %v4480_v40 = vpop.permute.xlu1 %4479  ;;  %v4998_v59 = vld [vmem:[#allocation2 + $0x82] sm:$0xff]  ;;  %v4805_v62 = vld [vmem:[#allocation2 + $0x79] sm:$0xff] }
 0x4e0   : > { %3626 = vst.msk [vmem:[#allocation3 + $0x58] sm:$0xff] %vm577_vm2, %v4614_v12  ;;  %3625 = vst.msk [vmem:[#allocation3 + $0x50] sm:$0xff] %vm577_vm2, %v4613_v32 }
 0x4e2   : > { %v3910_v38 = vpop.permute.xlu0 %3909 }
 0x4e3   : > { %3733 = vrot.lane.b32.xlu0 %v4232_v61, %s10427_s17  ;;  %4002 = vst.msk [vmem:[#allocation3 + $0x18] sm:$0xff] %vm1083_vm5, %v3910_v38  ;;  %5069 = vrot.lane.b32.xlu1 %v4998_v59, %s10434_s30  ;;  %v3908_v30 = vpop.permute.xlu1 %3907 }
 0x4e4   : > { %4001 = vst.msk [vmem:[#allocation3 + $0x10] sm:$0xff] %vm1083_vm5, %v3908_v30  ;;  %v4997_v30 = vld [vmem:[#allocation2 + $0x7a] sm:$0xff] }
 0x4e5   : > { %v9630_v19 = vpop.f32.mrb[40].mxu0 }
 0x4e6   : > { %v3006_v56 = vadd.f32 %v9630_v19, %v12162_v16  ;;  %v4096_v37 = vpop.permute.xlu0 %4095  ;;  %v3000_v60 = vpop.f32.mrb[41].mxu0 }
 0x4e7   : > { %4497 = vrot.lane.b32.xlu0 %v4998_v59, %s10431_s23  ;;  %4191 = vst.msk [vmem:[#allocation3] sm:$0xff] %vm1276_vm6, %v4096_v37  ;;  %v3001_v33 = vadd.f32 %v12162_v16, %v3000_v60  ;;  %4683 = vrot.lane.b32.xlu1 %v4613_v32, %s10432_s24 }
 0x4e8   : > { %v3064_v54 = vadd.f32 %v10373_v17, %v3006_v56 }
 0x4e9   : > { %v3063_v52 = vadd.f32 %v10374_v9, %v3001_v33 }
 0x4ea   : > { %v3128_v49 = vmul.f32 0.05, %v3064_v54  ;;  %v4288_v45 = vpop.permute.xlu0 %4287  ;;  %vm3096_vm14 = vcmp.ge.f32.partialorder %v3064_v54, 0.0 }
 0x4eb   : > { %3925 = vrot.lane.b32.xlu0 %v4998_v59, %s10428_s18  ;;  %v3127_v4 = vmul.f32 0.05, %v3063_v52  ;;  %4383 = vst.msk [vmem:[#allocation3] sm:$0xff] %vm1469_vm7, %v4288_v45  ;;  %4111 = vrot.lane.b32.xlu1 %v4613_v32, %s10430_s22  ;;  %vm3095_vm13 = vcmp.ge.f32.partialorder %v3063_v52, 0.0 }
 0x4ec   : > { %4575 = vst.msk [vmem:[#allocation3] sm:$0xff] %vm1662_vm8, %v4480_v40  ;;  %v12581_v48 = vsel %vm3096_vm14, %v3064_v54, %v3128_v49 }
 0x4ed   : > { %v12576_v16 = vsel %vm3095_vm13, %v3063_v52, %v3127_v4  ;;  %14836 = vst [vmem:[#allocation21_spill] sm:$0xff] %v12581_v48 }
 0x4ee   : > { %14835 = vst [vmem:[#allocation11_spill] sm:$0xff] %v12576_v16  ;;  %9678 = vmatprep.mubr.msk.f32.mxu1 %vm251_vm1, %v12576_v16 }
 0x4ef   : > { %4685 = vrot.lane.b32.xlu0 %v4614_v12, %s10432_s24  ;;  %4875 = vrot.lane.b32.xlu1 %v4805_v62, %s10433_s25 }
 0x4f0   : > { %9679 = vmatmul.mubr.msk.f32.gmra.mrb[72].mxu1 %vm251_vm1, %v12581_v48  ;;  %v4866_v27 = vpop.permute.xlu0 %4865  ;;  %v4294_v13 = vpop.permute.xlu1 %4293 }
 0x4f3   : > { %4113 = vrot.lane.b32.xlu0 %v4614_v12, %s10430_s22  ;;  %4303 = vrot.lane.b32.xlu1 %v4805_v62, %s10429_s21  ;;  %v9659_v61 = vpop.f32.mrb[58].mxu1 }
 0x4f4   : > { %v12589_v5 = vadd.f32 %v9659_v61, %v10680_v20  ;;  %v5058_v32 = vpop.permute.xlu1 %5057  ;;  %v3722_v40 = vpop.permute.xlu0 %3721 }
 0x4f5   : > { %3812 = vst.msk [vmem:[#allocation3 + $0x28] sm:$0xff] %vm890_vm4, %v3722_v40  ;;  %v3388_v38 = vpop.f32.mrb[59].mxu1  ;;  %v10376_v40 = vld [vmem:[%s10521_s10 + $0xd8] sm:$0xff] }
 0x4f6   : > { %3562 = vst.msk [vmem:[#allocation2 + $0x99] sm:$0xff] %vm577_vm2, %v12589_v5  ;;  %v12595_v59 = vadd.f32 %v10680_v20, %v3388_v38 }
 0x4f7   : > { %3731 = vrot.lane.b32.xlu0 %v4805_v62, %s10427_s17  ;;  %5067 = vrot.lane.b32.xlu1 %v4997_v30, %s10434_s30  ;;  %v12622_v62 = vld [vmem:[%s14642_s1 + $0x70] ss:$0 sm:$0xff] }
 0x4f8   : > { %3561 = vst.msk [vmem:[#allocation2 + $0x91] sm:$0xff] %vm577_vm2, %v12595_v59  ;;  %v4486_v12 = vpop.permute.xlu0 %4485  ;;  %v4672_v19 = vpop.permute.xlu1 %4671 }
 0x4f9   : > { %4767 = vst.msk [vmem:[#allocation3] sm:$0xff] %vm1856_vm9, %v4672_v19 }
 0x4fb   : > { %4495 = vrot.lane.b32.xlu0 %v4997_v30, %s10431_s23  ;;  %3923 = vrot.lane.b32.xlu1 %v4997_v30, %s10428_s18  ;;  %v10377_v30 = vld [vmem:[%s10521_s10 + $0xd0] sm:$0xff] }
 0x4fc   : > { %v3914_v56 = vpop.permute.xlu0 %3913  ;;  %v4100_v37 = vpop.permute.xlu1 %4099 }
 0x4fd   : > { %4004 = vst.msk [vmem:[#allocation3 + $0x28] sm:$0xff] %vm1083_vm5, %v3914_v56  ;;  %v4234_v60 = vld [vmem:[#allocation2 + $0x99] sm:$0xff] }
 0x4fe   : > { %4193 = vst.msk [vmem:[#allocation3 + $0x10] sm:$0xff] %vm1276_vm6, %v4100_v37  ;;  %v5000_v52 = vld [vmem:[#allocation2 + $0x9a] sm:$0xff] }
 0x4ff   : > { %4881 = vrot.lane.b32.xlu0 %v4234_v60, %s10433_s25  ;;  %4309 = vrot.lane.b32.xlu1 %v4234_v60, %s10429_s21  ;;  %v4615_v33 = vld [vmem:[#allocation2 + $0x90] sm:$0xff]  ;;  %v4616_v17 = vld [vmem:[#allocation2 + $0x98] sm:$0xff] }
 0x500   : > { %v4674_v54 = vpop.permute.xlu0 %4673  ;;  %3628 = vst.msk [vmem:[#allocation3 + $0x68] sm:$0xff] %vm577_vm2, %v4616_v17  ;;  %3627 = vst.msk [vmem:[#allocation3 + $0x60] sm:$0xff] %vm577_vm2, %v4615_v33 }
 0x501   : > { %4768 = vst.msk [vmem:[#allocation3 + $0x8] sm:$0xff] %vm1856_vm9, %v4674_v54  ;;  %v4864_v9 = vpop.permute.xlu1 %4863 }
 0x502   : > { %4960 = vst.msk [vmem:[#allocation3 + $0x8] sm:$0xff] %vm2049_vm10, %v4866_v27  ;;  %4959 = vst.msk [vmem:[#allocation3] sm:$0xff] %vm2049_vm10, %v4864_v9 }
 0x503   : > { %3737 = vrot.lane.b32.xlu0 %v4234_v60, %s10427_s17  ;;  %5152 = vst.msk [vmem:[#allocation3 + $0x8] sm:$0xff] %vm2242_vm11, %v5058_v32  ;;  %5073 = vrot.lane.b32.xlu1 %v5000_v52, %s10434_s30 }
 0x504   : > { %v4102_v49 = vpop.permute.xlu0 %4101 }
 0x505   : > { %4194 = vst.msk [vmem:[#allocation3 + $0x18] sm:$0xff] %vm1276_vm6, %v4102_v49  ;;  %v4292_v45 = vpop.permute.xlu1 %4291  ;;  %v9633_v4 = vpop.f32.mrb[42].mxu0  ;;  %v4807_v49 = vld [vmem:[#allocation2 + $0x91] sm:$0xff] }
 0x506   : > { %4386 = vst.msk [vmem:[#allocation3 + $0x18] sm:$0xff] %vm1469_vm7, %v4294_v13  ;;  %4385 = vst.msk [vmem:[#allocation3 + $0x10] sm:$0xff] %vm1469_vm7, %v4292_v45  ;;  %v3016_v27 = vadd.f32 %v12622_v62, %v9633_v4  ;;  %v3010_v61 = vpop.f32.mrb[43].mxu0 }
 0x507   : > { %4501 = vrot.lane.b32.xlu0 %v5000_v52, %s10431_s23  ;;  %4578 = vst.msk [vmem:[#allocation3 + $0x18] sm:$0xff] %vm1662_vm8, %v4486_v12  ;;  %v3011_v32 = vadd.f32 %v12622_v62, %v3010_v61  ;;  %4687 = vrot.lane.b32.xlu1 %v4615_v33, %s10432_s24 }
 0x508   : > { %v3066_v13 = vadd.f32 %v10376_v40, %v3016_v27  ;;  %v3720_v38 = vpop.permute.xlu0 %3719 }
 0x509   : > { %v3065_v19 = vadd.f32 %v10377_v30, %v3011_v32  ;;  %v5056_v56 = vpop.permute.xlu1 %5055  ;;  %3811 = vst.msk [vmem:[#allocation3 + $0x20] sm:$0xff] %vm890_vm4, %v3720_v38 }
 0x50a   : > { %v3130_v37 = vmul.f32 0.05, %v3066_v13  ;;  %5151 = vst.msk [vmem:[#allocation3] sm:$0xff] %vm2242_vm11, %v5056_v56  ;;  %vm3098_vm3 = vcmp.ge.f32.partialorder %v3066_v13, 0.0  ;;  %v5184_v27 = vld [vmem:[#allocation3 + $0x8] sm:$0xff] }
 0x50b   : > { %3929 = vrot.lane.b32.xlu0 %v5000_v52, %s10428_s18  ;;  %v3129_v60 = vmul.f32 0.05, %v3065_v19  ;;  %4115 = vrot.lane.b32.xlu1 %v4615_v33, %s10430_s22  ;;  %vm3097_vm15 = vcmp.ge.f32.partialorder %v3065_v19, 0.0 }
 0x50c   : > { %v4484_v12 = vpop.permute.xlu0 %4483  ;;  %v12642_v52 = vsel %vm3098_vm3, %v3066_v13, %v3130_v37 }
 0x50d   : > { %v3912_v54 = vpop.permute.xlu1 %3911  ;;  %4577 = vst.msk [vmem:[#allocation3 + $0x10] sm:$0xff] %vm1662_vm8, %v4484_v12  ;;  %v12636_v9 = vsel %vm3097_vm15, %v3065_v19, %v3129_v60  ;;  %14838 = vst [vmem:[#allocation23_spill] sm:$0xff] %v12642_v52 }
 0x50e   : > { %14837 = vst [vmem:[#allocation20_spill] sm:$0xff] %v12636_v9  ;;  %4003 = vst.msk [vmem:[#allocation3 + $0x20] sm:$0xff] %vm1083_vm5, %v3912_v54  ;;  %9681 = vmatprep.mubr.msk.f32.mxu1 %vm251_vm1, %v12636_v9 }
 0x50f   : > { %4689 = vrot.lane.b32.xlu0 %v4616_v17, %s10432_s24  ;;  %4879 = vrot.lane.b32.xlu1 %v4807_v49, %s10433_s25 }
 0x510   : > { %9682 = vmatmul.mubr.msk.f32.gmra.mrb[74].mxu1 %vm251_vm1, %v12642_v52  ;;  %v4870_v33 = vpop.permute.xlu0 %4869 }
 0x511   : > { %v4298_v45 = vpop.permute.xlu1 %4297  ;;  %v5183_v4 = vld [vmem:[#allocation3] sm:$0xff] }
 0x512   : > { %9708 = vmatprep.mubr.msk.f32.mxu0 %vm2321_vm12, %v5183_v4 }
 0x513   : > { %4117 = vrot.lane.b32.xlu0 %v4616_v17, %s10430_s22  ;;  %9709 = vmatmul.mubr.msk.f32.vlgmr.msra.gmra.mrb[48].mxu0 %vm2321_vm12, %v5184_v27  ;;  %v9662_v61 = vpop.f32.mrb[60].mxu1  ;;  %v4999_v17 = vld [vmem:[#allocation2 + $0x92] sm:$0xff] }
 0x514   : > { %4307 = vrot.lane.b32.xlu1 %v4807_v49, %s10429_s21  ;;  %v12652_v32 = vadd.f32 %v9662_v61, %v10680_v20  ;;  %v3398_v40 = vpop.f32.mrb[61].mxu1  ;;  %v3726_v13 = vpop.permute.xlu0 %3725 }
 0x515   : > { %v12655_v38 = vadd.f32 %v10680_v20, %v3398_v40  ;;  %v5062_v30 = vpop.permute.xlu1 %5061  ;;  %3814 = vst.msk [vmem:[#allocation3 + $0x38] sm:$0xff] %vm890_vm4, %v3726_v13 }
 0x516   : > { %3564 = vst.msk [vmem:[#allocation2 + $0xb1] sm:$0xff] %vm577_vm2, %v12652_v32 }
 0x517   : > { %3735 = vrot.lane.b32.xlu0 %v4807_v49, %s10427_s17  ;;  %3563 = vst.msk [vmem:[#allocation2 + $0xa9] sm:$0xff] %vm577_vm2, %v12655_v38 }
 0x518   : > { %5071 = vrot.lane.b32.xlu1 %v4999_v17, %s10434_s30  ;;  %v4490_v19 = vpop.permute.xlu0 %4489 }
 0x519   : > { %v4676_v56 = vpop.permute.xlu1 %4675 }
 0x51a   : > { %4769 = vst.msk [vmem:[#allocation3 + $0x10] sm:$0xff] %vm1856_vm9, %v4676_v56 }
 0x51b   : > { %4499 = vrot.lane.b32.xlu0 %v4999_v17, %s10431_s23 }
 0x51c   : > { %3927 = vrot.lane.b32.xlu1 %v4999_v17, %s10428_s18  ;;  %v3918_v37 = vpop.permute.xlu0 %3917 }
 0x51d   : > { %v4104_v60 = vpop.permute.xlu1 %4103  ;;  %4006 = vst.msk [vmem:[#allocation3 + $0x38] sm:$0xff] %vm1083_vm5, %v3918_v37  ;;  %v4236_v12 = vld [vmem:[#allocation2 + $0xb1] sm:$0xff] }
 0x51e   : > { %4195 = vst.msk [vmem:[#allocation3 + $0x20] sm:$0xff] %vm1276_vm6, %v4104_v60  ;;  %v4617_v54 = vld [vmem:[#allocation2 + $0xa8] sm:$0xff]  ;;  %v12670_v49 = vld [vmem:[#allocation2 + $0xb0] sm:$0xff] }
 0x51f   : > { %4885 = vrot.lane.b32.xlu0 %v4236_v12, %s10433_s25  ;;  %3630 = vst.msk [vmem:[#allocation3 + $0x78] sm:$0xff] %vm577_vm2, %v12670_v49  ;;  %3629 = vst.msk [vmem:[#allocation3 + $0x70] sm:$0xff] %vm577_vm2, %v4617_v54  ;;  %v5002_v40 = vld [vmem:[#allocation2 + $0xb2] sm:$0xff] }
 0x520   : > { %4313 = vrot.lane.b32.xlu1 %v4236_v12, %s10429_s21  ;;  %v4678_v4 = vpop.permute.xlu0 %4677 }
 0x521   : > { %v4868_v27 = vpop.permute.xlu1 %4867  ;;  %4770 = vst.msk [vmem:[#allocation3 + $0x18] sm:$0xff] %vm1856_vm9, %v4678_v4 }
 0x522   : > { %4961 = vst.msk [vmem:[#allocation3 + $0x10] sm:$0xff] %vm2049_vm10, %v4868_v27  ;;  %4962 = vst.msk [vmem:[#allocation3 + $0x18] sm:$0xff] %vm2049_vm10, %v4870_v33  ;;  %v9665_v61 = vpop.f32.mrb[62].mxu1  ;;  %v10378_v27 = vld [vmem:[%s10521_s10 + $0xe8] sm:$0xff] }
 0x523   : > { %3741 = vrot.lane.b32.xlu0 %v4236_v12, %s10427_s17  ;;  %5154 = vst.msk [vmem:[#allocation3 + $0x18] sm:$0xff] %vm2242_vm11, %v5062_v30  ;;  %v12682_v13 = vadd.f32 %v9665_v61, %v10680_v20  ;;  %v3408_v17 = vpop.f32.mrb[63].mxu1  ;;  %v9636_v37 = vpop.f32.mrb[44].mxu0 }
 0x524   : > { %5077 = vrot.lane.b32.xlu1 %v5002_v40, %s10434_s30  ;;  %v12686_v56 = vadd.f32 %v10680_v20, %v3408_v17  ;;  %v4106_v60 = vpop.permute.xlu0 %4105  ;;  %v3026_v33 = vadd.f32 %v12622_v62, %v9636_v37  ;;  %v3020_v30 = vpop.f32.mrb[45].mxu0  ;;  %v10379_v17 = vld [vmem:[%s10521_s10 + $0xe0] sm:$0xff] }
 0x525   : > { %3566 = vst.msk [vmem:[#allocation2 + $0xc9] sm:$0xff] %vm577_vm2, %v12682_v13  ;;  %v4296_v12 = vpop.permute.xlu1 %4295  ;;  %v3021_v4 = vadd.f32 %v12622_v62, %v3020_v30 }
 0x526   : > { %4196 = vst.msk [vmem:[#allocation3 + $0x28] sm:$0xff] %vm1276_vm6, %v4106_v60  ;;  %v3068_v61 = vadd.f32 %v10378_v27, %v3026_v33 }
 0x527   : > { %3565 = vst.msk [vmem:[#allocation2 + $0xc1] sm:$0xff] %vm577_vm2, %v12686_v56  ;;  %4505 = vrot.lane.b32.xlu0 %v5002_v40, %s10431_s23  ;;  %v3067_v37 = vadd.f32 %v10379_v17, %v3021_v4 }
 0x528   : > { %4387 = vst.msk [vmem:[#allocation3 + $0x20] sm:$0xff] %vm1469_vm7, %v4296_v12  ;;  %4388 = vst.msk [vmem:[#allocation3 + $0x28] sm:$0xff] %vm1469_vm7, %v4298_v45  ;;  %4691 = vrot.lane.b32.xlu1 %v4617_v54, %s10432_s24  ;;  %v3724_v60 = vpop.permute.xlu0 %3723  ;;  %v3132_v52 = vmul.f32 0.05, %v3068_v61  ;;  %vm3100_vm14 = vcmp.ge.f32.partialorder %v3068_v61, 0.0 }
 0x529   : > { %4580 = vst.msk [vmem:[#allocation3 + $0x28] sm:$0xff] %vm1662_vm8, %v4490_v19  ;;  %v5060_v9 = vpop.permute.xlu1 %5059  ;;  %v3131_v12 = vmul.f32 0.05, %v3067_v37  ;;  %vm3099_vm13 = vcmp.ge.f32.partialorder %v3067_v37, 0.0 }
 0x52a   : > { %3813 = vst.msk [vmem:[#allocation3 + $0x30] sm:$0xff] %vm890_vm4, %v3724_v60  ;;  %v12711_v30 = vsel %vm3100_vm14, %v3068_v61, %v3132_v52  ;;  %v5186_v60 = vld [vmem:[#allocation3 + $0x18] sm:$0xff]  ;;  %vm7313_vm14 = vcmask 910080  }
 0x52b   : > { %5153 = vst.msk [vmem:[#allocation3 + $0x10] sm:$0xff] %vm2242_vm11, %v5060_v9  ;;  %3933 = vrot.lane.b32.xlu0 %v5002_v40, %s10428_s18  ;;  %v12706_v19 = vsel %vm3099_vm13, %v3067_v37, %v3131_v12  ;;  %14840 = vst [vmem:[#allocation25_spill] sm:$0xff] %v12711_v30  ;;  %vm7306_vm13 = vcmask 778880  }
 0x52c   : > { %4119 = vrot.lane.b32.xlu1 %v4617_v54, %s10430_s22  ;;  %v4488_v45 = vpop.permute.xlu0 %4487  ;;  %14839 = vst [vmem:[#allocation22_spill] sm:$0xff] %v12706_v19  ;;  %9684 = vmatprep.mubr.msk.f32.mxu1 %vm251_vm1, %v12706_v19  ;;  %v4809_v54 = vld [vmem:[#allocation2 + $0xa9] sm:$0xff] }
 0x52d   : > { %v3916_v33 = vpop.permute.xlu1 %3915  ;;  %4579 = vst.msk [vmem:[#allocation3 + $0x20] sm:$0xff] %vm1662_vm8, %v4488_v45  ;;  %9685 = vmatmul.mubr.msk.f32.gmra.mrb[76].mxu1 %vm251_vm1, %v12711_v30  ;;  %v10380_v45 = vld [vmem:[%s10521_s10 + $0xf8] sm:$0xff]  ;;  %v10381_v19 = vld [vmem:[%s10521_s10 + $0xf0] sm:$0xff] }
 0x52e   : > { %v12713_v4 = vld [vmem:[#allocation2 + $0xc0] sm:$0xff]  ;;  %v12715_v9 = vld [vmem:[#allocation2 + $0xc8] sm:$0xff]  ;;  %4005 = vst.msk [vmem:[#allocation3 + $0x30] sm:$0xff] %vm1083_vm5, %v3916_v33 }
 0x52f   : > { %4693 = vrot.lane.b32.xlu0 %v12670_v49, %s10432_s24  ;;  %3632 = vst.msk [vmem:[#allocation3 + $0x88] sm:$0xff] %vm577_vm2, %v12715_v9  ;;  %3631 = vst.msk [vmem:[#allocation3 + $0x80] sm:$0xff] %vm577_vm2, %v12713_v4 }
 0x530   : > { %4883 = vrot.lane.b32.xlu1 %v4809_v54, %s10433_s25 }
 0x531   : > { %v4874_v52 = vpop.permute.xlu0 %4873  ;;  %v4302_v40 = vpop.permute.xlu1 %4301 }
 0x532   : > { %v9639_v27 = vpop.f32.mrb[46].mxu0  ;;  %v5185_v61 = vld [vmem:[#allocation3 + $0x10] sm:$0xff] }
 0x533   : > { %v3036_v17 = vadd.f32 %v12622_v62, %v9639_v27  ;;  %9711 = vmatprep.mubr.msk.f32.mxu0 %vm2321_vm12, %v5185_v61  ;;  %v3030_v37 = vpop.f32.mrb[47].mxu0  ;;  %4121 = vrot.lane.b32.xlu0 %v12670_v49, %s10430_s22  ;;  %v5001_v61 = vld [vmem:[#allocation2 + $0xaa] sm:$0xff] }
 0x534   : > { %v3031_v12 = vadd.f32 %v12622_v62, %v3030_v37  ;;  %4311 = vrot.lane.b32.xlu1 %v4809_v54, %s10429_s21  ;;  %9712 = vmatmul.mubr.msk.f32.gmra.mrb[50].mxu0 %vm2321_vm12, %v5186_v60 }
 0x535   : > { %v3070_v33 = vadd.f32 %v10380_v45, %v3036_v17  ;;  %v3730_v30 = vpop.permute.xlu0 %3729  ;;  %v5066_v16 = vpop.permute.xlu1 %5065 }
 0x536   : > { %v3069_v48 = vadd.f32 %v10381_v19, %v3031_v12  ;;  %3816 = vst.msk [vmem:[#allocation3 + $0x48] sm:$0xff] %vm890_vm4, %v3730_v30 }
 0x537   : > { %v3134_v27 = vmul.f32 0.05, %v3070_v33  ;;  %3739 = vrot.lane.b32.xlu0 %v4809_v54, %s10427_s17  ;;  %vm3102_vm3 = vcmp.ge.f32.partialorder %v3070_v33, 0.0 }
 0x538   : > { %v3133_v49 = vmul.f32 0.05, %v3069_v48  ;;  %5075 = vrot.lane.b32.xlu1 %v5001_v61, %s10434_s30  ;;  %vm3101_vm15 = vcmp.ge.f32.partialorder %v3069_v48, 0.0 }
 0x539   : > { %v4494_v62 = vpop.permute.xlu0 %4493  ;;  %v4680_v37 = vpop.permute.xlu1 %4679  ;;  %v12745_v19 = vsel %vm3102_vm3, %v3070_v33, %v3134_v27  ;;  %v5004_v33 = vld [vmem:[#allocation2 + $0xca] sm:$0xff]  ;;  %vm7565_vm3 = vcmask 123904  }
 0x53a   : > { %v12739_v60 = vsel %vm3101_vm15, %v3069_v48, %v3133_v49  ;;  %4771 = vst.msk [vmem:[#allocation3 + $0x20] sm:$0xff] %vm1856_vm9, %v4680_v37  ;;  %14842 = vst [vmem:[#allocation27_spill] sm:$0xff] %v12745_v19  ;;  %v4238_v48 = vld [vmem:[#allocation2 + $0xc9] sm:$0xff]  ;;  %vm7320_vm15 = vcmask 1041280  }
 0x53b   : > { %14841 = vst [vmem:[#allocation24_spill] sm:$0xff] %v12739_v60  ;;  %9687 = vmatprep.mubr.msk.f32.mxu1 %vm251_vm1, %v12739_v60  ;;  %4503 = vrot.lane.b32.xlu0 %v5001_v61, %s10431_s23 }
 0x53c   : > { %3931 = vrot.lane.b32.xlu1 %v5001_v61, %s10428_s18  ;;  %9688 = vmatmul.mubr.msk.f32.gmra.mrb[78].mxu1 %vm251_vm1, %v12745_v19 }
 0x53d   : > { %v3922_v30 = vpop.permute.xlu0 %3921  ;;  %v4108_v54 = vpop.permute.xlu1 %4107 }
 0x53e   : > { %4008 = vst.msk [vmem:[#allocation3 + $0x48] sm:$0xff] %vm1083_vm5, %v3922_v30 }
 0x53f   : > { %4197 = vst.msk [vmem:[#allocation3 + $0x30] sm:$0xff] %vm1276_vm6, %v4108_v54  ;;  %4889 = vrot.lane.b32.xlu0 %v4238_v48, %s10433_s25 }
 0x540   : > { %4317 = vrot.lane.b32.xlu1 %v4238_v48, %s10429_s21 }
 0x541   : > { %v4682_v17 = vpop.permute.xlu0 %4681  ;;  %v4872_v12 = vpop.permute.xlu1 %4871 }
 0x542   : > { %4772 = vst.msk [vmem:[#allocation3 + $0x28] sm:$0xff] %vm1856_vm9, %v4682_v17  ;;  %v9668_v45 = vpop.f32.mrb[64].mxu1  ;;  %v4811_v17 = vld [vmem:[#allocation2 + $0xc1] sm:$0xff] }
 0x543   : > { %4963 = vst.msk [vmem:[#allocation3 + $0x20] sm:$0xff] %vm2049_vm10, %v4872_v12  ;;  %4964 = vst.msk [vmem:[#allocation3 + $0x28] sm:$0xff] %vm2049_vm10, %v4874_v52  ;;  %3745 = vrot.lane.b32.xlu0 %v4238_v48, %s10427_s17  ;;  %v12760_v27 = vadd.f32 %v9668_v45, %v10680_v20  ;;  %v3418_v61 = vpop.f32.mrb[65].mxu1 }
 0x544   : > { %5156 = vst.msk [vmem:[#allocation3 + $0x28] sm:$0xff] %vm2242_vm11, %v5066_v16  ;;  %5081 = vrot.lane.b32.xlu1 %v5004_v33, %s10434_s30  ;;  %v12764_v49 = vadd.f32 %v10680_v20, %v3418_v61 }
 0x545   : > { %v4110_v37 = vpop.permute.xlu0 %4109  ;;  %3568 = vst.msk [vmem:[#allocation2 + $0xe1] sm:$0xff] %vm577_vm2, %v12760_v27  ;;  %v4300_v52 = vpop.permute.xlu1 %4299 }
 0x546   : > { %4198 = vst.msk [vmem:[#allocation3 + $0x38] sm:$0xff] %vm1276_vm6, %v4110_v37 }
 0x547   : > { %3567 = vst.msk [vmem:[#allocation2 + $0xd9] sm:$0xff] %vm577_vm2, %v12764_v49  ;;  %4509 = vrot.lane.b32.xlu0 %v5004_v33, %s10431_s23 }
 0x548   : > { %4389 = vst.msk [vmem:[#allocation3 + $0x30] sm:$0xff] %vm1469_vm7, %v4300_v52  ;;  %4390 = vst.msk [vmem:[#allocation3 + $0x38] sm:$0xff] %vm1469_vm7, %v4302_v40  ;;  %4695 = vrot.lane.b32.xlu1 %v12713_v4, %s10432_s24  ;;  %v5003_v52 = vld [vmem:[#allocation2 + $0xc2] sm:$0xff] }
 0x549   : > { %4582 = vst.msk [vmem:[#allocation3 + $0x38] sm:$0xff] %vm1662_vm8, %v4494_v62  ;;  %v3728_v16 = vpop.permute.xlu0 %3727  ;;  %v5064_v30 = vpop.permute.xlu1 %5063 }
 0x54a   : > { %3815 = vst.msk [vmem:[#allocation3 + $0x40] sm:$0xff] %vm890_vm4, %v3728_v16 }
 0x54b   : > { %5155 = vst.msk [vmem:[#allocation3 + $0x20] sm:$0xff] %vm2242_vm11, %v5064_v30  ;;  %3937 = vrot.lane.b32.xlu0 %v5004_v33, %s10428_s18  ;;  %v5188_v33 = vld [vmem:[#allocation3 + $0x28] sm:$0xff] }
 0x54c   : > { %4123 = vrot.lane.b32.xlu1 %v12713_v4, %s10430_s22 }
 0x54d   : > { %v4492_v54 = vpop.permute.xlu0 %4491  ;;  %v3920_v40 = vpop.permute.xlu1 %3919 }
 0x54e   : > { %4581 = vst.msk [vmem:[#allocation3 + $0x30] sm:$0xff] %vm1662_vm8, %v4492_v54  ;;  %v4621_v48 = vld [vmem:[#allocation2 + $0xd8] sm:$0xff]  ;;  %v12783_v62 = vld [vmem:[#allocation2 + $0xe0] sm:$0xff] }
 0x54f   : > { %4007 = vst.msk [vmem:[#allocation3 + $0x40] sm:$0xff] %vm1083_vm5, %v3920_v40  ;;  %4697 = vrot.lane.b32.xlu0 %v12715_v9, %s10432_s24  ;;  %v4240_v40 = vld [vmem:[#allocation2 + $0xe1] sm:$0xff] }
 0x550   : > { %3634 = vst.msk [vmem:[#allocation3 + $0x98] sm:$0xff] %vm577_vm2, %v12783_v62  ;;  %3633 = vst.msk [vmem:[#allocation3 + $0x90] sm:$0xff] %vm577_vm2, %v4621_v48  ;;  %4887 = vrot.lane.b32.xlu1 %v4811_v17, %s10433_s25 }
 0x551   : > { %v4878_v4 = vpop.permute.xlu0 %4877  ;;  %v4306_v12 = vpop.permute.xlu1 %4305 }
 0x552   : > { %v5187_v45 = vld [vmem:[#allocation3 + $0x20] sm:$0xff] }
 0x553   : > { %9714 = vmatprep.mubr.msk.f32.mxu0 %vm2321_vm12, %v5187_v45  ;;  %4125 = vrot.lane.b32.xlu0 %v12715_v9, %s10430_s22 }
 0x554   : > { %4315 = vrot.lane.b32.xlu1 %v4811_v17, %s10429_s21  ;;  %9715 = vmatmul.mubr.msk.f32.gmra.mrb[52].mxu0 %vm2321_vm12, %v5188_v33 }
 0x555   : > { %v3734_v61 = vpop.permute.xlu0 %3733  ;;  %v5070_v37 = vpop.permute.xlu1 %5069 }
 0x556   : > { %3818 = vst.msk [vmem:[#allocation3 + $0x58] sm:$0xff] %vm890_vm4, %v3734_v61  ;;  %v5006_v61 = vld [vmem:[#allocation2 + $0xe2] sm:$0xff] }
 0x557   : > { %3743 = vrot.lane.b32.xlu0 %v4811_v17, %s10427_s17 }
 0x558   : > { %5079 = vrot.lane.b32.xlu1 %v5003_v52, %s10434_s30 }
 0x559   : > { %v4498_v16 = vpop.permute.xlu0 %4497  ;;  %v4684_v30 = vpop.permute.xlu1 %4683 }
 0x55a   : > { %4773 = vst.msk [vmem:[#allocation3 + $0x30] sm:$0xff] %vm1856_vm9, %v4684_v30 }
 0x55b   : > { %4507 = vrot.lane.b32.xlu0 %v5003_v52, %s10431_s23 }
 0x55c   : > { %3935 = vrot.lane.b32.xlu1 %v5003_v52, %s10428_s18 }
 0x55d   : > { %v3926_v9 = vpop.permute.xlu0 %3925  ;;  %v4112_v54 = vpop.permute.xlu1 %4111 }
 0x55e   : > { %4010 = vst.msk [vmem:[#allocation3 + $0x58] sm:$0xff] %vm1083_vm5, %v3926_v9 }
 0x55f   : > { %4199 = vst.msk [vmem:[#allocation3 + $0x40] sm:$0xff] %vm1276_vm6, %v4112_v54  ;;  %4893 = vrot.lane.b32.xlu0 %v4240_v40, %s10433_s25 }
 0x560   : > { %4321 = vrot.lane.b32.xlu1 %v4240_v40, %s10429_s21 }
 0x561   : > { %v4686_v17 = vpop.permute.xlu0 %4685  ;;  %v4876_v45 = vpop.permute.xlu1 %4875 }
 0x562   : > { %4774 = vst.msk [vmem:[#allocation3 + $0x38] sm:$0xff] %vm1856_vm9, %v4686_v17  ;;  %v9671_v33 = vpop.f32.mrb[66].mxu1 }
 0x563   : > { %4965 = vst.msk [vmem:[#allocation3 + $0x30] sm:$0xff] %vm2049_vm10, %v4876_v45  ;;  %4966 = vst.msk [vmem:[#allocation3 + $0x38] sm:$0xff] %vm2049_vm10, %v4878_v4  ;;  %3749 = vrot.lane.b32.xlu0 %v4240_v40, %s10427_s17  ;;  %v12813_v52 = vadd.f32 %v9671_v33, %v10680_v20  ;;  %v3428_v30 = vpop.f32.mrb[67].mxu1 }
 0x564   : > { %5158 = vst.msk [vmem:[#allocation3 + $0x38] sm:$0xff] %vm2242_vm11, %v5070_v37  ;;  %5085 = vrot.lane.b32.xlu1 %v5006_v61, %s10434_s30  ;;  %v12817_v9 = vadd.f32 %v10680_v20, %v3428_v30  ;;  %v4813_v30 = vld [vmem:[#allocation2 + $0xd9] sm:$0xff] }
 0x565   : > { %v4114_v54 = vpop.permute.xlu0 %4113  ;;  %3570 = vst.msk [vmem:[#allocation2 + $0xf9] sm:$0xff] %vm577_vm2, %v12813_v52  ;;  %v4304_v4 = vpop.permute.xlu1 %4303 }
 0x566   : > { %4200 = vst.msk [vmem:[#allocation3 + $0x48] sm:$0xff] %vm1276_vm6, %v4114_v54 }
 0x567   : > { %3569 = vst.msk [vmem:[#allocation2 + $0xf1] sm:$0xff] %vm577_vm2, %v12817_v9  ;;  %4513 = vrot.lane.b32.xlu0 %v5006_v61, %s10431_s23 }
 0x568   : > { %4391 = vst.msk [vmem:[#allocation3 + $0x40] sm:$0xff] %vm1469_vm7, %v4304_v4  ;;  %4392 = vst.msk [vmem:[#allocation3 + $0x48] sm:$0xff] %vm1469_vm7, %v4306_v12  ;;  %4699 = vrot.lane.b32.xlu1 %v4621_v48, %s10432_s24  ;;  %v5619_v12 = vld [vmem:[%s14642_s1 + $0xe0] sm:$0xff] }
 0x569   : > { %4584 = vst.msk [vmem:[#allocation3 + $0x48] sm:$0xff] %vm1662_vm8, %v4498_v16  ;;  %v3732_v37 = vpop.permute.xlu0 %3731  ;;  %v5068_v40 = vpop.permute.xlu1 %5067  ;;  %9756 = vmatprep.subr.mxu1 %v5619_v12 }
 0x56a   : > { %3817 = vst.msk [vmem:[#allocation3 + $0x50] sm:$0xff] %vm890_vm4, %v3732_v37  ;;  %9757 = vmatpush3.msra.mxu1 %v5619_v12 }
 0x56b   : > { %5157 = vst.msk [vmem:[#allocation3 + $0x30] sm:$0xff] %vm2242_vm11, %v5068_v40  ;;  %3941 = vrot.lane.b32.xlu0 %v5006_v61, %s10428_s18  ;;  %v5190_v4 = vld [vmem:[#allocation3 + $0x38] sm:$0xff] }
 0x56c   : > { %4127 = vrot.lane.b32.xlu1 %v4621_v48, %s10430_s22 }
 0x56d   : > { %v4496_v17 = vpop.permute.xlu0 %4495  ;;  %v3924_v45 = vpop.permute.xlu1 %3923 }
 0x56e   : > { %4583 = vst.msk [vmem:[#allocation3 + $0x40] sm:$0xff] %vm1662_vm8, %v4496_v17  ;;  %v12837_v16 = vld [vmem:[#allocation2 + $0xf0] sm:$0xff]  ;;  %v12839_v33 = vld [vmem:[#allocation2 + $0xf8] sm:$0xff] }
 0x56f   : > { %4009 = vst.msk [vmem:[#allocation3 + $0x50] sm:$0xff] %vm1083_vm5, %v3924_v45  ;;  %4701 = vrot.lane.b32.xlu0 %v12783_v62, %s10432_s24  ;;  %v5005_v17 = vld [vmem:[#allocation2 + $0xda] sm:$0xff] }
 0x570   : > { %3636 = vst.msk [vmem:[#allocation3 + $0xa8] sm:$0xff] %vm577_vm2, %v12839_v33  ;;  %3635 = vst.msk [vmem:[#allocation3 + $0xa0] sm:$0xff] %vm577_vm2, %v12837_v16  ;;  %4891 = vrot.lane.b32.xlu1 %v4813_v30, %s10433_s25 }
 0x571   : > { %v4882_v48 = vpop.permute.xlu0 %4881  ;;  %v4310_v61 = vpop.permute.xlu1 %4309 }
 0x572   : > { %v5189_v54 = vld [vmem:[#allocation3 + $0x30] sm:$0xff] }
 0x573   : > { %9717 = vmatprep.mubr.msk.f32.mxu0 %vm2321_vm12, %v5189_v54  ;;  %4129 = vrot.lane.b32.xlu0 %v12783_v62, %s10430_s22 }
 0x574   : > { %4319 = vrot.lane.b32.xlu1 %v4813_v30, %s10429_s21  ;;  %9718 = vmatmul.mubr.msk.f32.gmra.mrb[54].mxu0 %vm2321_vm12, %v5190_v4  ;;  %v4242_v4 = vld [vmem:[#allocation2 + $0xf9] sm:$0xff] }
 0x575   : > { %v3738_v37 = vpop.permute.xlu0 %3737  ;;  %v5074_v40 = vpop.permute.xlu1 %5073 }
 0x576   : > { %3820 = vst.msk [vmem:[#allocation3 + $0x68] sm:$0xff] %vm890_vm4, %v3738_v37 }
 0x577   : > { %3747 = vrot.lane.b32.xlu0 %v4813_v30, %s10427_s17 }
 0x578   : > { %5083 = vrot.lane.b32.xlu1 %v5005_v17, %s10434_s30 }
 0x579   : > { %v4502_v12 = vpop.permute.xlu0 %4501  ;;  %v4688_v45 = vpop.permute.xlu1 %4687 }
 0x57a   : > { %4775 = vst.msk [vmem:[#allocation3 + $0x40] sm:$0xff] %vm1856_vm9, %v4688_v45  ;;  %v5008_v45 = vld [vmem:[#allocation2 + $0xfa] sm:$0xff] }
 0x57b   : > { %4511 = vrot.lane.b32.xlu0 %v5005_v17, %s10431_s23 }
 0x57c   : > { %3939 = vrot.lane.b32.xlu1 %v5005_v17, %s10428_s18 }
 0x57d   : > { %v3930_v62 = vpop.permute.xlu0 %3929  ;;  %v4116_v54 = vpop.permute.xlu1 %4115 }
 0x57e   : > { %4012 = vst.msk [vmem:[#allocation3 + $0x68] sm:$0xff] %vm1083_vm5, %v3930_v62 }
 0x57f   : > { %4201 = vst.msk [vmem:[#allocation3 + $0x50] sm:$0xff] %vm1276_vm6, %v4116_v54  ;;  %4897 = vrot.lane.b32.xlu0 %v4242_v4, %s10433_s25 }
 0x580   : > { %4325 = vrot.lane.b32.xlu1 %v4242_v4, %s10429_s21 }
 0x581   : > { %v4690_v30 = vpop.permute.xlu0 %4689  ;;  %v4880_v37 = vpop.permute.xlu1 %4879 }
 0x582   : > { %4776 = vst.msk [vmem:[#allocation3 + $0x48] sm:$0xff] %vm1856_vm9, %v4690_v30  ;;  %v9674_v17 = vpop.f32.mrb[68].mxu1 }
 0x583   : > { %4967 = vst.msk [vmem:[#allocation3 + $0x40] sm:$0xff] %vm2049_vm10, %v4880_v37  ;;  %4968 = vst.msk [vmem:[#allocation3 + $0x48] sm:$0xff] %vm2049_vm10, %v4882_v48  ;;  %3753 = vrot.lane.b32.xlu0 %v4242_v4, %s10427_s17  ;;  %v12870_v62 = vadd.f32 %v9674_v17, %v10680_v20  ;;  %v3438_v54 = vpop.f32.mrb[69].mxu1 }
 0x584   : > { %5160 = vst.msk [vmem:[#allocation3 + $0x48] sm:$0xff] %vm2242_vm11, %v5074_v40  ;;  %5089 = vrot.lane.b32.xlu1 %v5008_v45, %s10434_s30  ;;  %v12874_v19 = vadd.f32 %v10680_v20, %v3438_v54  ;;  %v4815_v54 = vld [vmem:[#allocation2 + $0xf1] sm:$0xff] }
 0x585   : > { %v4118_v30 = vpop.permute.xlu0 %4117  ;;  %3572 = vst.msk [vmem:[#allocation2 + $0x111] sm:$0xff] %vm577_vm2, %v12870_v62 }
 0x586   : > { %v4308_v48 = vpop.permute.xlu1 %4307  ;;  %4202 = vst.msk [vmem:[#allocation3 + $0x58] sm:$0xff] %vm1276_vm6, %v4118_v30 }
 0x587   : > { %3571 = vst.msk [vmem:[#allocation2 + $0x109] sm:$0xff] %vm577_vm2, %v12874_v19  ;;  %4517 = vrot.lane.b32.xlu0 %v5008_v45, %s10431_s23 }
 0x588   : > { %4393 = vst.msk [vmem:[#allocation3 + $0x50] sm:$0xff] %vm1469_vm7, %v4308_v48  ;;  %4394 = vst.msk [vmem:[#allocation3 + $0x58] sm:$0xff] %vm1469_vm7, %v4310_v61  ;;  %4703 = vrot.lane.b32.xlu1 %v12837_v16, %s10432_s24 }
 0x589   : > { %4586 = vst.msk [vmem:[#allocation3 + $0x58] sm:$0xff] %vm1662_vm8, %v4502_v12  ;;  %v3736_v40 = vpop.permute.xlu0 %3735 }
 0x58a   : > { %v5072_v4 = vpop.permute.xlu1 %5071  ;;  %3819 = vst.msk [vmem:[#allocation3 + $0x60] sm:$0xff] %vm890_vm4, %v3736_v40 }
 0x58b   : > { %5159 = vst.msk [vmem:[#allocation3 + $0x40] sm:$0xff] %vm2242_vm11, %v5072_v4  ;;  %3945 = vrot.lane.b32.xlu0 %v5008_v45, %s10428_s18  ;;  %v5192_v48 = vld [vmem:[#allocation3 + $0x48] sm:$0xff] }
 0x58c   : > { %4131 = vrot.lane.b32.xlu1 %v12837_v16, %s10430_s22 }
 0x58d   : > { %v4500_v37 = vpop.permute.xlu0 %4499 }
 0x58e   : > { %v3928_v61 = vpop.permute.xlu1 %3927  ;;  %4585 = vst.msk [vmem:[#allocation3 + $0x50] sm:$0xff] %vm1662_vm8, %v4500_v37  ;;  %v4625_v17 = vld [vmem:[#allocation2 + $0x108] sm:$0xff]  ;;  %v12893_v12 = vld [vmem:[#allocation2 + $0x110] sm:$0xff] }
 0x58f   : > { %4011 = vst.msk [vmem:[#allocation3 + $0x60] sm:$0xff] %vm1083_vm5, %v3928_v61  ;;  %4705 = vrot.lane.b32.xlu0 %v12839_v33, %s10432_s24  ;;  %v5007_v37 = vld [vmem:[#allocation2 + $0xf2] sm:$0xff] }
 0x590   : > { %3638 = vst.msk [vmem:[#allocation3 + $0xb8] sm:$0xff] %vm577_vm2, %v12893_v12  ;;  %3637 = vst.msk [vmem:[#allocation3 + $0xb0] sm:$0xff] %vm577_vm2, %v4625_v17  ;;  %4895 = vrot.lane.b32.xlu1 %v4815_v54, %s10433_s25 }
 0x591   : > { %v4886_v16 = vpop.permute.xlu0 %4885 }
 0x592   : > { %v4314_v45 = vpop.permute.xlu1 %4313  ;;  %v5191_v30 = vld [vmem:[#allocation3 + $0x40] sm:$0xff] }
 0x593   : > { %9720 = vmatprep.mubr.msk.f32.mxu0 %vm2321_vm12, %v5191_v30  ;;  %4133 = vrot.lane.b32.xlu0 %v12839_v33, %s10430_s22 }
 0x594   : > { %4323 = vrot.lane.b32.xlu1 %v4815_v54, %s10429_s21  ;;  %9721 = vmatmul.mubr.msk.f32.gmra.mrb[56].mxu0 %vm2321_vm12, %v5192_v48  ;;  %v4244_v48 = vld [vmem:[#allocation2 + $0x111] sm:$0xff] }
 0x595   : > { %v3742_v40 = vpop.permute.xlu0 %3741 }
 0x596   : > { %v5078_v4 = vpop.permute.xlu1 %5077  ;;  %3822 = vst.msk [vmem:[#allocation3 + $0x78] sm:$0xff] %vm890_vm4, %v3742_v40 }
 0x597   : > { %3751 = vrot.lane.b32.xlu0 %v4815_v54, %s10427_s17 }
 0x598   : > { %5087 = vrot.lane.b32.xlu1 %v5007_v37, %s10434_s30 }
 0x599   : > { %v4506_v61 = vpop.permute.xlu0 %4505 }
 0x59a   : > { %v4692_v60 = vpop.permute.xlu1 %4691 }
 0x59b   : > { %4777 = vst.msk [vmem:[#allocation3 + $0x50] sm:$0xff] %vm1856_vm9, %v4692_v60  ;;  %4515 = vrot.lane.b32.xlu0 %v5007_v37, %s10431_s23 }
 0x59c   : > { %3943 = vrot.lane.b32.xlu1 %v5007_v37, %s10428_s18  ;;  %v5010_v37 = vld [vmem:[#allocation2 + $0x112] sm:$0xff] }
 0x59d   : > { %v3934_v33 = vpop.permute.xlu0 %3933 }
 0x59e   : > { %v4120_v30 = vpop.permute.xlu1 %4119  ;;  %4014 = vst.msk [vmem:[#allocation3 + $0x78] sm:$0xff] %vm1083_vm5, %v3934_v33 }
 0x59f   : > { %4203 = vst.msk [vmem:[#allocation3 + $0x60] sm:$0xff] %vm1276_vm6, %v4120_v30  ;;  %4901 = vrot.lane.b32.xlu0 %v4244_v48, %s10433_s25 }
 0x5a0   : > { %4329 = vrot.lane.b32.xlu1 %v4244_v48, %s10429_s21 }
 0x5a1   : > { %v4694_v54 = vpop.permute.xlu0 %4693 }
 0x5a2   : > { %v4884_v40 = vpop.permute.xlu1 %4883  ;;  %4778 = vst.msk [vmem:[#allocation3 + $0x58] sm:$0xff] %vm1856_vm9, %v4694_v54 }
 0x5a3   : > { %4969 = vst.msk [vmem:[#allocation3 + $0x50] sm:$0xff] %vm2049_vm10, %v4884_v40  ;;  %4970 = vst.msk [vmem:[#allocation3 + $0x58] sm:$0xff] %vm2049_vm10, %v4886_v16  ;;  %v9677_v60 = vpop.f32.mrb[70].mxu1  ;;  %3757 = vrot.lane.b32.xlu0 %v4244_v48, %s10427_s17 }
 0x5a4   : > { %5162 = vst.msk [vmem:[#allocation3 + $0x58] sm:$0xff] %vm2242_vm11, %v5078_v4  ;;  %v12923_v33 = vadd.f32 %v9677_v60, %v10680_v20  ;;  %5093 = vrot.lane.b32.xlu1 %v5010_v37, %s10434_s30  ;;  %v3448_v30 = vpop.f32.mrb[71].mxu1 }
 0x5a5   : > { %v12927_v0 = vadd.f32 %v10680_v20, %v3448_v30  ;;  %v4122_v54 = vpop.permute.xlu0 %4121 }
 0x5a6   : > { %3574 = vst.msk [vmem:[#allocation2 + $0x129] sm:$0xff] %vm577_vm2, %v12923_v33  ;;  %v4312_v16 = vpop.permute.xlu1 %4311 }
 0x5a7   : > { %4204 = vst.msk [vmem:[#allocation3 + $0x68] sm:$0xff] %vm1276_vm6, %v4122_v54  ;;  %4521 = vrot.lane.b32.xlu0 %v5010_v37, %s10431_s23 }
 0x5a8   : > { %3573 = vst.msk [vmem:[#allocation2 + $0x121] sm:$0xff] %vm577_vm2, %v12927_v0  ;;  %4707 = vrot.lane.b32.xlu1 %v4625_v17, %s10432_s24 }
 0x5a9   : > { %4395 = vst.msk [vmem:[#allocation3 + $0x60] sm:$0xff] %vm1469_vm7, %v4312_v16  ;;  %4396 = vst.msk [vmem:[#allocation3 + $0x68] sm:$0xff] %vm1469_vm7, %v4314_v45  ;;  %v3740_v4 = vpop.permute.xlu0 %3739 }
 0x5aa   : > { %4588 = vst.msk [vmem:[#allocation3 + $0x68] sm:$0xff] %vm1662_vm8, %v4506_v61  ;;  %v5076_v48 = vpop.permute.xlu1 %5075  ;;  %v4817_v61 = vld [vmem:[#allocation2 + $0x109] sm:$0xff] }
 0x5ab   : > { %3821 = vst.msk [vmem:[#allocation3 + $0x70] sm:$0xff] %vm890_vm4, %v3740_v4  ;;  %3949 = vrot.lane.b32.xlu0 %v5010_v37, %s10428_s18  ;;  %v5194_v16 = vld [vmem:[#allocation3 + $0x58] sm:$0xff] }
 0x5ac   : > { %5161 = vst.msk [vmem:[#allocation3 + $0x50] sm:$0xff] %vm2242_vm11, %v5076_v48  ;;  %4135 = vrot.lane.b32.xlu1 %v4625_v17, %s10430_s22 }
 0x5ad   : > { %v4504_v40 = vpop.permute.xlu0 %4503 }
 0x5ae   : > { %v3932_v60 = vpop.permute.xlu1 %3931  ;;  %4587 = vst.msk [vmem:[#allocation3 + $0x60] sm:$0xff] %vm1662_vm8, %v4504_v40  ;;  %v5009_v40 = vld [vmem:[#allocation2 + $0x10a] sm:$0xff] }
 0x5af   : > { %v4627_v45 = vld [vmem:[#allocation2 + $0x120] sm:$0xff]  ;;  %v12944_v30 = vld [vmem:[#allocation2 + $0x128] sm:$0xff]  ;;  %4013 = vst.msk [vmem:[#allocation3 + $0x70] sm:$0xff] %vm1083_vm5, %v3932_v60  ;;  %4709 = vrot.lane.b32.xlu0 %v12893_v12, %s10432_s24 }
 0x5b0   : > { %3640 = vst.msk [vmem:[#allocation3 + $0xc8] sm:$0xff] %vm577_vm2, %v12944_v30  ;;  %3639 = vst.msk [vmem:[#allocation3 + $0xc0] sm:$0xff] %vm577_vm2, %v4627_v45  ;;  %4899 = vrot.lane.b32.xlu1 %v4817_v61, %s10433_s25 }
 0x5b1   : > { %v4890_v17 = vpop.permute.xlu0 %4889 }
 0x5b2   : > { %v4318_v37 = vpop.permute.xlu1 %4317 }
 0x5b3   : > { %v5193_v54 = vld [vmem:[#allocation3 + $0x50] sm:$0xff]  ;;  %4137 = vrot.lane.b32.xlu0 %v12893_v12, %s10430_s22 }
 0x5b4   : > { %9723 = vmatprep.mubr.msk.f32.mxu0 %vm2321_vm12, %v5193_v54  ;;  %4327 = vrot.lane.b32.xlu1 %v4817_v61, %s10429_s21 }
 0x5b5   : > { %9724 = vmatmul.mubr.msk.f32.gmra.mrb[58].mxu0 %vm2321_vm12, %v5194_v16  ;;  %v3746_v4 = vpop.permute.xlu0 %3745  ;;  %v4246_v16 = vld [vmem:[#allocation2 + $0x129] sm:$0xff] }
 0x5b6   : > { %v5082_v48 = vpop.permute.xlu1 %5081  ;;  %3824 = vst.msk [vmem:[#allocation3 + $0x88] sm:$0xff] %vm890_vm4, %v3746_v4 }
 0x5b7   : > { %3755 = vrot.lane.b32.xlu0 %v4817_v61, %s10427_s17 }
 0x5b8   : > { %5091 = vrot.lane.b32.xlu1 %v5009_v40, %s10434_s30 }
 0x5b9   : > { %v4510_v60 = vpop.permute.xlu0 %4509 }
 0x5ba   : > { %v4696_v41 = vpop.permute.xlu1 %4695 }
 0x5bb   : > { %4779 = vst.msk [vmem:[#allocation3 + $0x60] sm:$0xff] %vm1856_vm9, %v4696_v41  ;;  %4519 = vrot.lane.b32.xlu0 %v5009_v40, %s10431_s23 }
 0x5bc   : > { %3947 = vrot.lane.b32.xlu1 %v5009_v40, %s10428_s18  ;;  %v5012_v40 = vld [vmem:[#allocation2 + $0x12a] sm:$0xff] }
 0x5bd   : > { %v3938_v12 = vpop.permute.xlu0 %3937 }
 0x5be   : > { %v4124_v54 = vpop.permute.xlu1 %4123  ;;  %4016 = vst.msk [vmem:[#allocation3 + $0x88] sm:$0xff] %vm1083_vm5, %v3938_v12 }
 0x5bf   : > { %4205 = vst.msk [vmem:[#allocation3 + $0x70] sm:$0xff] %vm1276_vm6, %v4124_v54  ;;  %4905 = vrot.lane.b32.xlu0 %v4246_v16, %s10433_s25 }
 0x5c0   : > { %4333 = vrot.lane.b32.xlu1 %v4246_v16, %s10429_s21 }
 0x5c1   : > { %v4698_v61 = vpop.permute.xlu0 %4697 }
 0x5c2   : > { %v4888_v4 = vpop.permute.xlu1 %4887  ;;  %4780 = vst.msk [vmem:[#allocation3 + $0x68] sm:$0xff] %vm1856_vm9, %v4698_v61 }
 0x5c3   : > { %4971 = vst.msk [vmem:[#allocation3 + $0x60] sm:$0xff] %vm2049_vm10, %v4888_v4  ;;  %4972 = vst.msk [vmem:[#allocation3 + $0x68] sm:$0xff] %vm2049_vm10, %v4890_v17  ;;  %v9680_v41 = vpop.f32.mrb[72].mxu1  ;;  %3761 = vrot.lane.b32.xlu0 %v4246_v16, %s10427_s17 }
 0x5c4   : > { %5164 = vst.msk [vmem:[#allocation3 + $0x68] sm:$0xff] %vm2242_vm11, %v5082_v48  ;;  %v12974_v12 = vadd.f32 %v9680_v41, %v10680_v20  ;;  %5097 = vrot.lane.b32.xlu1 %v5012_v40, %s10434_s30  ;;  %v3458_v54 = vpop.f32.mrb[73].mxu1 }
 0x5c5   : > { %v12978_v25 = vadd.f32 %v10680_v20, %v3458_v54  ;;  %v4126_v61 = vpop.permute.xlu0 %4125 }
 0x5c6   : > { %3576 = vst.msk [vmem:[#allocation2 + $0x141] sm:$0xff] %vm577_vm2, %v12974_v12  ;;  %v4316_v17 = vpop.permute.xlu1 %4315 }
 0x5c7   : > { %4206 = vst.msk [vmem:[#allocation3 + $0x78] sm:$0xff] %vm1276_vm6, %v4126_v61  ;;  %4525 = vrot.lane.b32.xlu0 %v5012_v40, %s10431_s23 }
 0x5c8   : > { %3575 = vst.msk [vmem:[#allocation2 + $0x139] sm:$0xff] %vm577_vm2, %v12978_v25  ;;  %4711 = vrot.lane.b32.xlu1 %v4627_v45, %s10432_s24 }
 0x5c9   : > { %4397 = vst.msk [vmem:[#allocation3 + $0x70] sm:$0xff] %vm1469_vm7, %v4316_v17  ;;  %4398 = vst.msk [vmem:[#allocation3 + $0x78] sm:$0xff] %vm1469_vm7, %v4318_v37  ;;  %v3744_v48 = vpop.permute.xlu0 %3743 }
 0x5ca   : > { %4590 = vst.msk [vmem:[#allocation3 + $0x78] sm:$0xff] %vm1662_vm8, %v4510_v60  ;;  %v5080_v16 = vpop.permute.xlu1 %5079  ;;  %v4819_v60 = vld [vmem:[#allocation2 + $0x121] sm:$0xff] }
 0x5cb   : > { %3823 = vst.msk [vmem:[#allocation3 + $0x80] sm:$0xff] %vm890_vm4, %v3744_v48  ;;  %3953 = vrot.lane.b32.xlu0 %v5012_v40, %s10428_s18  ;;  %v5196_v17 = vld [vmem:[#allocation3 + $0x68] sm:$0xff] }
 0x5cc   : > { %5163 = vst.msk [vmem:[#allocation3 + $0x60] sm:$0xff] %vm2242_vm11, %v5080_v16  ;;  %4139 = vrot.lane.b32.xlu1 %v4627_v45, %s10430_s22 }
 0x5cd   : > { %v4508_v4 = vpop.permute.xlu0 %4507 }
 0x5ce   : > { %v3936_v41 = vpop.permute.xlu1 %3935  ;;  %4589 = vst.msk [vmem:[#allocation3 + $0x70] sm:$0xff] %vm1662_vm8, %v4508_v4  ;;  %v5011_v4 = vld [vmem:[#allocation2 + $0x122] sm:$0xff] }
 0x5cf   : > { %v12995_v37 = vld [vmem:[#allocation2 + $0x138] sm:$0xff]  ;;  %v12997_v54 = vld [vmem:[#allocation2 + $0x140] sm:$0xff]  ;;  %4015 = vst.msk [vmem:[#allocation3 + $0x80] sm:$0xff] %vm1083_vm5, %v3936_v41  ;;  %4713 = vrot.lane.b32.xlu0 %v12944_v30, %s10432_s24 }
 0x5d0   : > { %3642 = vst.msk [vmem:[#allocation3 + $0xd8] sm:$0xff] %vm577_vm2, %v12997_v54  ;;  %3641 = vst.msk [vmem:[#allocation3 + $0xd0] sm:$0xff] %vm577_vm2, %v12995_v37  ;;  %4903 = vrot.lane.b32.xlu1 %v4819_v60, %s10433_s25 }
 0x5d1   : > { %v4894_v45 = vpop.permute.xlu0 %4893 }
 0x5d2   : > { %v4322_v40 = vpop.permute.xlu1 %4321 }
 0x5d3   : > { %v5195_v61 = vld [vmem:[#allocation3 + $0x60] sm:$0xff]  ;;  %4141 = vrot.lane.b32.xlu0 %v12944_v30, %s10430_s22 }
 0x5d4   : > { %9726 = vmatprep.mubr.msk.f32.mxu0 %vm2321_vm12, %v5195_v61  ;;  %4331 = vrot.lane.b32.xlu1 %v4819_v60, %s10429_s21 }
 0x5d5   : > { %9727 = vmatmul.mubr.msk.f32.gmra.mrb[60].mxu0 %vm2321_vm12, %v5196_v17  ;;  %v3750_v48 = vpop.permute.xlu0 %3749  ;;  %v4248_v17 = vld [vmem:[#allocation2 + $0x141] sm:$0xff] }
 0x5d6   : > { %v5086_v16 = vpop.permute.xlu1 %5085  ;;  %3826 = vst.msk [vmem:[#allocation3 + $0x98] sm:$0xff] %vm890_vm4, %v3750_v48 }
 0x5d7   : > { %3759 = vrot.lane.b32.xlu0 %v4819_v60, %s10427_s17 }
 0x5d8   : > { %5095 = vrot.lane.b32.xlu1 %v5011_v4, %s10434_s30 }
 0x5d9   : > { %v4514_v41 = vpop.permute.xlu0 %4513 }
 0x5da   : > { %v4700_v46 = vpop.permute.xlu1 %4699 }
 0x5db   : > { %4781 = vst.msk [vmem:[#allocation3 + $0x70] sm:$0xff] %vm1856_vm9, %v4700_v46  ;;  %4523 = vrot.lane.b32.xlu0 %v5011_v4, %s10431_s23 }
 0x5dc   : > { %3951 = vrot.lane.b32.xlu1 %v5011_v4, %s10428_s18  ;;  %v5014_v4 = vld [vmem:[#allocation2 + $0x142] sm:$0xff] }
 0x5dd   : > { %v3942_v30 = vpop.permute.xlu0 %3941 }
 0x5de   : > { %v4128_v61 = vpop.permute.xlu1 %4127  ;;  %4018 = vst.msk [vmem:[#allocation3 + $0x98] sm:$0xff] %vm1083_vm5, %v3942_v30 }
 0x5df   : > { %4207 = vst.msk [vmem:[#allocation3 + $0x80] sm:$0xff] %vm1276_vm6, %v4128_v61  ;;  %4909 = vrot.lane.b32.xlu0 %v4248_v17, %s10433_s25 }
 0x5e0   : > { %4337 = vrot.lane.b32.xlu1 %v4248_v17, %s10429_s21 }
 0x5e1   : > { %v4702_v60 = vpop.permute.xlu0 %4701 }
 0x5e2   : > { %v4892_v48 = vpop.permute.xlu1 %4891  ;;  %4782 = vst.msk [vmem:[#allocation3 + $0x78] sm:$0xff] %vm1856_vm9, %v4702_v60 }
 0x5e3   : > { %4973 = vst.msk [vmem:[#allocation3 + $0x70] sm:$0xff] %vm2049_vm10, %v4892_v48  ;;  %4974 = vst.msk [vmem:[#allocation3 + $0x78] sm:$0xff] %vm2049_vm10, %v4894_v45  ;;  %v9683_v46 = vpop.f32.mrb[74].mxu1  ;;  %3765 = vrot.lane.b32.xlu0 %v4248_v17, %s10427_s17  ;;  %v13037_v45 = vld [vmem:[%s14642_s1 + $0xd0] ss:$0 sm:$0xff] }
 0x5e4   : > { %5166 = vst.msk [vmem:[#allocation3 + $0x78] sm:$0xff] %vm2242_vm11, %v5086_v16  ;;  %v13028_v30 = vadd.f32 %v9683_v46, %v10680_v20  ;;  %5101 = vrot.lane.b32.xlu1 %v5014_v4, %s10434_s30  ;;  %v3468_v61 = vpop.f32.mrb[75].mxu1  ;;  %v13049_v48 = vld [vmem:[%s14642_s1 + $0xd8] ss:$0 sm:$0xff] }
 0x5e5   : > { %v13032_v10 = vadd.f32 %v10680_v20, %v3468_v61  ;;  %v4130_v60 = vpop.permute.xlu0 %4129 }
 0x5e6   : > { %3578 = vst.msk [vmem:[#allocation2 + $0x159] sm:$0xff] %vm577_vm2, %v13028_v30  ;;  %v4320_v17 = vpop.permute.xlu1 %4319  ;;  %v9710_v16 = vpop.f32.mrb[48].mxu0 }
 0x5e7   : > { %4208 = vst.msk [vmem:[#allocation3 + $0x88] sm:$0xff] %vm1276_vm6, %v4130_v60  ;;  %4529 = vrot.lane.b32.xlu0 %v5014_v4, %s10431_s23  ;;  %v5397_v46 = vadd.f32 %v9710_v16, %v13037_v45  ;;  %v5391_v61 = vpop.f32.mrb[49].mxu0 }
 0x5e8   : > { %3577 = vst.msk [vmem:[#allocation2 + $0x151] sm:$0xff] %vm577_vm2, %v13032_v10  ;;  %4715 = vrot.lane.b32.xlu1 %v12995_v37, %s10432_s24  ;;  %v5392_v60 = vadd.f32 %v13037_v45, %v5391_v61 }
 0x5e9   : > { %4399 = vst.msk [vmem:[#allocation3 + $0x80] sm:$0xff] %vm1469_vm7, %v4320_v17  ;;  %4400 = vst.msk [vmem:[#allocation3 + $0x88] sm:$0xff] %vm1469_vm7, %v4322_v40  ;;  %v3748_v17 = vpop.permute.xlu0 %3747  ;;  %v5556_v40 = vmul.f32 %v13049_v48, %v5397_v46 }
 0x5ea   : > { %4592 = vst.msk [vmem:[#allocation3 + $0x88] sm:$0xff] %vm1662_vm8, %v4514_v41  ;;  %v5084_v34 = vpop.permute.xlu1 %5083  ;;  %v5555_v22 = vmul.f32 %v13049_v48, %v5392_v60  ;;  %v5013_v60 = vld [vmem:[#allocation2 + $0x13a] sm:$0xff] }
 0x5eb   : > { %3825 = vst.msk [vmem:[#allocation3 + $0x90] sm:$0xff] %vm890_vm4, %v3748_v17  ;;  %3957 = vrot.lane.b32.xlu0 %v5014_v4, %s10428_s18  ;;  %v5588_v61 = vadd.f32 %v5556_v40, %v12350_v23 }
 0x5ec   : > { %5165 = vst.msk [vmem:[#allocation3 + $0x70] sm:$0xff] %vm2242_vm11, %v5084_v34  ;;  %4143 = vrot.lane.b32.xlu1 %v12995_v37, %s10430_s22  ;;  %v5587_v41 = vadd.f32 %v5555_v22, %v12354_v39  ;;  %v4821_v34 = vld [vmem:[#allocation2 + $0x139] sm:$0xff] }
 0x5ed   : > { %v4512_v16 = vpop.permute.xlu0 %4511 }
 0x5ee   : > { %v3940_v24 = vpop.permute.xlu1 %3939  ;;  %4591 = vst.msk [vmem:[#allocation3 + $0x80] sm:$0xff] %vm1662_vm8, %v4512_v16  ;;  %9758 = vmatprep.mubr.msk.f32.mxu1 %vm577_vm2, %v5587_v41 }
 0x5ef   : > { %v13067_v46 = vld [vmem:[#allocation2 + $0x150] sm:$0xff]  ;;  %v13069_v17 = vld [vmem:[#allocation2 + $0x158] sm:$0xff]  ;;  %4017 = vst.msk [vmem:[#allocation3 + $0x90] sm:$0xff] %vm1083_vm5, %v3940_v24  ;;  %4717 = vrot.lane.b32.xlu0 %v12997_v54, %s10432_s24  ;;  %9759 = vmatmul.mubr.msk.f32.vlgmr.msra.gmra.mrb[80].mxu1 %vm577_vm2, %v5588_v61  ;;  %v5198_v24 = vld [vmem:[#allocation3 + $0x78] sm:$0xff] }
 0x5f0   : > { %3644 = vst.msk [vmem:[#allocation3 + $0xe8] sm:$0xff] %vm577_vm2, %v13069_v17  ;;  %3643 = vst.msk [vmem:[#allocation3 + $0xe0] sm:$0xff] %vm577_vm2, %v13067_v46  ;;  %4907 = vrot.lane.b32.xlu1 %v4821_v34, %s10433_s25  ;;  %v4250_v61 = vld [vmem:[#allocation2 + $0x159] sm:$0xff] }
 0x5f1   : > { %v4898_v23 = vpop.permute.xlu0 %4897 }
 0x5f2   : > { %v4326_v39 = vpop.permute.xlu1 %4325 }
 0x5f3   : > { %v5197_v22 = vld [vmem:[#allocation3 + $0x70] sm:$0xff]  ;;  %4145 = vrot.lane.b32.xlu0 %v12997_v54, %s10430_s22 }
 0x5f4   : > { %9729 = vmatprep.mubr.msk.f32.mxu0 %vm2321_vm12, %v5197_v22  ;;  %4335 = vrot.lane.b32.xlu1 %v4821_v34, %s10429_s21 }
 0x5f5   : > { %9730 = vmatmul.mubr.msk.f32.gmra.mrb[62].mxu0 %vm2321_vm12, %v5198_v24  ;;  %v3754_v37 = vpop.permute.xlu0 %3753 }
 0x5f6   : > { %v5090_v4 = vpop.permute.xlu1 %5089  ;;  %3828 = vst.msk [vmem:[#allocation3 + $0xa8] sm:$0xff] %vm890_vm4, %v3754_v37 }
 0x5f7   : > { %3763 = vrot.lane.b32.xlu0 %v4821_v34, %s10427_s17 }
 0x5f8   : > { %5099 = vrot.lane.b32.xlu1 %v5013_v60, %s10434_s30 }
 0x5f9   : > { %v4518_v40 = vpop.permute.xlu0 %4517 }
 0x5fa   : > { %v4704_v41 = vpop.permute.xlu1 %4703 }
 0x5fb   : > { %4783 = vst.msk [vmem:[#allocation3 + $0x80] sm:$0xff] %vm1856_vm9, %v4704_v41  ;;  %4527 = vrot.lane.b32.xlu0 %v5013_v60, %s10431_s23  ;;  %v5016_v41 = vld [vmem:[#allocation2 + $0x15a] sm:$0xff] }
 0x5fc   : > { %3955 = vrot.lane.b32.xlu1 %v5013_v60, %s10428_s18 }
 0x5fd   : > { %v3946_v54 = vpop.permute.xlu0 %3945 }
 0x5fe   : > { %v4132_v16 = vpop.permute.xlu1 %4131  ;;  %4020 = vst.msk [vmem:[#allocation3 + $0xa8] sm:$0xff] %vm1083_vm5, %v3946_v54 }
 0x5ff   : > { %4209 = vst.msk [vmem:[#allocation3 + $0x90] sm:$0xff] %vm1276_vm6, %v4132_v16  ;;  %4913 = vrot.lane.b32.xlu0 %v4250_v61, %s10433_s25 }
 0x600   : > { %4341 = vrot.lane.b32.xlu1 %v4250_v61, %s10429_s21  ;;  %v9686_v24 = vpop.f32.mrb[76].mxu1 }
 0x601   : > { %v4706_v34 = vpop.permute.xlu0 %4705  ;;  %v13100_v37 = vadd.f32 %v9686_v24, %v10680_v20  ;;  %v3478_v60 = vpop.f32.mrb[77].mxu1 }
 0x602   : > { %v4896_v22 = vpop.permute.xlu1 %4895  ;;  %4784 = vst.msk [vmem:[#allocation3 + $0x88] sm:$0xff] %vm1856_vm9, %v4706_v34  ;;  %v13105_v54 = vadd.f32 %v10680_v20, %v3478_v60 }
 0x603   : > { %4975 = vst.msk [vmem:[#allocation3 + $0x80] sm:$0xff] %vm2049_vm10, %v4896_v22  ;;  %4976 = vst.msk [vmem:[#allocation3 + $0x88] sm:$0xff] %vm2049_vm10, %v4898_v23  ;;  %3769 = vrot.lane.b32.xlu0 %v4250_v61, %s10427_s17 }
 0x604   : > { %14843 = vst [vmem:[#allocation26_spill] sm:$0xff] %v13100_v37  ;;  %5168 = vst.msk [vmem:[#allocation3 + $0x88] sm:$0xff] %vm2242_vm11, %v5090_v4  ;;  %5105 = vrot.lane.b32.xlu1 %v5016_v41, %s10434_s30 }
 0x605   : > { %3580 = vst.msk [vmem:[#allocation2 + $0x171] sm:$0xff] %vm577_vm2, %v13100_v37  ;;  %v4134_v16 = vpop.permute.xlu0 %4133  ;;  %3579 = vst.msk [vmem:[#allocation2 + $0x169] sm:$0xff] %vm577_vm2, %v13105_v54 }
 0x606   : > { %v4324_v23 = vpop.permute.xlu1 %4323  ;;  %4210 = vst.msk [vmem:[#allocation3 + $0x98] sm:$0xff] %vm1276_vm6, %v4134_v16 }
 0x607   : > { %4401 = vst.msk [vmem:[#allocation3 + $0x90] sm:$0xff] %vm1469_vm7, %v4324_v23  ;;  %4402 = vst.msk [vmem:[#allocation3 + $0x98] sm:$0xff] %vm1469_vm7, %v4326_v39  ;;  %v9713_v4 = vpop.f32.mrb[50].mxu0  ;;  %4533 = vrot.lane.b32.xlu0 %v5016_v41, %s10431_s23 }
 0x608   : > { %4594 = vst.msk [vmem:[#allocation3 + $0x98] sm:$0xff] %vm1662_vm8, %v4518_v40  ;;  %v5407_v61 = vadd.f32 %v9713_v4, %v13037_v45  ;;  %4719 = vrot.lane.b32.xlu1 %v13067_v46, %s10432_s24  ;;  %v5401_v34 = vpop.f32.mrb[51].mxu0 }
 0x609   : > { %v5402_v22 = vadd.f32 %v13037_v45, %v5401_v34  ;;  %v3752_v24 = vpop.permute.xlu0 %3751 }
 0x60a   : > { %v5558_v60 = vmul.f32 %v13049_v48, %v5407_v61  ;;  %v5088_v16 = vpop.permute.xlu1 %5087  ;;  %3827 = vst.msk [vmem:[#allocation3 + $0xa0] sm:$0xff] %vm890_vm4, %v3752_v24 }
 0x60b   : > { %v5557_v39 = vmul.f32 %v13049_v48, %v5402_v22  ;;  %5167 = vst.msk [vmem:[#allocation3 + $0x80] sm:$0xff] %vm2242_vm11, %v5088_v16  ;;  %3961 = vrot.lane.b32.xlu0 %v5016_v41, %s10428_s18  ;;  %v5200_v16 = vld [vmem:[#allocation3 + $0x88] sm:$0xff] }
 0x60c   : > { %4147 = vrot.lane.b32.xlu1 %v13067_v46, %s10430_s22  ;;  %v13129_v4 = vld [vmem:[#allocation2 + $0x168] sm:$0xff]  ;;  %v13131_v34 = vld [vmem:[#allocation2 + $0x170] sm:$0xff]  ;;  %v5590_v61 = vadd.f32 %v5558_v60, %v12386_v31 }
 0x60d   : > { %v5589_v40 = vadd.f32 %v5557_v39, %v12390_v53  ;;  %v4516_v23 = vpop.permute.xlu0 %4515  ;;  %3646 = vst.msk [vmem:[#allocation3 + $0xf8] sm:$0xff] %vm577_vm2, %v13131_v34  ;;  %3645 = vst.msk [vmem:[#allocation3 + $0xf0] sm:$0xff] %vm577_vm2, %v13129_v4  ;;  %v4823_v46 = vld [vmem:[#allocation2 + $0x151] sm:$0xff] }
 0x60e   : > { %v3944_v37 = vpop.permute.xlu1 %3943  ;;  %4593 = vst.msk [vmem:[#allocation3 + $0x90] sm:$0xff] %vm1662_vm8, %v4516_v23 }
 0x60f   : > { %4019 = vst.msk [vmem:[#allocation3 + $0xa0] sm:$0xff] %vm1083_vm5, %v3944_v37  ;;  %9761 = vmatprep.mubr.msk.f32.mxu1 %vm577_vm2, %v5589_v40  ;;  %v9689_v53 = vpop.f32.mrb[78].mxu1  ;;  %4721 = vrot.lane.b32.xlu0 %v13069_v17, %s10432_s24  ;;  %v5015_v40 = vld [vmem:[#allocation2 + $0x152] sm:$0xff] }
 0x610   : > { %v13144_v31 = vadd.f32 %v9689_v53, %v10680_v20  ;;  %4911 = vrot.lane.b32.xlu1 %v4823_v46, %s10433_s25  ;;  %9762 = vmatmul.mubr.msk.f32.gmra.mrb[82].mxu1 %vm577_vm2, %v5590_v61  ;;  %v3488_v41 = vpop.f32.mrb[79].mxu1 }
 0x611   : > { %v13149_v22 = vadd.f32 %v10680_v20, %v3488_v41  ;;  %v4902_v24 = vpop.permute.xlu0 %4901  ;;  %v4252_v41 = vld [vmem:[#allocation2 + $0x171] sm:$0xff] }
 0x612   : > { %3582 = vst.msk [vmem:[#allocation2 + $0x189] sm:$0xff] %vm577_vm2, %v13144_v31  ;;  %v4330_v37 = vpop.permute.xlu1 %4329  ;;  %v5199_v60 = vld [vmem:[#allocation3 + $0x80] sm:$0xff] }
 0x613   : > { %3581 = vst.msk [vmem:[#allocation2 + $0x181] sm:$0xff] %vm577_vm2, %v13149_v22  ;;  %9732 = vmatprep.mubr.msk.f32.mxu0 %vm2321_vm12, %v5199_v60  ;;  %4149 = vrot.lane.b32.xlu0 %v13069_v17, %s10430_s22 }
 0x614   : > { %4339 = vrot.lane.b32.xlu1 %v4823_v46, %s10429_s21  ;;  %9733 = vmatmul.mubr.msk.f32.gmra.mrb[64].mxu0 %vm2321_vm12, %v5200_v16  ;;  %v5018_v16 = vld [vmem:[#allocation2 + $0x172] sm:$0xff] }
 0x615   : > { %v3758_v20 = vpop.permute.xlu0 %3757 }
 0x616   : > { %v5094_v39 = vpop.permute.xlu1 %5093  ;;  %3830 = vst.msk [vmem:[#allocation3 + $0xb8] sm:$0xff] %vm890_vm4, %v3758_v20 }
 0x617   : > { %3767 = vrot.lane.b32.xlu0 %v4823_v46, %s10427_s17 }
 0x618   : > { %5103 = vrot.lane.b32.xlu1 %v5015_v40, %s10434_s30 }
 0x619   : > { %v4522_v23 = vpop.permute.xlu0 %4521 }
 0x61a   : > { %v4708_v61 = vpop.permute.xlu1 %4707 }
 0x61b   : > { %4785 = vst.msk [vmem:[#allocation3 + $0x90] sm:$0xff] %vm1856_vm9, %v4708_v61  ;;  %4531 = vrot.lane.b32.xlu0 %v5015_v40, %s10431_s23 }
 0x61c   : > { %3959 = vrot.lane.b32.xlu1 %v5015_v40, %s10428_s18 }
 0x61d   : > { %v3950_v17 = vpop.permute.xlu0 %3949 }
 0x61e   : > { %v4136_v53 = vpop.permute.xlu1 %4135  ;;  %4022 = vst.msk [vmem:[#allocation3 + $0xb8] sm:$0xff] %vm1083_vm5, %v3950_v17 }
 0x61f   : > { %4211 = vst.msk [vmem:[#allocation3 + $0xa0] sm:$0xff] %vm1276_vm6, %v4136_v53  ;;  %4917 = vrot.lane.b32.xlu0 %v4252_v41, %s10433_s25 }
 0x620   : > { %4345 = vrot.lane.b32.xlu1 %v4252_v41, %s10429_s21 }
 0x621   : > { %v4710_v46 = vpop.permute.xlu0 %4709 }
 0x622   : > { %v4900_v60 = vpop.permute.xlu1 %4899  ;;  %4786 = vst.msk [vmem:[#allocation3 + $0x98] sm:$0xff] %vm1856_vm9, %v4710_v46 }
 0x623   : > { %4977 = vst.msk [vmem:[#allocation3 + $0x90] sm:$0xff] %vm2049_vm10, %v4900_v60  ;;  %4978 = vst.msk [vmem:[#allocation3 + $0x98] sm:$0xff] %vm2049_vm10, %v4902_v24  ;;  %3773 = vrot.lane.b32.xlu0 %v4252_v41, %s10427_s17 }
 0x624   : > { %5170 = vst.msk [vmem:[#allocation3 + $0x98] sm:$0xff] %vm2242_vm11, %v5094_v39  ;;  %5109 = vrot.lane.b32.xlu1 %v5018_v16, %s10434_s30 }
 0x625   : > { %v4138_v20 = vpop.permute.xlu0 %4137 }
 0x626   : > { %v4328_v40 = vpop.permute.xlu1 %4327  ;;  %4212 = vst.msk [vmem:[#allocation3 + $0xa8] sm:$0xff] %vm1276_vm6, %v4138_v20 }
 0x627   : > { %4403 = vst.msk [vmem:[#allocation3 + $0xa0] sm:$0xff] %vm1469_vm7, %v4328_v40  ;;  %4404 = vst.msk [vmem:[#allocation3 + $0xa8] sm:$0xff] %vm1469_vm7, %v4330_v37  ;;  %v9716_v61 = vpop.f32.mrb[52].mxu0  ;;  %4537 = vrot.lane.b32.xlu0 %v5018_v16, %s10431_s23 }
 0x628   : > { %4596 = vst.msk [vmem:[#allocation3 + $0xa8] sm:$0xff] %vm1662_vm8, %v4522_v23  ;;  %v5417_v24 = vadd.f32 %v9716_v61, %v13037_v45  ;;  %4723 = vrot.lane.b32.xlu1 %v13129_v4, %s10432_s24  ;;  %v5411_v39 = vpop.f32.mrb[53].mxu0  ;;  %v4825_v61 = vld [vmem:[#allocation2 + $0x169] sm:$0xff] }
 0x629   : > { %v5412_v17 = vadd.f32 %v13037_v45, %v5411_v39  ;;  %v3756_v53 = vpop.permute.xlu0 %3755 }
 0x62a   : > { %v5560_v41 = vmul.f32 %v13049_v48, %v5417_v24  ;;  %v5092_v46 = vpop.permute.xlu1 %5091  ;;  %3829 = vst.msk [vmem:[#allocation3 + $0xb0] sm:$0xff] %vm890_vm4, %v3756_v53 }
 0x62b   : > { %v5559_v37 = vmul.f32 %v13049_v48, %v5412_v17  ;;  %5169 = vst.msk [vmem:[#allocation3 + $0x90] sm:$0xff] %vm2242_vm11, %v5092_v46  ;;  %3965 = vrot.lane.b32.xlu0 %v5018_v16, %s10428_s18  ;;  %v5017_v17 = vld [vmem:[#allocation2 + $0x16a] sm:$0xff] }
 0x62c   : > { %4151 = vrot.lane.b32.xlu1 %v13129_v4, %s10430_s22  ;;  %v5592_v20 = vadd.f32 %v5560_v41, %v12451_v8  ;;  %v5202_v8 = vld [vmem:[#allocation3 + $0x98] sm:$0xff] }
 0x62d   : > { %v5591_v23 = vadd.f32 %v5559_v37, %v12454_v29  ;;  %v4520_v60 = vpop.permute.xlu0 %4519  ;;  %v4828_v37 = vld [vmem:[#allocation2 + $0x189] sm:$0xff] }
 0x62e   : > { %v3948_v40 = vpop.permute.xlu1 %3947  ;;  %4595 = vst.msk [vmem:[#allocation3 + $0xa0] sm:$0xff] %vm1662_vm8, %v4520_v60 }
 0x62f   : > { %4021 = vst.msk [vmem:[#allocation3 + $0xb0] sm:$0xff] %vm1083_vm5, %v3948_v40  ;;  %9764 = vmatprep.mubr.msk.f32.mxu1 %vm577_vm2, %v5591_v23  ;;  %4725 = vrot.lane.b32.xlu0 %v13131_v34, %s10432_s24  ;;  %v4446_v23 = vld [vmem:[#allocation2 + $0x18a] sm:$0xff]  ;;  %v4635_v40 = vld [vmem:[#allocation2 + $0x180] sm:$0xff] }
 0x630   : > { %4915 = vrot.lane.b32.xlu1 %v4825_v61, %s10433_s25  ;;  %9765 = vmatmul.mubr.msk.f32.gmra.mrb[84].mxu1 %vm577_vm2, %v5592_v20 }
 0x631   : > { %v4906_v4 = vpop.permute.xlu0 %4905 }
 0x632   : > { %v4334_v29 = vpop.permute.xlu1 %4333  ;;  %v5201_v16 = vld [vmem:[#allocation3 + $0x90] sm:$0xff] }
 0x633   : > { %9735 = vmatprep.mubr.msk.f32.mxu0 %vm2321_vm12, %v5201_v16  ;;  %4153 = vrot.lane.b32.xlu0 %v13131_v34, %s10430_s22 }
 0x634   : > { %4343 = vrot.lane.b32.xlu1 %v4825_v61, %s10429_s21  ;;  %9736 = vmatmul.mubr.msk.f32.gmra.mrb[66].mxu0 %vm2321_vm12, %v5202_v8 }
 0x635   : > { %v3762_v24 = vpop.permute.xlu0 %3761 }
 0x636   : > { %v5098_v39 = vpop.permute.xlu1 %5097  ;;  %3832 = vst.msk [vmem:[#allocation3 + $0xc8] sm:$0xff] %vm890_vm4, %v3762_v24 }
 0x637   : > { %3771 = vrot.lane.b32.xlu0 %v4825_v61, %s10427_s17 }
 0x638   : > { %5107 = vrot.lane.b32.xlu1 %v5017_v17, %s10434_s30 }
 0x639   : > { %v4526_v53 = vpop.permute.xlu0 %4525 }
 0x63a   : > { %v4712_v41 = vpop.permute.xlu1 %4711 }
 0x63b   : > { %4787 = vst.msk [vmem:[#allocation3 + $0xa0] sm:$0xff] %vm1856_vm9, %v4712_v41  ;;  %4535 = vrot.lane.b32.xlu0 %v5017_v17, %s10431_s23 }
 0x63c   : > { %3963 = vrot.lane.b32.xlu1 %v5017_v17, %s10428_s18 }
 0x63d   : > { %v3954_v34 = vpop.permute.xlu0 %3953 }
 0x63e   : > { %v4140_v46 = vpop.permute.xlu1 %4139  ;;  %4024 = vst.msk [vmem:[#allocation3 + $0xc8] sm:$0xff] %vm1083_vm5, %v3954_v34 }
 0x63f   : > { %4213 = vst.msk [vmem:[#allocation3 + $0xb0] sm:$0xff] %vm1276_vm6, %v4140_v46  ;;  %4921 = vrot.lane.b32.xlu0 %v4828_v37, %s10433_s25  ;;  %v4636_v46 = vld [vmem:[#allocation2 + $0x188] sm:$0xff] }
 0x640   : > { %4541 = vrot.lane.b32.xlu1 %v4446_v23, %s10431_s23 }
 0x641   : > { %v4714_v60 = vpop.permute.xlu0 %4713 }
 0x642   : > { %v4904_v20 = vpop.permute.xlu1 %4903  ;;  %4788 = vst.msk [vmem:[#allocation3 + $0xa8] sm:$0xff] %vm1856_vm9, %v4714_v60 }
 0x643   : > { %4979 = vst.msk [vmem:[#allocation3 + $0xa0] sm:$0xff] %vm2049_vm10, %v4904_v20  ;;  %4980 = vst.msk [vmem:[#allocation3 + $0xa8] sm:$0xff] %vm2049_vm10, %v4906_v4  ;;  %4349 = vrot.lane.b32.xlu0 %v4828_v37, %s10429_s21  ;;  %v4827_v37 = vld [vmem:[#allocation2 + $0x181] sm:$0xff] }
 0x644   : > { %5172 = vst.msk [vmem:[#allocation3 + $0xa8] sm:$0xff] %vm2242_vm11, %v5098_v39  ;;  %4727 = vrot.lane.b32.xlu1 %v4635_v40, %s10432_s24 }
 0x645   : > { %v4142_v61 = vpop.permute.xlu0 %4141 }
 0x646   : > { %v4332_v16 = vpop.permute.xlu1 %4331  ;;  %4214 = vst.msk [vmem:[#allocation3 + $0xb8] sm:$0xff] %vm1276_vm6, %v4142_v61 }
 0x647   : > { %4405 = vst.msk [vmem:[#allocation3 + $0xb0] sm:$0xff] %vm1469_vm7, %v4332_v16  ;;  %4406 = vst.msk [vmem:[#allocation3 + $0xb8] sm:$0xff] %vm1469_vm7, %v4334_v29  ;;  %v9719_v8 = vpop.f32.mrb[54].mxu0  ;;  %5113 = vrot.lane.b32.xlu0 %v4446_v23, %s10434_s30 }
 0x648   : > { %4598 = vst.msk [vmem:[#allocation3 + $0xb8] sm:$0xff] %vm1662_vm8, %v4526_v53  ;;  %v5427_v4 = vadd.f32 %v9719_v8, %v13037_v45  ;;  %4155 = vrot.lane.b32.xlu1 %v4635_v40, %s10430_s22  ;;  %v5421_v24 = vpop.f32.mrb[55].mxu0  ;;  %v5021_v40 = vld [vmem:[#allocation2 + $0x19a] sm:$0xff] }
 0x649   : > { %v5422_v39 = vadd.f32 %v13037_v45, %v5421_v24  ;;  %v3760_v17 = vpop.permute.xlu0 %3759 }
 0x64a   : > { %v5562_v41 = vmul.f32 %v13049_v48, %v5427_v4  ;;  %v5096_v34 = vpop.permute.xlu1 %5095  ;;  %3831 = vst.msk [vmem:[#allocation3 + $0xc0] sm:$0xff] %vm890_vm4, %v3760_v17 }
 0x64b   : > { %v5561_v29 = vmul.f32 %v13049_v48, %v5422_v39  ;;  %5171 = vst.msk [vmem:[#allocation3 + $0xa0] sm:$0xff] %vm2242_vm11, %v5096_v34  ;;  %4729 = vrot.lane.b32.xlu0 %v4636_v46, %s10432_s24  ;;  %v5204_v8 = vld [vmem:[#allocation3 + $0xa8] sm:$0xff]  ;;  %v5978_v39 = vld [vmem:[%s14642_s1 + $0xf0] sm:$0xf] }
 0x64c   : > { %4919 = vrot.lane.b32.xlu1 %v4827_v37, %s10433_s25  ;;  %v5594_v60 = vadd.f32 %v5562_v41, %v12491_v47  ;;  %v5019_v47 = vld [vmem:[#allocation2 + $0x182] sm:$0xff]  ;;  %9806 = vmatprep.subr.msk.mxu0 %vm348_vm0, %v5978_v39  ;;  %s10437_s25 = smov 96  }
 0x64d   : > { %v5593_v53 = vadd.f32 %v5561_v29, %v12494_v51  ;;  %v4524_v23 = vpop.permute.xlu0 %4523  ;;  %v5022_v41 = vld [vmem:[#allocation2 + $0x1a2] sm:$0xff]  ;;  %9807 = vmatpush3.msk.msra.mxu0 %vm348_vm0, %v5978_v39 }
 0x64e   : > { %v3952_v20 = vpop.permute.xlu1 %3951  ;;  %4597 = vst.msk [vmem:[#allocation3 + $0xb0] sm:$0xff] %vm1662_vm8, %v4524_v23 }
 0x64f   : > { %4023 = vst.msk [vmem:[#allocation3 + $0xc0] sm:$0xff] %vm1083_vm5, %v3952_v20  ;;  %9767 = vmatprep.mubr.msk.f32.mxu1 %vm577_vm2, %v5593_v53  ;;  %4157 = vrot.lane.b32.xlu0 %v4636_v46, %s10430_s22 }
 0x650   : > { %4347 = vrot.lane.b32.xlu1 %v4827_v37, %s10429_s21  ;;  %9768 = vmatmul.mubr.msk.f32.gmra.mrb[86].mxu1 %vm577_vm2, %v5594_v60 }
 0x651   : > { %v4910_v61 = vpop.permute.xlu0 %4909 }
 0x652   : > { %v4338_v16 = vpop.permute.xlu1 %4337  ;;  %v5203_v51 = vld [vmem:[#allocation3 + $0xa0] sm:$0xff] }
 0x653   : > { %9738 = vmatprep.mubr.msk.f32.mxu0 %vm2321_vm12, %v5203_v51  ;;  %5115 = vrot.lane.b32.xlu0 %v5021_v40, %s10434_s30 }
 0x654   : > { %5111 = vrot.lane.b32.xlu1 %v5019_v47, %s10434_s30  ;;  %9739 = vmatmul.mubr.msk.f32.gmra.mrb[68].mxu0 %vm2321_vm12, %v5204_v8 }
 0x655   : > { %v3766_v4 = vpop.permute.xlu0 %3765 }
 0x656   : > { %v5102_v24 = vpop.permute.xlu1 %5101  ;;  %3834 = vst.msk [vmem:[#allocation3 + $0xd8] sm:$0xff] %vm890_vm4, %v3766_v4 }
 0x658   : > { %4539 = vrot.lane.b32.xlu1 %v5019_v47, %s10431_s23 }
 0x659   : > { %v4530_v17 = vpop.permute.xlu0 %4529 }
 0x65a   : > { %v4716_v34 = vpop.permute.xlu1 %4715 }
 0x65b   : > { %4789 = vst.msk [vmem:[#allocation3 + $0xb0] sm:$0xff] %vm1856_vm9, %v4716_v34 }
 0x65c   : > { %5117 = vrot.lane.b32.xlu1 %v5022_v41, %s10434_s30 }
 0x65d   : > { %v3958_v46 = vpop.permute.xlu0 %3957 }
 0x65e   : > { %v4144_v29 = vpop.permute.xlu1 %4143  ;;  %4026 = vst.msk [vmem:[#allocation3 + $0xd8] sm:$0xff] %vm1083_vm5, %v3958_v46 }
 0x65f   : > { %4215 = vst.msk [vmem:[#allocation3 + $0xc0] sm:$0xff] %vm1276_vm6, %v4144_v29 }
 0x661   : > { %v4718_v37 = vpop.permute.xlu0 %4717 }
 0x662   : > { %v4908_v53 = vpop.permute.xlu1 %4907  ;;  %4790 = vst.msk [vmem:[#allocation3 + $0xb8] sm:$0xff] %vm1856_vm9, %v4718_v37 }
 0x663   : > { %4981 = vst.msk [vmem:[#allocation3 + $0xb0] sm:$0xff] %vm2049_vm10, %v4908_v53  ;;  %4982 = vst.msk [vmem:[#allocation3 + $0xb8] sm:$0xff] %vm2049_vm10, %v4910_v61 }
 0x664   : > { %5174 = vst.msk [vmem:[#allocation3 + $0xb8] sm:$0xff] %vm2242_vm11, %v5102_v24 }
 0x665   : > { %v4146_v23 = vpop.permute.xlu0 %4145 }
 0x666   : > { %v4336_v60 = vpop.permute.xlu1 %4335  ;;  %4216 = vst.msk [vmem:[#allocation3 + $0xc8] sm:$0xff] %vm1276_vm6, %v4146_v23 }
 0x667   : > { %4407 = vst.msk [vmem:[#allocation3 + $0xc0] sm:$0xff] %vm1469_vm7, %v4336_v60  ;;  %4408 = vst.msk [vmem:[#allocation3 + $0xc8] sm:$0xff] %vm1469_vm7, %v4338_v16  ;;  %v9722_v20 = vpop.f32.mrb[56].mxu0 }
 0x668   : > { %4600 = vst.msk [vmem:[#allocation3 + $0xc8] sm:$0xff] %vm1662_vm8, %v4530_v17  ;;  %v5437_v40 = vadd.f32 %v9722_v20, %v13037_v45  ;;  %v5431_v51 = vpop.f32.mrb[57].mxu0 }
 0x669   : > { %v5432_v47 = vadd.f32 %v13037_v45, %v5431_v51  ;;  %v3764_v8 = vpop.permute.xlu0 %3763 }
 0x66a   : > { %v5564_v61 = vmul.f32 %v13049_v48, %v5437_v40  ;;  %v5100_v4 = vpop.permute.xlu1 %5099  ;;  %3833 = vst.msk [vmem:[#allocation3 + $0xd0] sm:$0xff] %vm890_vm4, %v3764_v8 }
 0x66b   : > { %v5563_v24 = vmul.f32 %v13049_v48, %v5432_v47  ;;  %5173 = vst.msk [vmem:[#allocation3 + $0xb0] sm:$0xff] %vm2242_vm11, %v5100_v4  ;;  %v5206_v37 = vld [vmem:[#allocation3 + $0xb8] sm:$0xff] }
 0x66c   : > { %v5596_v17 = vadd.f32 %v5564_v61, %v12539_v7 }
 0x66d   : > { %v5595_v16 = vadd.f32 %v5563_v24, %v12542_v6  ;;  %v4528_v39 = vpop.permute.xlu0 %4527 }
 0x66e   : > { %v3956_v41 = vpop.permute.xlu1 %3955  ;;  %4599 = vst.msk [vmem:[#allocation3 + $0xc0] sm:$0xff] %vm1662_vm8, %v4528_v39 }
 0x66f   : > { %4025 = vst.msk [vmem:[#allocation3 + $0xd0] sm:$0xff] %vm1083_vm5, %v3956_v41  ;;  %9770 = vmatprep.mubr.msk.f32.mxu1 %vm577_vm2, %v5595_v16 }
 0x670   : > { %9771 = vmatmul.mubr.msk.f32.gmra.mrb[88].mxu1 %vm577_vm2, %v5596_v17 }
 0x671   : > { %v4914_v34 = vpop.permute.xlu0 %4913 }
 0x672   : > { %v4342_v46 = vpop.permute.xlu1 %4341  ;;  %v5205_v29 = vld [vmem:[#allocation3 + $0xb0] sm:$0xff] }
 0x673   : > { %9741 = vmatprep.mubr.msk.f32.mxu0 %vm2321_vm12, %v5205_v29 }
 0x674   : > { %9742 = vmatmul.mubr.msk.f32.gmra.mrb[70].mxu0 %vm2321_vm12, %v5206_v37 }
 0x675   : > { %v3770_v6 = vpop.permute.xlu0 %3769 }
 0x676   : > { %v5106_v53 = vpop.permute.xlu1 %5105  ;;  %3836 = vst.msk [vmem:[#allocation3 + $0xe8] sm:$0xff] %vm890_vm4, %v3770_v6 }
 0x679   : > { %v4534_v7 = vpop.permute.xlu0 %4533 }
 0x67a   : > { %v4720_v23 = vpop.permute.xlu1 %4719 }
 0x67b   : > { %4791 = vst.msk [vmem:[#allocation3 + $0xc0] sm:$0xff] %vm1856_vm9, %v4720_v23 }
 0x67d   : > { %v3962_v60 = vpop.permute.xlu0 %3961 }
 0x67e   : > { %v4148_v20 = vpop.permute.xlu1 %4147  ;;  %4028 = vst.msk [vmem:[#allocation3 + $0xe8] sm:$0xff] %vm1083_vm5, %v3962_v60 }
 0x67f   : > { %4217 = vst.msk [vmem:[#allocation3 + $0xd0] sm:$0xff] %vm1276_vm6, %v4148_v20 }
 0x681   : > { %v4722_v40 = vpop.permute.xlu0 %4721 }
 0x682   : > { %v4912_v51 = vpop.permute.xlu1 %4911  ;;  %4792 = vst.msk [vmem:[#allocation3 + $0xc8] sm:$0xff] %vm1856_vm9, %v4722_v40 }
 0x683   : > { %4983 = vst.msk [vmem:[#allocation3 + $0xc0] sm:$0xff] %vm2049_vm10, %v4912_v51  ;;  %4984 = vst.msk [vmem:[#allocation3 + $0xc8] sm:$0xff] %vm2049_vm10, %v4914_v34 }
 0x684   : > { %5176 = vst.msk [vmem:[#allocation3 + $0xc8] sm:$0xff] %vm2242_vm11, %v5106_v53 }
 0x685   : > { %v4150_v47 = vpop.permute.xlu0 %4149 }
 0x686   : > { %v4340_v8 = vpop.permute.xlu1 %4339  ;;  %4218 = vst.msk [vmem:[#allocation3 + $0xd8] sm:$0xff] %vm1276_vm6, %v4150_v47 }
 0x687   : > { %4409 = vst.msk [vmem:[#allocation3 + $0xd0] sm:$0xff] %vm1469_vm7, %v4340_v8  ;;  %4410 = vst.msk [vmem:[#allocation3 + $0xd8] sm:$0xff] %vm1469_vm7, %v4342_v46 }
 0x688   : > { %v9725_v61 = vpop.f32.mrb[58].mxu0  ;;  %4602 = vst.msk [vmem:[#allocation3 + $0xd8] sm:$0xff] %vm1662_vm8, %v4534_v7 }
 0x689   : > { %v5447_v4 = vadd.f32 %v9725_v61, %v13037_v45  ;;  %v5441_v24 = vpop.f32.mrb[59].mxu0  ;;  %v3768_v39 = vpop.permute.xlu0 %3767 }
 0x68a   : > { %v5442_v16 = vadd.f32 %v13037_v45, %v5441_v24  ;;  %v5104_v41 = vpop.permute.xlu1 %5103  ;;  %3835 = vst.msk [vmem:[#allocation3 + $0xe0] sm:$0xff] %vm890_vm4, %v3768_v39 }
 0x68b   : > { %v5566_v17 = vmul.f32 %v13049_v48, %v5447_v4  ;;  %5175 = vst.msk [vmem:[#allocation3 + $0xc0] sm:$0xff] %vm2242_vm11, %v5104_v41  ;;  %v5208_v60 = vld [vmem:[#allocation3 + $0xc8] sm:$0xff] }
 0x68c   : > { %v5565_v34 = vmul.f32 %v13049_v48, %v5442_v16 }
 0x68d   : > { %v4532_v29 = vpop.permute.xlu0 %4531  ;;  %v5598_v37 = vadd.f32 %v5566_v17, %v12589_v5 }
 0x68e   : > { %v5597_v46 = vadd.f32 %v5565_v34, %v12595_v59  ;;  %v3960_v6 = vpop.permute.xlu1 %3959  ;;  %4601 = vst.msk [vmem:[#allocation3 + $0xd0] sm:$0xff] %vm1662_vm8, %v4532_v29 }
 0x68f   : > { %4027 = vst.msk [vmem:[#allocation3 + $0xe0] sm:$0xff] %vm1083_vm5, %v3960_v6 }
 0x690   : > { %9773 = vmatprep.mubr.msk.f32.mxu1 %vm577_vm2, %v5597_v46 }
 0x691   : > { %9774 = vmatmul.mubr.msk.f32.gmra.mrb[90].mxu1 %vm577_vm2, %v5598_v37  ;;  %v4918_v53 = vpop.permute.xlu0 %4917 }
 0x692   : > { %v4346_v7 = vpop.permute.xlu1 %4345  ;;  %v5207_v23 = vld [vmem:[#allocation3 + $0xc0] sm:$0xff] }
 0x693   : > { %9744 = vmatprep.mubr.msk.f32.mxu0 %vm2321_vm12, %v5207_v23 }
 0x694   : > { %9745 = vmatmul.mubr.msk.f32.gmra.mrb[72].mxu0 %vm2321_vm12, %v5208_v60 }
 0x695   : > { %v3774_v59 = vpop.permute.xlu0 %3773 }
 0x696   : > { %v5110_v20 = vpop.permute.xlu1 %5109  ;;  %3838 = vst.msk [vmem:[#allocation3 + $0xf8] sm:$0xff] %vm890_vm4, %v3774_v59 }
 0x699   : > { %v4538_v5 = vpop.permute.xlu0 %4537 }
 0x69a   : > { %v4724_v40 = vpop.permute.xlu1 %4723 }
 0x69b   : > { %4793 = vst.msk [vmem:[#allocation3 + $0xd0] sm:$0xff] %vm1856_vm9, %v4724_v40 }
 0x69d   : > { %v3966_v51 = vpop.permute.xlu0 %3965 }
 0x69e   : > { %v4152_v47 = vpop.permute.xlu1 %4151  ;;  %4030 = vst.msk [vmem:[#allocation3 + $0xf8] sm:$0xff] %vm1083_vm5, %v3966_v51 }
 0x69f   : > { %4219 = vst.msk [vmem:[#allocation3 + $0xe0] sm:$0xff] %vm1276_vm6, %v4152_v47 }
 0x6a1   : > { %v4726_v8 = vpop.permute.xlu0 %4725 }
 0x6a2   : > { %v4916_v61 = vpop.permute.xlu1 %4915  ;;  %4794 = vst.msk [vmem:[#allocation3 + $0xd8] sm:$0xff] %vm1856_vm9, %v4726_v8 }
 0x6a3   : > { %4985 = vst.msk [vmem:[#allocation3 + $0xd0] sm:$0xff] %vm2049_vm10, %v4916_v61  ;;  %4986 = vst.msk [vmem:[#allocation3 + $0xd8] sm:$0xff] %vm2049_vm10, %v4918_v53 }
 0x6a4   : > { %5178 = vst.msk [vmem:[#allocation3 + $0xd8] sm:$0xff] %vm2242_vm11, %v5110_v20 }
 0x6a5   : > { %v4154_v4 = vpop.permute.xlu0 %4153 }
 0x6a6   : > { %v4344_v24 = vpop.permute.xlu1 %4343  ;;  %4220 = vst.msk [vmem:[#allocation3 + $0xe8] sm:$0xff] %vm1276_vm6, %v4154_v4 }
 0x6a7   : > { %4411 = vst.msk [vmem:[#allocation3 + $0xe0] sm:$0xff] %vm1469_vm7, %v4344_v24  ;;  %4412 = vst.msk [vmem:[#allocation3 + $0xe8] sm:$0xff] %vm1469_vm7, %v4346_v7 }
 0x6a8   : > { %v9728_v16 = vpop.f32.mrb[60].mxu0  ;;  %4604 = vst.msk [vmem:[#allocation3 + $0xe8] sm:$0xff] %vm1662_vm8, %v4538_v5 }
 0x6a9   : > { %v5457_v39 = vadd.f32 %v9728_v16, %v13037_v45  ;;  %v5451_v17 = vpop.f32.mrb[61].mxu0  ;;  %v3772_v34 = vpop.permute.xlu0 %3771 }
 0x6aa   : > { %v5452_v41 = vadd.f32 %v13037_v45, %v5451_v17  ;;  %v5108_v29 = vpop.permute.xlu1 %5107  ;;  %3837 = vst.msk [vmem:[#allocation3 + $0xf0] sm:$0xff] %vm890_vm4, %v3772_v34  ;;  %vm6833_vm4 = vcmask 130048  }
 0x6ab   : > { %v5568_v46 = vmul.f32 %v13049_v48, %v5457_v39  ;;  %5177 = vst.msk [vmem:[#allocation3 + $0xd0] sm:$0xff] %vm2242_vm11, %v5108_v29  ;;  %v5210_v5 = vld [vmem:[#allocation3 + $0xd8] sm:$0xff] }
 0x6ac   : > { %v5567_v37 = vmul.f32 %v13049_v48, %v5452_v41 }
 0x6ad   : > { %v4536_v53 = vpop.permute.xlu0 %4535  ;;  %v5600_v7 = vadd.f32 %v5568_v46, %v12652_v32 }
 0x6ae   : > { %v5599_v6 = vadd.f32 %v5567_v37, %v12655_v38  ;;  %v3964_v23 = vpop.permute.xlu1 %3963  ;;  %4603 = vst.msk [vmem:[#allocation3 + $0xe0] sm:$0xff] %vm1662_vm8, %v4536_v53 }
 0x6af   : > { %4029 = vst.msk [vmem:[#allocation3 + $0xf0] sm:$0xff] %vm1083_vm5, %v3964_v23  ;;  %vm7253_vm5 = vcmask 128000  }
 0x6b0   : > { %9776 = vmatprep.mubr.msk.f32.mxu1 %vm577_vm2, %v5599_v6 }
 0x6b1   : > { %9777 = vmatmul.mubr.msk.f32.gmra.mrb[92].mxu1 %vm577_vm2, %v5600_v7  ;;  %v4922_v60 = vpop.permute.xlu0 %4921 }
 0x6b2   : > { %v4542_v59 = vpop.permute.xlu1 %4541  ;;  %v5209_v20 = vld [vmem:[#allocation3 + $0xd0] sm:$0xff] }
 0x6b3   : > { %9747 = vmatprep.mubr.msk.f32.mxu0 %vm2321_vm12, %v5209_v20 }
 0x6b4   : > { %9748 = vmatmul.mubr.msk.f32.gmra.mrb[74].mxu0 %vm2321_vm12, %v5210_v5 }
 0x6b5   : > { %v4350_v38 = vpop.permute.xlu0 %4349 }
 0x6b6   : > { %v4728_v40 = vpop.permute.xlu1 %4727 }
 0x6b7   : > { %4795 = vst.msk [vmem:[#allocation3 + $0xe0] sm:$0xff] %vm1856_vm9, %v4728_v40 }
 0x6b9   : > { %v5114_v32 = vpop.permute.xlu0 %5113 }
 0x6ba   : > { %v4156_v51 = vpop.permute.xlu1 %4155 }
 0x6bb   : > { %4221 = vst.msk [vmem:[#allocation3 + $0xf0] sm:$0xff] %vm1276_vm6, %v4156_v51 }
 0x6bd   : > { %v4730_v47 = vpop.permute.xlu0 %4729 }
 0x6be   : > { %v4920_v8 = vpop.permute.xlu1 %4919  ;;  %4796 = vst.msk [vmem:[#allocation3 + $0xe8] sm:$0xff] %vm1856_vm9, %v4730_v47 }
 0x6bf   : > { %4987 = vst.msk [vmem:[#allocation3 + $0xe0] sm:$0xff] %vm2049_vm10, %v4920_v8  ;;  %4988 = vst.msk [vmem:[#allocation3 + $0xe8] sm:$0xff] %vm2049_vm10, %v4922_v60  ;;  %v13363_v60 = vld [vmem:[%s14642_s1 + $0xe8] ss:$0 sm:$0xff] }
 0x6c0   : > { %5180 = vst.msk [vmem:[#allocation3 + $0xe8] sm:$0xff] %vm2242_vm11, %v5114_v32 }
 0x6c1   : > { %v4158_v61 = vpop.permute.xlu0 %4157 }
 0x6c2   : > { %v4348_v4 = vpop.permute.xlu1 %4347  ;;  %4222 = vst.msk [vmem:[#allocation3 + $0xf8] sm:$0xff] %vm1276_vm6, %v4158_v61  ;;  %v9760_v24 = vpop.f32.mrb[80].mxu1  ;;  %vm7261_vm6 = vcmask 125952  }
 0x6c3   : > { %4413 = vst.msk [vmem:[#allocation3 + $0xf0] sm:$0xff] %vm1469_vm7, %v4348_v4  ;;  %4414 = vst.msk [vmem:[#allocation3 + $0xf8] sm:$0xff] %vm1469_vm7, %v4350_v38  ;;  %v5787_v16 = vpop.f32.mrb[81].mxu1  ;;  %vm7271_vm7 = vcmask 122880  }
 0x6c4   : > { %4606 = vst.msk [vmem:[#allocation3 + $0xf8] sm:$0xff] %vm1662_vm8, %v4542_v59 }
 0x6c5   : > { %4798 = vst.msk [vmem:[#allocation3 + $0xf8] sm:$0xff] %vm1856_vm9, %v12520_v15  ;;  %v5116_v15 = vpop.permute.xlu0 %5115 }
 0x6c6   : > { %4990 = vst.msk [vmem:[#allocation3 + $0xf8] sm:$0xff] %vm2049_vm10, %v12534_v2  ;;  %v5112_v39 = vpop.permute.xlu1 %5111 }
 0x6c7   : > { %5179 = vst.msk [vmem:[#allocation3 + $0xe0] sm:$0xff] %vm2242_vm11, %v5112_v39 }
 0x6c8   : > { %v9731_v17 = vpop.f32.mrb[62].mxu0 }
 0x6c9   : > { %v5467_v41 = vadd.f32 %v9731_v17, %v13037_v45  ;;  %v5461_v34 = vpop.f32.mrb[63].mxu0 }
 0x6ca   : > { %v5462_v46 = vadd.f32 %v13037_v45, %v5461_v34  ;;  %v4540_v37 = vpop.permute.xlu1 %4539 }
 0x6cb   : > { %v5570_v29 = vmul.f32 %v13049_v48, %v5467_v41  ;;  %4605 = vst.msk [vmem:[#allocation3 + $0xf0] sm:$0xff] %vm1662_vm8, %v4540_v37  ;;  %vm7278_vm8 = vcmask 254080  }
 0x6cc   : > { %v5569_v6 = vmul.f32 %v13049_v48, %v5462_v46  ;;  %4797 = vst.msk [vmem:[#allocation3 + $0xf0] sm:$0xff] %vm1856_vm9, %v12517_v35  ;;  %v5212_v35 = vld [vmem:[#allocation3 + $0xe8] sm:$0xff]  ;;  %vm7285_vm9 = vcmask 385280  }
 0x6cd   : > { %4989 = vst.msk [vmem:[#allocation3 + $0xf0] sm:$0xff] %vm2049_vm10, %v12532_v55  ;;  %v5602_v53 = vadd.f32 %v5570_v29, %v12682_v13  ;;  %v5788_v55 = vadd.f32 %v13363_v60, %v5787_v16  ;;  %v5793_v13 = vadd.f32 %v9760_v24, %v13363_v60  ;;  %vm7292_vm10 = vcmask 516480  }
 0x6ce   : > { %v5601_v2 = vadd.f32 %v5569_v6, %v12686_v56  ;;  %5181 = vst.msk [vmem:[#allocation3 + $0xf0] sm:$0xff] %vm2242_vm11, %v5116_v15  ;;  %v5118_v7 = vpop.permute.xlu1 %5117  ;;  %v5211_v23 = vld [vmem:[#allocation3 + $0xe0] sm:$0xff] }
 0x6cf   : > { %5182 = vst.msk [vmem:[#allocation3 + $0xf8] sm:$0xff] %vm2242_vm11, %v5118_v7  ;;  %9750 = vmatprep.mubr.msk.f32.mxu0 %vm2321_vm12, %v5211_v23  ;;  %v13373_v59 = vadd.f32 %v5788_v55, %v12173_v3  ;;  %v13380_v5 = vadd.f32 %v5793_v13, %v12177_v1  ;;  %vm7264_vm11 = vcmask 130052  }
 0x6d0   : > { %9779 = vmatprep.mubr.msk.f32.mxu1 %vm577_vm2, %v5601_v2  ;;  %9751 = vmatmul.mubr.msk.f32.gmra.mrb[76].mxu0 %vm2321_vm12, %v5212_v35 }
 0x6d1   : > { %9780 = vmatmul.mubr.msk.f32.gmra.mrb[94].mxu1 %vm577_vm2, %v5602_v53 }
 0x6d5   : > { %v5213_v56 = vld [vmem:[#allocation3 + $0xf0] sm:$0xff] }
 0x6d6   : > { %9753 = vmatprep.mubr.msk.f32.mxu0 %vm2321_vm12, %v5213_v56  ;;  %v5214_v20 = vld [vmem:[#allocation3 + $0xf8] sm:$0xff] }
 0x6d7   : > { %9754 = vmatmul.mubr.msk.f32.gmra.mrb[78].mxu0 %vm2321_vm12, %v5214_v20  ;;  %vm7299_vm12 = vcmask 647680  }
 0x6d8   : > { %9808 = vmatprep.mubr.msk.f32.mxu0 %vm251_vm1, %v13373_v59 }
 0x6db   : > { %9809 = vmatmul.mubr.msk.f32.vlgmr.msra.gmra.mrb[80].mxu0 %vm251_vm1, %v13380_v5 }
 0x6e3   : > { %v9763_v38 = vpop.f32.mrb[82].mxu1 }
 0x6e4   : > { %v5803_v40 = vadd.f32 %v9763_v38, %v13363_v60  ;;  %v5797_v32 = vpop.f32.mrb[83].mxu1 }
 0x6e5   : > { %v5798_v3 = vadd.f32 %v13363_v60, %v5797_v32  ;;  %v10435_v32 = vmov 0  }
 0x6e6   : > { %v13390_v8 = vadd.f32 %v5803_v40, %v12197_v36  ;;  %10144 = vset.pattern.permute.xlu1 %v10435_v32  ;;  %10143 = vset.pattern.permute.xlu0 %v10435_v32 }
 0x6e7   : > { %v13387_v51 = vadd.f32 %v5798_v3, %v12193_v57  ;;  %v9734_v47 = vpop.f32.mrb[64].mxu0 }
 0x6e8   : > { %v5477_v61 = vadd.f32 %v9734_v47, %v13037_v45  ;;  %v5471_v1 = vpop.f32.mrb[65].mxu0 }
 0x6e9   : > { %v5472_v4 = vadd.f32 %v13037_v45, %v5471_v1  ;;  %9811 = vmatprep.mubr.msk.f32.mxu0 %vm251_vm1, %v13387_v51 }
 0x6ea   : > { %v5572_v24 = vmul.f32 %v13049_v48, %v5477_v61  ;;  %9812 = vmatmul.mubr.msk.f32.gmra.mrb[82].mxu0 %vm251_vm1, %v13390_v8 }
 0x6eb   : > { %v5571_v57 = vmul.f32 %v13049_v48, %v5472_v4 }
 0x6ec   : > { %v5604_v36 = vadd.f32 %v5572_v24, %v12760_v27 }
 0x6ed   : > { %v5603_v16 = vadd.f32 %v5571_v57, %v12764_v49 }
 0x6ef   : > { %9782 = vmatprep.mubr.msk.f32.mxu1 %vm577_vm2, %v5603_v16 }
 0x6f0   : > { %9783 = vmatmul.mubr.msk.f32.gmra.mrb[96].mxu1 %vm577_vm2, %v5604_v36 }
 0x703   : > { %v9766_v39 = vpop.f32.mrb[84].mxu1 }
 0x704   : > { %v5813_v17 = vadd.f32 %v9766_v39, %v13363_v60  ;;  %v5807_v41 = vpop.f32.mrb[85].mxu1 }
 0x705   : > { %v5808_v34 = vadd.f32 %v13363_v60, %v5807_v41 }
 0x706   : > { %v13410_v37 = vadd.f32 %v5813_v17, %v12217_v58 }
 0x707   : > { %v13407_v46 = vadd.f32 %v5808_v34, %v12213_v44  ;;  %v9737_v29 = vpop.f32.mrb[66].mxu0 }
 0x708   : > { %v5487_v49 = vadd.f32 %v9737_v29, %v13037_v45  ;;  %v5481_v27 = vpop.f32.mrb[67].mxu0 }
 0x709   : > { %v5482_v6 = vadd.f32 %v13037_v45, %v5481_v27  ;;  %9814 = vmatprep.mubr.msk.f32.mxu0 %vm251_vm1, %v13407_v46 }
 0x70a   : > { %v5574_v15 = vmul.f32 %v13049_v48, %v5487_v49  ;;  %9815 = vmatmul.mubr.msk.f32.gmra.mrb[84].mxu0 %vm251_vm1, %v13410_v37 }
 0x70b   : > { %v5573_v44 = vmul.f32 %v13049_v48, %v5482_v6 }
 0x70c   : > { %v5606_v58 = vadd.f32 %v5574_v15, %v12813_v52 }
 0x70d   : > { %v5605_v2 = vadd.f32 %v5573_v44, %v12817_v9 }
 0x70f   : > { %9785 = vmatprep.mubr.msk.f32.mxu1 %vm577_vm2, %v5605_v2 }
 0x710   : > { %9786 = vmatmul.mubr.msk.f32.gmra.mrb[98].mxu1 %vm577_vm2, %v5606_v58 }
 0x723   : > { %v9769_v53 = vpop.f32.mrb[86].mxu1 }
 0x724   : > { %v5823_v7 = vadd.f32 %v9769_v53, %v13363_v60  ;;  %v5817_v23 = vpop.f32.mrb[87].mxu1 }
 0x725   : > { %v5818_v35 = vadd.f32 %v13363_v60, %v5817_v23 }
 0x726   : > { %v13430_v56 = vadd.f32 %v5823_v7, %v12243_v63 }
 0x727   : > { %v13427_v55 = vadd.f32 %v5818_v35, %v12238_v14  ;;  %v9740_v13 = vpop.f32.mrb[68].mxu0 }
 0x728   : > { %v5497_v9 = vadd.f32 %v9740_v13, %v13037_v45  ;;  %v5491_v52 = vpop.f32.mrb[69].mxu0 }
 0x729   : > { %v5492_v20 = vadd.f32 %v13037_v45, %v5491_v52  ;;  %9817 = vmatprep.mubr.msk.f32.mxu0 %vm251_vm1, %v13427_v55 }
 0x72a   : > { %v5576_v38 = vmul.f32 %v13049_v48, %v5497_v9  ;;  %9818 = vmatmul.mubr.msk.f32.gmra.mrb[86].mxu0 %vm251_vm1, %v13430_v56 }
 0x72b   : > { %v5575_v14 = vmul.f32 %v13049_v48, %v5492_v20 }
 0x72c   : > { %v5608_v63 = vadd.f32 %v5576_v38, %v12870_v62  ;;  %v13455_v62 = vld [vmem:[%s14642_s1 + $0xd0] ss:$0 sm:$0xff] }
 0x72d   : > { %v5607_v40 = vadd.f32 %v5575_v14, %v12874_v19 }
 0x72f   : > { %9788 = vmatprep.mubr.msk.f32.mxu1 %vm577_vm2, %v5607_v40 }
 0x730   : > { %9789 = vmatmul.mubr.msk.f32.gmra.mrb[100].mxu1 %vm577_vm2, %v5608_v63 }
 0x743   : > { %v9772_v45 = vpop.f32.mrb[88].mxu1 }
 0x744   : > { %v5833_v3 = vadd.f32 %v9772_v45, %v13363_v60  ;;  %v5827_v47 = vpop.f32.mrb[89].mxu1 }
 0x745   : > { %v5828_v61 = vadd.f32 %v13363_v60, %v5827_v47 }
 0x746   : > { %v13450_v19 = vadd.f32 %v5833_v3, %v12265_v11 }
 0x747   : > { %v13447_v1 = vadd.f32 %v5828_v61, %v12261_v50  ;;  %v9743_v48 = vpop.f32.mrb[70].mxu0  ;;  %v13464_v50 = vld [vmem:[%s14642_s1 + $0xd8] ss:$0 sm:$0xff] }
 0x748   : > { %v5507_v4 = vadd.f32 %v13455_v62, %v9743_v48  ;;  %v5501_v24 = vpop.f32.mrb[71].mxu0 }
 0x749   : > { %v5502_v57 = vadd.f32 %v13455_v62, %v5501_v24  ;;  %9820 = vmatprep.mubr.msk.f32.mxu0 %vm251_vm1, %v13447_v1 }
 0x74a   : > { %v5578_v11 = vmul.f32 %v13464_v50, %v5507_v4  ;;  %9821 = vmatmul.mubr.msk.f32.gmra.mrb[88].mxu0 %vm251_vm1, %v13450_v19 }
 0x74b   : > { %v5577_v16 = vmul.f32 %v13464_v50, %v5502_v57  ;;  %v14844_v57 = vld [vmem:[#allocation26_spill] sm:$0xff] }
 0x74c   : > { %v5610_v39 = vadd.f32 %v5578_v11, %v12923_v33 }
 0x74d   : > { %v5609_v36 = vadd.f32 %v5577_v16, %v12927_v0 }
 0x74f   : > { %9791 = vmatprep.mubr.msk.f32.mxu1 %vm577_vm2, %v5609_v36 }
 0x750   : > { %9792 = vmatmul.mubr.msk.f32.gmra.mrb[102].mxu1 %vm577_vm2, %v5610_v39 }
 0x764   : > { %v9775_v17 = vpop.f32.mrb[90].mxu1 }
 0x765   : > { %v5843_v41 = vadd.f32 %v9775_v17, %v13363_v60  ;;  %v5837_v34 = vpop.f32.mrb[91].mxu1 }
 0x766   : > { %v5838_v29 = vadd.f32 %v13363_v60, %v5837_v34 }
 0x767   : > { %v9746_v27 = vpop.f32.mrb[72].mxu0  ;;  %v13480_v6 = vadd.f32 %v5843_v41, %v12295_v18 }
 0x768   : > { %v13477_v49 = vadd.f32 %v5838_v29, %v12291_v26  ;;  %v5517_v0 = vadd.f32 %v13455_v62, %v9746_v27  ;;  %v5511_v33 = vpop.f32.mrb[73].mxu0 }
 0x769   : > { %v5512_v15 = vadd.f32 %v13455_v62, %v5511_v33  ;;  %v6503_v33 = vld [vmem:[%s14642_s1 + $0x100] sm:$0xf] }
 0x76a   : > { %9823 = vmatprep.mubr.msk.f32.mxu0 %vm251_vm1, %v13477_v49  ;;  %v5580_v44 = vmul.f32 %v13464_v50, %v5517_v0  ;;  %9856 = vmatprep.subr.msk.mxu1 %vm348_vm0, %v6503_v33 }
 0x76b   : > { %9824 = vmatmul.mubr.msk.f32.gmra.mrb[90].mxu0 %vm251_vm1, %v13480_v6  ;;  %v5579_v26 = vmul.f32 %v13464_v50, %v5512_v15  ;;  %9857 = vmatpush3.msk.msra.mxu1 %vm348_vm0, %v6503_v33 }
 0x76c   : > { %v5612_v18 = vadd.f32 %v5580_v44, %v12974_v12 }
 0x76d   : > { %v5611_v2 = vadd.f32 %v5579_v26, %v12978_v25 }
 0x76f   : > { %9794 = vmatprep.mubr.msk.f32.mxu1 %vm577_vm2, %v5611_v2 }
 0x770   : > { %9795 = vmatmul.mubr.msk.f32.gmra.mrb[104].mxu1 %vm577_vm2, %v5612_v18 }
 0x784   : > { %v9778_v58 = vpop.f32.mrb[92].mxu1 }
 0x785   : > { %v5853_v53 = vadd.f32 %v9778_v58, %v13363_v60  ;;  %v5847_v7 = vpop.f32.mrb[93].mxu1  ;;  %v14845_v58 = vld [vmem:[#allocation13_spill] sm:$0xff] }
 0x786   : > { %v5848_v23 = vadd.f32 %v13363_v60, %v5847_v7  ;;  %v14846_v7 = vld [vmem:[#allocation15_spill] sm:$0xff] }
 0x787   : > { %v9749_v13 = vpop.f32.mrb[74].mxu0  ;;  %v13500_v9 = vadd.f32 %v5853_v53, %v12315_v28 }
 0x788   : > { %v13497_v35 = vadd.f32 %v5848_v23, %v12311_v21  ;;  %v5527_v25 = vadd.f32 %v13455_v62, %v9749_v13  ;;  %v5521_v12 = vpop.f32.mrb[75].mxu0 }
 0x789   : > { %v5522_v52 = vadd.f32 %v13455_v62, %v5521_v12 }
 0x78a   : > { %9826 = vmatprep.mubr.msk.f32.mxu0 %vm251_vm1, %v13497_v35  ;;  %v5582_v20 = vmul.f32 %v13464_v50, %v5527_v25 }
 0x78b   : > { %9827 = vmatmul.mubr.msk.f32.gmra.mrb[92].mxu0 %vm251_vm1, %v13500_v9  ;;  %v5581_v21 = vmul.f32 %v13464_v50, %v5522_v52 }
 0x78c   : > { %v5614_v28 = vadd.f32 %v5582_v20, %v13028_v30 }
 0x78d   : > { %v5613_v38 = vadd.f32 %v5581_v21, %v13032_v10 }
 0x78f   : > { %9797 = vmatprep.mubr.msk.f32.mxu1 %vm577_vm2, %v5613_v38 }
 0x790   : > { %9798 = vmatmul.mubr.msk.f32.gmra.mrb[106].mxu1 %vm577_vm2, %v5614_v28 }
 0x7a3   : > { %v9752_v14 = vpop.f32.mrb[76].mxu0 }
 0x7a4   : > { %v9781_v40 = vpop.f32.mrb[94].mxu1  ;;  %v5537_v63 = vadd.f32 %v13455_v62, %v9752_v14  ;;  %v5531_v45 = vpop.f32.mrb[77].mxu0  ;;  %v14847_v14 = vld [vmem:[#allocation14_spill] sm:$0xff] }
 0x7a5   : > { %v5863_v32 = vadd.f32 %v9781_v40, %v13363_v60  ;;  %v5857_v3 = vpop.f32.mrb[95].mxu1  ;;  %v5532_v47 = vadd.f32 %v13455_v62, %v5531_v45 }
 0x7a6   : > { %v5858_v61 = vadd.f32 %v13363_v60, %v5857_v3  ;;  %v5584_v10 = vmul.f32 %v13464_v50, %v5537_v63  ;;  %v14848_v63 = vld [vmem:[#allocation17_spill] sm:$0xff] }
 0x7a7   : > { %v5583_v30 = vmul.f32 %v13464_v50, %v5532_v47  ;;  %v13524_v4 = vadd.f32 %v5863_v32, %v12337_v42  ;;  %v13539_v42 = vld [vmem:[%s14642_s1 + $0xf8] ss:$0 sm:$0xff] }
 0x7a8   : > { %v13521_v48 = vadd.f32 %v5858_v61, %v12330_v43  ;;  %v5616_v11 = vadd.f32 %v5584_v10, %v14844_v57 }
 0x7a9   : > { %v5615_v24 = vadd.f32 %v5583_v30, %v13105_v54 }
 0x7aa   : > { %9829 = vmatprep.mubr.msk.f32.mxu0 %vm251_vm1, %v13521_v48  ;;  %v9755_v16 = vpop.f32.mrb[78].mxu0 }
 0x7ab   : > { %9830 = vmatmul.mubr.msk.f32.gmra.mrb[94].mxu0 %vm251_vm1, %v13524_v4  ;;  %v5547_v36 = vadd.f32 %v13455_v62, %v9755_v16  ;;  %v5541_v39 = vpop.f32.mrb[79].mxu0  ;;  %9800 = vmatprep.mubr.msk.f32.mxu1 %vm577_vm2, %v5615_v24 }
 0x7ac   : > { %v5542_v43 = vadd.f32 %v13455_v62, %v5541_v39  ;;  %9801 = vmatmul.mubr.msk.f32.gmra.mrb[108].mxu1 %vm577_vm2, %v5616_v11  ;;  %v14849_v11 = vld [vmem:[#allocation16_spill] sm:$0xff] }
 0x7ad   : > { %v5586_v54 = vmul.f32 %v13464_v50, %v5547_v36  ;;  %v14850_v36 = vld [vmem:[#allocation19_spill] sm:$0xff] }
 0x7ae   : > { %v5585_v17 = vmul.f32 %v13464_v50, %v5542_v43  ;;  %v9810_v41 = vpop.f32.mrb[80].mxu0 }
 0x7af   : > { %v6155_v34 = vadd.f32 %v9810_v41, %v13539_v42  ;;  %v6149_v29 = vpop.f32.mrb[81].mxu0  ;;  %v5618_v62 = vadd.f32 %v5586_v54, %v13144_v31 }
 0x7b0   : > { %v5617_v27 = vadd.f32 %v5585_v17, %v13149_v22  ;;  %v6150_v0 = vadd.f32 %v13539_v42, %v6149_v29 }
 0x7b1   : > { %6318 = vperm.xlu1 %10144, %v6155_v34  }
 0x7b2   : > { %6313 = vperm.xlu0 %10143, %v6150_v0   ;;  %9803 = vmatprep.mubr.msk.f32.mxu1 %vm577_vm2, %v5617_v27 }
 0x7b3   : > { %9804 = vmatmul.mubr.msk.f32.gmra.mrb[110].mxu1 %vm577_vm2, %v5618_v62  ;;  %v14851_v62 = vld [vmem:[#allocation18_spill] sm:$0xff] }
 0x7bd   : > { %v9813_v50 = vpop.f32.mrb[82].mxu0 }
 0x7be   : > { %v6165_v22 = vadd.f32 %v9813_v50, %v13539_v42  ;;  %v6159_v15 = vpop.f32.mrb[83].mxu0  ;;  %v6308_v50 = vlaneseq }
 0x7bf   : > { %v6160_v31 = vadd.f32 %v13539_v42, %v6159_v15 }
 0x7c0   : > { %6328 = vperm.xlu0 %10143, %v6165_v22   ;;  %v14852_v22 = vld [vmem:[#allocation12_spill] sm:$0xff] }
 0x7c1   : > { %6323 = vperm.xlu1 %10144, %v6160_v31   ;;  %v13610_v31 = vand.u32 127, %v6308_v50 }
 0x7c3   : > { %v9784_v44 = vpop.f32.mrb[96].mxu1  ;;  %vm6310_vm2 = vcmp.eq.s32.totalorder %v13610_v31, 0 }
 0x7c4   : > { %v5873_v26 = vadd.f32 %v9784_v44, %v13363_v60  ;;  %v5867_v2 = vpop.f32.mrb[97].mxu1 }
 0x7c5   : > { %v5868_v18 = vadd.f32 %v13363_v60, %v5867_v2 }
 0x7c6   : > { %v13562_v23 = vadd.f32 %v5873_v26, %v14846_v7 }
 0x7c7   : > { %v13559_v53 = vadd.f32 %v5868_v18, %v14845_v58 }
 0x7c9   : > { %9832 = vmatprep.mubr.msk.f32.mxu0 %vm251_vm1, %v13559_v53 }
 0x7ca   : > { %9833 = vmatmul.mubr.msk.f32.gmra.mrb[96].mxu0 %vm251_vm1, %v13562_v23 }
 0x7dd   : > { %v9816_v13 = vpop.f32.mrb[84].mxu0 }
 0x7de   : > { %v6175_v25 = vadd.f32 %v9816_v13, %v13539_v42  ;;  %v6169_v12 = vpop.f32.mrb[85].mxu0 }
 0x7df   : > { %v6170_v52 = vadd.f32 %v13539_v42, %v6169_v12 }
 0x7e0   : > { %6338 = vperm.xlu0 %10143, %v6175_v25  }
 0x7e1   : > { %6333 = vperm.xlu1 %10144, %v6170_v52  }
 0x7e3   : > { %v9787_v20 = vpop.f32.mrb[98].mxu1 }
 0x7e4   : > { %v5883_v21 = vadd.f32 %v9787_v20, %v13363_v60  ;;  %v5877_v38 = vpop.f32.mrb[99].mxu1 }
 0x7e5   : > { %v5878_v28 = vadd.f32 %v13363_v60, %v5877_v38 }
 0x7e6   : > { %v13576_v32 = vadd.f32 %v5883_v21, %v14848_v63  ;;  %v14858_v63 = vld [vmem:[#allocation21_spill] sm:$0xff] }
 0x7e7   : > { %v13573_v40 = vadd.f32 %v5878_v28, %v14847_v14 }
 0x7e9   : > { %9835 = vmatprep.mubr.msk.f32.mxu0 %vm251_vm1, %v13573_v40 }
 0x7ea   : > { %9836 = vmatmul.mubr.msk.f32.gmra.mrb[98].mxu0 %vm251_vm1, %v13576_v32 }
 0x7fd   : > { %v9819_v45 = vpop.f32.mrb[86].mxu0 }
 0x7fe   : > { %v6185_v3 = vadd.f32 %v9819_v45, %v13539_v42  ;;  %v6179_v47 = vpop.f32.mrb[87].mxu0 }
 0x7ff   : > { %v6180_v61 = vadd.f32 %v13539_v42, %v6179_v47 }
 0x800   : > { %6348 = vperm.xlu0 %10143, %v6185_v3  }
 0x801   : > { %6343 = vperm.xlu1 %10144, %v6180_v61  }
 0x803   : > { %v9790_v10 = vpop.f32.mrb[100].mxu1 }
 0x804   : > { %v5893_v30 = vadd.f32 %v9790_v10, %v13363_v60  ;;  %v5887_v24 = vpop.f32.mrb[101].mxu1 }
 0x805   : > { %v5888_v57 = vadd.f32 %v13363_v60, %v5887_v24 }
 0x806   : > { %v13590_v39 = vadd.f32 %v5893_v30, %v14850_v36 }
 0x807   : > { %v13587_v16 = vadd.f32 %v5888_v57, %v14849_v11 }
 0x809   : > { %9838 = vmatprep.mubr.msk.f32.mxu0 %vm251_vm1, %v13587_v16 }
 0x80a   : > { %9839 = vmatmul.mubr.msk.f32.gmra.mrb[100].mxu0 %vm251_vm1, %v13590_v39 }
 0x81d   : > { %v9822_v43 = vpop.f32.mrb[88].mxu0 }
 0x81e   : > { %v6195_v54 = vadd.f32 %v9822_v43, %v13539_v42  ;;  %v6189_v17 = vpop.f32.mrb[89].mxu0 }
 0x81f   : > { %v6190_v41 = vadd.f32 %v13539_v42, %v6189_v17 }
 0x820   : > { %6358 = vperm.xlu0 %10143, %v6195_v54  }
 0x821   : > { %6353 = vperm.xlu1 %10144, %v6190_v41   ;;  %v14862_v41 = vld [vmem:[#allocation23_spill] sm:$0xff] }
 0x823   : > { %v9793_v34 = vpop.f32.mrb[102].mxu1 }
 0x824   : > { %v5903_v29 = vadd.f32 %v9793_v34, %v13363_v60  ;;  %v5897_v27 = vpop.f32.mrb[103].mxu1 }
 0x825   : > { %v5898_v0 = vadd.f32 %v13363_v60, %v5897_v27 }
 0x826   : > { %v13604_v15 = vadd.f32 %v5903_v29, %v14852_v22 }
 0x827   : > { %v13601_v33 = vadd.f32 %v5898_v0, %v14851_v62 }
 0x829   : > { %9841 = vmatprep.mubr.msk.f32.mxu0 %vm251_vm1, %v13601_v33 }
 0x82a   : > { %9842 = vmatmul.mubr.msk.f32.gmra.mrb[102].mxu0 %vm251_vm1, %v13604_v15 }
 0x830   : > { %v6319_v44 = vpop.permute.xlu1 %6318 }
 0x831   : > { %v6314_v26 = vpop.permute.xlu0 %6313  ;;  %v13621_v18 = vsel %vm6310_vm2, %v6319_v44, %v13380_v5 }
 0x832   : > { %v13616_v2 = vsel %vm6310_vm2, %v6314_v26, %v13373_v59  ;;  %14854 = vst [vmem:[#allocation28_spill] sm:$0xff] %v13621_v18 }
 0x833   : > { %14853 = vst [vmem:[#allocation29_spill] sm:$0xff] %v13616_v2  ;;  %9858 = vmatprep.mubr.msk.f32.mxu1 %vm251_vm1, %v13616_v2 }
 0x834   : > { %9859 = vmatmul.mubr.msk.f32.vlgmr.msra.gmra.mrb[112].mxu1 %vm251_vm1, %v13621_v18 }
 0x83e   : > { %v9825_v58 = vpop.f32.mrb[90].mxu0 }
 0x83f   : > { %v6205_v7 = vadd.f32 %v9825_v58, %v13539_v42  ;;  %v6199_v13 = vpop.f32.mrb[91].mxu0  ;;  %v6329_v12 = vpop.permute.xlu0 %6328 }
 0x840   : > { %v6200_v25 = vadd.f32 %v13539_v42, %v6199_v13  ;;  %v6324_v59 = vpop.permute.xlu1 %6323  ;;  %v13637_v52 = vsel %vm6310_vm2, %v6329_v12, %v13390_v8 }
 0x841   : > { %6368 = vperm.xlu0 %10143, %v6205_v7   ;;  %v13632_v5 = vsel %vm6310_vm2, %v6324_v59, %v13387_v51  ;;  %14856 = vst [vmem:[#allocation30_spill] sm:$0xff] %v13637_v52  ;;  %v14857_v51 = vld [vmem:[#allocation11_spill] sm:$0xff]  ;;  %v14866_v59 = vld [vmem:[#allocation25_spill] sm:$0xff] }
 0x842   : > { %14855 = vst [vmem:[#allocation31_spill] sm:$0xff] %v13632_v5  ;;  %6363 = vperm.xlu1 %10144, %v6200_v25   ;;  %9861 = vmatprep.mubr.msk.f32.mxu1 %vm251_vm1, %v13632_v5  ;;  %v14865_v25 = vld [vmem:[#allocation22_spill] sm:$0xff] }
 0x843   : > { %v9796_v20 = vpop.f32.mrb[104].mxu1  ;;  %9862 = vmatmul.mubr.msk.f32.gmra.mrb[114].mxu1 %vm251_vm1, %v13637_v52 }
 0x844   : > { %v5913_v21 = vadd.f32 %v9796_v20, %v13363_v60  ;;  %v5907_v38 = vpop.f32.mrb[105].mxu1 }
 0x845   : > { %v5908_v28 = vadd.f32 %v13363_v60, %v5907_v38 }
 0x846   : > { %v13649_v45 = vadd.f32 %v5913_v21, %v14858_v63  ;;  %v14868_v63 = vld [vmem:[#allocation27_spill] sm:$0xff] }
 0x847   : > { %v13646_v14 = vadd.f32 %v5908_v28, %v14857_v51  ;;  %v14867_v28 = vld [vmem:[#allocation24_spill] sm:$0xff] }
 0x849   : > { %9844 = vmatprep.mubr.msk.f32.mxu0 %vm251_vm1, %v13646_v14 }
 0x84a   : > { %9845 = vmatmul.mubr.msk.f32.gmra.mrb[104].mxu0 %vm251_vm1, %v13649_v45 }
 0x85e   : > { %v9828_v8 = vpop.f32.mrb[92].mxu0 }
 0x85f   : > { %v6215_v3 = vadd.f32 %v9828_v8, %v13539_v42  ;;  %v6209_v47 = vpop.f32.mrb[93].mxu0  ;;  %v6339_v10 = vpop.permute.xlu0 %6338 }
 0x860   : > { %v6210_v61 = vadd.f32 %v13539_v42, %v6209_v47  ;;  %v6334_v30 = vpop.permute.xlu1 %6333  ;;  %v13665_v57 = vsel %vm6310_vm2, %v6339_v10, %v13410_v37 }
 0x861   : > { %6378 = vperm.xlu0 %10143, %v6215_v3   ;;  %v13660_v24 = vsel %vm6310_vm2, %v6334_v30, %v13407_v46  ;;  %14860 = vst [vmem:[#allocation32_spill] sm:$0xff] %v13665_v57  ;;  %v14861_v46 = vld [vmem:[#allocation20_spill] sm:$0xff] }
 0x862   : > { %14859 = vst [vmem:[#allocation33_spill] sm:$0xff] %v13660_v24  ;;  %6373 = vperm.xlu1 %10144, %v6210_v61   ;;  %9864 = vmatprep.mubr.msk.f32.mxu1 %vm251_vm1, %v13660_v24 }
 0x863   : > { %v9799_v11 = vpop.f32.mrb[106].mxu1  ;;  %9865 = vmatmul.mubr.msk.f32.gmra.mrb[116].mxu1 %vm251_vm1, %v13665_v57 }
 0x864   : > { %v5923_v36 = vadd.f32 %v9799_v11, %v13363_v60  ;;  %v5917_v43 = vpop.f32.mrb[107].mxu1 }
 0x865   : > { %v5918_v54 = vadd.f32 %v13363_v60, %v5917_v43 }
 0x866   : > { %v13677_v34 = vadd.f32 %v5923_v36, %v14862_v41 }
 0x867   : > { %v13674_v17 = vadd.f32 %v5918_v54, %v14861_v46 }
 0x869   : > { %9847 = vmatprep.mubr.msk.f32.mxu0 %vm251_vm1, %v13674_v17 }
 0x86a   : > { %9848 = vmatmul.mubr.msk.f32.gmra.mrb[106].mxu0 %vm251_vm1, %v13677_v34 }
 0x87e   : > { %v9831_v37 = vpop.f32.mrb[94].mxu0 }
 0x87f   : > { %v6225_v29 = vadd.f32 %v9831_v37, %v13539_v42  ;;  %v6219_v27 = vpop.f32.mrb[95].mxu0  ;;  %v9802_v62 = vpop.f32.mrb[108].mxu1 }
 0x880   : > { %v6220_v0 = vadd.f32 %v13539_v42, %v6219_v27  ;;  %v6349_v50 = vpop.permute.xlu0 %6348  ;;  %v5933_v22 = vadd.f32 %v9802_v62, %v13363_v60  ;;  %v5927_v44 = vpop.f32.mrb[109].mxu1 }
 0x881   : > { %6388 = vperm.xlu0 %10143, %v6225_v29   ;;  %v6344_v26 = vpop.permute.xlu1 %6343  ;;  %v5928_v58 = vadd.f32 %v13363_v60, %v5927_v44  ;;  %v13695_v13 = vsel %vm6310_vm2, %v6349_v50, %v13430_v56 }
 0x882   : > { %v13690_v7 = vsel %vm6310_vm2, %v6344_v26, %v13427_v55  ;;  %6383 = vperm.xlu1 %10144, %v6220_v0   ;;  %14864 = vst [vmem:[#allocation13_spill] sm:$0xff] %v13695_v13  ;;  %v13705_v20 = vadd.f32 %v5933_v22, %v14866_v59 }
 0x883   : > { %14863 = vst [vmem:[#allocation26_spill] sm:$0xff] %v13690_v7  ;;  %9867 = vmatprep.mubr.msk.f32.mxu1 %vm251_vm1, %v13690_v7  ;;  %v13700_v12 = vadd.f32 %v5928_v58, %v14865_v25 }
 0x884   : > { %9868 = vmatmul.mubr.msk.f32.gmra.mrb[118].mxu1 %vm251_vm1, %v13695_v13 }
 0x885   : > { %9850 = vmatprep.mubr.msk.f32.mxu0 %vm251_vm1, %v13700_v12 }
 0x886   : > { %v9805_v55 = vpop.f32.mrb[110].mxu1  ;;  %9851 = vmatmul.mubr.msk.f32.gmra.mrb[108].mxu0 %vm251_vm1, %v13705_v20 }
 0x887   : > { %v5943_v56 = vadd.f32 %v9805_v55, %v13363_v60  ;;  %v5937_v21 = vpop.f32.mrb[111].mxu1 }
 0x888   : > { %v5938_v38 = vadd.f32 %v13363_v60, %v5937_v21 }
 0x889   : > { %v13717_v8 = vadd.f32 %v5943_v56, %v14868_v63 }
 0x88a   : > { %v13714_v51 = vadd.f32 %v5938_v38, %v14867_v28 }
 0x88c   : > { %9853 = vmatprep.mubr.msk.f32.mxu0 %vm251_vm1, %v13714_v51 }
 0x88d   : > { %9854 = vmatmul.mubr.msk.f32.gmra.mrb[110].mxu0 %vm251_vm1, %v13717_v8 }
 0x89d   : > { %v9834_v3 = vpop.f32.mrb[96].mxu0 }
 0x89e   : > { %v6235_v47 = vadd.f32 %v9834_v3, %v13539_v42  ;;  %v6229_v61 = vpop.f32.mrb[97].mxu0 }
 0x89f   : > { %v6230_v10 = vadd.f32 %v13539_v42, %v6229_v61  ;;  %v6359_v30 = vpop.permute.xlu0 %6358 }
 0x8a0   : > { %6398 = vperm.xlu0 %10143, %v6235_v47   ;;  %v6354_v60 = vpop.permute.xlu1 %6353  ;;  %v13733_v36 = vsel %vm6310_vm2, %v6359_v30, %v13450_v19 }
 0x8a1   : > { %v13728_v11 = vsel %vm6310_vm2, %v6354_v60, %v13447_v1  ;;  %6393 = vperm.xlu1 %10144, %v6230_v10   ;;  %14870 = vst [vmem:[#allocation14_spill] sm:$0xff] %v13733_v36 }
 0x8a2   : > { %14869 = vst [vmem:[#allocation15_spill] sm:$0xff] %v13728_v11  ;;  %9870 = vmatprep.mubr.msk.f32.mxu1 %vm251_vm1, %v13728_v11 }
 0x8a3   : > { %9871 = vmatmul.mubr.msk.f32.gmra.mrb[120].mxu1 %vm251_vm1, %v13733_v36 }
 0x8bd   : > { %v9837_v43 = vpop.f32.mrb[98].mxu0 }
 0x8be   : > { %v6245_v54 = vadd.f32 %v9837_v43, %v13539_v42  ;;  %v6239_v46 = vpop.f32.mrb[99].mxu0 }
 0x8bf   : > { %v6240_v41 = vadd.f32 %v13539_v42, %v6239_v46 }
 0x8c0   : > { %v6369_v1 = vpop.permute.xlu0 %6368  ;;  %6408 = vperm.xlu0 %10143, %v6245_v54  }
 0x8c1   : > { %v6364_v37 = vpop.permute.xlu1 %6363  ;;  %6403 = vperm.xlu1 %10144, %v6240_v41   ;;  %v13749_v29 = vsel %vm6310_vm2, %v6369_v1, %v13480_v6 }
 0x8c2   : > { %v13744_v19 = vsel %vm6310_vm2, %v6364_v37, %v13477_v49  ;;  %14872 = vst [vmem:[#allocation16_spill] sm:$0xff] %v13749_v29 }
 0x8c3   : > { %14871 = vst [vmem:[#allocation17_spill] sm:$0xff] %v13744_v19  ;;  %9873 = vmatprep.mubr.msk.f32.mxu1 %vm251_vm1, %v13744_v19 }
 0x8c4   : > { %9874 = vmatmul.mubr.msk.f32.gmra.mrb[122].mxu1 %vm251_vm1, %v13749_v29 }
 0x8dd   : > { %v9840_v27 = vpop.f32.mrb[100].mxu0 }
 0x8de   : > { %v6255_v0 = vadd.f32 %v9840_v27, %v13539_v42  ;;  %v6249_v62 = vpop.f32.mrb[101].mxu0 }
 0x8df   : > { %v6250_v50 = vadd.f32 %v13539_v42, %v6249_v62 }
 0x8e0   : > { %v6379_v49 = vpop.permute.xlu0 %6378  ;;  %6418 = vperm.xlu0 %10143, %v6255_v0  }
 0x8e1   : > { %v6374_v22 = vpop.permute.xlu1 %6373  ;;  %6413 = vperm.xlu1 %10144, %v6250_v50   ;;  %v13765_v44 = vsel %vm6310_vm2, %v6379_v49, %v13500_v9 }
 0x8e2   : > { %v13760_v6 = vsel %vm6310_vm2, %v6374_v22, %v13497_v35  ;;  %14874 = vst [vmem:[#allocation18_spill] sm:$0xff] %v13765_v44 }
 0x8e3   : > { %14873 = vst [vmem:[#allocation19_spill] sm:$0xff] %v13760_v6  ;;  %9876 = vmatprep.mubr.msk.f32.mxu1 %vm251_vm1, %v13760_v6 }
 0x8e4   : > { %9877 = vmatmul.mubr.msk.f32.gmra.mrb[124].mxu1 %vm251_vm1, %v13765_v44 }
 0x8fd   : > { %v9843_v26 = vpop.f32.mrb[102].mxu0 }
 0x8fe   : > { %v6265_v58 = vadd.f32 %v9843_v26, %v13539_v42  ;;  %v6259_v25 = vpop.f32.mrb[103].mxu0 }
 0x8ff   : > { %v6260_v59 = vadd.f32 %v13539_v42, %v6259_v25 }
 0x900   : > { %v6389_v35 = vpop.permute.xlu0 %6388  ;;  %6428 = vperm.xlu0 %10143, %v6265_v58  }
 0x901   : > { %v6384_v55 = vpop.permute.xlu1 %6383  ;;  %6423 = vperm.xlu1 %10144, %v6260_v59   ;;  %v13781_v56 = vsel %vm6310_vm2, %v6389_v35, %v13524_v4 }
 0x902   : > { %v13776_v9 = vsel %vm6310_vm2, %v6384_v55, %v13521_v48  ;;  %14876 = vst [vmem:[#allocation11_spill] sm:$0xff] %v13781_v56 }
 0x903   : > { %14875 = vst [vmem:[#allocation12_spill] sm:$0xff] %v13776_v9  ;;  %9879 = vmatprep.mubr.msk.f32.mxu1 %vm251_vm1, %v13776_v9 }
 0x904   : > { %9880 = vmatmul.mubr.msk.f32.gmra.mrb[126].mxu1 %vm251_vm1, %v13781_v56 }
 0x907   : > { %v9860_v21 = vpop.f32.mrb[112].mxu1 }
 0x908   : > { %v6674_v38 = vpop.f32.mrb[113].mxu1 }
 0x916   : > { %v13787_v28 = vpop.f32.mrb[114].mxu1 }
 0x917   : > { %v6684_v63 = vpop.f32.mrb[115].mxu1 }
 0x91d   : > { %v9846_v3 = vpop.f32.mrb[104].mxu0 }
 0x91e   : > { %v6275_v48 = vadd.f32 %v9846_v3, %v13539_v42  ;;  %v6269_v47 = vpop.f32.mrb[105].mxu0 }
 0x91f   : > { %v6270_v61 = vadd.f32 %v13539_v42, %v6269_v47  ;;  %v6399_v10 = vpop.permute.xlu0 %6398 }
 0x920   : > { %6438 = vperm.xlu0 %10143, %v6275_v48   ;;  %v6394_v4 = vpop.permute.xlu1 %6393  ;;  %v13799_v60 = vsel %vm6310_vm2, %v6399_v10, %v13562_v23 }
 0x921   : > { %v13794_v30 = vsel %vm6310_vm2, %v6394_v4, %v13559_v53  ;;  %6433 = vperm.xlu1 %10144, %v6270_v61   ;;  %14878 = vst [vmem:[#allocation20_spill] sm:$0xff] %v13799_v60 }
 0x922   : > { %14877 = vst [vmem:[#allocation21_spill] sm:$0xff] %v13794_v30  ;;  %9882 = vmatprep.mubr.msk.f32.mxu1 %vm251_vm1, %v13794_v30 }
 0x923   : > { %9883 = vmatmul.mubr.msk.f32.gmra.mrb[128].mxu1 %vm251_vm1, %v13799_v60 }
 0x936   : > { %v9866_v43 = vpop.f32.mrb[116].mxu1 }
 0x937   : > { %v6694_v54 = vpop.f32.mrb[117].mxu1 }
 0x93d   : > { %v9849_v46 = vpop.f32.mrb[106].mxu0 }
 0x93e   : > { %v6285_v41 = vadd.f32 %v9849_v46, %v13539_v42  ;;  %v6279_v1 = vpop.f32.mrb[107].mxu0 }
 0x93f   : > { %v6280_v53 = vadd.f32 %v13539_v42, %v6279_v1  ;;  %v6409_v37 = vpop.permute.xlu0 %6408 }
 0x940   : > { %6448 = vperm.xlu0 %10143, %v6285_v41   ;;  %v6404_v27 = vpop.permute.xlu1 %6403  ;;  %v13815_v0 = vsel %vm6310_vm2, %v6409_v37, %v13576_v32 }
 0x941   : > { %v13810_v23 = vsel %vm6310_vm2, %v6404_v27, %v13573_v40  ;;  %6443 = vperm.xlu1 %10144, %v6280_v53   ;;  %14880 = vst [vmem:[#allocation22_spill] sm:$0xff] %v13815_v0 }
 0x942   : > { %14879 = vst [vmem:[#allocation23_spill] sm:$0xff] %v13810_v23  ;;  %9885 = vmatprep.mubr.msk.f32.mxu1 %vm251_vm1, %v13810_v23 }
 0x943   : > { %9886 = vmatmul.mubr.msk.f32.gmra.mrb[130].mxu1 %vm251_vm1, %v13815_v0 }
 0x957   : > { %v9869_v62 = vpop.f32.mrb[118].mxu1 }
 0x958   : > { %v6704_v50 = vpop.f32.mrb[119].mxu1 }
 0x959   : > { %v9852_v49 = vpop.f32.mrb[108].mxu0 }
 0x95a   : > { %v6295_v22 = vadd.f32 %v9852_v49, %v13539_v42  ;;  %v6289_v26 = vpop.f32.mrb[109].mxu0 }
 0x95b   : > { %v6290_v40 = vadd.f32 %v13539_v42, %v6289_v26 }
 0x95c   : > { %6458 = vperm.xlu0 %10143, %v6295_v22  }
 0x95d   : > { %6453 = vperm.xlu1 %10144, %v6290_v40  }
 0x95f   : > { %v6419_v58 = vpop.permute.xlu0 %6418 }
 0x960   : > { %v9855_v25 = vpop.f32.mrb[110].mxu0  ;;  %v6414_v32 = vpop.permute.xlu1 %6413  ;;  %v13832_v3 = vsel %vm6310_vm2, %v6419_v58, %v13590_v39 }
 0x961   : > { %v6305_v59 = vadd.f32 %v9855_v25, %v13539_v42  ;;  %v13827_v35 = vsel %vm6310_vm2, %v6414_v32, %v13587_v16  ;;  %v6299_v55 = vpop.f32.mrb[111].mxu0  ;;  %14882 = vst [vmem:[#allocation24_spill] sm:$0xff] %v13832_v3  ;;  %v13842_v16 = vld [vmem:[%s14642_s1 + $0x108] ss:$0 sm:$0xff] }
 0x962   : > { %14881 = vst [vmem:[#allocation25_spill] sm:$0xff] %v13827_v35  ;;  %v6300_v48 = vadd.f32 %v13539_v42, %v6299_v55  ;;  %9888 = vmatprep.mubr.msk.f32.mxu1 %vm251_vm1, %v13827_v35  ;;  %v13845_v39 = vadd.f32 %v9860_v21, %v13842_v16  ;;  %v13848_v4 = vadd.f32 %v13842_v16, %v6684_v63 }
 0x963   : > { %6468 = vperm.xlu0 %10143, %v6305_v59   ;;  %9889 = vmatmul.mubr.msk.f32.gmra.mrb[132].mxu1 %vm251_vm1, %v13832_v3  ;;  %v13865_v21 = vadd.f32 %v13842_v16, %v6674_v38  ;;  %v13881_v38 = vadd.f32 %v13842_v16, %v6704_v50  ;;  %v13896_v50 = vadd.f32 %v9869_v62, %v13842_v16 }
 0x964   : > { %6463 = vperm.xlu1 %10144, %v6300_v48   ;;  %v6837_v41 = vsel %vm6833_vm4, %v13845_v39, -inf  ;;  %v6840_v63 = vsel %vm6833_vm4, %v13848_v4, -inf }
 0x965   : > { %v6834_v53 = vsel %vm6833_vm4, %v13865_v21, -inf  ;;  %v6852_v49 = vsel %vm6833_vm4, %v13881_v38, -inf  ;;  %v6855_v40 = vsel %vm6833_vm4, %v13896_v50, -inf }
 0x976   : > { %v9872_v47 = vpop.f32.mrb[120].mxu1 }
 0x977   : > { %v6714_v61 = vpop.f32.mrb[121].mxu1  ;;  %v13903_v26 = vadd.f32 %v9872_v47, %v13842_v16 }
 0x979   : > { %v6861_v32 = vsel %vm6833_vm4, %v13903_v26, -inf }
 0x97f   : > { %v6429_v42 = vpop.permute.xlu0 %6428 }
 0x980   : > { %v6424_v10 = vpop.permute.xlu1 %6423  ;;  %v13860_v1 = vsel %vm6310_vm2, %v6429_v42, %v13604_v15  ;;  %v13876_v15 = vadd.f32 %v13787_v28, %v13842_v16  ;;  %v13891_v28 = vadd.f32 %v13842_v16, %v6714_v61 }
 0x981   : > { %v13853_v46 = vsel %vm6310_vm2, %v6424_v10, %v13601_v33  ;;  %14884 = vst [vmem:[#allocation34_spill] sm:$0xff] %v13860_v1  ;;  %v13870_v33 = vadd.f32 %v13842_v16, %v6694_v54  ;;  %v13886_v54 = vadd.f32 %v9866_v43, %v13842_v16 }
 0x982   : > { %14883 = vst [vmem:[#allocation27_spill] sm:$0xff] %v13853_v46  ;;  %6838 = vmax.xlane.f32.xlu0 %v6837_v41  ;;  %9891 = vmatprep.mubr.msk.f32.mxu1 %vm251_vm1, %v13853_v46  ;;  %v6843_v27 = vsel %vm6833_vm4, %v13876_v15, -inf  ;;  %v6858_v43 = vsel %vm6833_vm4, %v13891_v28, -inf }
 0x983   : > { %9892 = vmatmul.mubr.msk.f32.gmra.mrb[134].mxu1 %vm251_vm1, %v13860_v1  ;;  %v6846_v37 = vsel %vm6833_vm4, %v13870_v33, -inf  ;;  %v6849_v22 = vsel %vm6833_vm4, %v13886_v54, -inf }
 0x986   : > { %6841 = vmax.xlane.f32.xlu0 %v6840_v63 }
 0x988   : > { %6835 = vmax.xlane.f32.xlu1 %v6834_v53 }
 0x98a   : > { %6847 = vmax.xlane.f32.xlu0 %v6846_v37 }
 0x98c   : > { %6844 = vmax.xlane.f32.xlu1 %v6843_v27 }
 0x98e   : > { %6853 = vmax.xlane.f32.xlu0 %v6852_v49 }
 0x990   : > { %6850 = vmax.xlane.f32.xlu1 %v6849_v22 }
 0x992   : > { %6859 = vmax.xlane.f32.xlu0 %v6858_v43 }
 0x994   : > { %6856 = vmax.xlane.f32.xlu1 %v6855_v40 }
 0x997   : > { %v9875_v58 = vpop.f32.mrb[122].mxu1 }
 0x998   : > { %v13908_v25 = vadd.f32 %v9875_v58, %v13842_v16  ;;  %v6724_v62 = vpop.f32.mrb[123].mxu1  ;;  %6862 = vmax.xlane.f32.xlu1 %v6861_v32 }
 0x999   : > { %v13913_v59 = vadd.f32 %v13842_v16, %v6724_v62 }
 0x99a   : > { %14885 = vst [vmem:[#allocation35_spill] sm:$0xff] %v13908_v25  ;;  %v6867_v48 = vsel %vm6833_vm4, %v13908_v25, -inf }
 0x99b   : > { %14886 = vst [vmem:[#allocation36_spill] sm:$0xff] %v13913_v59  ;;  %v6864_v55 = vsel %vm6833_vm4, %v13913_v59, -inf }
 0x99c   : > { %6865 = vmax.xlane.f32.xlu0 %v6864_v55  ;;  %6868 = vmax.xlane.f32.xlu1 %v6867_v48 }
 0x99f   : > { %v6439_v47 = vpop.permute.xlu0 %6438 }
 0x9a0   : > { %v6434_v61 = vpop.permute.xlu1 %6433  ;;  %v13927_v10 = vsel %vm6310_vm2, %v6439_v47, %v13649_v45 }
 0x9a1   : > { %v13922_v42 = vsel %vm6310_vm2, %v6434_v61, %v13646_v14  ;;  %14888 = vst [vmem:[#allocation38_spill] sm:$0xff] %v13927_v10 }
 0x9a2   : > { %14887 = vst [vmem:[#allocation37_spill] sm:$0xff] %v13922_v42  ;;  %9894 = vmatprep.mubr.msk.f32.mxu1 %vm251_vm1, %v13922_v42 }
 0x9a3   : > { %9895 = vmatmul.mubr.msk.f32.gmra.mrb[136].mxu1 %vm251_vm1, %v13927_v10 }
 0x9b7   : > { %v9878_v41 = vpop.f32.mrb[124].mxu1 }
 0x9b8   : > { %v13934_v63 = vadd.f32 %v9878_v41, %v13842_v16  ;;  %v6734_v53 = vpop.f32.mrb[125].mxu1 }
 0x9b9   : > { %v13937_v37 = vadd.f32 %v13842_v16, %v6734_v53 }
 0x9ba   : > { %14889 = vst [vmem:[#allocation39_spill] sm:$0xff] %v13934_v63  ;;  %v6873_v14 = vsel %vm6833_vm4, %v13934_v63, -inf }
 0x9bb   : > { %14890 = vst [vmem:[#allocation40_spill] sm:$0xff] %v13937_v37  ;;  %6874 = vmax.xlane.f32.xlu1 %v6873_v14  ;;  %v6870_v45 = vsel %vm6833_vm4, %v13937_v37, -inf }
 0x9bc   : > { %6871 = vmax.xlane.f32.xlu0 %v6870_v45 }
 0x9bf   : > { %v6449_v27 = vpop.permute.xlu0 %6448 }
 0x9c0   : > { %v6444_v49 = vpop.permute.xlu1 %6443  ;;  %v13951_v43 = vsel %vm6310_vm2, %v6449_v27, %v13677_v34 }
 0x9c1   : > { %v13946_v22 = vsel %vm6310_vm2, %v6444_v49, %v13674_v17  ;;  %14892 = vst [vmem:[#allocation42_spill] sm:$0xff] %v13951_v43 }
 0x9c2   : > { %14891 = vst [vmem:[#allocation41_spill] sm:$0xff] %v13946_v22  ;;  %9897 = vmatprep.mubr.msk.f32.mxu1 %vm251_vm1, %v13946_v22 }
 0x9c3   : > { %9898 = vmatmul.mubr.msk.f32.gmra.mrb[138].mxu1 %vm251_vm1, %v13951_v43 }
 0x9d7   : > { %v9881_v40 = vpop.f32.mrb[126].mxu1 }
 0x9d8   : > { %v13958_v58 = vadd.f32 %v9881_v40, %v13842_v16  ;;  %v6744_v62 = vpop.f32.mrb[127].mxu1 }
 0x9d9   : > { %v13961_v32 = vadd.f32 %v13842_v16, %v6744_v62 }
 0x9da   : > { %14893 = vst [vmem:[#allocation43_spill] sm:$0xff] %v13958_v58  ;;  %v6879_v17 = vsel %vm6833_vm4, %v13958_v58, -inf }
 0x9db   : > { %14894 = vst [vmem:[#allocation44_spill] sm:$0xff] %v13961_v32  ;;  %6880 = vmax.xlane.f32.xlu1 %v6879_v17  ;;  %v6876_v34 = vsel %vm6833_vm4, %v13961_v32, -inf  ;;  %v6459_v55 = vpop.permute.xlu0 %6458 }
 0x9dc   : > { %6877 = vmax.xlane.f32.xlu0 %v6876_v34  ;;  %v6454_v48 = vpop.permute.xlu1 %6453  ;;  %v13975_v61 = vsel %vm6310_vm2, %v6459_v55, %v13705_v20 }
 0x9dd   : > { %v13970_v47 = vsel %vm6310_vm2, %v6454_v48, %v13700_v12  ;;  %14896 = vst [vmem:[#allocation46_spill] sm:$0xff] %v13975_v61 }
 0x9de   : > { %14895 = vst [vmem:[#allocation45_spill] sm:$0xff] %v13970_v47  ;;  %9900 = vmatprep.mubr.msk.f32.mxu1 %vm251_vm1, %v13970_v47 }
 0x9df   : > { %9901 = vmatmul.mubr.msk.f32.gmra.mrb[140].mxu1 %vm251_vm1, %v13975_v61 }
 0x9e2   : > { %v6469_v41 = vpop.permute.xlu0 %6468 }
 0x9e3   : > { %v6464_v53 = vpop.permute.xlu1 %6463  ;;  %v13989_v12 = vsel %vm6310_vm2, %v6469_v41, %v13717_v8 }
 0x9e4   : > { %v13984_v14 = vsel %vm6310_vm2, %v6464_v53, %v13714_v51  ;;  %14898 = vst [vmem:[#allocation48_spill] sm:$0xff] %v13989_v12  ;;  %vm7568_vm2 = vcmask 125954  }
 0x9e5   : > { %14897 = vst [vmem:[#allocation47_spill] sm:$0xff] %v13984_v14  ;;  %9903 = vmatprep.mubr.msk.f32.mxu1 %vm251_vm1, %v13984_v14 }
 0x9e6   : > { %9904 = vmatmul.mubr.msk.f32.gmra.mrb[142].mxu1 %vm251_vm1, %v13989_v12 }
 0x9f6   : > { %v9884_v20 = vpop.f32.mrb[128].mxu1 }
 0x9f7   : > { %v13996_v45 = vadd.f32 %v9884_v20, %v13842_v16  ;;  %v6754_v27 = vpop.f32.mrb[129].mxu1 }
 0x9f8   : > { %v13999_v49 = vadd.f32 %v13842_v16, %v6754_v27 }
 0x9f9   : > { %v6885_v51 = vsel %vm6833_vm4, %v13996_v45, -inf }
 0x9fa   : > { %6886 = vmax.xlane.f32.xlu1 %v6885_v51  ;;  %v6882_v31 = vsel %vm6833_vm4, %v13999_v49, -inf }
 0x9fb   : > { %6883 = vmax.xlane.f32.xlu0 %v6882_v31 }
 0xa0f   : > { %v6839_v10 = vpop.xlane.xlu0 %6838 }
 0xa16   : > { %v9887_v8 = vpop.f32.mrb[130].mxu1 }
 0xa17   : > { %v14006_v40 = vadd.f32 %v9887_v8, %v13842_v16  ;;  %v6764_v62 = vpop.f32.mrb[131].mxu1 }
 0xa18   : > { %v14009_v17 = vadd.f32 %v13842_v16, %v6764_v62 }
 0xa19   : > { %v6891_v34 = vsel %vm6833_vm4, %v14006_v40, -inf }
 0xa1a   : > { %6892 = vmax.xlane.f32.xlu1 %v6891_v34  ;;  %v6888_v55 = vsel %vm6833_vm4, %v14009_v17, -inf }
 0xa1b   : > { %6889 = vmax.xlane.f32.xlu0 %v6888_v55 }
 0xa36   : > { %v9890_v48 = vpop.f32.mrb[132].mxu1 }
 0xa37   : > { %v14016_v41 = vadd.f32 %v9890_v48, %v13842_v16  ;;  %v6774_v53 = vpop.f32.mrb[133].mxu1 }
 0xa38   : > { %v14019_v20 = vadd.f32 %v13842_v16, %v6774_v53 }
 0xa39   : > { %v6897_v27 = vsel %vm6833_vm4, %v14016_v41, -inf }
 0xa3a   : > { %6898 = vmax.xlane.f32.xlu1 %v6897_v27  ;;  %v6894_v51 = vsel %vm6833_vm4, %v14019_v20, -inf }
 0xa3b   : > { %6895 = vmax.xlane.f32.xlu0 %v6894_v51 }
 0xa56   : > { %v9893_v31 = vpop.f32.mrb[134].mxu1 }
 0xa57   : > { %v14026_v8 = vadd.f32 %v9893_v31, %v13842_v16  ;;  %v6784_v62 = vpop.f32.mrb[135].mxu1 }
 0xa58   : > { %v14029_v34 = vadd.f32 %v13842_v16, %v6784_v62 }
 0xa59   : > { %v6903_v55 = vsel %vm6833_vm4, %v14026_v8, -inf }
 0xa5a   : > { %6904 = vmax.xlane.f32.xlu1 %v6903_v55  ;;  %v6900_v48 = vsel %vm6833_vm4, %v14029_v34, -inf }
 0xa5b   : > { %6901 = vmax.xlane.f32.xlu0 %v6900_v48 }
 0xa76   : > { %v9896_v53 = vpop.f32.mrb[136].mxu1 }
 0xa77   : > { %v14036_v27 = vadd.f32 %v9896_v53, %v13842_v16  ;;  %v6794_v51 = vpop.f32.mrb[137].mxu1 }
 0xa78   : > { %v14039_v31 = vadd.f32 %v13842_v16, %v6794_v51 }
 0xa79   : > { %v6909_v62 = vsel %vm6833_vm4, %v14036_v27, -inf }
 0xa7a   : > { %6910 = vmax.xlane.f32.xlu1 %v6909_v62  ;;  %v6906_v14 = vsel %vm6833_vm4, %v14039_v31, -inf }
 0xa7b   : > { %6907 = vmax.xlane.f32.xlu0 %v6906_v14 }
 0xa96   : > { %v9899_v55 = vpop.f32.mrb[138].mxu1 }
 0xa97   : > { %v14046_v12 = vadd.f32 %v9899_v55, %v13842_v16  ;;  %v6804_v48 = vpop.f32.mrb[139].mxu1 }
 0xa98   : > { %v14049_v53 = vadd.f32 %v13842_v16, %v6804_v48 }
 0xa99   : > { %14899 = vst [vmem:[#allocation49_spill] sm:$0xff] %v14046_v12  ;;  %v6915_v51 = vsel %vm6833_vm4, %v14046_v12, -inf }
 0xa9a   : > { %14900 = vst [vmem:[#allocation50_spill] sm:$0xff] %v14049_v53  ;;  %6916 = vmax.xlane.f32.xlu1 %v6915_v51  ;;  %v6912_v47 = vsel %vm6833_vm4, %v14049_v53, -inf }
 0xa9b   : > { %6913 = vmax.xlane.f32.xlu0 %v6912_v47 }
 0xab2   : > { %v9902_v62 = vpop.f32.mrb[140].mxu1 }
 0xab3   : > { %v14056_v61 = vadd.f32 %v9902_v62, %v13842_v16  ;;  %v6814_v14 = vpop.f32.mrb[141].mxu1 }
 0xab4   : > { %v14059_v55 = vadd.f32 %v13842_v16, %v6814_v14 }
 0xab5   : > { %14901 = vst [vmem:[#allocation51_spill] sm:$0xff] %v14056_v61  ;;  %v6921_v48 = vsel %vm6833_vm4, %v14056_v61, -inf }
 0xab6   : > { %14902 = vst [vmem:[#allocation52_spill] sm:$0xff] %v14059_v55  ;;  %6922 = vmax.xlane.f32.xlu1 %v6921_v48  ;;  %v6918_v22 = vsel %vm6833_vm4, %v14059_v55, -inf  ;;  %v6836_v48 = vpop.xlane.xlu1 %6835 }
 0xab7   : > { %6919 = vmax.xlane.f32.xlu0 %v6918_v22  ;;  %v6842_v22 = vpop.xlane.xlu0 %6841 }
 0xab9   : > { %v9905_v51 = vpop.f32.mrb[142].mxu1 }
 0xaba   : > { %v14066_v43 = vadd.f32 %v9905_v51, %v13842_v16  ;;  %v6824_v47 = vpop.f32.mrb[143].mxu1  ;;  %v6845_v46 = vpop.xlane.xlu1 %6844 }
 0xabb   : > { %v14069_v62 = vadd.f32 %v13842_v16, %v6824_v47  ;;  %v6848_v35 = vpop.xlane.xlu0 %6847 }
 0xabc   : > { %14903 = vst [vmem:[#allocation53_spill] sm:$0xff] %v14066_v43  ;;  %v6927_v14 = vsel %vm6833_vm4, %v14066_v43, -inf  ;;  %v6930_v13 = vmax.f32 %v6836_v48, %v6848_v35 }
 0xabd   : > { %14904 = vst [vmem:[#allocation54_spill] sm:$0xff] %v14069_v62  ;;  %6928 = vmax.xlane.f32.xlu1 %v6927_v14  ;;  %v6924_v42 = vsel %vm6833_vm4, %v14069_v62, -inf  ;;  %v7064_v14 = vld [vmem:[%s14643_s2 + $0x8] sm:$0xff] }
 0xabe   : > { %6925 = vmax.xlane.f32.xlu0 %v6924_v42  ;;  %v6851_v1 = vpop.xlane.xlu1 %6850  ;;  %7238 = vmatprep.mubr.f32.mxu1 %v7064_v14 }
 0xabf   : > { %v6854_v3 = vpop.xlane.xlu0 %6853  ;;  %7163 = vmatprep.mubr.f32.mxu0 %v7064_v14  ;;  %v6931_v24 = vmax.f32 %v6839_v10, %v6851_v1 }
 0xac0   : > { %v6932_v2 = vmax.f32 %v6842_v22, %v6854_v3 }
 0xac2   : > { %v6857_v51 = vpop.xlane.xlu1 %6856 }
 0xac3   : > { %v6860_v0 = vpop.xlane.xlu0 %6859  ;;  %v6933_v5 = vmax.f32 %v6845_v46, %v6857_v51 }
 0xac4   : > { %v6934_v18 = vmax.f32 %v6930_v13, %v6860_v0 }
 0xac6   : > { %v6863_v23 = vpop.xlane.xlu1 %6862 }
 0xac7   : > { %v6866_v47 = vpop.xlane.xlu0 %6865  ;;  %v6935_v14 = vmax.f32 %v6931_v24, %v6863_v23 }
 0xac8   : > { %v6936_v62 = vmax.f32 %v6932_v2, %v6866_v47 }
 0xaca   : > { %v6869_v16 = vpop.xlane.xlu1 %6868 }
 0xacb   : > { %v6872_v42 = vpop.xlane.xlu0 %6871  ;;  %v6937_v43 = vmax.f32 %v6933_v5, %v6869_v16 }
 0xacc   : > { %v6938_v32 = vmax.f32 %v6934_v18, %v6872_v42 }
 0xace   : > { %v6875_v30 = vpop.xlane.xlu1 %6874 }
 0xacf   : > { %v6878_v9 = vpop.xlane.xlu0 %6877  ;;  %v6939_v58 = vmax.f32 %v6935_v14, %v6875_v30 }
 0xad0   : > { %v6940_v37 = vmax.f32 %v6936_v62, %v6878_v9 }
 0xad2   : > { %v6881_v60 = vpop.xlane.xlu1 %6880 }
 0xad3   : > { %v6884_v6 = vpop.xlane.xlu0 %6883  ;;  %v6941_v55 = vmax.f32 %v6937_v43, %v6881_v60 }
 0xad4   : > { %v6942_v59 = vmax.f32 %v6938_v32, %v6884_v6 }
 0xad6   : > { %v6887_v56 = vpop.xlane.xlu1 %6886 }
 0xad7   : > { %v6890_v19 = vpop.xlane.xlu0 %6889  ;;  %v6943_v25 = vmax.f32 %v6939_v58, %v6887_v56 }
 0xad8   : > { %v6944_v53 = vmax.f32 %v6940_v37, %v6890_v19 }
 0xada   : > { %v6893_v44 = vpop.xlane.xlu1 %6892 }
 0xadb   : > { %v6896_v11 = vpop.xlane.xlu0 %6895  ;;  %v6945_v12 = vmax.f32 %v6941_v55, %v6893_v44 }
 0xadc   : > { %v6946_v1 = vmax.f32 %v6942_v59, %v6896_v11 }
 0xade   : > { %v6899_v29 = vpop.xlane.xlu1 %6898 }
 0xadf   : > { %v6947_v35 = vmax.f32 %v6943_v25, %v6899_v29 }
 0xae7   : > { %v6905_v36 = vpop.xlane.xlu1 %6904 }
 0xae8   : > { %v6902_v7 = vpop.xlane.xlu0 %6901  ;;  %v6949_v46 = vmax.f32 %v6945_v12, %v6905_v36 }
 0xae9   : > { %v6948_v3 = vmax.f32 %v6944_v53, %v6902_v7 }
 0xb07   : > { %v6911_v57 = vpop.xlane.xlu1 %6910 }
 0xb08   : > { %v6908_v52 = vpop.xlane.xlu0 %6907  ;;  %v6951_v13 = vmax.f32 %v6947_v35, %v6911_v57 }
 0xb09   : > { %v6950_v24 = vmax.f32 %v6946_v1, %v6908_v52 }
 0xb27   : > { %v6917_v61 = vpop.xlane.xlu1 %6916 }
 0xb28   : > { %v6914_v63 = vpop.xlane.xlu0 %6913  ;;  %v6953_v5 = vmax.f32 %v6949_v46, %v6917_v61 }
 0xb29   : > { %v6952_v2 = vmax.f32 %v6948_v3, %v6914_v63 }
 0xb43   : > { %v6923_v10 = vpop.xlane.xlu1 %6922 }
 0xb44   : > { %v6920_v48 = vpop.xlane.xlu0 %6919  ;;  %v6955_v30 = vmax.f32 %v6951_v13, %v6923_v10 }
 0xb45   : > { %v6954_v18 = vmax.f32 %v6950_v24, %v6920_v48 }
 0xb47   : > { %v6958_v56 = vmax.f32 %v6954_v18, %v6955_v30 }
 0xb4a   : > { %v6929_v23 = vpop.xlane.xlu1 %6928 }
 0xb4b   : > { %v6957_v60 = vmax.f32 %v6953_v5, %v6929_v23  ;;  %v6926_v0 = vpop.xlane.xlu0 %6925 }
 0xb4c   : > { %v6956_v9 = vmax.f32 %v6952_v2, %v6926_v0 }
 0xb4e   : > { %v6959_v6 = vmax.f32 %v6956_v9, %v6957_v60 }
 0xb50   : > { %v6960_v44 = vmax.f32 %v6958_v56, %v6959_v6 }
 0xb52   : > { %v6961_v19 = vrot.slane %v6960_v44, 4 }
 0xb54   : > { %v6962_v29 = vmax.f32 %v6960_v44, %v6961_v19 }
 0xb56   : > { %v6963_v11 = vrot.slane %v6962_v29, 2 }
 0xb58   : > { %v6964_v25 = vmax.f32 %v6962_v29, %v6963_v11 }
 0xb5a   : > { %v6965_v36 = vrot.slane %v6964_v25, 1 }
 0xb5c   : > { %v14078_v59 = vmax.f32 %v6964_v25, %v6965_v36 }
 0xb5e   : > { %v6967_v52 = vsub.f32 %v13865_v21, %v14078_v59  ;;  %v6983_v57 = vsub.f32 %v13999_v49, %v14078_v59  ;;  %v6984_v7 = vsub.f32 %v13996_v45, %v14078_v59  ;;  %v6968_v63 = vsub.f32 %v13845_v39, %v14078_v59 }
 0xb5f   : > { %v6969_v61 = vsub.f32 %v13848_v4, %v14078_v59  ;;  %v6970_v12 = vsub.f32 %v13876_v15, %v14078_v59  ;;  %v6971_v53 = vsub.f32 %v13870_v33, %v14078_v59  ;;  %v6972_v55 = vsub.f32 %v13886_v54, %v14078_v59 }
 0xb60   : > { %v7031_v37 = vmul.f32 1.442695, %v6983_v57  ;;  %v7033_v43 = vmul.f32 1.442695, %v6984_v7  ;;  %v6999_v58 = vmul.f32 1.442695, %v6967_v52  ;;  %v6973_v62 = vsub.f32 %v13881_v38, %v14078_v59 }
 0xb61   : > { %v7001_v32 = vmul.f32 1.442695, %v6968_v63  ;;  %v7003_v22 = vmul.f32 1.442695, %v6969_v61  ;;  %v6974_v51 = vsub.f32 %v13896_v50, %v14078_v59  ;;  %v6985_v16 = vsub.f32 %v14009_v17, %v14078_v59  ;;  %v14905_v57 = vld [vmem:[#allocation50_spill] sm:$0xff]  ;;  %v14907_v61 = vld [vmem:[#allocation36_spill] sm:$0xff] }
 0xb62   : > { %10147 = vpow2.f32 %v7031_v37  ;;  %v7005_v47 = vmul.f32 1.442695, %v6970_v12  ;;  %v6986_v14 = vsub.f32 %v14006_v40, %v14078_v59  ;;  %v6987_v35 = vsub.f32 %v14019_v20, %v14078_v59  ;;  %v14906_v37 = vld [vmem:[#allocation49_spill] sm:$0xff] }
 0xb63   : > { %10149 = vpow2.f32 %v7033_v43  ;;  %v7007_v1 = vmul.f32 1.442695, %v6971_v53  ;;  %v6988_v46 = vsub.f32 %v14016_v41, %v14078_v59  ;;  %v6989_v48 = vsub.f32 %v14029_v34, %v14078_v59  ;;  %v14908_v53 = vld [vmem:[#allocation35_spill] sm:$0xff] }
 0xb64   : > { %10151 = vpow2.f32 %v6999_v58  ;;  %v7009_v3 = vmul.f32 1.442695, %v6972_v55  ;;  %v7011_v2 = vmul.f32 1.442695, %v6973_v62  ;;  %v7013_v23 = vmul.f32 1.442695, %v6974_v51 }
 0xb65   : > { %10153 = vpow2.f32 %v7001_v32  ;;  %v7035_v60 = vmul.f32 1.442695, %v6985_v16  ;;  %v7037_v44 = vmul.f32 1.442695, %v6986_v14  ;;  %v7039_v19 = vmul.f32 1.442695, %v6987_v35 }
 0xb66   : > { %10155 = vpow2.f32 %v7003_v22  ;;  %v7041_v11 = vmul.f32 1.442695, %v6988_v46  ;;  %v7043_v25 = vmul.f32 1.442695, %v6989_v48  ;;  %v6976_v36 = vsub.f32 %v13903_v26, %v14078_v59  ;;  %v14909_v51 = vld [vmem:[#allocation40_spill] sm:$0xff]  ;;  %v14912_v46 = vld [vmem:[#allocation51_spill] sm:$0xff] }
 0xb67   : > { %10157 = vpow2.f32 %v7005_v47  ;;  %v6993_v7 = vsub.f32 %v14905_v57, %v14078_v59  ;;  %v6994_v43 = vsub.f32 %v14906_v37, %v14078_v59  ;;  %v6977_v12 = vsub.f32 %v14907_v61, %v14078_v59  ;;  %v14910_v47 = vld [vmem:[#allocation39_spill] sm:$0xff] }
 0xb68   : > { %10159 = vpow2.f32 %v7007_v1  ;;  %v6978_v55 = vsub.f32 %v14908_v53, %v14078_v59  ;;  %v6979_v16 = vsub.f32 %v14909_v51, %v14078_v59  ;;  %v7017_v14 = vmul.f32 1.442695, %v6976_v36  ;;  %v14911_v1 = vld [vmem:[#allocation52_spill] sm:$0xff] }
 0xb69   : > { %10161 = vpow2.f32 %v7009_v3  ;;  %v6996_v48 = vsub.f32 %v14912_v46, %v14078_v59  ;;  %v7051_v3 = vmul.f32 1.442695, %v6993_v7 }
 0xb6a   : > { %10163 = vpow2.f32 %v7011_v2  ;;  %v7053_v2 = vmul.f32 1.442695, %v6994_v43 }
 0xb6b   : > { %10165 = vpow2.f32 %v7013_v23 }
 0xb6c   : > { %v10148_v42 = vpop.eup %10147  ;;  %10167 = vpow2.f32 %v7035_v60  ;;  %v14915_v60 = vld [vmem:[#allocation54_spill] sm:$0xff] }
 0xb6d   : > { %v10150_v10 = vpop.eup %10149  ;;  %v7083_v13 = vmul.f32 %v10148_v42, %v13999_v49  ;;  %v6990_v49 = vsub.f32 %v14026_v8, %v14078_v59  ;;  %10169 = vpow2.f32 %v7037_v44  ;;  %v7021_v44 = vmul.f32 1.442695, %v6978_v55 }
 0xb6e   : > { %v10152_v24 = vpop.eup %10151  ;;  %v10020_v5 = vpack.c.bf16 %v10150_v10, %v10148_v42  ;;  %v7084_v30 = vmul.f32 %v10150_v10, %v13996_v45  ;;  %v6991_v45 = vsub.f32 %v14039_v31, %v14078_v59  ;;  %10171 = vpow2.f32 %v7039_v19 }
 0xb6f   : > { %v10154_v18 = vpop.eup %10153  ;;  %v7067_v0 = vmul.f32 %v10152_v24, %v13865_v21  ;;  %v6992_v21 = vsub.f32 %v14036_v27, %v14078_v59  ;;  %v7045_v52 = vmul.f32 1.442695, %v6990_v49  ;;  %10173 = vpow2.f32 %v7041_v11 }
 0xb70   : > { %10021 = vmatprep.subr.bf16.mxu1 %v10020_v5  ;;  %v10022_v9 = vpack.c.bf16 %v10154_v18, %v10152_v24  ;;  %v7068_v56 = vmul.f32 %v10154_v18, %v13845_v39  ;;  %v9988_v6 = vpack.c.bf16 %v7084_v30, %v7083_v13  ;;  %v6975_v39 = vsub.f32 %v13891_v28, %v14078_v59  ;;  %v10156_v32 = vpop.eup %10155  ;;  %v14913_v24 = vld [vmem:[#allocation44_spill] sm:$0xff]  ;;  %v14914_v18 = vld [vmem:[#allocation43_spill] sm:$0xff] }
 0xb71   : > { %v7047_v63 = vmul.f32 1.442695, %v6991_v45  ;;  %v7049_v58 = vmul.f32 1.442695, %v6992_v21  ;;  %10175 = vpow2.f32 %v7043_v25  ;;  %v10158_v22 = vpop.eup %10157  ;;  %v6980_v42 = vsub.f32 %v14910_v47, %v14078_v59 }
 0xb72   : > { %10023 = vmatpush3.bf16.msra.mxu1 %v10022_v9  ;;  %9989 = vmatprep.subr.bf16.mxu0 %v9988_v6  ;;  %v9990_v29 = vpack.c.bf16 %v7068_v56, %v7067_v0  ;;  %v7015_v62 = vmul.f32 1.442695, %v6975_v39  ;;  %10177 = vpow2.f32 %v7045_v52  ;;  %v14136_v35 = vpop.eup %10159  ;;  %v6995_v10 = vsub.f32 %v14911_v1, %v14078_v59  ;;  %v14916_v6 = vld [vmem:[#allocation53_spill] sm:$0xff] }
 0xb73   : > { %10179 = vpow2.f32 %v7047_v63  ;;  %v14142_v13 = vpop.eup %10161  ;;  %v6981_v5 = vsub.f32 %v14913_v24, %v14078_v59  ;;  %v6982_v23 = vsub.f32 %v14914_v18, %v14078_v59  ;;  %v6997_v0 = vsub.f32 %v14915_v60, %v14078_v59 }
 0xb74   : > { %9991 = vmatpush3.bf16.msra.mxu0 %v9990_v29  ;;  %10181 = vpow2.f32 %v7049_v58  ;;  %v14146_v30 = vpop.eup %10163  ;;  %v7019_v9 = vmul.f32 1.442695, %v6977_v12  ;;  %v6998_v49 = vsub.f32 %v14916_v6, %v14078_v59  ;;  %v7023_v45 = vmul.f32 1.442695, %v6979_v16 }
 0xb75   : > { %10183 = vpow2.f32 %v7015_v62  ;;  %v14152_v56 = vpop.eup %10165  ;;  %v7025_v29 = vmul.f32 1.442695, %v6980_v42  ;;  %v7055_v21 = vmul.f32 1.442695, %v6995_v10  ;;  %v7057_v11 = vmul.f32 1.442695, %v6996_v48 }
 0xb76   : > { %10185 = vpow2.f32 %v7017_v14  ;;  %v10168_v19 = vpop.eup %10167  ;;  %v7069_v25 = vmul.f32 %v10156_v32, %v13848_v4  ;;  %v7070_v36 = vmul.f32 %v10158_v22, %v13876_v15  ;;  %v7059_v63 = vmul.f32 1.442695, %v6997_v0 }
 0xb77   : > { %10187 = vpow2.f32 %v7051_v3  ;;  %v10170_v39 = vpop.eup %10169  ;;  %v7085_v52 = vmul.f32 %v10168_v19, %v14009_v17  ;;  %v7061_v12 = vmul.f32 1.442695, %v6998_v49  ;;  %v10026_v62 = vpack.c.bf16 %v10158_v22, %v10156_v32 }
 0xb78   : > { %10189 = vpow2.f32 %v7053_v2  ;;  %v10172_v7 = vpop.eup %10171  ;;  %v7086_v59 = vmul.f32 %v10170_v39, %v14006_v40  ;;  %v10024_v43 = vpack.c.bf16 %v10170_v39, %v10168_v19  ;;  %v7071_v14 = vmul.f32 %v14136_v35, %v13870_v33 }
 0xb79   : > { %10191 = vpow2.f32 %v7019_v9  ;;  %v10174_v58 = vpop.eup %10173  ;;  %v7087_v55 = vmul.f32 %v10172_v7, %v14019_v20  ;;  %v7072_v40 = vmul.f32 %v14142_v13, %v13886_v54  ;;  %v9994_v10 = vpack.c.bf16 %v7070_v36, %v7069_v25 }
 0xb7a   : > { %10193 = vpow2.f32 %v7021_v44  ;;  %v7088_v4 = vmul.f32 %v10174_v58, %v14016_v41  ;;  %10025 = vmatprep.subr.bf16.mxu1 %v10024_v43  ;;  %v9992_v15 = vpack.c.bf16 %v7086_v59, %v7085_v52  ;;  %v10028_v42 = vpack.c.bf16 %v10174_v58, %v10172_v7 }
 0xb7b   : > { %v10176_v16 = vpop.eup %10175  ;;  %10195 = vpow2.f32 %v7055_v21  ;;  %10027 = vmatpush3.bf16.msra.mxu1 %v10026_v62  ;;  %v7027_v3 = vmul.f32 1.442695, %v6981_v5  ;;  %v10030_v33 = vpack.c.bf16 %v14142_v13, %v14136_v35  ;;  %v7029_v54 = vmul.f32 1.442695, %v6982_v23 }
 0xb7c   : > { %v10178_v17 = vpop.eup %10177  ;;  %10197 = vpow2.f32 %v7057_v11  ;;  %v7089_v20 = vmul.f32 %v10176_v16, %v14029_v34  ;;  %9993 = vmatprep.subr.bf16.mxu0 %v9992_v15  ;;  %10029 = vmatprep.subr.bf16.mxu1 %v10028_v42  ;;  %v9996_v41 = vpack.c.bf16 %v7088_v4, %v7087_v55  ;;  %v7074_v34 = vmul.f32 %v14152_v56, %v13896_v50 }
 0xb7d   : > { %v10180_v48 = vpop.eup %10179  ;;  %10199 = vpow2.f32 %v7023_v45  ;;  %v7090_v32 = vmul.f32 %v10178_v17, %v14026_v8  ;;  %9995 = vmatpush3.bf16.msra.mxu0 %v9994_v10  ;;  %v10032_v0 = vpack.c.bf16 %v10178_v17, %v10176_v16  ;;  %v7073_v8 = vmul.f32 %v14146_v30, %v13881_v38 }
 0xb7e   : > { %v10182_v22 = vpop.eup %10181  ;;  %10201 = vpow2.f32 %v7025_v29  ;;  %9997 = vmatprep.subr.bf16.mxu0 %v9996_v41  ;;  %v9998_v49 = vpack.c.bf16 %v7072_v40, %v7071_v14  ;;  %v7091_v44 = vmul.f32 %v10180_v48, %v14039_v31  ;;  %v10034_v45 = vpack.c.bf16 %v14152_v56, %v14146_v30 }
 0xb7f   : > { %v10184_v2 = vpop.eup %10183  ;;  %10203 = vpow2.f32 %v7059_v63  ;;  %10031 = vmatpush3.bf16.msra.mxu1 %v10030_v33  ;;  %v7092_v35 = vmul.f32 %v10182_v22, %v14036_v27  ;;  %v10000_v13 = vpack.c.bf16 %v7090_v32, %v7089_v20  ;;  %v10036_v38 = vpack.c.bf16 %v10182_v22, %v10180_v48  ;;  %v7066_v48 = vld [vmem:[%s14643_s2 + $0x18] sm:$0xff] }
 0xb80   : > { %v10186_v9 = vpop.eup %10185  ;;  %10205 = vpow2.f32 %v7061_v12  ;;  %10033 = vmatprep.subr.bf16.mxu1 %v10032_v0  ;;  %v7075_v29 = vmul.f32 %v10184_v2, %v13891_v28  ;;  %v10002_v31 = vpack.c.bf16 %v7074_v34, %v7073_v8 }
 0xb81   : > { %v10188_v5 = vpop.eup %10187  ;;  %10207 = vpow2.f32 %v7027_v3  ;;  %9999 = vmatpush3.bf16.msra.mxu0 %v9998_v49  ;;  %v7076_v21 = vmul.f32 %v10186_v9, %v13903_v26  ;;  %v10004_v25 = vpack.c.bf16 %v7092_v35, %v7091_v44  ;;  %v10038_v30 = vpack.c.bf16 %v10186_v9, %v10184_v2 }
 0xb82   : > { %v10190_v23 = vpop.eup %10189  ;;  %10209 = vpow2.f32 %v7029_v54  ;;  %10001 = vmatprep.subr.bf16.mxu0 %v10000_v13  ;;  %v7093_v11 = vmul.f32 %v10188_v5, %v14905_v57 }
 0xb83   : > { %v10192_v19 = vpop.eup %10191  ;;  %10035 = vmatpush3.bf16.msra.mxu1 %v10034_v45  ;;  %v7094_v39 = vmul.f32 %v10190_v23, %v14906_v37  ;;  %v10040_v52 = vpack.c.bf16 %v10190_v23, %v10188_v5  ;;  %v10006_v63 = vpack.c.bf16 %v7076_v21, %v7075_v29 }
 0xb84   : > { %v10194_v50 = vpop.eup %10193  ;;  %10037 = vmatprep.subr.bf16.mxu1 %v10036_v38  ;;  %v7077_v28 = vmul.f32 %v10192_v19, %v14907_v61 }
 0xb85   : > { %v10196_v27 = vpop.eup %10195  ;;  %10003 = vmatpush3.bf16.msra.mxu0 %v10002_v31  ;;  %v7078_v26 = vmul.f32 %v10194_v50, %v14908_v53  ;;  %v10008_v43 = vpack.c.bf16 %v7094_v39, %v7093_v11  ;;  %v10042_v12 = vpack.c.bf16 %v10194_v50, %v10192_v19 }
 0xb86   : > { %v10198_v36 = vpop.eup %10197  ;;  %10005 = vmatprep.subr.bf16.mxu0 %v10004_v25  ;;  %v7095_v57 = vmul.f32 %v10196_v27, %v14911_v1 }
 0xb87   : > { %v10200_v56 = vpop.eup %10199  ;;  %10039 = vmatpush3.bf16.msra.mxu1 %v10038_v30  ;;  %v7096_v37 = vmul.f32 %v10198_v36, %v14912_v46  ;;  %v10044_v55 = vpack.c.bf16 %v10198_v36, %v10196_v27  ;;  %v10010_v53 = vpack.c.bf16 %v7078_v26, %v7077_v28 }
 0xb88   : > { %v10202_v7 = vpop.eup %10201  ;;  %10041 = vmatprep.subr.bf16.mxu1 %v10040_v52  ;;  %v7079_v16 = vmul.f32 %v10200_v56, %v14909_v51 }
 0xb89   : > { %v10204_v59 = vpop.eup %10203  ;;  %10007 = vmatpush3.bf16.msra.mxu0 %v10006_v63  ;;  %v7080_v61 = vmul.f32 %v10202_v7, %v14910_v47  ;;  %v10012_v46 = vpack.c.bf16 %v7096_v37, %v7095_v57  ;;  %v10046_v42 = vpack.c.bf16 %v10202_v7, %v10200_v56 }
 0xb8a   : > { %v10206_v58 = vpop.eup %10205  ;;  %10009 = vmatprep.subr.bf16.mxu0 %v10008_v43  ;;  %v7097_v15 = vmul.f32 %v10204_v59, %v14915_v60 }
 0xb8b   : > { %v10208_v62 = vpop.eup %10207  ;;  %10043 = vmatpush3.bf16.msra.mxu1 %v10042_v12  ;;  %v7098_v1 = vmul.f32 %v10206_v58, %v14916_v6  ;;  %v10048_v17 = vpack.c.bf16 %v10206_v58, %v10204_v59  ;;  %v10014_v51 = vpack.c.bf16 %v7080_v61, %v7079_v16  ;;  %v7063_v6 = vld [vmem:[%s14643_s2] sm:$0xff]  ;;  %v10438_v12 = vmov 0.0|0.0  }
 0xb8c   : > { %v10210_v4 = vpop.eup %10209  ;;  %10045 = vmatprep.subr.bf16.mxu1 %v10044_v55  ;;  %v7081_v14 = vmul.f32 %v10208_v62, %v14913_v24  ;;  %v7065_v24 = vld [vmem:[%s14643_s2 + $0x10] sm:$0xff] }
 0xb8d   : > { %10011 = vmatpush3.bf16.msra.mxu0 %v10010_v53  ;;  %v7082_v40 = vmul.f32 %v10210_v4, %v14914_v18  ;;  %v10016_v47 = vpack.c.bf16 %v7098_v1, %v7097_v15  ;;  %v10050_v10 = vpack.c.bf16 %v10210_v4, %v10208_v62  ;;  %v10436_v18 = vmov 0.0   ;;  %v7463_v55 = vld [vmem:[%s14642_s1 + $0x110] sm:$0xff]  ;;  %v7464_v62 = vld [vmem:[%s14642_s1 + $0x118] sm:$0xff]  ;;  %v7465_v4 = vld [vmem:[%s14642_s1 + $0x120] sm:$0xff] }
 0xb8e   : > { %10013 = vmatprep.subr.bf16.mxu0 %v10012_v46  ;;  %7254 = vst.msk [vmem:[#allocation4] sm:$0x3f] %vm7253_vm5, %v10436_v18  ;;  %7255 = vst.msk [vmem:[#allocation4 + $0x8] sm:$0x3f] %vm7253_vm5, %v10436_v18  ;;  %v10053_v61 = vpack.c.bf16 %v7464_v62, %v7463_v55  ;;  %v7466_v15 = vld [vmem:[%s14642_s1 + $0x128] sm:$0xff] }
 0xb8f   : > { %10047 = vmatpush3.bf16.msra.mxu1 %v10046_v42  ;;  %v10018_v60 = vpack.c.bf16 %v7082_v40, %v7081_v14  ;;  %7256 = vst.msk [vmem:[#allocation4 + $0x10] sm:$0x3f] %vm7253_vm5, %v10436_v18  ;;  %7257 = vst.msk [vmem:[#allocation4 + $0x18] sm:$0x3f] %vm7253_vm5, %v10436_v18  ;;  %v10056_v1 = vpack.c.bf16 %v7466_v15, %v7465_v4  ;;  %v7468_v14 = vld [vmem:[%s14642_s1 + $0x138] sm:$0xff] }
 0xb90   : > { %10049 = vmatprep.subr.bf16.mxu1 %v10048_v17  ;;  %7258 = vst.msk [vmem:[#allocation4 + $0x20] sm:$0x3f] %vm7253_vm5, %v10436_v18  ;;  %v7467_v17 = vld [vmem:[%s14642_s1 + $0x130] sm:$0xff] }
 0xb91   : > { %10015 = vmatpush3.bf16.msra.mxu0 %v10014_v51  ;;  %7560 = vst.msk [vmem:[#allocation6] sm:$0xf] %vm7261_vm6, %v10436_v18  ;;  %7561 = vst.msk [vmem:[#allocation6 + $0x4] sm:$0xf] %vm7261_vm6, %v10436_v18  ;;  %v10059_v40 = vpack.c.bf16 %v7468_v14, %v7467_v17 }
 0xb92   : > { %10017 = vmatprep.subr.bf16.mxu0 %v10016_v47  ;;  %7562 = vst.msk [vmem:[#allocation6 + $0x8] sm:$0xf] %vm7261_vm6, %v10436_v18  ;;  %7563 = vst.msk [vmem:[#allocation6 + $0xc] sm:$0xf] %vm7261_vm6, %v10436_v18 }
 0xb93   : > { %10051 = vmatpush3.bf16.msra.mxu1 %v10050_v10 }
 0xb94   : > { %10079 = vmatprep.subr.bf16.mxu1 %v10438_v12 }
 0xb95   : > { %10019 = vmatpush3.bf16.msra.mxu0 %v10018_v60  ;;  %v7326_v20 = vld [vmem:[#allocation4 + $0x3] sm:$0x1]  ;;  %v7280_v32 = vld [vmem:[#allocation4 + $0x2] sm:$0x1]  ;;  %v7273_v41 = vld [vmem:[#allocation4 + $0x1] sm:$0x1] }
 0xb96   : > { %7239 = vmatmul.mubr.f32.vlgmr.msra.gmra.mrb[144].mxu1 %v7063_v6  ;;  %7328 = vrot.lane.b32.xlu1 %v7326_v20, %s10428_s18  ;;  %v7287_v22 = vld [vmem:[#allocation4 + $0x8] sm:$0x1]  ;;  %v7332_v3 = vld [vmem:[#allocation4 + $0x4] sm:$0x1]  ;;  %v7384_v33 = vld [vmem:[#allocation4 + $0x18] sm:$0x1] }
 0xb97   : > { %7243 = vmatprep.mubr.f32.mxu1 %v7066_v48  ;;  %7275 = vrot.lane.b32.xlu0 %v7273_v41, %s10428_s18  ;;  %v7308_v2 = vld [vmem:[#allocation4 + $0x10] sm:$0x1]  ;;  %v7402_v54 = vld [vmem:[#allocation4 + $0x20] sm:$0x1]  ;;  %v7324_v0 = vld [vmem:[#allocation4 + $0x2] sm:$0x1] }
 0xb98   : > { %7164 = vmatmul.mubr.f32.vlgmr.msra.gmra.mrb[112].mxu0 %v7063_v6  ;;  %v7270_v9 = vld [vmem:[#allocation4] sm:$0x1]  ;;  %7325 = vst.msk [vmem:[#allocation5 + $0x1] sm:$0x1] %vm7271_vm7, %v7324_v0  ;;  %v7370_v58 = vld [vmem:[#allocation4 + $0x10] sm:$0x1]  ;;  %10052 = vmatprep.subr.bf16.mxu0 %v10438_v12 }
 0xb99   : > { %7168 = vmatprep.mubr.f32.mxu0 %v7066_v48  ;;  %7272 = vst.msk [vmem:[#allocation5] sm:$0x1] %vm7271_vm7, %v7270_v9  ;;  %7371 = vst.msk [vmem:[#allocation5 + $0x2] sm:$0x1] %vm7271_vm7, %v7370_v58  ;;  %10054 = vmatpush1.bf16.msra.mxu0 %v10053_v61  ;;  %v7469_v60 = vld [vmem:[%s14642_s1 + $0x140] sm:$0xff]  ;;  %v7470_v6 = vld [vmem:[%s14642_s1 + $0x148] sm:$0xff] }
 0xb9a   : > { %7244 = vmatmul.mubr.f32.gmra.mrb[146].mxu1 %v7065_v24  ;;  %7282 = vrot.lane.b32.xlu1 %v7280_v32, %s10429_s21  ;;  %v10062_v48 = vpack.c.bf16 %v7470_v6, %v7469_v60  ;;  %v7471_v20 = vld [vmem:[%s14642_s1 + $0x150] sm:$0xff]  ;;  %v7472_v32 = vld [vmem:[%s14642_s1 + $0x158] sm:$0xff]  ;;  %v7616_v60 = vld [vmem:[#allocation6 + $0x1] sm:$0x1] }
 0xb9b   : > { %7334 = vrot.lane.b32.xlu0 %v7332_v3, %s10429_s21  ;;  %10055 = vmatprep.subr.bf16.mxu0 %v10438_v12  ;;  %v10065_v41 = vpack.c.bf16 %v7472_v32, %v7471_v20  ;;  %v7475_v9 = vld [vmem:[%s14642_s1 + $0x170] sm:$0xff]  ;;  %7617 = vst.msk [vmem:[#allocation7 + $0x1] sm:$0x1] %vm7271_vm7, %v7616_v60 }
 0xb9c   : > { %7169 = vmatmul.mubr.f32.gmra.mrb[114].mxu0 %v7065_v24 }
 0xb9d   : > { %10057 = vmatpush1.bf16.msra.mxu0 %v10056_v1 }
 0xb9e   : > { %7289 = vrot.lane.b32.xlu1 %v7287_v22, %s10432_s24  ;;  %10058 = vmatprep.subr.bf16.mxu0 %v10438_v12 }
 0xba1   : > { %10060 = vmatpush1.bf16.msra.mxu0 %v10059_v40  ;;  %v7735_v40 = vld [vmem:[#allocation6 + $0xb] sm:$0x1] }
 0xba2   : > { %7386 = vrot.lane.b32.xlu1 %v7384_v33, %s10432_s24  ;;  %10061 = vmatprep.subr.bf16.mxu0 %v10438_v12  ;;  %v7473_v33 = vld [vmem:[%s14642_s1 + $0x160] sm:$0xff] }
 0xba5   : > { %10063 = vmatpush1.bf16.msra.mxu0 %v10062_v48  ;;  %v7570_v48 = vld [vmem:[#allocation6] sm:$0x1] }
 0xba6   : > { %7310 = vrot.lane.b32.xlu1 %v7308_v2, %s10437_s25  ;;  %10064 = vmatprep.subr.bf16.mxu0 %v10438_v12  ;;  %v7474_v2 = vld [vmem:[%s14642_s1 + $0x168] sm:$0xff]  ;;  %7571 = vst.msk [vmem:[#allocation7] sm:$0x1] %vm7271_vm7, %v7570_v48 }
 0xba9   : > { %10066 = vmatpush1.bf16.msra.mxu0 %v10065_v41  ;;  %v9011_v41 = vld [vmem:[%s14642_s1 + $0x1a0] ss:$0 sm:$0xff] }
 0xbaa   : > { %7404 = vrot.lane.b32.xlu1 %v7402_v54, %s10437_s25  ;;  %10067 = vmatprep.subr.bf16.mxu0 %v10438_v12  ;;  %v10068_v54 = vpack.c.bf16 %v7474_v2, %v7473_v33 }
 0xbad   : > { %10069 = vmatpush1.bf16.msra.mxu0 %v10068_v54  ;;  %v7756_v54 = vld [vmem:[%s14642_s1 + $0x1a8] sm:$0xff] }
 0xbae   : > { %10070 = vmatprep.subr.bf16.mxu0 %v10438_v12 }
 0xc08   : > { %v7329_v35 = vpop.permute.xlu1 %7328 }
 0xc09   : > { %7331 = vst.msk [vmem:[#allocation5 + $0x1] sm:$0x1] %vm7278_vm8, %v7329_v35  ;;  %v7276_v31 = vpop.permute.xlu0 %7275 }
 0xc0a   : > { %7279 = vst.msk [vmem:[#allocation5] sm:$0x1] %vm7278_vm8, %v7276_v31  ;;  %v7584_v31 = vld [vmem:[#allocation6 + $0x4] sm:$0x1] }
 0xc0c   : > { %v7283_v29 = vpop.permute.xlu1 %7282 }
 0xc0d   : > { %7286 = vst.msk [vmem:[#allocation5] sm:$0x1] %vm7285_vm9, %v7283_v29  ;;  %v7335_v25 = vpop.permute.xlu0 %7334  ;;  %v7578_v29 = vld [vmem:[#allocation6 + $0x2] sm:$0x1] }
 0xc0e   : > { %7337 = vst.msk [vmem:[#allocation5 + $0x1] sm:$0x1] %vm7285_vm9, %v7335_v25  ;;  %v7642_v25 = vld [vmem:[#allocation6 + $0x7] sm:$0x1] }
 0xc10   : > { %v7290_v27 = vpop.permute.xlu1 %7289 }
 0xc11   : > { %7293 = vst.msk [vmem:[#allocation5] sm:$0x1] %vm7292_vm10, %v7290_v27  ;;  %v7624_v27 = vld [vmem:[#allocation6 + $0x3] sm:$0x1] }
 0xc69   : > { %v9435_v8 = vpop.f32.mrb[144].mxu1 }
 0xc6a   : > { %v9436_v34 = vpop.f32.mrb[145].mxu1 }
 0xc6b   : > { %v9437_v49 = vadd.f32 %v9436_v34, %v9435_v8  ;;  %v9397_v5 = vpop.f32.mrb[112].mxu0  ;;  %v7476_v8 = vld [vmem:[%s14642_s1 + $0x178] sm:$0xff] }
 0xc6c   : > { %v9398_v44 = vpop.f32.mrb[113].mxu0  ;;  %v10071_v34 = vpack.c.bf16 %v7476_v8, %v7475_v9  ;;  %v7758_v8 = vld [vmem:[%s14642_s1 + $0x1b8] sm:$0xff] }
 0xc6d   : > { %10211 = vrcp.f32 %v9437_v49  ;;  %v9399_v13 = vadd.f32 %v9398_v44, %v9397_v5  ;;  %v9438_v23 = vpop.f32.mrb[146].mxu1  ;;  %v7477_v49 = vld [vmem:[%s14642_s1 + $0x180] sm:$0xff]  ;;  %v7478_v5 = vld [vmem:[%s14642_s1 + $0x188] sm:$0xff] }
 0xc6e   : > { %v9439_v45 = vpop.f32.mrb[147].mxu1  ;;  %10072 = vmatpush1.bf16.msra.mxu0 %v10071_v34  ;;  %v10074_v35 = vpack.c.bf16 %v7478_v5, %v7477_v49  ;;  %v7759_v34 = vld [vmem:[%s14642_s1 + $0x1c0] sm:$0xff]  ;;  %v14917_v5 = vld [vmem:[#allocation28_spill] sm:$0xff] }
 0xc6f   : > { %v9440_v19 = vadd.f32 %v9439_v45, %v9438_v23  ;;  %v9400_v38 = vpop.f32.mrb[114].mxu0  ;;  %10073 = vmatprep.subr.bf16.mxu0 %v10438_v12  ;;  %v7480_v23 = vld [vmem:[%s14642_s1 + $0x198] sm:$0xff]  ;;  %v10083_v49 = vpack.c.bf16 %v7759_v34, %v7758_v8 }
 0xc70   : > { %v9401_v50 = vpop.f32.mrb[115].mxu0 }
 0xc71   : > { %10213 = vrcp.f32 %v9440_v19  ;;  %v9402_v21 = vadd.f32 %v9401_v50, %v9400_v38  ;;  %v7572_v38 = vld [vmem:[#allocation6 + $0x1] sm:$0x1] }
 0xc72   : > { %10075 = vmatpush1.bf16.msra.mxu0 %v10074_v35  ;;  %v14918_v35 = vld [vmem:[#allocation29_spill] sm:$0xff] }
 0xc73   : > { %10076 = vmatprep.subr.bf16.mxu0 %v10438_v12 }
 0xc77   : > { %v10212_v11 = vpop.eup %10211 }
 0xc78   : > { %v7250_v39 = vmul.f32 %v10212_v11, %v9399_v13  ;;  %v7479_v13 = vld [vmem:[%s14642_s1 + $0x190] sm:$0xff] }
 0xc79   : > { %v10077_v19 = vpack.c.bf16 %v7480_v23, %v7479_v13  ;;  %v7676_v11 = vld [vmem:[#allocation6 + $0x8] sm:$0x1]  ;;  %v9049_v13 = vmul.f32 -1.442695, %v14918_v35 }
 0xc7a   : > { %7262 = vst.msk [vmem:[#allocation4 + $0x9] sm:$0xf] %vm7261_vm6, %v7250_v39 }
 0xc7b   : > { %7265 = vst.msk [vmem:[#allocation4 + $0xd] sm:$0xf0] %vm7264_vm11, %v7250_v39  ;;  %v10214_v36 = vpop.eup %10213  ;;  %10078 = vmatpush1.bf16.msra.mxu0 %v10077_v19  ;;  %v7717_v39 = vld [vmem:[#allocation6 + $0x7] sm:$0x1] }
 0xc7c   : > { %v7252_v30 = vmul.f32 %v10214_v36, %v9402_v21  ;;  %v7618_v21 = vld [vmem:[#allocation6 + $0x2] sm:$0x1]  ;;  %v7387_v36 = vpop.permute.xlu1 %7386 }
 0xc7e   : > { %7267 = vst.msk [vmem:[#allocation4 + $0x19] sm:$0xf] %vm7261_vm6, %v7252_v30 }
 0xc7f   : > { %7269 = vst.msk [vmem:[#allocation4 + $0x1d] sm:$0xf0] %vm7264_vm11, %v7252_v30 }
 0xc80   : > { %v7311_v30 = vpop.permute.xlu1 %7310 }
 0xc81   : > { %v7338_v37 = vld [vmem:[#allocation4 + $0xa] sm:$0x1]  ;;  %v7294_v16 = vld [vmem:[#allocation4 + $0x9] sm:$0x1]  ;;  %v7344_v53 = vld [vmem:[#allocation4 + $0xb] sm:$0x1] }
 0xc82   : > { %v7322_v56 = vld [vmem:[#allocation4 + $0x12] sm:$0x1]  ;;  %v7368_v52 = vld [vmem:[#allocation4 + $0x14] sm:$0x1]  ;;  %v7418_v7 = vld [vmem:[#allocation4 + $0x13] sm:$0x1] }
 0xc83   : > { %7420 = vrot.lane.b32.xlu0 %v7418_v7, %s10428_s18  ;;  %7323 = vst.msk [vmem:[#allocation5 + $0x4] sm:$0x1] %vm7271_vm7, %v7322_v56  ;;  %7369 = vst.msk [vmem:[#allocation5 + $0x5] sm:$0x1] %vm7271_vm7, %v7368_v52  ;;  %v7372_v28 = vld [vmem:[#allocation4 + $0x11] sm:$0x1] }
 0xc84   : > { %7374 = vrot.lane.b32.xlu1 %v7372_v28, %s10428_s18  ;;  %v7424_v26 = vld [vmem:[#allocation4 + $0x14] sm:$0x1]  ;;  %v7378_v57 = vld [vmem:[#allocation4 + $0x12] sm:$0x1]  ;;  %v7301_v46 = vld [vmem:[#allocation4 + $0xa] sm:$0x1]  ;;  %v7405_v56 = vpop.permute.xlu1 %7404 }
 0xc85   : > { %v7416_v43 = vld [vmem:[#allocation4 + $0x12] sm:$0x1]  ;;  %v7350_v42 = vld [vmem:[#allocation4 + $0xc] sm:$0x1]  ;;  %v7315_v51 = vld [vmem:[#allocation4 + $0x11] sm:$0x1] }
 0xc86   : > { %v7414_v63 = vld [vmem:[#allocation4 + $0x22] sm:$0x1]  ;;  %v7460_v59 = vld [vmem:[#allocation4 + $0x24] sm:$0x1]  ;;  %7417 = vst.msk [vmem:[#allocation5 + $0x3] sm:$0x1] %vm7271_vm7, %v7416_v43 }
 0xc87   : > { %7426 = vrot.lane.b32.xlu0 %v7424_v26, %s10429_s21  ;;  %7415 = vst.msk [vmem:[#allocation5 + $0x6] sm:$0x1] %vm7271_vm7, %v7414_v63  ;;  %7461 = vst.msk [vmem:[#allocation5 + $0x7] sm:$0x1] %vm7271_vm7, %v7460_v59  ;;  %v7356_v47 = vld [vmem:[#allocation4 + $0x12] sm:$0x1] }
 0xc88   : > { %7380 = vrot.lane.b32.xlu1 %v7378_v57, %s10429_s21  ;;  %v7390_v10 = vld [vmem:[#allocation4 + $0x19] sm:$0x1]  ;;  %v7362_v24 = vld [vmem:[#allocation4 + $0x13] sm:$0x1]  ;;  %v7396_v18 = vld [vmem:[#allocation4 + $0x1a] sm:$0x1] }
 0xc89   : > { %v7430_v22 = vld [vmem:[#allocation4 + $0x1a] sm:$0x1]  ;;  %v7408_v3 = vld [vmem:[#allocation4 + $0x21] sm:$0x1]  ;;  %v7436_v0 = vld [vmem:[#allocation4 + $0x1b] sm:$0x1] }
 0xc8a   : > { %v7442_v44 = vld [vmem:[#allocation4 + $0x1c] sm:$0x1]  ;;  %v7448_v45 = vld [vmem:[#allocation4 + $0x22] sm:$0x1]  ;;  %v7454_v50 = vld [vmem:[#allocation4 + $0x23] sm:$0x1] }
 0xc8b   : > { %7340 = vrot.lane.b32.xlu0 %v7338_v37, %s10432_s24 }
 0xc8c   : > { %7296 = vrot.lane.b32.xlu1 %v7294_v16, %s10434_s30 }
 0xc8f   : > { %7346 = vrot.lane.b32.xlu0 %v7344_v53, %s10434_s30 }
 0xc90   : > { %7303 = vrot.lane.b32.xlu1 %v7301_v46, %s10439_s12 }
 0xc93   : > { %7352 = vrot.lane.b32.xlu0 %v7350_v42, %s10439_s12 }
 0xc94   : > { %7317 = vrot.lane.b32.xlu1 %v7315_v51, %s10440_s20  ;;  %v7602_v51 = vld [vmem:[#allocation6 + $0x8] sm:$0x1] }
 0xc97   : > { %7358 = vrot.lane.b32.xlu0 %v7356_v47, %s10437_s25  ;;  %v7741_v47 = vld [vmem:[#allocation6 + $0xd] sm:$0x1] }
 0xc98   : > { %7392 = vrot.lane.b32.xlu1 %v7390_v10, %s10434_s30  ;;  %v7695_v10 = vld [vmem:[#allocation6 + $0xc] sm:$0x1] }
 0xc9b   : > { %7364 = vrot.lane.b32.xlu0 %v7362_v24, %s10440_s20 }
 0xc9c   : > { %7398 = vrot.lane.b32.xlu1 %v7396_v18, %s10439_s12 }
 0xc9f   : > { %7432 = vrot.lane.b32.xlu0 %v7430_v22, %s10432_s24  ;;  %v7662_v22 = vld [vmem:[#allocation6 + $0x4] sm:$0x1] }
 0xca0   : > { %7410 = vrot.lane.b32.xlu1 %v7408_v3, %s10440_s20  ;;  %7663 = vst.msk [vmem:[#allocation7 + $0x2] sm:$0x1] %vm7271_vm7, %v7662_v22  ;;  %v14927_v22 = vld [vmem:[#allocation16_spill] sm:$0xff] }
 0xca3   : > { %7438 = vrot.lane.b32.xlu0 %v7436_v0, %s10434_s30  ;;  %v7757_v0 = vld [vmem:[%s14642_s1 + $0x1b0] sm:$0xff] }
 0xca4   : > { %7574 = vrot.lane.b32.xlu1 %v7572_v38, %s10428_s18  ;;  %v10080_v9 = vpack.c.bf16 %v7757_v0, %v7756_v54  ;;  %v14919_v38 = vld [vmem:[#allocation30_spill] sm:$0xff]  ;;  %v14928_v54 = vld [vmem:[#allocation17_spill] sm:$0xff] }
 0xca5   : > { %v9059_v0 = vmul.f32 -1.442695, %v14928_v54 }
 0xca6   : > { %10081 = vmatpush1.bf16.msra.mxu1 %v10080_v9 }
 0xca7   : > { %7444 = vrot.lane.b32.xlu0 %v7442_v44, %s10439_s12  ;;  %10082 = vmatprep.subr.bf16.mxu1 %v10438_v12  ;;  %v9050_v44 = vmul.f32 -1.442695, %v14917_v5 }
 0xca8   : > { %7580 = vrot.lane.b32.xlu1 %v7578_v29, %s10429_s21  ;;  %v14920_v29 = vld [vmem:[#allocation31_spill] sm:$0xff] }
 0xca9   : > { %10215 = vpow2.f32 %v9050_v44 }
 0xcaa   : > { %10084 = vmatpush1.bf16.msra.mxu1 %v10083_v49  ;;  %10217 = vpow2.f32 %v9049_v13 }
 0xcab   : > { %7450 = vrot.lane.b32.xlu0 %v7448_v45, %s10437_s25  ;;  %10085 = vmatprep.subr.bf16.mxu1 %v10438_v12 }
 0xcac   : > { %7586 = vrot.lane.b32.xlu1 %v7584_v31, %s10432_s24 }
 0xcaf   : > { %7456 = vrot.lane.b32.xlu0 %v7454_v50, %s10440_s20  ;;  %v9052_v50 = vmul.f32 -1.442695, %v14919_v38 }
 0xcb0   : > { %7678 = vrot.lane.b32.xlu1 %v7676_v11, %s10432_s24 }
 0xcb1   : > { %10219 = vpow2.f32 %v9052_v50  ;;  %v14929_v50 = vld [vmem:[#allocation18_spill] sm:$0xff] }
 0xcb3   : > { %7620 = vrot.lane.b32.xlu0 %v7618_v21, %s10428_s18  ;;  %v9051_v21 = vmul.f32 -1.442695, %v14920_v29 }
 0xcb4   : > { %7604 = vrot.lane.b32.xlu1 %v7602_v51, %s10437_s25 }
 0xcb5   : > { %10221 = vpow2.f32 %v9051_v21  ;;  %v9062_v21 = vmul.f32 -1.442695, %v14929_v50 }
 0xcb7   : > { %7626 = vrot.lane.b32.xlu0 %v7624_v27, %s10429_s21 }
 0xcb8   : > { %7697 = vrot.lane.b32.xlu1 %v7695_v10, %s10437_s25 }
 0xcbb   : > { %7719 = vrot.lane.b32.xlu0 %v7717_v39, %s10429_s21  ;;  %v7760_v39 = vld [vmem:[%s14642_s1 + $0x1c8] sm:$0xff] }
 0xcbf   : > { %7644 = vrot.lane.b32.xlu0 %v7642_v25, %s10439_s12  ;;  %v7761_v25 = vld [vmem:[%s14642_s1 + $0x1d0] sm:$0xff] }
 0xcc3   : > { %7737 = vrot.lane.b32.xlu0 %v7735_v40, %s10439_s12  ;;  %v14926_v40 = vld [vmem:[#allocation15_spill] sm:$0xff] }
 0xcc4   : > { %v9057_v51 = vmul.f32 -1.442695, %v14926_v40 }
 0xcc7   : > { %7743 = vrot.lane.b32.xlu0 %v7741_v47, %s10437_s25 }
 0xcf5   : > { %v7421_v52 = vpop.permute.xlu0 %7420 }
 0xcf6   : > { %7423 = vst.msk [vmem:[#allocation5 + $0x3] sm:$0x1] %vm7278_vm8, %v7421_v52  ;;  %v7375_v7 = vpop.permute.xlu1 %7374  ;;  %v14921_v52 = vld [vmem:[#allocation32_spill] sm:$0xff] }
 0xcf7   : > { %7377 = vst.msk [vmem:[#allocation5 + $0x2] sm:$0x1] %vm7278_vm8, %v7375_v7  ;;  %v9054_v7 = vmul.f32 -1.442695, %v14921_v52 }
 0xcf9   : > { %v7427_v28 = vpop.permute.xlu0 %7426  ;;  %10223 = vpow2.f32 %v9054_v7 }
 0xcfa   : > { %7429 = vst.msk [vmem:[#allocation5 + $0x3] sm:$0x1] %vm7285_vm9, %v7427_v28  ;;  %v7381_v26 = vpop.permute.xlu1 %7380  ;;  %v14922_v28 = vld [vmem:[#allocation33_spill] sm:$0xff] }
 0xcfb   : > { %7383 = vst.msk [vmem:[#allocation5 + $0x2] sm:$0x1] %vm7285_vm9, %v7381_v26  ;;  %v9053_v26 = vmul.f32 -1.442695, %v14922_v28 }
 0xcfc   : > { %7389 = vst.msk [vmem:[#allocation5 + $0x2] sm:$0x1] %vm7292_vm10, %v7387_v36  ;;  %v10086_v36 = vpack.c.bf16 %v7761_v25, %v7760_v39 }
 0xcfd   : > { %v7341_v63 = vpop.permute.xlu0 %7340  ;;  %10225 = vpow2.f32 %v9053_v26  ;;  %v7772_v26 = vld [vmem:[%s14642_s1 + $0x228] sm:$0xff] }
 0xcfe   : > { %7343 = vst.msk [vmem:[#allocation5 + $0x1] sm:$0x1] %vm7292_vm10, %v7341_v63  ;;  %v7297_v59 = vpop.permute.xlu1 %7296  ;;  %10087 = vmatpush1.bf16.msra.mxu1 %v10086_v36 }
 0xcff   : > { %7300 = vst.msk [vmem:[#allocation5] sm:$0x1] %vm7299_vm12, %v7297_v59  ;;  %10088 = vmatprep.subr.bf16.mxu1 %v10438_v12 }
 0xd01   : > { %v7347_v57 = vpop.permute.xlu0 %7346 }
 0xd02   : > { %7349 = vst.msk [vmem:[#allocation5 + $0x1] sm:$0x1] %vm7299_vm12, %v7347_v57  ;;  %v7304_v37 = vpop.permute.xlu1 %7303 }
 0xd03   : > { %7307 = vst.msk [vmem:[#allocation5] sm:$0x1] %vm7306_vm13, %v7304_v37  ;;  %v14923_v37 = vld [vmem:[#allocation13_spill] sm:$0xff] }
 0xd04   : > { %7314 = vst.msk [vmem:[#allocation5] sm:$0x1] %vm7313_vm14, %v7311_v30  ;;  %v7762_v30 = vld [vmem:[%s14642_s1 + $0x1d8] sm:$0xff] }
 0xd05   : > { %v7353_v43 = vpop.permute.xlu0 %7352 }
 0xd06   : > { %7355 = vst.msk [vmem:[#allocation5 + $0x1] sm:$0x1] %vm7306_vm13, %v7353_v43  ;;  %v7318_v58 = vpop.permute.xlu1 %7317  ;;  %v9056_v43 = vmul.f32 -1.442695, %v14923_v37 }
 0xd07   : > { %7321 = vst.msk [vmem:[#allocation5] sm:$0x1] %vm7320_vm15, %v7318_v58  ;;  %v7764_v58 = vld [vmem:[%s14642_s1 + $0x1e8] sm:$0xff] }
 0xd08   : > { %10227 = vpow2.f32 %v9056_v43  ;;  %v7701_v43 = vld [vmem:[#allocation6 + $0xd] sm:$0x1] }
 0xd09   : > { %v7359_v55 = vpop.permute.xlu0 %7358 }
 0xd0a   : > { %7361 = vst.msk [vmem:[#allocation5 + $0x1] sm:$0x1] %vm7313_vm14, %v7359_v55  ;;  %v7393_v62 = vpop.permute.xlu1 %7392  ;;  %v7765_v55 = vld [vmem:[%s14642_s1 + $0x1f0] sm:$0xff] }
 0xd0b   : > { %7395 = vst.msk [vmem:[#allocation5 + $0x2] sm:$0x1] %vm7299_vm12, %v7393_v62  ;;  %v14924_v62 = vld [vmem:[#allocation26_spill] sm:$0xff] }
 0xd0d   : > { %v7365_v16 = vpop.permute.xlu0 %7364 }
 0xd0e   : > { %7367 = vst.msk [vmem:[#allocation5 + $0x1] sm:$0x1] %vm7320_vm15, %v7365_v16  ;;  %v7399_v61 = vpop.permute.xlu1 %7398  ;;  %v9055_v16 = vmul.f32 -1.442695, %v14924_v62 }
 0xd0f   : > { %7401 = vst.msk [vmem:[#allocation5 + $0x2] sm:$0x1] %vm7306_vm13, %v7399_v61 }
 0xd10   : > { %7407 = vst.msk [vmem:[#allocation5 + $0x2] sm:$0x1] %vm7313_vm14, %v7405_v56  ;;  %v7763_v56 = vld [vmem:[%s14642_s1 + $0x1e0] sm:$0xff]  ;;  %10229 = vpow2.f32 %v9055_v16 }
 0xd11   : > { %v7433_v53 = vpop.permute.xlu0 %7432  ;;  %v10089_v57 = vpack.c.bf16 %v7763_v56, %v7762_v30 }
 0xd12   : > { %7435 = vst.msk [vmem:[#allocation5 + $0x3] sm:$0x1] %vm7292_vm10, %v7433_v53  ;;  %v7411_v4 = vpop.permute.xlu1 %7410 }
 0xd13   : > { %7413 = vst.msk [vmem:[#allocation5 + $0x2] sm:$0x1] %vm7320_vm15, %v7411_v4  ;;  %10090 = vmatpush1.bf16.msra.mxu1 %v10089_v57  ;;  %v10092_v4 = vpack.c.bf16 %v7765_v55, %v7764_v58  ;;  %v7747_v57 = vld [vmem:[#allocation6 + $0xe] sm:$0x1]  ;;  %v14931_v58 = vld [vmem:[#allocation11_spill] sm:$0xff] }
 0xd14   : > { %10091 = vmatprep.subr.bf16.mxu1 %v10438_v12  ;;  %v9064_v55 = vmul.f32 -1.442695, %v14931_v58 }
 0xd15   : > { %v7439_v15 = vpop.permute.xlu0 %7438 }
 0xd16   : > { %7441 = vst.msk [vmem:[#allocation5 + $0x3] sm:$0x1] %vm7299_vm12, %v7439_v15  ;;  %v7575_v24 = vpop.permute.xlu1 %7574  ;;  %v10216_v15 = vpop.eup %10215 }
 0xd17   : > { %7577 = vst.msk [vmem:[#allocation7] sm:$0x1] %vm7278_vm8, %v7575_v24  ;;  %v8312_v47 = vadd.f32 1.0, %v10216_v15  ;;  %10093 = vmatpush1.bf16.msra.mxu1 %v10092_v4  ;;  %v14932_v15 = vld [vmem:[#allocation12_spill] sm:$0xff] }
 0xd18   : > { %10094 = vmatprep.subr.bf16.mxu1 %v10438_v12 }
 0xd19   : > { %v7445_v1 = vpop.permute.xlu0 %7444 }
 0xd1a   : > { %7447 = vst.msk [vmem:[#allocation5 + $0x3] sm:$0x1] %vm7306_vm13, %v7445_v1  ;;  %v7581_v20 = vpop.permute.xlu1 %7580  ;;  %v7766_v1 = vld [vmem:[%s14642_s1 + $0x1f8] sm:$0xff] }
 0xd1b   : > { %7583 = vst.msk [vmem:[#allocation7] sm:$0x1] %vm7285_vm9, %v7581_v20  ;;  %v7769_v20 = vld [vmem:[%s14642_s1 + $0x210] sm:$0xff] }
 0xd1d   : > { %v7451_v46 = vpop.permute.xlu0 %7450 }
 0xd1e   : > { %7453 = vst.msk [vmem:[#allocation5 + $0x3] sm:$0x1] %vm7313_vm14, %v7451_v46  ;;  %v7587_v32 = vpop.permute.xlu1 %7586  ;;  %v7767_v46 = vld [vmem:[%s14642_s1 + $0x200] sm:$0xff] }
 0xd1f   : > { %7589 = vst.msk [vmem:[#allocation7] sm:$0x1] %vm7292_vm10, %v7587_v32  ;;  %v7660_v32 = vld [vmem:[#allocation6 + $0xb] sm:$0x1] }
 0xd20   : > { %7661 = vst.msk [vmem:[#allocation7 + $0x5] sm:$0x1] %vm7271_vm7, %v7660_v32 }
 0xd21   : > { %v7457_v42 = vpop.permute.xlu0 %7456 }
 0xd22   : > { %7459 = vst.msk [vmem:[#allocation5 + $0x3] sm:$0x1] %vm7320_vm15, %v7457_v42  ;;  %v10218_v42 = vpop.eup %10217 }
 0xd23   : > { %v10220_v48 = vpop.eup %10219  ;;  %v8311_v24 = vadd.f32 1.0, %v10218_v42  ;;  %v14933_v42 = vld [vmem:[#allocation20_spill] sm:$0xff] }
 0xd24   : > { %v8314_v9 = vadd.f32 1.0, %v10220_v48  ;;  %v14934_v48 = vld [vmem:[#allocation21_spill] sm:$0xff] }
 0xd25   : > { %v7621_v6 = vpop.permute.xlu0 %7620 }
 0xd26   : > { %7623 = vst.msk [vmem:[#allocation7 + $0x1] sm:$0x1] %vm7278_vm8, %v7621_v6  ;;  %v10095_v6 = vpack.c.bf16 %v7767_v46, %v7766_v1  ;;  %v9063_v1 = vmul.f32 -1.442695, %v14932_v15 }
 0xd28   : > { %10096 = vmatpush1.bf16.msra.mxu1 %v10095_v6 }
 0xd29   : > { %v7462_v17 = vld [vmem:[#allocation5] sm:$0xff]  ;;  %v7627_v18 = vpop.permute.xlu0 %7626  ;;  %10097 = vmatprep.subr.bf16.mxu1 %v10438_v12 }
 0xd2a   : > { %v7487_v14 = vcombine.high %v7462_v17, %v7462_v17  ;;  %7629 = vst.msk [vmem:[#allocation7 + $0x1] sm:$0x1] %vm7285_vm9, %v7627_v18  ;;  %v7768_v18 = vld [vmem:[%s14642_s1 + $0x208] sm:$0xff] }
 0xd2b   : > { %v10098_v49 = vpack.c.bf16 %v7769_v20, %v7768_v18  ;;  %v14935_v20 = vld [vmem:[#allocation22_spill] sm:$0xff] }
 0xd2c   : > { %9012 = vmatprep.mubr.msk.f32.mxu0 %vm6833_vm4, %v7487_v14  ;;  %v9068_v32 = vmul.f32 -1.442695, %v14935_v20 }
 0xd2d   : > { %7555 = vmatmul.mubr.f32.vlgmr.msra.gmra.mrb[116].mxu0 %v7462_v17  ;;  %v14925_v17 = vld [vmem:[#allocation14_spill] sm:$0xff]  ;;  %10099 = vmatpush1.bf16.msra.mxu1 %v10098_v49 }
 0xd2e   : > { %v9058_v14 = vmul.f32 -1.442695, %v14925_v17  ;;  %10100 = vmatprep.subr.bf16.mxu1 %v10438_v12 }
 0xd30   : > { %10231 = vpow2.f32 %v9058_v14  ;;  %v9066_v14 = vmul.f32 -1.442695, %v14933_v42 }
 0xd31   : > { %10233 = vpow2.f32 %v9057_v51 }
 0xd32   : > { %10235 = vrcp.f32 %v8312_v47 }
 0xd33   : > { %10237 = vrcp.f32 %v8311_v24  ;;  %v9065_v24 = vmul.f32 -1.442695, %v14934_v48 }
 0xe00   : > { %v7556_v3 = vpop.f32.mrb[116].mxu0 }
 0xe01   : > { %v7557_v33 = vadd.f32 %v9011_v41, %v7556_v3  ;;  %v7558_v2 = vpop.f32.mrb[117].mxu0  ;;  %v10222_v41 = vpop.eup %10221  ;;  %v9060_v3 = vmul.f32 -1.442695, %v14927_v22 }
 0xe02   : > { %v7753_v2 = vld [vmem:[#allocation6 + $0xf] sm:$0x1]  ;;  %v10224_v44 = vpop.eup %10223  ;;  %v8313_v13 = vadd.f32 1.0, %v10222_v41 }
 0xe03   : > { %7566 = vst.msk [vmem:[#allocation6 + $0x5] sm:$0x3] %vm7565_vm3, %v7557_v33  ;;  %10239 = vpow2.f32 %v9060_v3  ;;  %v8316_v39 = vadd.f32 1.0, %v10224_v44 }
 0xe04   : > { %7569 = vst.msk [vmem:[#allocation6 + $0x7] sm:$0xc] %vm7568_vm2, %v7557_v33  ;;  %v7707_v33 = vld [vmem:[#allocation6 + $0xe] sm:$0x1]  ;;  %10241 = vpow2.f32 %v9059_v0  ;;  %v14936_v0 = vld [vmem:[#allocation23_spill] sm:$0xff] }
 0xe05   : > { %7708 = vst.msk [vmem:[#allocation7 + $0x6] sm:$0x1] %vm7271_vm7, %v7707_v33  ;;  %7754 = vst.msk [vmem:[#allocation7 + $0x7] sm:$0x1] %vm7271_vm7, %v7753_v2  ;;  %10243 = vrcp.f32 %v8314_v9  ;;  %v9067_v9 = vmul.f32 -1.442695, %v14936_v0 }
 0xe06   : > { %10245 = vrcp.f32 %v8313_v13 }
 0xe07   : > { %10247 = vpow2.f32 %v9062_v21  ;;  %v14938_v21 = vld [vmem:[#allocation25_spill] sm:$0xff] }
 0xe0a   : > { %v7711_v45 = vld [vmem:[#allocation6 + $0x6] sm:$0x1]  ;;  %v7664_v19 = vld [vmem:[#allocation6 + $0x5] sm:$0x1] }
 0xe0b   : > { %v7614_v23 = vld [vmem:[#allocation6 + $0xa] sm:$0x1]  ;;  %7713 = vrot.lane.b32.xlu0 %v7711_v45, %s10428_s18  ;;  %7666 = vrot.lane.b32.xlu1 %v7664_v19, %s10428_s18  ;;  %v7670_v31 = vld [vmem:[#allocation6 + $0x6] sm:$0x1]  ;;  %v7630_v27 = vld [vmem:[#allocation6 + $0x5] sm:$0x1]  ;;  %v10226_v19 = vpop.eup %10225 }
 0xe0c   : > { %7615 = vst.msk [vmem:[#allocation7 + $0x4] sm:$0x1] %vm7271_vm7, %v7614_v23  ;;  %v7709_v11 = vld [vmem:[#allocation6 + $0x5] sm:$0x1]  ;;  %v7723_v63 = vld [vmem:[#allocation6 + $0x9] sm:$0x1] }
 0xe0d   : > { %7710 = vst.msk [vmem:[#allocation7 + $0x3] sm:$0x1] %vm7271_vm7, %v7709_v11  ;;  %v7590_v59 = vld [vmem:[#allocation6 + $0x5] sm:$0x1]  ;;  %v7636_v61 = vld [vmem:[#allocation6 + $0x6] sm:$0x1] }
 0xe0e   : > { %v7682_v53 = vld [vmem:[#allocation6 + $0x9] sm:$0x1]  ;;  %v7729_v10 = vld [vmem:[#allocation6 + $0xa] sm:$0x1]  ;;  %v7596_v60 = vld [vmem:[#allocation6 + $0x6] sm:$0x1] }
 0xe0f   : > { %7672 = vrot.lane.b32.xlu1 %v7670_v31, %s10429_s21  ;;  %7632 = vrot.lane.b32.xlu0 %v7630_v27, %s10432_s24  ;;  %v7648_v8 = vld [vmem:[#allocation6 + $0x9] sm:$0x1]  ;;  %v7688_v34 = vld [vmem:[#allocation6 + $0xa] sm:$0x1]  ;;  %v7770_v23 = vld [vmem:[%s14642_s1 + $0x218] sm:$0xff]  ;;  %v10228_v31 = vpop.eup %10227  ;;  %v8315_v7 = vadd.f32 1.0, %v10226_v19 }
 0xe10   : > { %v7771_v45 = vld [vmem:[%s14642_s1 + $0x220] sm:$0xff]  ;;  %v7654_v25 = vld [vmem:[#allocation6 + $0xa] sm:$0x1]  ;;  %v7608_v36 = vld [vmem:[#allocation6 + $0x9] sm:$0x1]  ;;  %v10230_v56 = vpop.eup %10229 }
 0xe11   : > { %v14930_v27 = vld [vmem:[#allocation19_spill] sm:$0xff]  ;;  %v10101_v30 = vpack.c.bf16 %v7771_v45, %v7770_v23  ;;  %v10232_v16 = vpop.eup %10231 }
 0xe12   : > { %v9061_v11 = vmul.f32 -1.442695, %v14930_v27  ;;  %v10234_v4 = vpop.eup %10233  ;;  %v8320_v47 = vadd.f32 1.0, %v10232_v16 }
 0xe13   : > { %7725 = vrot.lane.b32.xlu0 %v7723_v63, %s10432_s24  ;;  %7592 = vrot.lane.b32.xlu1 %v7590_v59, %s10434_s30  ;;  %v7773_v63 = vld [vmem:[%s14642_s1 + $0x230] sm:$0xff]  ;;  %v8318_v59 = vadd.f32 1.0, %v10228_v31  ;;  %v10236_v46 = vpop.eup %10235  ;;  %v9069_v31 = vmul.f32 -1.442695, %v14938_v21 }
 0xe14   : > { %10249 = vpow2.f32 %v9061_v11  ;;  %10102 = vmatpush1.bf16.msra.mxu1 %v10101_v30  ;;  %v10238_v51 = vpop.eup %10237 }
 0xe15   : > { %10251 = vrcp.f32 %v8316_v39  ;;  %10103 = vmatprep.subr.bf16.mxu1 %v10438_v12  ;;  %v14939_v39 = vld [vmem:[#allocation34_spill] sm:$0xff] }
 0xe16   : > { %10253 = vrcp.f32 %v8315_v7 }
 0xe17   : > { %7638 = vrot.lane.b32.xlu0 %v7636_v61, %s10434_s30  ;;  %7684 = vrot.lane.b32.xlu1 %v7682_v53, %s10434_s30  ;;  %v8317_v61 = vadd.f32 1.0, %v10230_v56  ;;  %v10104_v53 = vpack.c.bf16 %v7773_v63, %v7772_v26  ;;  %10255 = vrcp.f32 %v8318_v59  ;;  %v14940_v26 = vld [vmem:[#allocation27_spill] sm:$0xff] }
 0xe18   : > { %10257 = vpow2.f32 %v9064_v55  ;;  %v9071_v63 = vmul.f32 -1.442695, %v14940_v26 }
 0xe19   : > { %10259 = vrcp.f32 %v8317_v61  ;;  %10105 = vmatpush1.bf16.msra.mxu1 %v10104_v53  ;;  %v14941_v61 = vld [vmem:[#allocation38_spill] sm:$0xff] }
 0xe1a   : > { %10261 = vpow2.f32 %v9063_v1  ;;  %v9074_v53 = vmul.f32 -1.442695, %v14941_v61  ;;  %v14942_v1 = vld [vmem:[#allocation37_spill] sm:$0xff] }
 0xe1b   : > { %7731 = vrot.lane.b32.xlu0 %v7729_v10, %s10434_s30  ;;  %7598 = vrot.lane.b32.xlu1 %v7596_v60, %s10439_s12  ;;  %v10240_v10 = vpop.eup %10239  ;;  %v8319_v60 = vadd.f32 1.0, %v10234_v4  ;;  %10263 = vpow2.f32 %v9066_v14 }
 0xe1c   : > { %v10242_v6 = vpop.eup %10241  ;;  %10265 = vrcp.f32 %v8320_v47  ;;  %v8322_v12 = vadd.f32 1.0, %v10240_v10 }
 0xe1d   : > { %v10244_v18 = vpop.eup %10243  ;;  %10267 = vrcp.f32 %v8319_v60  ;;  %v8321_v33 = vadd.f32 1.0, %v10242_v6  ;;  %v14943_v6 = vld [vmem:[#allocation42_spill] sm:$0xff] }
 0xe1e   : > { %v10246_v41 = vpop.eup %10245  ;;  %10269 = vpow2.f32 %v9065_v24  ;;  %v9076_v24 = vmul.f32 -1.442695, %v14943_v6 }
 0xe1f   : > { %7650 = vrot.lane.b32.xlu0 %v7648_v8, %s10437_s25  ;;  %7690 = vrot.lane.b32.xlu1 %v7688_v34, %s10439_s12  ;;  %v10248_v3 = vpop.eup %10247  ;;  %10271 = vpow2.f32 %v9068_v32  ;;  %v14937_v34 = vld [vmem:[#allocation24_spill] sm:$0xff]  ;;  %v14944_v32 = vld [vmem:[#allocation41_spill] sm:$0xff] }
 0xe20   : > { %v10250_v2 = vpop.eup %10249  ;;  %v9070_v49 = vmul.f32 -1.442695, %v14937_v34  ;;  %10273 = vrcp.f32 %v8322_v12  ;;  %v8324_v13 = vadd.f32 1.0, %v10248_v3 }
 0xe21   : > { %v10252_v8 = vpop.eup %10251  ;;  %10275 = vrcp.f32 %v8321_v33  ;;  %v8323_v45 = vadd.f32 1.0, %v10250_v2 }
 0xe22   : > { %v10254_v44 = vpop.eup %10253  ;;  %10277 = vpow2.f32 %v9067_v9 }
 0xe23   : > { %7656 = vrot.lane.b32.xlu0 %v7654_v25, %s10440_s20  ;;  %7610 = vrot.lane.b32.xlu1 %v7608_v36, %s10440_s20  ;;  %v10256_v23 = vpop.eup %10255  ;;  %10279 = vpow2.f32 %v9070_v49  ;;  %v9072_v25 = vmul.f32 -1.442695, %v14939_v39 }
 0xe24   : > { %v10258_v19 = vpop.eup %10257  ;;  %10281 = vrcp.f32 %v8324_v13 }
 0xe25   : > { %v10260_v11 = vpop.eup %10259  ;;  %10283 = vrcp.f32 %v8323_v45  ;;  %v8326_v56 = vadd.f32 1.0, %v10258_v19 }
 0xe26   : > { %v10262_v36 = vpop.eup %10261  ;;  %10285 = vpow2.f32 %v9069_v31 }
 0xe27   : > { %7749 = vrot.lane.b32.xlu0 %v7747_v57, %s10440_s20  ;;  %7703 = vrot.lane.b32.xlu1 %v7701_v43, %s10440_s20  ;;  %v10264_v30 = vpop.eup %10263  ;;  %v8325_v57 = vadd.f32 1.0, %v10262_v36  ;;  %10287 = vpow2.f32 %v9072_v25  ;;  %v14947_v25 = vld [vmem:[#allocation48_spill] sm:$0xff] }
 0xe28   : > { %v10266_v7 = vpop.eup %10265  ;;  %v8328_v55 = vadd.f32 1.0, %v10264_v30  ;;  %10289 = vrcp.f32 %v8326_v56  ;;  %v9080_v36 = vmul.f32 -1.442695, %v14947_v25  ;;  %v14948_v56 = vld [vmem:[#allocation47_spill] sm:$0xff] }
 0xe29   : > { %v10268_v59 = vpop.eup %10267  ;;  %10291 = vpow2.f32 %v9071_v63 }
 0xe2a   : > { %v10270_v43 = vpop.eup %10269  ;;  %10293 = vrcp.f32 %v8325_v57 }
 0xe2b   : > { %8446 = vperm.xlu0 %10143, %v10236_v46   ;;  %8441 = vperm.xlu1 %10144, %v10238_v51   ;;  %v10272_v16 = vpop.eup %10271  ;;  %v9073_v46 = vmul.f32 -1.442695, %v14942_v1  ;;  %v8327_v51 = vadd.f32 1.0, %v10270_v43  ;;  %10295 = vrcp.f32 %v8328_v55 }
 0xe2c   : > { %v10274_v4 = vpop.eup %10273  ;;  %v8330_v10 = vadd.f32 1.0, %v10272_v16  ;;  %10297 = vpow2.f32 %v9074_v53 }
 0xe2d   : > { %v10276_v14 = vpop.eup %10275  ;;  %10299 = vpow2.f32 %v9073_v46 }
 0xe2e   : > { %v10278_v47 = vpop.eup %10277  ;;  %10301 = vrcp.f32 %v8327_v51 }
 0xe2f   : > { %8456 = vperm.xlu0 %10143, %v10244_v18   ;;  %8451 = vperm.xlu1 %10144, %v10246_v41   ;;  %v10280_v60 = vpop.eup %10279  ;;  %v9075_v41 = vmul.f32 -1.442695, %v14944_v32  ;;  %v8329_v3 = vadd.f32 1.0, %v10278_v47  ;;  %10303 = vrcp.f32 %v8330_v10 }
 0xe30   : > { %v10282_v18 = vpop.eup %10281  ;;  %v8332_v2 = vadd.f32 1.0, %v10280_v60  ;;  %10305 = vpow2.f32 %v9076_v24 }
 0xe31   : > { %v10284_v12 = vpop.eup %10283  ;;  %10307 = vpow2.f32 %v9075_v41 }
 0xe32   : > { %v10286_v33 = vpop.eup %10285  ;;  %10309 = vrcp.f32 %v8329_v3 }
 0xe33   : > { %8466 = vperm.xlu0 %10143, %v10252_v8   ;;  %8461 = vperm.xlu1 %10144, %v10254_v44   ;;  %v10288_v9 = vpop.eup %10287  ;;  %v14945_v8 = vld [vmem:[#allocation46_spill] sm:$0xff]  ;;  %v14946_v44 = vld [vmem:[#allocation45_spill] sm:$0xff]  ;;  %v8331_v45 = vadd.f32 1.0, %v10286_v33  ;;  %10311 = vrcp.f32 %v8332_v2 }
 0xe34   : > { %v9078_v49 = vmul.f32 -1.442695, %v14945_v8  ;;  %v9077_v13 = vmul.f32 -1.442695, %v14946_v44  ;;  %v8334_v31 = vadd.f32 1.0, %v10288_v9 }
 0xe36   : > { %10313 = vpow2.f32 %v9078_v49 }
 0xe37   : > { %8476 = vperm.xlu0 %10143, %v10256_v23   ;;  %8471 = vperm.xlu1 %10144, %v10260_v11   ;;  %v10290_v23 = vpop.eup %10289  ;;  %10315 = vpow2.f32 %v9077_v13 }
 0xe38   : > { %v10292_v19 = vpop.eup %10291  ;;  %10317 = vrcp.f32 %v8331_v45 }
 0xe39   : > { %v10294_v11 = vpop.eup %10293  ;;  %10319 = vrcp.f32 %v8334_v31 }
 0xe3a   : > { %v10296_v30 = vpop.eup %10295  ;;  %10321 = vpow2.f32 %v9080_v36 }
 0xe3b   : > { %8486 = vperm.xlu0 %10143, %v10266_v7   ;;  %8481 = vperm.xlu1 %10144, %v10268_v59   ;;  %v9079_v7 = vmul.f32 -1.442695, %v14948_v56  ;;  %v10298_v63 = vpop.eup %10297  ;;  %v8333_v59 = vadd.f32 1.0, %v10292_v19 }
 0xe3c   : > { %v10300_v57 = vpop.eup %10299  ;;  %v8336_v16 = vadd.f32 1.0, %v10298_v63 }
 0xe3d   : > { %v10302_v43 = vpop.eup %10301  ;;  %10323 = vpow2.f32 %v9079_v7  ;;  %v7720_v7 = vpop.permute.xlu0 %7719 }
 0xe3e   : > { %v10304_v55 = vpop.eup %10303  ;;  %10325 = vrcp.f32 %v8333_v59 }
 0xe3f   : > { %8496 = vperm.xlu0 %10143, %v10274_v4   ;;  %8491 = vperm.xlu1 %10144, %v10276_v14   ;;  %v10306_v53 = vpop.eup %10305  ;;  %v8335_v4 = vadd.f32 1.0, %v10300_v57  ;;  %10327 = vrcp.f32 %v8336_v16  ;;  %v7679_v57 = vpop.permute.xlu1 %7678 }
 0xe40   : > { %v10308_v46 = vpop.eup %10307  ;;  %v8338_v47 = vadd.f32 1.0, %v10306_v53 }
 0xe41   : > { %v10310_v14 = vpop.eup %10309  ;;  %10329 = vrcp.f32 %v8335_v4  ;;  %v8337_v60 = vadd.f32 1.0, %v10308_v46  ;;  %v7645_v59 = vpop.permute.xlu0 %7644 }
 0xe42   : > { %v10312_v51 = vpop.eup %10311  ;;  %10331 = vrcp.f32 %v8338_v47 }
 0xe43   : > { %8506 = vperm.xlu0 %10143, %v10282_v18   ;;  %8501 = vperm.xlu1 %10144, %v10284_v12   ;;  %v10314_v10 = vpop.eup %10313  ;;  %10333 = vrcp.f32 %v8337_v60 }
 0xe44   : > { %v10316_v24 = vpop.eup %10315  ;;  %v8340_v12 = vadd.f32 1.0, %v10314_v10 }
 0xe45   : > { %v10318_v18 = vpop.eup %10317  ;;  %v8339_v33 = vadd.f32 1.0, %v10316_v24 }
 0xe46   : > { %v10320_v41 = vpop.eup %10319  ;;  %10335 = vrcp.f32 %v8340_v12 }
 0xe47   : > { %8516 = vperm.xlu0 %10143, %v10290_v23   ;;  %8511 = vperm.xlu1 %10144, %v10294_v11   ;;  %v10322_v3 = vpop.eup %10321  ;;  %10337 = vrcp.f32 %v8339_v33 }
 0xe48   : > { %v10324_v2 = vpop.eup %10323  ;;  %v8342_v49 = vadd.f32 1.0, %v10322_v3 }
 0xe49   : > { %v10326_v9 = vpop.eup %10325  ;;  %v8341_v13 = vadd.f32 1.0, %v10324_v2 }
 0xe4a   : > { %v10328_v23 = vpop.eup %10327  ;;  %10339 = vrcp.f32 %v8342_v49 }
 0xe4b   : > { %8526 = vperm.xlu0 %10143, %v10296_v30   ;;  %8521 = vperm.xlu1 %10144, %v10302_v43   ;;  %v10330_v45 = vpop.eup %10329  ;;  %10341 = vrcp.f32 %v8341_v13  ;;  %v7738_v43 = vpop.permute.xlu0 %7737 }
 0xe4c   : > { %v10332_v19 = vpop.eup %10331 }
 0xe4d   : > { %v10334_v31 = vpop.eup %10333 }
 0xe4f   : > { %8536 = vperm.xlu0 %10143, %v10304_v55   ;;  %8531 = vperm.xlu1 %10144, %v10310_v14   ;;  %v7605_v55 = vpop.permute.xlu1 %7604  ;;  %v7744_v16 = vpop.permute.xlu0 %7743 }
 0xe50   : > { %v10336_v11 = vpop.eup %10335 }
 0xe51   : > { %v10338_v36 = vpop.eup %10337 }
 0xe53   : > { %8546 = vperm.xlu0 %10143, %v10312_v51   ;;  %8541 = vperm.xlu1 %10144, %v10318_v18   ;;  %v7698_v53 = vpop.permute.xlu1 %7697 }
 0xe54   : > { %v10340_v30 = vpop.eup %10339 }
 0xe55   : > { %v10342_v63 = vpop.eup %10341 }
 0xe57   : > { %8556 = vperm.xlu0 %10143, %v10320_v41   ;;  %8551 = vperm.xlu1 %10144, %v10326_v9  }
 0xe5b   : > { %8566 = vperm.xlu0 %10143, %v10328_v23   ;;  %8561 = vperm.xlu1 %10144, %v10330_v45   ;;  %v7859_v45 = vld [vmem:[#allocation8] sm:$0xff] }
 0xe5c   : > { %9908 = vmatprep.mubr.msk.f32.mxu0 %vm251_vm1, %v7859_v45  ;;  %v7883_v45 = vld [vmem:[#allocation8 + $0xc0] sm:$0xff] }
 0xe5f   : > { %8576 = vperm.xlu0 %10143, %v10332_v19   ;;  %8571 = vperm.xlu1 %10144, %v10334_v31   ;;  %v9013_v19 = vld [vmem:[%s14642_s1 + $0x238] ss:$0 sm:$0xff] }
 0xe63   : > { %8586 = vperm.xlu0 %10143, %v10336_v11   ;;  %8581 = vperm.xlu1 %10144, %v10338_v36  }
 0xe67   : > { %8596 = vperm.xlu0 %10143, %v10340_v30   ;;  %8591 = vperm.xlu1 %10144, %v10342_v63  }
 0xe7d   : > { %v7714_v4 = vpop.permute.xlu0 %7713  ;;  %v7667_v46 = vpop.permute.xlu1 %7666 }
 0xe7e   : > { %7716 = vst.msk [vmem:[#allocation7 + $0x3] sm:$0x1] %vm7278_vm8, %v7714_v4  ;;  %7669 = vst.msk [vmem:[#allocation7 + $0x2] sm:$0x1] %vm7278_vm8, %v7667_v46  ;;  %v7865_v4 = vld [vmem:[#allocation8 + $0x30] sm:$0xff]  ;;  %v7866_v46 = vld [vmem:[#allocation8 + $0x38] sm:$0xff] }
 0xe7f   : > { %7722 = vst.msk [vmem:[#allocation7 + $0x3] sm:$0x1] %vm7285_vm9, %v7720_v7 }
 0xe81   : > { %v7633_v14 = vpop.permute.xlu0 %7632  ;;  %v7673_v51 = vpop.permute.xlu1 %7672 }
 0xe82   : > { %7635 = vst.msk [vmem:[#allocation7 + $0x1] sm:$0x1] %vm7292_vm10, %v7633_v14  ;;  %v7867_v14 = vld [vmem:[#allocation8 + $0x40] sm:$0xff] }
 0xe83   : > { %7675 = vst.msk [vmem:[#allocation7 + $0x2] sm:$0x1] %vm7285_vm9, %v7673_v51  ;;  %v7868_v51 = vld [vmem:[#allocation8 + $0x48] sm:$0xff] }
 0xe84   : > { %7681 = vst.msk [vmem:[#allocation7 + $0x2] sm:$0x1] %vm7292_vm10, %v7679_v57  ;;  %v7860_v57 = vld [vmem:[#allocation8 + $0x8] sm:$0xff] }
 0xe85   : > { %v7726_v47 = vpop.permute.xlu0 %7725  ;;  %v7593_v10 = vpop.permute.xlu1 %7592 }
 0xe86   : > { %7728 = vst.msk [vmem:[#allocation7 + $0x3] sm:$0x1] %vm7292_vm10, %v7726_v47  ;;  %v7869_v47 = vld [vmem:[#allocation8 + $0x50] sm:$0xff] }
 0xe87   : > { %7595 = vst.msk [vmem:[#allocation7] sm:$0x1] %vm7299_vm12, %v7593_v10  ;;  %v7870_v10 = vld [vmem:[#allocation8 + $0x58] sm:$0xff] }
 0xe89   : > { %v7639_v60 = vpop.permute.xlu0 %7638  ;;  %v7685_v24 = vpop.permute.xlu1 %7684 }
 0xe8a   : > { %7641 = vst.msk [vmem:[#allocation7 + $0x1] sm:$0x1] %vm7299_vm12, %v7639_v60  ;;  %7687 = vst.msk [vmem:[#allocation7 + $0x2] sm:$0x1] %vm7299_vm12, %v7685_v24  ;;  %v7871_v60 = vld [vmem:[#allocation8 + $0x60] sm:$0xff]  ;;  %v7872_v24 = vld [vmem:[#allocation8 + $0x68] sm:$0xff] }
 0xe8b   : > { %7647 = vst.msk [vmem:[#allocation7 + $0x1] sm:$0x1] %vm7306_vm13, %v7645_v59 }
 0xe8d   : > { %v7732_v18 = vpop.permute.xlu0 %7731  ;;  %v7599_v41 = vpop.permute.xlu1 %7598 }
 0xe8e   : > { %7734 = vst.msk [vmem:[#allocation7 + $0x3] sm:$0x1] %vm7299_vm12, %v7732_v18  ;;  %v7873_v18 = vld [vmem:[#allocation8 + $0x70] sm:$0xff] }
 0xe8f   : > { %7601 = vst.msk [vmem:[#allocation7] sm:$0x1] %vm7306_vm13, %v7599_v41  ;;  %7740 = vst.msk [vmem:[#allocation7 + $0x3] sm:$0x1] %vm7306_vm13, %v7738_v43  ;;  %v7861_v43 = vld [vmem:[#allocation8 + $0x10] sm:$0xff]  ;;  %v7874_v41 = vld [vmem:[#allocation8 + $0x78] sm:$0xff] }
 0xe90   : > { %7607 = vst.msk [vmem:[#allocation7] sm:$0x1] %vm7313_vm14, %v7605_v55  ;;  %7746 = vst.msk [vmem:[#allocation7 + $0x3] sm:$0x1] %vm7313_vm14, %v7744_v16  ;;  %v7862_v55 = vld [vmem:[#allocation8 + $0x18] sm:$0xff]  ;;  %v7863_v16 = vld [vmem:[#allocation8 + $0x20] sm:$0xff] }
 0xe91   : > { %v7651_v12 = vpop.permute.xlu0 %7650  ;;  %v7691_v3 = vpop.permute.xlu1 %7690 }
 0xe92   : > { %7653 = vst.msk [vmem:[#allocation7 + $0x1] sm:$0x1] %vm7313_vm14, %v7651_v12  ;;  %v7875_v12 = vld [vmem:[#allocation8 + $0x80] sm:$0xff] }
 0xe93   : > { %7693 = vst.msk [vmem:[#allocation7 + $0x2] sm:$0x1] %vm7306_vm13, %v7691_v3  ;;  %v7876_v3 = vld [vmem:[#allocation8 + $0x88] sm:$0xff] }
 0xe94   : > { %7700 = vst.msk [vmem:[#allocation7 + $0x2] sm:$0x1] %vm7313_vm14, %v7698_v53  ;;  %v7864_v53 = vld [vmem:[#allocation8 + $0x28] sm:$0xff] }
 0xe95   : > { %v7657_v33 = vpop.permute.xlu0 %7656  ;;  %v7611_v2 = vpop.permute.xlu1 %7610 }
 0xe96   : > { %7659 = vst.msk [vmem:[#allocation7 + $0x1] sm:$0x1] %vm7320_vm15, %v7657_v33  ;;  %7613 = vst.msk [vmem:[#allocation7] sm:$0x1] %vm7320_vm15, %v7611_v2  ;;  %v7877_v33 = vld [vmem:[#allocation8 + $0x90] sm:$0xff]  ;;  %v7878_v2 = vld [vmem:[#allocation8 + $0x98] sm:$0xff] }
 0xe99   : > { %v7750_v9 = vpop.permute.xlu0 %7749  ;;  %v7704_v49 = vpop.permute.xlu1 %7703 }
 0xe9a   : > { %7752 = vst.msk [vmem:[#allocation7 + $0x3] sm:$0x1] %vm7320_vm15, %v7750_v9  ;;  %7706 = vst.msk [vmem:[#allocation7 + $0x2] sm:$0x1] %vm7320_vm15, %v7704_v49  ;;  %v7879_v9 = vld [vmem:[#allocation8 + $0xa0] sm:$0xff]  ;;  %v7880_v49 = vld [vmem:[#allocation8 + $0xa8] sm:$0xff] }
 0xea1   : > { %v7755_v13 = vld [vmem:[#allocation7] sm:$0xff] }
 0xea2   : > { %v7780_v23 = vcombine.high %v7755_v13, %v7755_v13 }
 0xea4   : > { %9014 = vmatprep.mubr.msk.f32.mxu1 %vm6833_vm4, %v7780_v23  ;;  %v7882_v23 = vld [vmem:[#allocation8 + $0xb8] sm:$0xff] }
 0xea5   : > { %7848 = vmatmul.mubr.f32.vlgmr.msra.gmra.mrb[148].mxu1 %v7755_v13  ;;  %v7881_v13 = vld [vmem:[#allocation8 + $0xb0] sm:$0xff] }
 0xf78   : > { %v7849_v31 = vpop.f32.mrb[148].mxu1 }
 0xf79   : > { %v7850_v11 = vadd.f32 %v9013_v19, %v7849_v31  ;;  %v7851_v36 = vpop.f32.mrb[149].mxu1  ;;  %v7884_v19 = vld [vmem:[#allocation8 + $0xc8] sm:$0xff]  ;;  %v7885_v31 = vld [vmem:[#allocation8 + $0xd0] sm:$0xff] }
 0xf7a   : > { %v7887_v36 = vld [vmem:[#allocation8 + $0xe0] sm:$0xff] }
 0xf7b   : > { %v9015_v30 = vmul.f32 -1.442695, %v7850_v11  ;;  %v7886_v11 = vld [vmem:[#allocation8 + $0xd8] sm:$0xff] }
 0xf7d   : > { %10343 = vpow2.f32 %v9015_v30  ;;  %v7888_v30 = vld [vmem:[#allocation8 + $0xe8] sm:$0xff] }
 0xf87   : > { %v10344_v7 = vpop.eup %10343 }
 0xf88   : > { %v7856_v63 = vadd.f32 1.0, %v10344_v7  ;;  %v7889_v7 = vld [vmem:[#allocation8 + $0xf0] sm:$0xff] }
 0xf8a   : > { %10345 = vrcp.f32 %v7856_v63  ;;  %v7890_v63 = vld [vmem:[#allocation8 + $0xf8] sm:$0xff] }
 0xf94   : > { %v10346_v59 = vpop.eup %10345 }
 0xf95   : > { %9906 = vmatprep.subr.msk.mxu0 %vm348_vm0, %v10346_v59 }
 0xf96   : > { %9907 = vmatpush3.msk.msra.mxu0 %vm348_vm0, %v10346_v59  ;;  %v8447_v59 = vpop.permute.xlu0 %8446 }
 0xf97   : > { %9909 = vmatmul.mubr.msk.f32.vlgmr.msra.gmra.mrb[118].mxu0 %vm251_vm1, %v7860_v57  ;;  %v8442_v57 = vpop.permute.xlu1 %8441 }
 0xf98   : > { %9911 = vmatprep.mubr.msk.f32.mxu0 %vm251_vm1, %v7861_v43 }
 0xf9a   : > { %v8457_v43 = vpop.permute.xlu0 %8456 }
 0xf9b   : > { %9912 = vmatmul.mubr.msk.f32.gmra.mrb[120].mxu0 %vm251_vm1, %v7862_v55  ;;  %v8452_v55 = vpop.permute.xlu1 %8451 }
 0xf9c   : > { %9914 = vmatprep.mubr.msk.f32.mxu0 %vm251_vm1, %v7863_v16 }
 0xf9e   : > { %v8467_v16 = vpop.permute.xlu0 %8466 }
 0xf9f   : > { %9915 = vmatmul.mubr.msk.f32.gmra.mrb[122].mxu0 %vm251_vm1, %v7864_v53  ;;  %v8462_v53 = vpop.permute.xlu1 %8461 }
 0xfa0   : > { %9917 = vmatprep.mubr.msk.f32.mxu0 %vm251_vm1, %v7865_v4 }
 0xfa2   : > { %v8477_v4 = vpop.permute.xlu0 %8476 }
 0xfa3   : > { %9918 = vmatmul.mubr.msk.f32.gmra.mrb[124].mxu0 %vm251_vm1, %v7866_v46  ;;  %v8472_v46 = vpop.permute.xlu1 %8471 }
 0xfa4   : > { %9920 = vmatprep.mubr.msk.f32.mxu0 %vm251_vm1, %v7867_v14 }
 0xfa6   : > { %v8487_v14 = vpop.permute.xlu0 %8486 }
 0xfa7   : > { %9921 = vmatmul.mubr.msk.f32.gmra.mrb[126].mxu0 %vm251_vm1, %v7868_v51  ;;  %v8482_v51 = vpop.permute.xlu1 %8481 }
 0xfa8   : > { %9923 = vmatprep.mubr.msk.f32.mxu0 %vm251_vm1, %v7869_v47 }
 0xfab   : > { %9924 = vmatmul.mubr.msk.f32.gmra.mrb[128].mxu0 %vm251_vm1, %v7870_v10 }
 0xfac   : > { %9926 = vmatprep.mubr.msk.f32.mxu0 %vm251_vm1, %v7871_v60 }
 0xfaf   : > { %9927 = vmatmul.mubr.msk.f32.gmra.mrb[130].mxu0 %vm251_vm1, %v7872_v24  ;;  %v8497_v24 = vpop.permute.xlu0 %8496 }
 0xfb0   : > { %9929 = vmatprep.mubr.msk.f32.mxu0 %vm251_vm1, %v7873_v18 }
 0xfb3   : > { %9930 = vmatmul.mubr.msk.f32.gmra.mrb[132].mxu0 %vm251_vm1, %v7874_v41  ;;  %v8492_v41 = vpop.permute.xlu1 %8491 }
 0xfb4   : > { %9932 = vmatprep.mubr.msk.f32.mxu0 %vm251_vm1, %v7875_v12 }
 0xfb7   : > { %9933 = vmatmul.mubr.msk.f32.gmra.mrb[134].mxu0 %vm251_vm1, %v7876_v3 }
 0xfb8   : > { %9935 = vmatprep.mubr.msk.f32.mxu0 %vm251_vm1, %v7877_v33 }
 0xfbb   : > { %9936 = vmatmul.mubr.msk.f32.gmra.mrb[136].mxu0 %vm251_vm1, %v7878_v2 }
 0xfbc   : > { %9938 = vmatprep.mubr.msk.f32.mxu0 %vm251_vm1, %v7879_v9 }
 0xfbf   : > { %9939 = vmatmul.mubr.msk.f32.gmra.mrb[138].mxu0 %vm251_vm1, %v7880_v49 }
 0xfc0   : > { %9941 = vmatprep.mubr.msk.f32.mxu0 %vm251_vm1, %v7881_v13  ;;  %v8507_v13 = vpop.permute.xlu0 %8506 }
 0xfc3   : > { %9942 = vmatmul.mubr.msk.f32.gmra.mrb[140].mxu0 %vm251_vm1, %v7882_v23 }
 0xfc4   : > { %9944 = vmatprep.mubr.msk.f32.mxu0 %vm251_vm1, %v7883_v45  ;;  %v8502_v45 = vpop.permute.xlu1 %8501 }
 0xfc7   : > { %9945 = vmatmul.mubr.msk.f32.gmra.mrb[142].mxu0 %vm251_vm1, %v7884_v19 }
 0xfc8   : > { %9947 = vmatprep.mubr.msk.f32.mxu0 %vm251_vm1, %v7885_v31 }
 0xfcb   : > { %9948 = vmatmul.mubr.msk.f32.gmra.mrb[144].mxu0 %vm251_vm1, %v7886_v11 }
 0xfcc   : > { %9950 = vmatprep.mubr.msk.f32.mxu0 %vm251_vm1, %v7887_v36 }
 0xfcf   : > { %9951 = vmatmul.mubr.msk.f32.gmra.mrb[146].mxu0 %vm251_vm1, %v7888_v30 }
 0xfd0   : > { %9953 = vmatprep.mubr.msk.f32.mxu0 %vm251_vm1, %v7889_v7 }
 0xfd3   : > { %9954 = vmatmul.mubr.msk.f32.gmra.mrb[148].mxu0 %vm251_vm1, %v7890_v63  ;;  %v8517_v63 = vpop.permute.xlu0 %8516 }
0x106a   : > { %v9910_v47 = vpop.f32.mrb[118].mxu0 }
0x106b   : > { %v8408_v10 = vmul.f32 %v9910_v47, %v14917_v5  ;;  %v8056_v60 = vpop.f32.mrb[119].mxu0  ;;  %v8527_v47 = vpop.permute.xlu0 %8526 }
0x106c   : > { %v8407_v18 = vmul.f32 %v8056_v60, %v14918_v35 }
0x106d   : > { %v8600_v12 = vmul.f32 %v8447_v59, %v8408_v10  ;;  %v8512_v59 = vpop.permute.xlu1 %8511 }
0x106e   : > { %v8599_v3 = vmul.f32 %v8442_v57, %v8407_v18  ;;  %v9913_v33 = vpop.f32.mrb[120].mxu0 }
0x106f   : > { %8632 = vst.msk [vmem:[%s14541_s8 + $0x8] sm:$0xff] %vm251_vm1, %v8600_v12  ;;  %v8410_v5 = vmul.f32 %v9913_v33, %v14919_v38  ;;  %v8066_v2 = vpop.f32.mrb[121].mxu0 }
0x1070   : > { %8631 = vst.msk [vmem:[%s14541_s8] sm:$0xff] %vm251_vm1, %v8599_v3  ;;  %v8409_v9 = vmul.f32 %v8066_v2, %v14920_v29  ;;  %v8537_v3 = vpop.permute.xlu0 %8536 }
0x1071   : > { %v8602_v49 = vmul.f32 %v8457_v43, %v8410_v5  ;;  %v8522_v60 = vpop.permute.xlu1 %8521 }
0x1072   : > { %v8601_v23 = vmul.f32 %v8452_v55, %v8409_v9  ;;  %v9916_v35 = vpop.f32.mrb[122].mxu0 }
0x1073   : > { %8634 = vst.msk [vmem:[%s14541_s8 + $0x18] sm:$0xff] %vm251_vm1, %v8602_v49  ;;  %v8412_v19 = vmul.f32 %v9916_v35, %v14921_v52  ;;  %v8076_v31 = vpop.f32.mrb[123].mxu0 }
0x1074   : > { %8633 = vst.msk [vmem:[%s14541_s8 + $0x10] sm:$0xff] %vm251_vm1, %v8601_v23  ;;  %v8411_v38 = vmul.f32 %v8076_v31, %v14922_v28  ;;  %v8547_v49 = vpop.permute.xlu0 %8546 }
0x1075   : > { %v8604_v11 = vmul.f32 %v8467_v16, %v8412_v19  ;;  %v8532_v33 = vpop.permute.xlu1 %8531 }
0x1076   : > { %v8603_v36 = vmul.f32 %v8462_v53, %v8411_v38  ;;  %v9919_v29 = vpop.f32.mrb[124].mxu0 }
0x1077   : > { %8636 = vst.msk [vmem:[%s14541_s8 + $0x28] sm:$0xff] %vm251_vm1, %v8604_v11  ;;  %v8414_v30 = vmul.f32 %v9919_v29, %v14923_v37  ;;  %v8086_v7 = vpop.f32.mrb[125].mxu0 }
0x1078   : > { %8635 = vst.msk [vmem:[%s14541_s8 + $0x20] sm:$0xff] %vm251_vm1, %v8603_v36  ;;  %v8413_v52 = vmul.f32 %v8086_v7, %v14924_v62  ;;  %v8557_v36 = vpop.permute.xlu0 %8556 }
0x1079   : > { %v8606_v57 = vmul.f32 %v8477_v4, %v8414_v30  ;;  %v8542_v35 = vpop.permute.xlu1 %8541 }
0x107a   : > { %v8605_v43 = vmul.f32 %v8472_v46, %v8413_v52  ;;  %v9922_v28 = vpop.f32.mrb[126].mxu0 }
0x107b   : > { %8638 = vst.msk [vmem:[%s14541_s8 + $0x38] sm:$0xff] %vm251_vm1, %v8606_v57  ;;  %v8416_v55 = vmul.f32 %v9922_v28, %v14925_v17  ;;  %v8096_v16 = vpop.f32.mrb[127].mxu0 }
0x107c   : > { %8637 = vst.msk [vmem:[%s14541_s8 + $0x30] sm:$0xff] %vm251_vm1, %v8605_v43  ;;  %v8415_v37 = vmul.f32 %v8096_v16, %v14926_v40  ;;  %v8567_v57 = vpop.permute.xlu0 %8566 }
0x107d   : > { %v8608_v53 = vmul.f32 %v8487_v14, %v8416_v55  ;;  %v8552_v29 = vpop.permute.xlu1 %8551 }
0x107e   : > { %v8607_v10 = vmul.f32 %v8482_v51, %v8415_v37  ;;  %v9925_v62 = vpop.f32.mrb[128].mxu0 }
0x107f   : > { %8640 = vst.msk [vmem:[%s14541_s8 + $0x48] sm:$0xff] %vm251_vm1, %v8608_v53  ;;  %v8418_v4 = vmul.f32 %v9925_v62, %v14927_v22  ;;  %v8106_v46 = vpop.f32.mrb[129].mxu0 }
0x1080   : > { %8639 = vst.msk [vmem:[%s14541_s8 + $0x40] sm:$0xff] %vm251_vm1, %v8607_v10  ;;  %v8417_v17 = vmul.f32 %v8106_v46, %v14928_v54  ;;  %v8577_v62 = vpop.permute.xlu0 %8576 }
0x1081   : > { %v8610_v18 = vmul.f32 %v8497_v24, %v8418_v4  ;;  %v8562_v28 = vpop.permute.xlu1 %8561 }
0x1082   : > { %v8609_v12 = vmul.f32 %v8492_v41, %v8417_v17  ;;  %v9928_v40 = vpop.f32.mrb[130].mxu0 }
0x1083   : > { %8642 = vst.msk [vmem:[%s14541_s8 + $0x58] sm:$0xff] %vm251_vm1, %v8610_v18  ;;  %v8420_v14 = vmul.f32 %v9928_v40, %v14929_v50  ;;  %v8116_v51 = vpop.f32.mrb[131].mxu0 }
0x1084   : > { %8641 = vst.msk [vmem:[%s14541_s8 + $0x50] sm:$0xff] %vm251_vm1, %v8609_v12  ;;  %v8419_v22 = vmul.f32 %v8116_v51, %v14930_v27  ;;  %v8587_v40 = vpop.permute.xlu0 %8586 }
0x1085   : > { %v8612_v5 = vmul.f32 %v8507_v13, %v8420_v14 }
0x1086   : > { %v8611_v2 = vmul.f32 %v8502_v45, %v8419_v22  ;;  %v9931_v54 = vpop.f32.mrb[132].mxu0 }
0x1087   : > { %8644 = vst.msk [vmem:[%s14541_s8 + $0x68] sm:$0xff] %vm251_vm1, %v8612_v5  ;;  %v8422_v24 = vmul.f32 %v9931_v54, %v14931_v58  ;;  %v8126_v41 = vpop.f32.mrb[133].mxu0 }
0x1088   : > { %8643 = vst.msk [vmem:[%s14541_s8 + $0x60] sm:$0xff] %vm251_vm1, %v8611_v2  ;;  %v8421_v50 = vmul.f32 %v8126_v41, %v14932_v15 }
0x1089   : > { %v8614_v9 = vmul.f32 %v8517_v63, %v8422_v24  ;;  %v8597_v24 = vpop.permute.xlu0 %8596 }
0x108a   : > { %v8613_v23 = vmul.f32 %v8512_v59, %v8421_v50  ;;  %v9934_v27 = vpop.f32.mrb[134].mxu0 }
0x108b   : > { %8646 = vst.msk [vmem:[%s14541_s8 + $0x78] sm:$0xff] %vm251_vm1, %v8614_v9  ;;  %v8424_v13 = vmul.f32 %v9934_v27, %v14933_v42  ;;  %v8136_v45 = vpop.f32.mrb[135].mxu0 }
0x108c   : > { %8645 = vst.msk [vmem:[%s14541_s8 + $0x70] sm:$0xff] %vm251_vm1, %v8613_v23  ;;  %v8423_v58 = vmul.f32 %v8136_v45, %v14934_v48 }
0x108d   : > { %v8616_v19 = vmul.f32 %v8527_v47, %v8424_v13 }
0x108e   : > { %v8615_v31 = vmul.f32 %v8522_v60, %v8423_v58  ;;  %v9937_v15 = vpop.f32.mrb[136].mxu0  ;;  %v8572_v60 = vpop.permute.xlu1 %8571 }
0x108f   : > { %8648 = vst.msk [vmem:[%s14541_s8 + $0x88] sm:$0xff] %vm251_vm1, %v8616_v19  ;;  %v8426_v38 = vmul.f32 %v9937_v15, %v14935_v20  ;;  %v8146_v11 = vpop.f32.mrb[137].mxu0 }
0x1090   : > { %8647 = vst.msk [vmem:[%s14541_s8 + $0x80] sm:$0xff] %vm251_vm1, %v8615_v31  ;;  %v8425_v42 = vmul.f32 %v8146_v11, %v14936_v0 }
0x1091   : > { %v8618_v30 = vmul.f32 %v8537_v3, %v8426_v38 }
0x1092   : > { %v8617_v7 = vmul.f32 %v8532_v33, %v8425_v42  ;;  %v9940_v48 = vpop.f32.mrb[138].mxu0  ;;  %v8582_v51 = vpop.permute.xlu1 %8581 }
0x1093   : > { %8650 = vst.msk [vmem:[%s14541_s8 + $0x98] sm:$0xff] %vm251_vm1, %v8618_v30  ;;  %v8428_v63 = vmul.f32 %v9940_v48, %v14937_v34  ;;  %v8156_v52 = vpop.f32.mrb[139].mxu0 }
0x1094   : > { %8649 = vst.msk [vmem:[%s14541_s8 + $0x90] sm:$0xff] %vm251_vm1, %v8617_v7  ;;  %v8427_v20 = vmul.f32 %v8156_v52, %v14938_v21 }
0x1095   : > { %v8620_v59 = vmul.f32 %v8547_v49, %v8428_v63 }
0x1096   : > { %v8619_v43 = vmul.f32 %v8542_v35, %v8427_v20  ;;  %v9943_v0 = vpop.f32.mrb[140].mxu0  ;;  %v8592_v41 = vpop.permute.xlu1 %8591 }
0x1097   : > { %8652 = vst.msk [vmem:[%s14541_s8 + $0xa8] sm:$0xff] %vm251_vm1, %v8620_v59  ;;  %v8430_v55 = vmul.f32 %v9943_v0, %v14939_v39  ;;  %v8166_v16 = vpop.f32.mrb[141].mxu0 }
0x1098   : > { %8651 = vst.msk [vmem:[%s14541_s8 + $0xa0] sm:$0xff] %vm251_vm1, %v8619_v43  ;;  %v8429_v34 = vmul.f32 %v8166_v16, %v14940_v26 }
0x1099   : > { %v8622_v37 = vmul.f32 %v8557_v36, %v8430_v55 }
0x109a   : > { %v8621_v53 = vmul.f32 %v8552_v29, %v8429_v34  ;;  %v9946_v21 = vpop.f32.mrb[142].mxu0 }
0x109b   : > { %8654 = vst.msk [vmem:[%s14541_s8 + $0xb8] sm:$0xff] %vm251_vm1, %v8622_v37  ;;  %v8432_v47 = vmul.f32 %v9946_v21, %v14941_v61  ;;  %v8176_v10 = vpop.f32.mrb[143].mxu0 }
0x109c   : > { %8653 = vst.msk [vmem:[%s14541_s8 + $0xb0] sm:$0xff] %vm251_vm1, %v8621_v53  ;;  %v8431_v39 = vmul.f32 %v8176_v10, %v14942_v1 }
0x109d   : > { %v8624_v4 = vmul.f32 %v8567_v57, %v8432_v47 }
0x109e   : > { %v8623_v46 = vmul.f32 %v8562_v28, %v8431_v39  ;;  %v9949_v26 = vpop.f32.mrb[144].mxu0 }
0x109f   : > { %8656 = vst.msk [vmem:[%s14541_s8 + $0xc8] sm:$0xff] %vm251_vm1, %v8624_v4  ;;  %v8434_v17 = vmul.f32 %v9949_v26, %v14943_v6  ;;  %v8186_v18 = vpop.f32.mrb[145].mxu0 }
0x10a0   : > { %8655 = vst.msk [vmem:[%s14541_s8 + $0xc0] sm:$0xff] %vm251_vm1, %v8623_v46  ;;  %v8433_v61 = vmul.f32 %v8186_v18, %v14944_v32 }
0x10a1   : > { %v8626_v12 = vmul.f32 %v8577_v62, %v8434_v17 }
0x10a2   : > { %v8625_v14 = vmul.f32 %v8572_v60, %v8433_v61  ;;  %v9952_v1 = vpop.f32.mrb[146].mxu0 }
0x10a3   : > { %8658 = vst.msk [vmem:[%s14541_s8 + $0xd8] sm:$0xff] %vm251_vm1, %v8626_v12  ;;  %v8436_v3 = vmul.f32 %v9952_v1, %v14945_v8  ;;  %v8196_v22 = vpop.f32.mrb[147].mxu0 }
0x10a4   : > { %8657 = vst.msk [vmem:[%s14541_s8 + $0xd0] sm:$0xff] %vm251_vm1, %v8625_v14  ;;  %v8435_v6 = vmul.f32 %v8196_v22, %v14946_v44 }
0x10a5   : > { %v8628_v33 = vmul.f32 %v8587_v40, %v8436_v3 }
0x10a6   : > { %v8627_v5 = vmul.f32 %v8582_v51, %v8435_v6  ;;  %v9955_v32 = vpop.f32.mrb[148].mxu0 }
0x10a7   : > { %8660 = vst.msk [vmem:[%s14541_s8 + $0xe8] sm:$0xff] %vm251_vm1, %v8628_v33  ;;  %v8438_v2 = vmul.f32 %v9955_v32, %v14947_v25  ;;  %v8206_v54 = vpop.f32.mrb[149].mxu0 }
0x10a8   : > { %8659 = vst.msk [vmem:[%s14541_s8 + $0xe0] sm:$0xff] %vm251_vm1, %v8627_v5  ;;  %v8437_v8 = vmul.f32 %v8206_v54, %v14948_v56 }
0x10a9   : > { %v8630_v50 = vmul.f32 %v8597_v24, %v8438_v2 }
0x10aa   : > { %v8629_v9 = vmul.f32 %v8592_v41, %v8437_v8 }
0x10ab   : > { %8662 = vst.msk [vmem:[%s14541_s8 + $0xf8] sm:$0xff] %vm251_vm1, %v8630_v50 }
0x10ac   : > { %8661 = vst.msk [vmem:[%s14541_s8 + $0xf0] sm:$0xff] %vm251_vm1, %v8629_v9 }
0x10ad PF: > { %s15_s15 = sadd.s32 1, %s10422_s15  }
0x10ae   : > { %p12_p3 = scmp.ge.s32.totalorder %s15_s15, 4  }
0x10b0   :  { %14 = sbr.rel (!%p12_p3) target bundleno = 1 (0x1), region = 80 }
0x10b7   :  { %8684 = vsyncpa [#allocation9], 1 }
0x10b8   :  { %8686 = vsyncpa [#allocation9 + $0x1], 1 }

</bundles_post_ra>
